<compile_context>
chip_gen: v7x
topology: tpu7x:2x2x1
jax: 0.10.0
libtpu: 0.0.40
codegen_flags: <defaults>
</compile_context>

<pallas_src>
import functools
import math

import jax
import jax.numpy as jnp
from jax import lax
from jax.experimental import pallas as pl
from jax.experimental.pallas import tpu as pltpu


_LANES = 128
_VMEM_LIMIT = 32 * 1024 * 1024   # safe on v5e/v6e/v7x; raises v5e's 16 MiB scoped default


def _round_up(x, m):
    return ((x + m - 1) // m) * m


def _pick_hw_tile(total, target=2048):
    """Largest multiple-of-8 divisor of `total` <= target (else the full extent)."""
    if total <= target:
        return total
    start = (min(target, total) // 8) * 8
    for cand in range(start, 7, -8):
        if total % cand == 0:
            return cand
    return total


# --------------------------------------------------------------------------------------
# Pallas kernel 1: fused 3x3 / stride-1 / pad-1 convolution (+ bias + optional ReLU)
#   - loads one padded image per grid step, accumulates 9 shifted MXU matmuls in f32
# --------------------------------------------------------------------------------------
def _conv3x3_s1_kernel(x_ref, w_ref, b_ref, o_ref, *, H, W, activation):
    cp = o_ref.shape[-1]
    acc = jnp.zeros((H * W, cp), jnp.float32)
    for kh in range(3):
        for kw in range(3):
            win = x_ref[0, kh:kh + H, kw:kw + W, :]                 # (H, W, Cin) shifted window
            acc = acc + jnp.dot(win.reshape(H * W, win.shape[-1]),
                                w_ref[kh * 3 + kw],
                                preferred_element_type=jnp.float32)
    acc = acc + b_ref[...]
    if activation == "relu":
        acc = jnp.maximum(acc, 0.0)
    o_ref[...] = acc.reshape(1, H, W, cp).astype(o_ref.dtype)


# --------------------------------------------------------------------------------------
# Pallas kernel 2: fused 3x3 / stride-2 / pad-1 convolution on parity-split input planes
#   (space-to-depth done once in JAX so the kernel only needs contiguous slices)
# --------------------------------------------------------------------------------------
def _conv3x3_s2_kernel(xee_ref, xeo_ref, xoe_ref, xoo_ref, w_ref, b_ref, o_ref,
                       *, Ho, Wo, activation):
    cp = o_ref.shape[-1]
    planes = ((xee_ref, xeo_ref), (xoe_ref, xoo_ref))
    acc = jnp.zeros((Ho * Wo, cp), jnp.float32)
    for kh in range(3):
        for kw in range(3):
            p_ref = planes[kh % 2][kw % 2]
            oh, ow = kh // 2, kw // 2
            win = p_ref[0, oh:oh + Ho, ow:ow + Wo, :]               # (Ho, Wo, Cin)
            acc = acc + jnp.dot(win.reshape(Ho * Wo, win.shape[-1]),
                                w_ref[kh * 3 + kw],
                                preferred_element_type=jnp.float32)
    acc = acc + b_ref[...]
    if activation == "relu":
        acc = jnp.maximum(acc, 0.0)
    o_ref[...] = acc.reshape(1, Ho, Wo, cp).astype(o_ref.dtype)


def _prep_conv_params(w, b, cin_x):
    """(3,3,Cin_w,Cout) -> (9, Cin_x, Cp) bf16 taps and (1, Cp) f32 bias (Cout padded to 128)."""
    _, _, cin_w, cout = w.shape
    cp = _round_up(cout, _LANES)
    if cin_x > cin_w:                 # input carries zero-padded channels -> zero weight rows
        w = jnp.pad(w, ((0, 0), (0, 0), (0, cin_x - cin_w), (0, 0)))
    w9 = jnp.pad(w.reshape(9, cin_x, cout), ((0, 0), (0, 0), (0, cp - cout)))
    b2 = jnp.pad(b, (0, cp - cout)).astype(jnp.float32).reshape(1, cp)
    return w9.astype(jnp.bfloat16), b2, cp


def conv3x3_s1(x, w, b, *, activation=None, out_dtype=None):
    """Fused 3x3/stride-1/pad-1 conv. x: (N,H,W,Cin) -> (N,H,W,Cp) with Cp = Cout padded to 128."""
    N, H, W, cin = x.shape
    w9, b2, cp = _prep_conv_params(w, b, cin)
    xp = jnp.pad(x, ((0, 0), (1, 1), (1, 1), (0, 0))).astype(jnp.bfloat16)
    out_dtype = out_dtype or x.dtype
    kernel = functools.partial(_conv3x3_s1_kernel, H=H, W=W, activation=activation)
    # TODO(synk): for very large H*W (e.g. 128x128x256 on v7x) tile the H axis into halo'd
    # row bands (manual DMA) instead of one whole-image block per sample.
    return pl.pallas_call(
        kernel,
        out_shape=jax.ShapeDtypeStruct((N, H, W, cp), out_dtype),
        grid_spec=pltpu.PrefetchScalarGridSpec(
            num_scalar_prefetch=0,
            grid=(N,),
            in_specs=[
                pl.BlockSpec((1, H + 2, W + 2, cin), lambda n: (n, 0, 0, 0)),
                pl.BlockSpec((9, cin, cp), lambda n: (0, 0, 0)),
                pl.BlockSpec((1, cp), lambda n: (0, 0)),
            ],
            out_specs=pl.BlockSpec((1, H, W, cp), lambda n: (n, 0, 0, 0)),
        ),
        compiler_params=pltpu.CompilerParams(
            dimension_semantics=("parallel",),
            vmem_limit_bytes=_VMEM_LIMIT,
        ),
    )(xp, w9, b2)


def conv3x3_s2(x, w, b, *, activation=None, out_dtype=None):
    """Fused 3x3/stride-2/pad-1 conv. x: (N,H,W,Cin) -> (N,H//2,W//2,Cp)."""
    N, H, W, cin = x.shape
    assert H % 2 == 0 and W % 2 == 0, "stride-2 down conv expects even spatial dims"
    Ho, Wo = H // 2, W // 2
    w9, b2, cp = _prep_conv_params(w, b, cin)
    xp = jnp.pad(x, ((0, 0), (1, 1), (1, 1), (0, 0))).astype(jnp.bfloat16)
    # Space-to-depth parity split (single JAX pass over the input, no 9x expansion).
    xee = xp[:, 0::2, 0::2, :]
    xeo = xp[:, 0::2, 1::2, :]
    xoe = xp[:, 1::2, 0::2, :]
    xoo = xp[:, 1::2, 1::2, :]
    Hh, Wh = Ho + 1, Wo + 1
    out_dtype = out_dtype or x.dtype
    kernel = functools.partial(_conv3x3_s2_kernel, Ho=Ho, Wo=Wo, activation=activation)
    plane_spec = pl.BlockSpec((1, Hh, Wh, cin), lambda n: (n, 0, 0, 0))
    return pl.pallas_call(
        kernel,
        out_shape=jax.ShapeDtypeStruct((N, Ho, Wo, cp), out_dtype),
        grid_spec=pltpu.PrefetchScalarGridSpec(
            num_scalar_prefetch=0,
            grid=(N,),
            in_specs=[plane_spec, plane_spec, plane_spec, plane_spec,
                      pl.BlockSpec((9, cin, cp), lambda n: (0, 0, 0)),
                      pl.BlockSpec((1, cp), lambda n: (0, 0))],
            out_specs=pl.BlockSpec((1, Ho, Wo, cp), lambda n: (n, 0, 0, 0)),
        ),
        compiler_params=pltpu.CompilerParams(
            dimension_semantics=("parallel",),
            vmem_limit_bytes=_VMEM_LIMIT,
        ),
    )(xee, xeo, xoe, xoo, w9, b2)


# --------------------------------------------------------------------------------------
# Pallas kernel 3: instance-norm statistics (per sample, per channel) — HW-tiled
#   one-pass sum / sum-of-squares accumulation into VMEM scratch, finalize to mean & rstd
# --------------------------------------------------------------------------------------
def _instnorm_stats_kernel(x_ref, mean_ref, rstd_ref, sum_sc, sq_sc, *, inv_hw, eps):
    t = pl.program_id(1)

    @pl.when(t == 0)
    def _init():
        sum_sc[...] = jnp.zeros_like(sum_sc)
        sq_sc[...] = jnp.zeros_like(sq_sc)

    x = x_ref[0].astype(jnp.float32)                        # (thw, C)
    sum_sc[...] += jnp.sum(x, axis=0, keepdims=True)
    sq_sc[...] += jnp.sum(x * x, axis=0, keepdims=True)

    @pl.when(t == pl.num_programs(1) - 1)
    def _finalize():
        mean = sum_sc[...] * inv_hw                         # (1, C)
        var = sq_sc[...] * inv_hw - mean * mean             # biased variance (InstanceNorm2d)
        mean_ref[0] = mean
        rstd_ref[0] = lax.rsqrt(var + eps)


def instance_norm_stats(x_flat, *, eps):
    N, HW, C = x_flat.shape
    thw = _pick_hw_tile(HW)
    kernel = functools.partial(_instnorm_stats_kernel, inv_hw=1.0 / HW, eps=eps)
    return pl.pallas_call(
        kernel,
        out_shape=(jax.ShapeDtypeStruct((N, 1, C), jnp.float32),
                   jax.ShapeDtypeStruct((N, 1, C), jnp.float32)),
        grid_spec=pltpu.PrefetchScalarGridSpec(
            num_scalar_prefetch=0,
            grid=(N, HW // thw),
            in_specs=[pl.BlockSpec((1, thw, C), lambda n, t: (n, t, 0))],
            out_specs=(pl.BlockSpec((1, 1, C), lambda n, t: (n, 0, 0)),
                       pl.BlockSpec((1, 1, C), lambda n, t: (n, 0, 0))),
            scratch_shapes=[pltpu.VMEM((1, C), jnp.float32),
                            pltpu.VMEM((1, C), jnp.float32)],
        ),
        compiler_params=pltpu.CompilerParams(
            dimension_semantics=("parallel", "arbitrary"),
            vmem_limit_bytes=_VMEM_LIMIT,
        ),
    )(x_flat)


# --------------------------------------------------------------------------------------
# Pallas kernel 4: SPADE modulation, HW-tiled:  out = (x - mean) * rstd * (1 + gamma) + beta
#   gamma/beta arrive as one lane-padded fused-conv output (channels [0:C] / [C:2C])
# --------------------------------------------------------------------------------------
def _spade_modulate_kernel(x_ref, gb_ref, mean_ref, rstd_ref, o_ref, *, C):
    x = x_ref[0].astype(jnp.float32)                        # (thw, C)
    gb = gb_ref[0]                                          # (thw, Cp): [gamma | beta | 0-pad]
    gamma = gb[:, :C].astype(jnp.float32)
    beta = gb[:, C:2 * C].astype(jnp.float32)
    normed = (x - mean_ref[0]) * rstd_ref[0]
    o_ref[0] = (normed * (1.0 + gamma) + beta).astype(o_ref.dtype)


def spade_modulate(x_flat, gb_flat, mean, rstd, *, out_dtype):
    N, HW, C = x_flat.shape
    cp = gb_flat.shape[-1]
    thw = _pick_hw_tile(HW)
    kernel = functools.partial(_spade_modulate_kernel, C=C)
    return pl.pallas_call(
        kernel,
        out_shape=jax.ShapeDtypeStruct((N, HW, C), out_dtype),
        grid_spec=pltpu.PrefetchScalarGridSpec(
            num_scalar_prefetch=0,
            grid=(N, HW // thw),
            in_specs=[pl.BlockSpec((1, thw, C), lambda n, t: (n, t, 0)),
                      pl.BlockSpec((1, thw, cp), lambda n, t: (n, t, 0)),
                      pl.BlockSpec((1, 1, C), lambda n, t: (n, 0, 0)),
                      pl.BlockSpec((1, 1, C), lambda n, t: (n, 0, 0))],
            out_specs=pl.BlockSpec((1, thw, C), lambda n, t: (n, t, 0)),
        ),
        compiler_params=pltpu.CompilerParams(
            dimension_semantics=("parallel", "parallel"),
            vmem_limit_bytes=_VMEM_LIMIT,
        ),
    )(x_flat, gb_flat, mean, rstd)


# --------------------------------------------------------------------------------------
# JAX glue: nearest resize (broadcast for integer factors, gather fallback), params
# --------------------------------------------------------------------------------------
def nearest_resize(seg, H, W):
    """F.interpolate(mode='nearest'): src = floor(dst * in/out)."""
    N, Hs, Ws, C = seg.shape
    if H == Hs and W == Ws:
        return seg
    if H % Hs == 0 and W % Ws == 0:           # integer upscale -> broadcast, no gathers
        fh, fw = H // Hs, W // Ws
        seg = jnp.broadcast_to(seg[:, :, None, :, None, :], (N, Hs, fh, Ws, fw, C))
        return seg.reshape(N, H, W, C)
    hi = (jnp.arange(H) * Hs) // H
    wi = (jnp.arange(W) * Ws) // W
    return jnp.take(jnp.take(seg, hi, axis=1), wi, axis=2)


def _conv_param(key, cin, cout):
    kw_, kb_ = jax.random.split(key)
    bound = 1.0 / math.sqrt(cin * 9)
    w = jax.random.uniform(kw_, (3, 3, cin, cout), jnp.float32, -bound, bound)
    b = jax.random.uniform(kb_, (cout,), jnp.float32, -bound, bound)
    return w, b


def init_params(key, in_ch, out_ch, label_nc, nhidden):
    # NOTE: weights are (kh, kw, cin, cout); PyTorch (cout, cin, kh, kw) must be permuted.
    k0, k1, k2, k3 = jax.random.split(key, 4)
    p = {}
    p["w_shared"], p["b_shared"] = _conv_param(k0, label_nc, nhidden)
    p["w_gamma"], p["b_gamma"] = _conv_param(k1, nhidden, in_ch)
    p["w_beta"], p["b_beta"] = _conv_param(k2, nhidden, in_ch)
    p["w_down"], p["b_down"] = _conv_param(k3, in_ch, out_ch)
    return p


# --------------------------------------------------------------------------------------
# Full SPADEDownBlock forward
# --------------------------------------------------------------------------------------
def spade_down_block_nhwc(x, segmap, params, *, eps=1e-5):
    """x: (N,H,W,C) f32, segmap: (N,Hs,Ws,label_nc); returns (N, H//2, W//2, out_ch)."""
    N, H, W, C = x.shape
    out_ch = params["b_down"].shape[0]

    # ---- SPADE ----
    seg = nearest_resize(segmap, H, W)
    actv = conv3x3_s1(seg, params["w_shared"], params["b_shared"],
                      activation="relu", out_dtype=jnp.bfloat16)       # (N,H,W,128) lane-padded

    # gamma & beta consume the same actv -> fused into one conv (Cout = 2C, lane-padded)
    w_gb = jnp.concatenate([params["w_gamma"], params["w_beta"]], axis=-1)
    b_gb = jnp.concatenate([params["b_gamma"], params["b_beta"]], axis=-1)
    gb = conv3x3_s1(actv, w_gb, b_gb, activation=None, out_dtype=jnp.bfloat16)

    # instance-norm stats (f32) + modulation, both HW-tiled
    x_flat = x.reshape(N, H * W, C)
    mean, rstd = instance_norm_stats(x_flat, eps=eps)
    out = spade_modulate(x_flat, gb.reshape(N, H * W, gb.shape[-1]), mean, rstd,
                         out_dtype=jnp.bfloat16).reshape(N, H, W, C)

    # ---- sequential_block: stride-2 downsampling conv + ReLU ----
    # TODO(synk): the reference wraps an arbitrary nn.Sequential; a canonical SegResNet
    # down layer (3x3 stride-2 conv + ReLU) is instantiated here.
    y = conv3x3_s2(out, params["w_down"], params["b_down"],
                   activation="relu", out_dtype=x.dtype)               # (N,Ho,Wo,128)
    return y[..., :out_ch]                                             # drop lane padding


def spade_down_block(x_nchw, segmap_nchw, params, *, eps=1e-5):
    """PyTorch-layout wrapper (NCHW in/out). Prefer spade_down_block_nhwc when composing
    with other channels-last Pallas kernels to avoid the two transpose passes."""
    x = jnp.transpose(x_nchw, (0, 2, 3, 1))
    seg = jnp.transpose(segmap_nchw, (0, 2, 3, 1))
    y = spade_down_block_nhwc(x, seg, params, eps=eps)
    return jnp.transpose(y, (0, 3, 1, 2))


if __name__ == "__main__":
    key = jax.random.PRNGKey(0)
    k_x, k_seg, k_p = jax.random.split(key, 3)

    N, C, H, W = 2, 4, 16, 16
    label_nc, nhidden, out_ch = 3, 32, 8

    x = jax.random.normal(k_x, (N, C, H, W), jnp.float32)
    segmap = jax.random.normal(k_seg, (N, label_nc, 8, 8), jnp.float32)  # nearest-upsampled
    params = init_params(k_p, C, out_ch, label_nc, nhidden)

    fwd = jax.jit(spade_down_block)
    y = jax.block_until_ready(fwd(x, segmap, params))
    assert y.shape == (N, out_ch, H // 2, W // 2), y.shape
    assert bool(jnp.all(jnp.isfinite(y)))
    print("KERNEL_OK")
</pallas_src>

<mosaic_0001>
module attributes {stable_mosaic.version = 11 : i64} {
  func.func @_conv3x3_s1_kernel(%arg0: i32, %arg1: memref<1x18x18x3xbf16, #tpu.memory_space<vmem>>, %arg2: memref<9x3x128xbf16, #tpu.memory_space<vmem>>, %arg3: memref<1x128xf32, #tpu.memory_space<vmem>>, %arg4: memref<1x16x16x128xbf16, #tpu.memory_space<vmem>>) attributes {dimension_semantics = [#tpu.dimension_semantics<parallel>], iteration_bounds = array<i64: 2>, scalar_prefetch = 0 : i64, scratch_operands = 0 : i64, tpu.core_type = #tpu.core_type<tc>, window_params = [{transform_indices = @transform_0, window_bounds = array<i64: 1, 18, 18, 3>}, {pipeline_mode = #tpu.pipeline_mode<synchronous>, transform_indices = @transform_1, window_bounds = array<i64: 9, 3, 128>}, {pipeline_mode = #tpu.pipeline_mode<synchronous>, transform_indices = @transform_2, window_bounds = array<i64: 1, 128>}, {transform_indices = @transform_3, window_bounds = array<i64: 1, 16, 16, 128>}]} {
    %cst = arith.constant 0.000000e+00 : f32
    %0 = vector.broadcast %cst : f32 to vector<256x128xf32>
    %c0 = arith.constant 0 : index
    %c0_0 = arith.constant 0 : index
    %c0_1 = arith.constant 0 : index
    %c0_2 = arith.constant 0 : index
    %1 = vector.load %arg1[%c0, %c0_0, %c0_1, %c0_2] : memref<1x18x18x3xbf16, #tpu.memory_space<vmem>>, vector<1x16x16x3xbf16>
    %2 = vector.shape_cast %1 : vector<1x16x16x3xbf16> to vector<16x16x3xbf16>
    %3 = vector.shape_cast %2 : vector<16x16x3xbf16> to vector<256x3xbf16>
    %c0_3 = arith.constant 0 : index
    %c0_4 = arith.constant 0 : index
    %c0_5 = arith.constant 0 : index
    %4 = vector.load %arg2[%c0_3, %c0_4, %c0_5] : memref<9x3x128xbf16, #tpu.memory_space<vmem>>, vector<1x3x128xbf16>
    %5 = vector.shape_cast %4 : vector<1x3x128xbf16> to vector<3x128xbf16>
    %cst_6 = arith.constant dense<0.000000e+00> : vector<256x128xf32>
    %6 = tpu.matmul %3, %5, %cst_6 {dimension_numbers = #tpu.dot_dimension_numbers<[1], [0], [0], [1], [0, 0, 1, 1], [], []>} : vector<256x3xbf16>, vector<3x128xbf16>, vector<256x128xf32> -> vector<256x128xf32>
    %7 = arith.addf %0, %6 : vector<256x128xf32>
    %c0_7 = arith.constant 0 : index
    %c0_8 = arith.constant 0 : index
    %c1 = arith.constant 1 : index
    %c0_9 = arith.constant 0 : index
    %8 = vector.load %arg1[%c0_7, %c0_8, %c1, %c0_9] : memref<1x18x18x3xbf16, #tpu.memory_space<vmem>>, vector<1x16x16x3xbf16>
    %9 = vector.shape_cast %8 : vector<1x16x16x3xbf16> to vector<16x16x3xbf16>
    %10 = vector.shape_cast %9 : vector<16x16x3xbf16> to vector<256x3xbf16>
    %c1_10 = arith.constant 1 : index
    %c0_11 = arith.constant 0 : index
    %c0_12 = arith.constant 0 : index
    %11 = vector.load %arg2[%c1_10, %c0_11, %c0_12] : memref<9x3x128xbf16, #tpu.memory_space<vmem>>, vector<1x3x128xbf16>
    %12 = vector.shape_cast %11 : vector<1x3x128xbf16> to vector<3x128xbf16>
    %cst_13 = arith.constant dense<0.000000e+00> : vector<256x128xf32>
    %13 = tpu.matmul %10, %12, %cst_13 {dimension_numbers = #tpu.dot_dimension_numbers<[1], [0], [0], [1], [0, 0, 1, 1], [], []>} : vector<256x3xbf16>, vector<3x128xbf16>, vector<256x128xf32> -> vector<256x128xf32>
    %14 = arith.addf %7, %13 : vector<256x128xf32>
    %c0_14 = arith.constant 0 : index
    %c0_15 = arith.constant 0 : index
    %c2 = arith.constant 2 : index
    %c0_16 = arith.constant 0 : index
    %15 = vector.load %arg1[%c0_14, %c0_15, %c2, %c0_16] : memref<1x18x18x3xbf16, #tpu.memory_space<vmem>>, vector<1x16x16x3xbf16>
    %16 = vector.shape_cast %15 : vector<1x16x16x3xbf16> to vector<16x16x3xbf16>
    %17 = vector.shape_cast %16 : vector<16x16x3xbf16> to vector<256x3xbf16>
    %c2_17 = arith.constant 2 : index
    %c0_18 = arith.constant 0 : index
    %c0_19 = arith.constant 0 : index
    %18 = vector.load %arg2[%c2_17, %c0_18, %c0_19] : memref<9x3x128xbf16, #tpu.memory_space<vmem>>, vector<1x3x128xbf16>
    %19 = vector.shape_cast %18 : vector<1x3x128xbf16> to vector<3x128xbf16>
    %cst_20 = arith.constant dense<0.000000e+00> : vector<256x128xf32>
    %20 = tpu.matmul %17, %19, %cst_20 {dimension_numbers = #tpu.dot_dimension_numbers<[1], [0], [0], [1], [0, 0, 1, 1], [], []>} : vector<256x3xbf16>, vector<3x128xbf16>, vector<256x128xf32> -> vector<256x128xf32>
    %21 = arith.addf %14, %20 : vector<256x128xf32>
    %c0_21 = arith.constant 0 : index
    %c1_22 = arith.constant 1 : index
    %c0_23 = arith.constant 0 : index
    %c0_24 = arith.constant 0 : index
    %22 = vector.load %arg1[%c0_21, %c1_22, %c0_23, %c0_24] : memref<1x18x18x3xbf16, #tpu.memory_space<vmem>>, vector<1x16x16x3xbf16>
    %23 = vector.shape_cast %22 : vector<1x16x16x3xbf16> to vector<16x16x3xbf16>
    %24 = vector.shape_cast %23 : vector<16x16x3xbf16> to vector<256x3xbf16>
    %c3 = arith.constant 3 : index
    %c0_25 = arith.constant 0 : index
    %c0_26 = arith.constant 0 : index
    %25 = vector.load %arg2[%c3, %c0_25, %c0_26] : memref<9x3x128xbf16, #tpu.memory_space<vmem>>, vector<1x3x128xbf16>
    %26 = vector.shape_cast %25 : vector<1x3x128xbf16> to vector<3x128xbf16>
    %cst_27 = arith.constant dense<0.000000e+00> : vector<256x128xf32>
    %27 = tpu.matmul %24, %26, %cst_27 {dimension_numbers = #tpu.dot_dimension_numbers<[1], [0], [0], [1], [0, 0, 1, 1], [], []>} : vector<256x3xbf16>, vector<3x128xbf16>, vector<256x128xf32> -> vector<256x128xf32>
    %28 = arith.addf %21, %27 : vector<256x128xf32>
    %c0_28 = arith.constant 0 : index
    %c1_29 = arith.constant 1 : index
    %c1_30 = arith.constant 1 : index
    %c0_31 = arith.constant 0 : index
    %29 = vector.load %arg1[%c0_28, %c1_29, %c1_30, %c0_31] : memref<1x18x18x3xbf16, #tpu.memory_space<vmem>>, vector<1x16x16x3xbf16>
    %30 = vector.shape_cast %29 : vector<1x16x16x3xbf16> to vector<16x16x3xbf16>
    %31 = vector.shape_cast %30 : vector<16x16x3xbf16> to vector<256x3xbf16>
    %c4 = arith.constant 4 : index
    %c0_32 = arith.constant 0 : index
    %c0_33 = arith.constant 0 : index
    %32 = vector.load %arg2[%c4, %c0_32, %c0_33] : memref<9x3x128xbf16, #tpu.memory_space<vmem>>, vector<1x3x128xbf16>
    %33 = vector.shape_cast %32 : vector<1x3x128xbf16> to vector<3x128xbf16>
    %cst_34 = arith.constant dense<0.000000e+00> : vector<256x128xf32>
    %34 = tpu.matmul %31, %33, %cst_34 {dimension_numbers = #tpu.dot_dimension_numbers<[1], [0], [0], [1], [0, 0, 1, 1], [], []>} : vector<256x3xbf16>, vector<3x128xbf16>, vector<256x128xf32> -> vector<256x128xf32>
    %35 = arith.addf %28, %34 : vector<256x128xf32>
    %c0_35 = arith.constant 0 : index
    %c1_36 = arith.constant 1 : index
    %c2_37 = arith.constant 2 : index
    %c0_38 = arith.constant 0 : index
    %36 = vector.load %arg1[%c0_35, %c1_36, %c2_37, %c0_38] : memref<1x18x18x3xbf16, #tpu.memory_space<vmem>>, vector<1x16x16x3xbf16>
    %37 = vector.shape_cast %36 : vector<1x16x16x3xbf16> to vector<16x16x3xbf16>
    %38 = vector.shape_cast %37 : vector<16x16x3xbf16> to vector<256x3xbf16>
    %c5 = arith.constant 5 : index
    %c0_39 = arith.constant 0 : index
    %c0_40 = arith.constant 0 : index
    %39 = vector.load %arg2[%c5, %c0_39, %c0_40] : memref<9x3x128xbf16, #tpu.memory_space<vmem>>, vector<1x3x128xbf16>
    %40 = vector.shape_cast %39 : vector<1x3x128xbf16> to vector<3x128xbf16>
    %cst_41 = arith.constant dense<0.000000e+00> : vector<256x128xf32>
    %41 = tpu.matmul %38, %40, %cst_41 {dimension_numbers = #tpu.dot_dimension_numbers<[1], [0], [0], [1], [0, 0, 1, 1], [], []>} : vector<256x3xbf16>, vector<3x128xbf16>, vector<256x128xf32> -> vector<256x128xf32>
    %42 = arith.addf %35, %41 : vector<256x128xf32>
    %c0_42 = arith.constant 0 : index
    %c2_43 = arith.constant 2 : index
    %c0_44 = arith.constant 0 : index
    %c0_45 = arith.constant 0 : index
    %43 = vector.load %arg1[%c0_42, %c2_43, %c0_44, %c0_45] : memref<1x18x18x3xbf16, #tpu.memory_space<vmem>>, vector<1x16x16x3xbf16>
    %44 = vector.shape_cast %43 : vector<1x16x16x3xbf16> to vector<16x16x3xbf16>
    %45 = vector.shape_cast %44 : vector<16x16x3xbf16> to vector<256x3xbf16>
    %c6 = arith.constant 6 : index
    %c0_46 = arith.constant 0 : index
    %c0_47 = arith.constant 0 : index
    %46 = vector.load %arg2[%c6, %c0_46, %c0_47] : memref<9x3x128xbf16, #tpu.memory_space<vmem>>, vector<1x3x128xbf16>
    %47 = vector.shape_cast %46 : vector<1x3x128xbf16> to vector<3x128xbf16>
    %cst_48 = arith.constant dense<0.000000e+00> : vector<256x128xf32>
    %48 = tpu.matmul %45, %47, %cst_48 {dimension_numbers = #tpu.dot_dimension_numbers<[1], [0], [0], [1], [0, 0, 1, 1], [], []>} : vector<256x3xbf16>, vector<3x128xbf16>, vector<256x128xf32> -> vector<256x128xf32>
    %49 = arith.addf %42, %48 : vector<256x128xf32>
    %c0_49 = arith.constant 0 : index
    %c2_50 = arith.constant 2 : index
    %c1_51 = arith.constant 1 : index
    %c0_52 = arith.constant 0 : index
    %50 = vector.load %arg1[%c0_49, %c2_50, %c1_51, %c0_52] : memref<1x18x18x3xbf16, #tpu.memory_space<vmem>>, vector<1x16x16x3xbf16>
    %51 = vector.shape_cast %50 : vector<1x16x16x3xbf16> to vector<16x16x3xbf16>
    %52 = vector.shape_cast %51 : vector<16x16x3xbf16> to vector<256x3xbf16>
    %c7 = arith.constant 7 : index
    %c0_53 = arith.constant 0 : index
    %c0_54 = arith.constant 0 : index
    %53 = vector.load %arg2[%c7, %c0_53, %c0_54] : memref<9x3x128xbf16, #tpu.memory_space<vmem>>, vector<1x3x128xbf16>
    %54 = vector.shape_cast %53 : vector<1x3x128xbf16> to vector<3x128xbf16>
    %cst_55 = arith.constant dense<0.000000e+00> : vector<256x128xf32>
    %55 = tpu.matmul %52, %54, %cst_55 {dimension_numbers = #tpu.dot_dimension_numbers<[1], [0], [0], [1], [0, 0, 1, 1], [], []>} : vector<256x3xbf16>, vector<3x128xbf16>, vector<256x128xf32> -> vector<256x128xf32>
    %56 = arith.addf %49, %55 : vector<256x128xf32>
    %c0_56 = arith.constant 0 : index
    %c2_57 = arith.constant 2 : index
    %c2_58 = arith.constant 2 : index
    %c0_59 = arith.constant 0 : index
    %57 = vector.load %arg1[%c0_56, %c2_57, %c2_58, %c0_59] : memref<1x18x18x3xbf16, #tpu.memory_space<vmem>>, vector<1x16x16x3xbf16>
    %58 = vector.shape_cast %57 : vector<1x16x16x3xbf16> to vector<16x16x3xbf16>
    %59 = vector.shape_cast %58 : vector<16x16x3xbf16> to vector<256x3xbf16>
    %c8 = arith.constant 8 : index
    %c0_60 = arith.constant 0 : index
    %c0_61 = arith.constant 0 : index
    %60 = vector.load %arg2[%c8, %c0_60, %c0_61] : memref<9x3x128xbf16, #tpu.memory_space<vmem>>, vector<1x3x128xbf16>
    %61 = vector.shape_cast %60 : vector<1x3x128xbf16> to vector<3x128xbf16>
    %cst_62 = arith.constant dense<0.000000e+00> : vector<256x128xf32>
    %62 = tpu.matmul %59, %61, %cst_62 {dimension_numbers = #tpu.dot_dimension_numbers<[1], [0], [0], [1], [0, 0, 1, 1], [], []>} : vector<256x3xbf16>, vector<3x128xbf16>, vector<256x128xf32> -> vector<256x128xf32>
    %63 = arith.addf %56, %62 : vector<256x128xf32>
    %c0_63 = arith.constant 0 : index
    %c0_64 = arith.constant 0 : index
    %64 = vector.load %arg3[%c0_63, %c0_64] : memref<1x128xf32, #tpu.memory_space<vmem>>, vector<1x128xf32>
    %65 = vector.broadcast %64 : vector<1x128xf32> to vector<256x128xf32>
    %66 = arith.addf %63, %65 : vector<256x128xf32>
    %cst_65 = arith.constant 0.000000e+00 : f32
    %67 = vector.broadcast %cst_65 : f32 to vector<256x128xf32>
    %68 = arith.maximumf %66, %67 : vector<256x128xf32>
    %69 = vector.shape_cast %68 : vector<256x128xf32> to vector<1x16x16x128xf32>
    %70 = arith.truncf %69 : vector<1x16x16x128xf32> to vector<1x16x16x128xbf16>
    %c0_66 = arith.constant 0 : index
    %c0_67 = arith.constant 0 : index
    %c0_68 = arith.constant 0 : index
    %c0_69 = arith.constant 0 : index
    %71 = vector.load %arg4[%c0_66, %c0_67, %c0_68, %c0_69] : memref<1x16x16x128xbf16, #tpu.memory_space<vmem>>, vector<1x16x16x128xbf16>
    tpu.vector_store %arg4[%c0_66, %c0_67, %c0_68, %c0_69], %70 {strides = array<i32>} : memref<1x16x16x128xbf16, #tpu.memory_space<vmem>>, vector<1x16x16x128xbf16>,
    return
  }
  func.func @transform_0(%arg0: i32) -> (i32, i32, i32, i32) {
    %c0_i32 = arith.constant 0 : i32
    %c0_i32_0 = arith.constant 0 : i32
    %c0_i32_1 = arith.constant 0 : i32
    %c0_i32_2 = arith.constant 0 : i32
    return %arg0, %c0_i32, %c0_i32_0, %c0_i32_1 : i32, i32, i32, i32
  }
  func.func @transform_1(%arg0: i32) -> (i32, i32, i32) {
    %c0_i32 = arith.constant 0 : i32
    %c0_i32_0 = arith.constant 0 : i32
    %c0_i32_1 = arith.constant 0 : i32
    %c0_i32_2 = arith.constant 0 : i32
    return %c0_i32, %c0_i32_0, %c0_i32_1 : i32, i32, i32
  }
  func.func @transform_2(%arg0: i32) -> (i32, i32) {
    %c0_i32 = arith.constant 0 : i32
    %c0_i32_0 = arith.constant 0 : i32
    %c0_i32_1 = arith.constant 0 : i32
    return %c0_i32, %c0_i32_0 : i32, i32
  }
  func.func @transform_3(%arg0: i32) -> (i32, i32, i32, i32) {
    %c0_i32 = arith.constant 0 : i32
    %c0_i32_0 = arith.constant 0 : i32
    %c0_i32_1 = arith.constant 0 : i32
    %c0_i32_2 = arith.constant 0 : i32
    return %arg0, %c0_i32, %c0_i32_0, %c0_i32_1 : i32, i32, i32, i32
  }
}

module attributes {stable_mosaic.version = 11 : i64} {
  func.func @_conv3x3_s1_kernel(%arg0: i32, %arg1: memref<1x18x18x128xbf16, #tpu.memory_space<vmem>>, %arg2: memref<9x128x128xbf16, #tpu.memory_space<vmem>>, %arg3: memref<1x128xf32, #tpu.memory_space<vmem>>, %arg4: memref<1x16x16x128xbf16, #tpu.memory_space<vmem>>) attributes {dimension_semantics = [#tpu.dimension_semantics<parallel>], iteration_bounds = array<i64: 2>, scalar_prefetch = 0 : i64, scratch_operands = 0 : i64, tpu.core_type = #tpu.core_type<tc>, window_params = [{transform_indices = @transform_0, window_bounds = array<i64: 1, 18, 18, 128>}, {pipeline_mode = #tpu.pipeline_mode<synchronous>, transform_indices = @transform_1, window_bounds = array<i64: 9, 128, 128>}, {pipeline_mode = #tpu.pipeline_mode<synchronous>, transform_indices = @transform_2, window_bounds = array<i64: 1, 128>}, {transform_indices = @transform_3, window_bounds = array<i64: 1, 16, 16, 128>}]} {
    %cst = arith.constant 0.000000e+00 : f32
    %0 = vector.broadcast %cst : f32 to vector<256x128xf32>
    %c0 = arith.constant 0 : index
    %c0_0 = arith.constant 0 : index
    %c0_1 = arith.constant 0 : index
    %c0_2 = arith.constant 0 : index
    %1 = vector.load %arg1[%c0, %c0_0, %c0_1, %c0_2] : memref<1x18x18x128xbf16, #tpu.memory_space<vmem>>, vector<1x16x16x128xbf16>
    %2 = vector.shape_cast %1 : vector<1x16x16x128xbf16> to vector<16x16x128xbf16>
    %3 = vector.shape_cast %2 : vector<16x16x128xbf16> to vector<256x128xbf16>
    %c0_3 = arith.constant 0 : index
    %c0_4 = arith.constant 0 : index
    %c0_5 = arith.constant 0 : index
    %4 = vector.load %arg2[%c0_3, %c0_4, %c0_5] : memref<9x128x128xbf16, #tpu.memory_space<vmem>>, vector<1x128x128xbf16>
    %5 = vector.shape_cast %4 : vector<1x128x128xbf16> to vector<128x128xbf16>
    %cst_6 = arith.constant dense<0.000000e+00> : vector<256x128xf32>
    %6 = tpu.matmul %3, %5, %cst_6 {dimension_numbers = #tpu.dot_dimension_numbers<[1], [0], [0], [1], [0, 0, 1, 1], [], []>} : vector<256x128xbf16>, vector<128x128xbf16>, vector<256x128xf32> -> vector<256x128xf32>
    %7 = arith.addf %0, %6 : vector<256x128xf32>
    %c0_7 = arith.constant 0 : index
    %c0_8 = arith.constant 0 : index
    %c1 = arith.constant 1 : index
    %c0_9 = arith.constant 0 : index
    %8 = vector.load %arg1[%c0_7, %c0_8, %c1, %c0_9] : memref<1x18x18x128xbf16, #tpu.memory_space<vmem>>, vector<1x16x16x128xbf16>
    %9 = vector.shape_cast %8 : vector<1x16x16x128xbf16> to vector<16x16x128xbf16>
    %10 = vector.shape_cast %9 : vector<16x16x128xbf16> to vector<256x128xbf16>
    %c1_10 = arith.constant 1 : index
    %c0_11 = arith.constant 0 : index
    %c0_12 = arith.constant 0 : index
    %11 = vector.load %arg2[%c1_10, %c0_11, %c0_12] : memref<9x128x128xbf16, #tpu.memory_space<vmem>>, vector<1x128x128xbf16>
    %12 = vector.shape_cast %11 : vector<1x128x128xbf16> to vector<128x128xbf16>
    %cst_13 = arith.constant dense<0.000000e+00> : vector<256x128xf32>
    %13 = tpu.matmul %10, %12, %cst_13 {dimension_numbers = #tpu.dot_dimension_numbers<[1], [0], [0], [1], [0, 0, 1, 1], [], []>} : vector<256x128xbf16>, vector<128x128xbf16>, vector<256x128xf32> -> vector<256x128xf32>
    %14 = arith.addf %7, %13 : vector<256x128xf32>
    %c0_14 = arith.constant 0 : index
    %c0_15 = arith.constant 0 : index
    %c2 = arith.constant 2 : index
    %c0_16 = arith.constant 0 : index
    %15 = vector.load %arg1[%c0_14, %c0_15, %c2, %c0_16] : memref<1x18x18x128xbf16, #tpu.memory_space<vmem>>, vector<1x16x16x128xbf16>
    %16 = vector.shape_cast %15 : vector<1x16x16x128xbf16> to vector<16x16x128xbf16>
    %17 = vector.shape_cast %16 : vector<16x16x128xbf16> to vector<256x128xbf16>
    %c2_17 = arith.constant 2 : index
    %c0_18 = arith.constant 0 : index
    %c0_19 = arith.constant 0 : index
    %18 = vector.load %arg2[%c2_17, %c0_18, %c0_19] : memref<9x128x128xbf16, #tpu.memory_space<vmem>>, vector<1x128x128xbf16>
    %19 = vector.shape_cast %18 : vector<1x128x128xbf16> to vector<128x128xbf16>
    %cst_20 = arith.constant dense<0.000000e+00> : vector<256x128xf32>
    %20 = tpu.matmul %17, %19, %cst_20 {dimension_numbers = #tpu.dot_dimension_numbers<[1], [0], [0], [1], [0, 0, 1, 1], [], []>} : vector<256x128xbf16>, vector<128x128xbf16>, vector<256x128xf32> -> vector<256x128xf32>
    %21 = arith.addf %14, %20 : vector<256x128xf32>
    %c0_21 = arith.constant 0 : index
    %c1_22 = arith.constant 1 : index
    %c0_23 = arith.constant 0 : index
    %c0_24 = arith.constant 0 : index
    %22 = vector.load %arg1[%c0_21, %c1_22, %c0_23, %c0_24] : memref<1x18x18x128xbf16, #tpu.memory_space<vmem>>, vector<1x16x16x128xbf16>
    %23 = vector.shape_cast %22 : vector<1x16x16x128xbf16> to vector<16x16x128xbf16>
    %24 = vector.shape_cast %23 : vector<16x16x128xbf16> to vector<256x128xbf16>
    %c3 = arith.constant 3 : index
    %c0_25 = arith.constant 0 : index
    %c0_26 = arith.constant 0 : index
    %25 = vector.load %arg2[%c3, %c0_25, %c0_26] : memref<9x128x128xbf16, #tpu.memory_space<vmem>>, vector<1x128x128xbf16>
    %26 = vector.shape_cast %25 : vector<1x128x128xbf16> to vector<128x128xbf16>
    %cst_27 = arith.constant dense<0.000000e+00> : vector<256x128xf32>
    %27 = tpu.matmul %24, %26, %cst_27 {dimension_numbers = #tpu.dot_dimension_numbers<[1], [0], [0], [1], [0, 0, 1, 1], [], []>} : vector<256x128xbf16>, vector<128x128xbf16>, vector<256x128xf32> -> vector<256x128xf32>
    %28 = arith.addf %21, %27 : vector<256x128xf32>
    %c0_28 = arith.constant 0 : index
    %c1_29 = arith.constant 1 : index
    %c1_30 = arith.constant 1 : index
    %c0_31 = arith.constant 0 : index
    %29 = vector.load %arg1[%c0_28, %c1_29, %c1_30, %c0_31] : memref<1x18x18x128xbf16, #tpu.memory_space<vmem>>, vector<1x16x16x128xbf16>
    %30 = vector.shape_cast %29 : vector<1x16x16x128xbf16> to vector<16x16x128xbf16>
    %31 = vector.shape_cast %30 : vector<16x16x128xbf16> to vector<256x128xbf16>
    %c4 = arith.constant 4 : index
    %c0_32 = arith.constant 0 : index
    %c0_33 = arith.constant 0 : index
    %32 = vector.load %arg2[%c4, %c0_32, %c0_33] : memref<9x128x128xbf16, #tpu.memory_space<vmem>>, vector<1x128x128xbf16>
    %33 = vector.shape_cast %32 : vector<1x128x128xbf16> to vector<128x128xbf16>
    %cst_34 = arith.constant dense<0.000000e+00> : vector<256x128xf32>
    %34 = tpu.matmul %31, %33, %cst_34 {dimension_numbers = #tpu.dot_dimension_numbers<[1], [0], [0], [1], [0, 0, 1, 1], [], []>} : vector<256x128xbf16>, vector<128x128xbf16>, vector<256x128xf32> -> vector<256x128xf32>
    %35 = arith.addf %28, %34 : vector<256x128xf32>
    %c0_35 = arith.constant 0 : index
    %c1_36 = arith.constant 1 : index
    %c2_37 = arith.constant 2 : index
    %c0_38 = arith.constant 0 : index
    %36 = vector.load %arg1[%c0_35, %c1_36, %c2_37, %c0_38] : memref<1x18x18x128xbf16, #tpu.memory_space<vmem>>, vector<1x16x16x128xbf16>
    %37 = vector.shape_cast %36 : vector<1x16x16x128xbf16> to vector<16x16x128xbf16>
    %38 = vector.shape_cast %37 : vector<16x16x128xbf16> to vector<256x128xbf16>
    %c5 = arith.constant 5 : index
    %c0_39 = arith.constant 0 : index
    %c0_40 = arith.constant 0 : index
    %39 = vector.load %arg2[%c5, %c0_39, %c0_40] : memref<9x128x128xbf16, #tpu.memory_space<vmem>>, vector<1x128x128xbf16>
    %40 = vector.shape_cast %39 : vector<1x128x128xbf16> to vector<128x128xbf16>
    %cst_41 = arith.constant dense<0.000000e+00> : vector<256x128xf32>
    %41 = tpu.matmul %38, %40, %cst_41 {dimension_numbers = #tpu.dot_dimension_numbers<[1], [0], [0], [1], [0, 0, 1, 1], [], []>} : vector<256x128xbf16>, vector<128x128xbf16>, vector<256x128xf32> -> vector<256x128xf32>
    %42 = arith.addf %35, %41 : vector<256x128xf32>
    %c0_42 = arith.constant 0 : index
    %c2_43 = arith.constant 2 : index
    %c0_44 = arith.constant 0 : index
    %c0_45 = arith.constant 0 : index
    %43 = vector.load %arg1[%c0_42, %c2_43, %c0_44, %c0_45] : memref<1x18x18x128xbf16, #tpu.memory_space<vmem>>, vector<1x16x16x128xbf16>
    %44 = vector.shape_cast %43 : vector<1x16x16x128xbf16> to vector<16x16x128xbf16>
    %45 = vector.shape_cast %44 : vector<16x16x128xbf16> to vector<256x128xbf16>
    %c6 = arith.constant 6 : index
    %c0_46 = arith.constant 0 : index
    %c0_47 = arith.constant 0 : index
    %46 = vector.load %arg2[%c6, %c0_46, %c0_47] : memref<9x128x128xbf16, #tpu.memory_space<vmem>>, vector<1x128x128xbf16>
    %47 = vector.shape_cast %46 : vector<1x128x128xbf16> to vector<128x128xbf16>
    %cst_48 = arith.constant dense<0.000000e+00> : vector<256x128xf32>
    %48 = tpu.matmul %45, %47, %cst_48 {dimension_numbers = #tpu.dot_dimension_numbers<[1], [0], [0], [1], [0, 0, 1, 1], [], []>} : vector<256x128xbf16>, vector<128x128xbf16>, vector<256x128xf32> -> vector<256x128xf32>
    %49 = arith.addf %42, %48 : vector<256x128xf32>
    %c0_49 = arith.constant 0 : index
    %c2_50 = arith.constant 2 : index
    %c1_51 = arith.constant 1 : index
    %c0_52 = arith.constant 0 : index
    %50 = vector.load %arg1[%c0_49, %c2_50, %c1_51, %c0_52] : memref<1x18x18x128xbf16, #tpu.memory_space<vmem>>, vector<1x16x16x128xbf16>
    %51 = vector.shape_cast %50 : vector<1x16x16x128xbf16> to vector<16x16x128xbf16>
    %52 = vector.shape_cast %51 : vector<16x16x128xbf16> to vector<256x128xbf16>
    %c7 = arith.constant 7 : index
    %c0_53 = arith.constant 0 : index
    %c0_54 = arith.constant 0 : index
    %53 = vector.load %arg2[%c7, %c0_53, %c0_54] : memref<9x128x128xbf16, #tpu.memory_space<vmem>>, vector<1x128x128xbf16>
    %54 = vector.shape_cast %53 : vector<1x128x128xbf16> to vector<128x128xbf16>
    %cst_55 = arith.constant dense<0.000000e+00> : vector<256x128xf32>
    %55 = tpu.matmul %52, %54, %cst_55 {dimension_numbers = #tpu.dot_dimension_numbers<[1], [0], [0], [1], [0, 0, 1, 1], [], []>} : vector<256x128xbf16>, vector<128x128xbf16>, vector<256x128xf32> -> vector<256x128xf32>
    %56 = arith.addf %49, %55 : vector<256x128xf32>
    %c0_56 = arith.constant 0 : index
    %c2_57 = arith.constant 2 : index
    %c2_58 = arith.constant 2 : index
    %c0_59 = arith.constant 0 : index
    %57 = vector.load %arg1[%c0_56, %c2_57, %c2_58, %c0_59] : memref<1x18x18x128xbf16, #tpu.memory_space<vmem>>, vector<1x16x16x128xbf16>
    %58 = vector.shape_cast %57 : vector<1x16x16x128xbf16> to vector<16x16x128xbf16>
    %59 = vector.shape_cast %58 : vector<16x16x128xbf16> to vector<256x128xbf16>
    %c8 = arith.constant 8 : index
    %c0_60 = arith.constant 0 : index
    %c0_61 = arith.constant 0 : index
    %60 = vector.load %arg2[%c8, %c0_60, %c0_61] : memref<9x128x128xbf16, #tpu.memory_space<vmem>>, vector<1x128x128xbf16>
    %61 = vector.shape_cast %60 : vector<1x128x128xbf16> to vector<128x128xbf16>
    %cst_62 = arith.constant dense<0.000000e+00> : vector<256x128xf32>
    %62 = tpu.matmul %59, %61, %cst_62 {dimension_numbers = #tpu.dot_dimension_numbers<[1], [0], [0], [1], [0, 0, 1, 1], [], []>} : vector<256x128xbf16>, vector<128x128xbf16>, vector<256x128xf32> -> vector<256x128xf32>
    %63 = arith.addf %56, %62 : vector<256x128xf32>
    %c0_63 = arith.constant 0 : index
    %c0_64 = arith.constant 0 : index
    %64 = vector.load %arg3[%c0_63, %c0_64] : memref<1x128xf32, #tpu.memory_space<vmem>>, vector<1x128xf32>
    %65 = vector.broadcast %64 : vector<1x128xf32> to vector<256x128xf32>
    %66 = arith.addf %63, %65 : vector<256x128xf32>
    %67 = vector.shape_cast %66 : vector<256x128xf32> to vector<1x16x16x128xf32>
    %68 = arith.truncf %67 : vector<1x16x16x128xf32> to vector<1x16x16x128xbf16>
    %c0_65 = arith.constant 0 : index
    %c0_66 = arith.constant 0 : index
    %c0_67 = arith.constant 0 : index
    %c0_68 = arith.constant 0 : index
    %69 = vector.load %arg4[%c0_65, %c0_66, %c0_67, %c0_68] : memref<1x16x16x128xbf16, #tpu.memory_space<vmem>>, vector<1x16x16x128xbf16>
    tpu.vector_store %arg4[%c0_65, %c0_66, %c0_67, %c0_68], %68 {strides = array<i32>} : memref<1x16x16x128xbf16, #tpu.memory_space<vmem>>, vector<1x16x16x128xbf16>,
    return
  }
  func.func @transform_0(%arg0: i32) -> (i32, i32, i32, i32) {
    %c0_i32 = arith.constant 0 : i32
    %c0_i32_0 = arith.constant 0 : i32
    %c0_i32_1 = arith.constant 0 : i32
    %c0_i32_2 = arith.constant 0 : i32
    return %arg0, %c0_i32, %c0_i32_0, %c0_i32_1 : i32, i32, i32, i32
  }
  func.func @transform_1(%arg0: i32) -> (i32, i32, i32) {
    %c0_i32 = arith.constant 0 : i32
    %c0_i32_0 = arith.constant 0 : i32
    %c0_i32_1 = arith.constant 0 : i32
    %c0_i32_2 = arith.constant 0 : i32
    return %c0_i32, %c0_i32_0, %c0_i32_1 : i32, i32, i32
  }
  func.func @transform_2(%arg0: i32) -> (i32, i32) {
    %c0_i32 = arith.constant 0 : i32
    %c0_i32_0 = arith.constant 0 : i32
    %c0_i32_1 = arith.constant 0 : i32
    return %c0_i32, %c0_i32_0 : i32, i32
  }
  func.func @transform_3(%arg0: i32) -> (i32, i32, i32, i32) {
    %c0_i32 = arith.constant 0 : i32
    %c0_i32_0 = arith.constant 0 : i32
    %c0_i32_1 = arith.constant 0 : i32
    %c0_i32_2 = arith.constant 0 : i32
    return %arg0, %c0_i32, %c0_i32_0, %c0_i32_1 : i32, i32, i32, i32
  }
}

module attributes {stable_mosaic.version = 11 : i64} {
  func.func @_spade_modulate_kernel(%arg0: i32, %arg1: i32, %arg2: memref<1x256x4xf32, #tpu.memory_space<vmem>>, %arg3: memref<1x256x128xbf16, #tpu.memory_space<vmem>>, %arg4: memref<1x1x4xf32, #tpu.memory_space<vmem>>, %arg5: memref<1x1x4xf32, #tpu.memory_space<vmem>>, %arg6: memref<1x256x4xbf16, #tpu.memory_space<vmem>>) attributes {dimension_semantics = [#tpu.dimension_semantics<parallel>, #tpu.dimension_semantics<parallel>], iteration_bounds = array<i64: 2, 1>, scalar_prefetch = 0 : i64, scratch_operands = 0 : i64, tpu.core_type = #tpu.core_type<tc>, window_params = [{transform_indices = @transform_0, window_bounds = array<i64: 1, 256, 4>}, {transform_indices = @transform_1, window_bounds = array<i64: 1, 256, 128>}, {transform_indices = @transform_2, window_bounds = array<i64: 1, 1, 4>}, {transform_indices = @transform_3, window_bounds = array<i64: 1, 1, 4>}, {transform_indices = @transform_4, window_bounds = array<i64: 1, 256, 4>}]} {
    %c0 = arith.constant 0 : index
    %c0_0 = arith.constant 0 : index
    %c0_1 = arith.constant 0 : index
    %0 = vector.load %arg2[%c0, %c0_0, %c0_1] : memref<1x256x4xf32, #tpu.memory_space<vmem>>, vector<1x256x4xf32>
    %1 = vector.shape_cast %0 : vector<1x256x4xf32> to vector<256x4xf32>
    %c0_2 = arith.constant 0 : index
    %c0_3 = arith.constant 0 : index
    %c0_4 = arith.constant 0 : index
    %2 = vector.load %arg3[%c0_2, %c0_3, %c0_4] : memref<1x256x128xbf16, #tpu.memory_space<vmem>>, vector<1x256x128xbf16>
    %3 = vector.shape_cast %2 : vector<1x256x128xbf16> to vector<256x128xbf16>
    %4 = vector.extract_strided_slice %3 {offsets = [0, 0], sizes = [256, 4], strides = [1, 1]} : vector<256x128xbf16> to vector<256x4xbf16>
    %5 = arith.extf %4 : vector<256x4xbf16> to vector<256x4xf32>
    %6 = vector.extract_strided_slice %3 {offsets = [0, 4], sizes = [256, 4], strides = [1, 1]} : vector<256x128xbf16> to vector<256x4xbf16>
    %7 = arith.extf %6 : vector<256x4xbf16> to vector<256x4xf32>
    %c0_5 = arith.constant 0 : index
    %c0_6 = arith.constant 0 : index
    %c0_7 = arith.constant 0 : index
    %8 = vector.load %arg4[%c0_5, %c0_6, %c0_7] : memref<1x1x4xf32, #tpu.memory_space<vmem>>, vector<1x1x4xf32>
    %9 = vector.shape_cast %8 : vector<1x1x4xf32> to vector<1x4xf32>
    %10 = vector.broadcast %9 : vector<1x4xf32> to vector<256x4xf32>
    %11 = arith.subf %1, %10 : vector<256x4xf32>
    %c0_8 = arith.constant 0 : index
    %c0_9 = arith.constant 0 : index
    %c0_10 = arith.constant 0 : index
    %12 = vector.load %arg5[%c0_8, %c0_9, %c0_10] : memref<1x1x4xf32, #tpu.memory_space<vmem>>, vector<1x1x4xf32>
    %13 = vector.shape_cast %12 : vector<1x1x4xf32> to vector<1x4xf32>
    %14 = vector.broadcast %13 : vector<1x4xf32> to vector<256x4xf32>
    %15 = arith.mulf %11, %14 : vector<256x4xf32>
    %cst = arith.constant 1.000000e+00 : f32
    %16 = vector.broadcast %cst : f32 to vector<256x4xf32>
    %17 = arith.addf %16, %5 : vector<256x4xf32>
    %18 = arith.mulf %15, %17 : vector<256x4xf32>
    %19 = arith.addf %18, %7 : vector<256x4xf32>
    %20 = arith.truncf %19 : vector<256x4xf32> to vector<256x4xbf16>
    %c0_11 = arith.constant 0 : index
    %c0_12 = arith.constant 0 : index
    %c0_13 = arith.constant 0 : index
    %21 = vector.load %arg6[%c0_11, %c0_12, %c0_13] : memref<1x256x4xbf16, #tpu.memory_space<vmem>>, vector<1x256x4xbf16>
    %22 = vector.shape_cast %21 : vector<1x256x4xbf16> to vector<256x4xbf16>
    %23 = vector.shape_cast %20 : vector<256x4xbf16> to vector<1x256x4xbf16>
    tpu.vector_store %arg6[%c0_11, %c0_12, %c0_13], %23 {strides = array<i32>} : memref<1x256x4xbf16, #tpu.memory_space<vmem>>, vector<1x256x4xbf16>,
    return
  }
  func.func @transform_0(%arg0: i32, %arg1: i32) -> (i32, i32, i32) {
    %c0_i32 = arith.constant 0 : i32
    %c0_i32_0 = arith.constant 0 : i32
    return %arg0, %arg1, %c0_i32 : i32, i32, i32
  }
  func.func @transform_1(%arg0: i32, %arg1: i32) -> (i32, i32, i32) {
    %c0_i32 = arith.constant 0 : i32
    %c0_i32_0 = arith.constant 0 : i32
    return %arg0, %arg1, %c0_i32 : i32, i32, i32
  }
  func.func @transform_2(%arg0: i32, %arg1: i32) -> (i32, i32, i32) {
    %c0_i32 = arith.constant 0 : i32
    %c0_i32_0 = arith.constant 0 : i32
    %c0_i32_1 = arith.constant 0 : i32
    return %arg0, %c0_i32, %c0_i32_0 : i32, i32, i32
  }
  func.func @transform_3(%arg0: i32, %arg1: i32) -> (i32, i32, i32) {
    %c0_i32 = arith.constant 0 : i32
    %c0_i32_0 = arith.constant 0 : i32
    %c0_i32_1 = arith.constant 0 : i32
    return %arg0, %c0_i32, %c0_i32_0 : i32, i32, i32
  }
  func.func @transform_4(%arg0: i32, %arg1: i32) -> (i32, i32, i32) {
    %c0_i32 = arith.constant 0 : i32
    %c0_i32_0 = arith.constant 0 : i32
    return %arg0, %arg1, %c0_i32 : i32, i32, i32
  }
}

module attributes {stable_mosaic.version = 11 : i64} {
  func.func @_instnorm_stats_kernel(%arg0: i32, %arg1: i32, %arg2: memref<1x256x4xf32, #tpu.memory_space<vmem>>, %arg3: memref<1x1x4xf32, #tpu.memory_space<vmem>>, %arg4: memref<1x1x4xf32, #tpu.memory_space<vmem>>, %arg5: memref<1x4xf32, #tpu.memory_space<vmem>>, %arg6: memref<1x4xf32, #tpu.memory_space<vmem>>) attributes {dimension_semantics = [#tpu.dimension_semantics<parallel>, #tpu.dimension_semantics<arbitrary>], iteration_bounds = array<i64: 2, 1>, scalar_prefetch = 0 : i64, scratch_operands = 2 : i64, tpu.core_type = #tpu.core_type<tc>, window_params = [{transform_indices = @transform_0, window_bounds = array<i64: 1, 256, 4>}, {transform_indices = @transform_1, window_bounds = array<i64: 1, 1, 4>}, {transform_indices = @transform_2, window_bounds = array<i64: 1, 1, 4>}]} {
    %c0_i32 = arith.constant 0 : i32
    %0 = arith.cmpi eq, %arg1, %c0_i32 : i32
    %1 = arith.extui %0 : i1 to i32
    %c0_i32_0 = arith.constant 0 : i32
    %2 = arith.cmpi ne, %1, %c0_i32_0 : i32
    scf.if %2 {
      %cst_14 = arith.constant 0.000000e+00 : f32
      %19 = vector.broadcast %cst_14 : f32 to vector<1x4xf32>
      %c0_15 = arith.constant 0 : index
      %c0_16 = arith.constant 0 : index
      %20 = vector.load %arg5[%c0_15, %c0_16] : memref<1x4xf32, #tpu.memory_space<vmem>>, vector<1x4xf32>
      tpu.vector_store %arg5[%c0_15, %c0_16], %19 {strides = array<i32>} : memref<1x4xf32, #tpu.memory_space<vmem>>, vector<1x4xf32>,
      %cst_17 = arith.constant 0.000000e+00 : f32
      %21 = vector.broadcast %cst_17 : f32 to vector<1x4xf32>
      %c0_18 = arith.constant 0 : index
      %c0_19 = arith.constant 0 : index
      %22 = vector.load %arg6[%c0_18, %c0_19] : memref<1x4xf32, #tpu.memory_space<vmem>>, vector<1x4xf32>
      tpu.vector_store %arg6[%c0_18, %c0_19], %21 {strides = array<i32>} : memref<1x4xf32, #tpu.memory_space<vmem>>, vector<1x4xf32>,
    } else {
    }
    %c0 = arith.constant 0 : index
    %c0_1 = arith.constant 0 : index
    %c0_2 = arith.constant 0 : index
    %3 = vector.load %arg2[%c0, %c0_1, %c0_2] : memref<1x256x4xf32, #tpu.memory_space<vmem>>, vector<1x256x4xf32>
    %4 = vector.shape_cast %3 : vector<1x256x4xf32> to vector<256x4xf32>
    %c0_3 = arith.constant 0 : index
    %c0_4 = arith.constant 0 : index
    %5 = vector.load %arg5[%c0_3, %c0_4] : memref<1x4xf32, #tpu.memory_space<vmem>>, vector<1x4xf32>
    %cst = arith.constant dense<0.000000e+00> : vector<4xf32>
    %6 = vector.multi_reduction <add>, %4, %cst [0] : vector<256x4xf32> to vector<4xf32>
    %7 = vector.shape_cast %6 : vector<4xf32> to vector<1x4xf32>
    %8 = arith.addf %5, %7 : vector<1x4xf32>
    %c0_5 = arith.constant 0 : index
    %c0_6 = arith.constant 0 : index
    %9 = vector.load %arg5[%c0_5, %c0_6] : memref<1x4xf32, #tpu.memory_space<vmem>>, vector<1x4xf32>
    tpu.vector_store %arg5[%c0_5, %c0_6], %8 {strides = array<i32>} : memref<1x4xf32, #tpu.memory_space<vmem>>, vector<1x4xf32>,
    %c0_7 = arith.constant 0 : index
    %c0_8 = arith.constant 0 : index
    %10 = vector.load %arg6[%c0_7, %c0_8] : memref<1x4xf32, #tpu.memory_space<vmem>>, vector<1x4xf32>
    %11 = arith.mulf %4, %4 : vector<256x4xf32>
    %cst_9 = arith.constant dense<0.000000e+00> : vector<4xf32>
    %12 = vector.multi_reduction <add>, %11, %cst_9 [0] : vector<256x4xf32> to vector<4xf32>
    %13 = vector.shape_cast %12 : vector<4xf32> to vector<1x4xf32>
    %14 = arith.addf %10, %13 : vector<1x4xf32>
    %c0_10 = arith.constant 0 : index
    %c0_11 = arith.constant 0 : index
    %15 = vector.load %arg6[%c0_10, %c0_11] : memref<1x4xf32, #tpu.memory_space<vmem>>, vector<1x4xf32>
    tpu.vector_store %arg6[%c0_10, %c0_11], %14 {strides = array<i32>} : memref<1x4xf32, #tpu.memory_space<vmem>>, vector<1x4xf32>,
    %c0_i32_12 = arith.constant 0 : i32
    %16 = arith.cmpi eq, %arg1, %c0_i32_12 : i32
    %17 = arith.extui %16 : i1 to i32
    %c0_i32_13 = arith.constant 0 : i32
    %18 = arith.cmpi ne, %17, %c0_i32_13 : i32
    scf.if %18 {
      %c0_14 = arith.constant 0 : index
      %c0_15 = arith.constant 0 : index
      %19 = vector.load %arg5[%c0_14, %c0_15] : memref<1x4xf32, #tpu.memory_space<vmem>>, vector<1x4xf32>
      %cst_16 = arith.constant 3.906250e-03 : f32
      %20 = vector.broadcast %cst_16 : f32 to vector<1x4xf32>
      %21 = arith.mulf %19, %20 : vector<1x4xf32>
      %c0_17 = arith.constant 0 : index
      %c0_18 = arith.constant 0 : index
      %22 = vector.load %arg6[%c0_17, %c0_18] : memref<1x4xf32, #tpu.memory_space<vmem>>, vector<1x4xf32>
      %cst_19 = arith.constant 3.906250e-03 : f32
      %23 = vector.broadcast %cst_19 : f32 to vector<1x4xf32>
      %24 = arith.mulf %22, %23 : vector<1x4xf32>
      %25 = arith.mulf %21, %21 : vector<1x4xf32>
      %26 = arith.subf %24, %25 : vector<1x4xf32>
      %c0_20 = arith.constant 0 : index
      %c0_21 = arith.constant 0 : index
      %c0_22 = arith.constant 0 : index
      %27 = vector.load %arg3[%c0_20, %c0_21, %c0_22] : memref<1x1x4xf32, #tpu.memory_space<vmem>>, vector<1x1x4xf32>
      %28 = vector.shape_cast %27 : vector<1x1x4xf32> to vector<1x4xf32>
      %29 = vector.shape_cast %21 : vector<1x4xf32> to vector<1x1x4xf32>
      tpu.vector_store %arg3[%c0_20, %c0_21, %c0_22], %29 {strides = array<i32>} : memref<1x1x4xf32, #tpu.memory_space<vmem>>, vector<1x1x4xf32>,
      %cst_23 = arith.constant 9.99999974E-6 : f32
      %30 = vector.broadcast %cst_23 : f32 to vector<1x4xf32>
      %31 = arith.addf %26, %30 : vector<1x4xf32>
      %32 = math.rsqrt %31 : vector<1x4xf32>
      %c0_24 = arith.constant 0 : index
      %c0_25 = arith.constant 0 : index
      %c0_26 = arith.constant 0 : index
      %33 = vector.load %arg4[%c0_24, %c0_25, %c0_26] : memref<1x1x4xf32, #tpu.memory_space<vmem>>, vector<1x1x4xf32>
      %34 = vector.shape_cast %33 : vector<1x1x4xf32> to vector<1x4xf32>
      %35 = vector.shape_cast %32 : vector<1x4xf32> to vector<1x1x4xf32>
      tpu.vector_store %arg4[%c0_24, %c0_25, %c0_26], %35 {strides = array<i32>} : memref<1x1x4xf32, #tpu.memory_space<vmem>>, vector<1x1x4xf32>,
    } else {
    }
    return
  }
  func.func @transform_0(%arg0: i32, %arg1: i32) -> (i32, i32, i32) {
    %c0_i32 = arith.constant 0 : i32
    %c0_i32_0 = arith.constant 0 : i32
    return %arg0, %arg1, %c0_i32 : i32, i32, i32
  }
  func.func @transform_1(%arg0: i32, %arg1: i32) -> (i32, i32, i32) {
    %c0_i32 = arith.constant 0 : i32
    %c0_i32_0 = arith.constant 0 : i32
    %c0_i32_1 = arith.constant 0 : i32
    return %arg0, %c0_i32, %c0_i32_0 : i32, i32, i32
  }
  func.func @transform_2(%arg0: i32, %arg1: i32) -> (i32, i32, i32) {
    %c0_i32 = arith.constant 0 : i32
    %c0_i32_0 = arith.constant 0 : i32
    %c0_i32_1 = arith.constant 0 : i32
    return %arg0, %c0_i32, %c0_i32_0 : i32, i32, i32
  }
}

module attributes {stable_mosaic.version = 11 : i64} {
  func.func @_conv3x3_s2_kernel(%arg0: i32, %arg1: memref<1x9x9x4xbf16, #tpu.memory_space<vmem>>, %arg2: memref<1x9x9x4xbf16, #tpu.memory_space<vmem>>, %arg3: memref<1x9x9x4xbf16, #tpu.memory_space<vmem>>, %arg4: memref<1x9x9x4xbf16, #tpu.memory_space<vmem>>, %arg5: memref<9x4x128xbf16, #tpu.memory_space<vmem>>, %arg6: memref<1x128xf32, #tpu.memory_space<vmem>>, %arg7: memref<1x8x8x128xf32, #tpu.memory_space<vmem>>) attributes {dimension_semantics = [#tpu.dimension_semantics<parallel>], iteration_bounds = array<i64: 2>, scalar_prefetch = 0 : i64, scratch_operands = 0 : i64, tpu.core_type = #tpu.core_type<tc>, window_params = [{transform_indices = @transform_0, window_bounds = array<i64: 1, 9, 9, 4>}, {transform_indices = @transform_1, window_bounds = array<i64: 1, 9, 9, 4>}, {transform_indices = @transform_2, window_bounds = array<i64: 1, 9, 9, 4>}, {transform_indices = @transform_3, window_bounds = array<i64: 1, 9, 9, 4>}, {pipeline_mode = #tpu.pipeline_mode<synchronous>, transform_indices = @transform_4, window_bounds = array<i64: 9, 4, 128>}, {pipeline_mode = #tpu.pipeline_mode<synchronous>, transform_indices = @transform_5, window_bounds = array<i64: 1, 128>}, {transform_indices = @transform_6, window_bounds = array<i64: 1, 8, 8, 128>}]} {
    %cst = arith.constant 0.000000e+00 : f32
    %0 = vector.broadcast %cst : f32 to vector<64x128xf32>
    %c0 = arith.constant 0 : index
    %c0_0 = arith.constant 0 : index
    %c0_1 = arith.constant 0 : index
    %c0_2 = arith.constant 0 : index
    %1 = vector.load %arg1[%c0, %c0_0, %c0_1, %c0_2] : memref<1x9x9x4xbf16, #tpu.memory_space<vmem>>, vector<1x8x8x4xbf16>
    %2 = vector.shape_cast %1 : vector<1x8x8x4xbf16> to vector<8x8x4xbf16>
    %3 = vector.shape_cast %2 : vector<8x8x4xbf16> to vector<64x4xbf16>
    %c0_3 = arith.constant 0 : index
    %c0_4 = arith.constant 0 : index
    %c0_5 = arith.constant 0 : index
    %4 = vector.load %arg5[%c0_3, %c0_4, %c0_5] : memref<9x4x128xbf16, #tpu.memory_space<vmem>>, vector<1x4x128xbf16>
    %5 = vector.shape_cast %4 : vector<1x4x128xbf16> to vector<4x128xbf16>
    %cst_6 = arith.constant dense<0.000000e+00> : vector<64x128xf32>
    %6 = tpu.matmul %3, %5, %cst_6 {dimension_numbers = #tpu.dot_dimension_numbers<[1], [0], [0], [1], [0, 0, 1, 1], [], []>} : vector<64x4xbf16>, vector<4x128xbf16>, vector<64x128xf32> -> vector<64x128xf32>
    %7 = arith.addf %0, %6 : vector<64x128xf32>
    %c0_7 = arith.constant 0 : index
    %c0_8 = arith.constant 0 : index
    %c0_9 = arith.constant 0 : index
    %c0_10 = arith.constant 0 : index
    %8 = vector.load %arg2[%c0_7, %c0_8, %c0_9, %c0_10] : memref<1x9x9x4xbf16, #tpu.memory_space<vmem>>, vector<1x8x8x4xbf16>
    %9 = vector.shape_cast %8 : vector<1x8x8x4xbf16> to vector<8x8x4xbf16>
    %10 = vector.shape_cast %9 : vector<8x8x4xbf16> to vector<64x4xbf16>
    %c1 = arith.constant 1 : index
    %c0_11 = arith.constant 0 : index
    %c0_12 = arith.constant 0 : index
    %11 = vector.load %arg5[%c1, %c0_11, %c0_12] : memref<9x4x128xbf16, #tpu.memory_space<vmem>>, vector<1x4x128xbf16>
    %12 = vector.shape_cast %11 : vector<1x4x128xbf16> to vector<4x128xbf16>
    %cst_13 = arith.constant dense<0.000000e+00> : vector<64x128xf32>
    %13 = tpu.matmul %10, %12, %cst_13 {dimension_numbers = #tpu.dot_dimension_numbers<[1], [0], [0], [1], [0, 0, 1, 1], [], []>} : vector<64x4xbf16>, vector<4x128xbf16>, vector<64x128xf32> -> vector<64x128xf32>
    %14 = arith.addf %7, %13 : vector<64x128xf32>
    %c0_14 = arith.constant 0 : index
    %c0_15 = arith.constant 0 : index
    %c1_16 = arith.constant 1 : index
    %c0_17 = arith.constant 0 : index
    %15 = vector.load %arg1[%c0_14, %c0_15, %c1_16, %c0_17] : memref<1x9x9x4xbf16, #tpu.memory_space<vmem>>, vector<1x8x8x4xbf16>
    %16 = vector.shape_cast %15 : vector<1x8x8x4xbf16> to vector<8x8x4xbf16>
    %17 = vector.shape_cast %16 : vector<8x8x4xbf16> to vector<64x4xbf16>
    %c2 = arith.constant 2 : index
    %c0_18 = arith.constant 0 : index
    %c0_19 = arith.constant 0 : index
    %18 = vector.load %arg5[%c2, %c0_18, %c0_19] : memref<9x4x128xbf16, #tpu.memory_space<vmem>>, vector<1x4x128xbf16>
    %19 = vector.shape_cast %18 : vector<1x4x128xbf16> to vector<4x128xbf16>
    %cst_20 = arith.constant dense<0.000000e+00> : vector<64x128xf32>
    %20 = tpu.matmul %17, %19, %cst_20 {dimension_numbers = #tpu.dot_dimension_numbers<[1], [0], [0], [1], [0, 0, 1, 1], [], []>} : vector<64x4xbf16>, vector<4x128xbf16>, vector<64x128xf32> -> vector<64x128xf32>
    %21 = arith.addf %14, %20 : vector<64x128xf32>
    %c0_21 = arith.constant 0 : index
    %c0_22 = arith.constant 0 : index
    %c0_23 = arith.constant 0 : index
    %c0_24 = arith.constant 0 : index
    %22 = vector.load %arg3[%c0_21, %c0_22, %c0_23, %c0_24] : memref<1x9x9x4xbf16, #tpu.memory_space<vmem>>, vector<1x8x8x4xbf16>
    %23 = vector.shape_cast %22 : vector<1x8x8x4xbf16> to vector<8x8x4xbf16>
    %24 = vector.shape_cast %23 : vector<8x8x4xbf16> to vector<64x4xbf16>
    %c3 = arith.constant 3 : index
    %c0_25 = arith.constant 0 : index
    %c0_26 = arith.constant 0 : index
    %25 = vector.load %arg5[%c3, %c0_25, %c0_26] : memref<9x4x128xbf16, #tpu.memory_space<vmem>>, vector<1x4x128xbf16>
    %26 = vector.shape_cast %25 : vector<1x4x128xbf16> to vector<4x128xbf16>
    %cst_27 = arith.constant dense<0.000000e+00> : vector<64x128xf32>
    %27 = tpu.matmul %24, %26, %cst_27 {dimension_numbers = #tpu.dot_dimension_numbers<[1], [0], [0], [1], [0, 0, 1, 1], [], []>} : vector<64x4xbf16>, vector<4x128xbf16>, vector<64x128xf32> -> vector<64x128xf32>
    %28 = arith.addf %21, %27 : vector<64x128xf32>
    %c0_28 = arith.constant 0 : index
    %c0_29 = arith.constant 0 : index
    %c0_30 = arith.constant 0 : index
    %c0_31 = arith.constant 0 : index
    %29 = vector.load %arg4[%c0_28, %c0_29, %c0_30, %c0_31] : memref<1x9x9x4xbf16, #tpu.memory_space<vmem>>, vector<1x8x8x4xbf16>
    %30 = vector.shape_cast %29 : vector<1x8x8x4xbf16> to vector<8x8x4xbf16>
    %31 = vector.shape_cast %30 : vector<8x8x4xbf16> to vector<64x4xbf16>
    %c4 = arith.constant 4 : index
    %c0_32 = arith.constant 0 : index
    %c0_33 = arith.constant 0 : index
    %32 = vector.load %arg5[%c4, %c0_32, %c0_33] : memref<9x4x128xbf16, #tpu.memory_space<vmem>>, vector<1x4x128xbf16>
    %33 = vector.shape_cast %32 : vector<1x4x128xbf16> to vector<4x128xbf16>
    %cst_34 = arith.constant dense<0.000000e+00> : vector<64x128xf32>
    %34 = tpu.matmul %31, %33, %cst_34 {dimension_numbers = #tpu.dot_dimension_numbers<[1], [0], [0], [1], [0, 0, 1, 1], [], []>} : vector<64x4xbf16>, vector<4x128xbf16>, vector<64x128xf32> -> vector<64x128xf32>
    %35 = arith.addf %28, %34 : vector<64x128xf32>
    %c0_35 = arith.constant 0 : index
    %c0_36 = arith.constant 0 : index
    %c1_37 = arith.constant 1 : index
    %c0_38 = arith.constant 0 : index
    %36 = vector.load %arg3[%c0_35, %c0_36, %c1_37, %c0_38] : memref<1x9x9x4xbf16, #tpu.memory_space<vmem>>, vector<1x8x8x4xbf16>
    %37 = vector.shape_cast %36 : vector<1x8x8x4xbf16> to vector<8x8x4xbf16>
    %38 = vector.shape_cast %37 : vector<8x8x4xbf16> to vector<64x4xbf16>
    %c5 = arith.constant 5 : index
    %c0_39 = arith.constant 0 : index
    %c0_40 = arith.constant 0 : index
    %39 = vector.load %arg5[%c5, %c0_39, %c0_40] : memref<9x4x128xbf16, #tpu.memory_space<vmem>>, vector<1x4x128xbf16>
    %40 = vector.shape_cast %39 : vector<1x4x128xbf16> to vector<4x128xbf16>
    %cst_41 = arith.constant dense<0.000000e+00> : vector<64x128xf32>
    %41 = tpu.matmul %38, %40, %cst_41 {dimension_numbers = #tpu.dot_dimension_numbers<[1], [0], [0], [1], [0, 0, 1, 1], [], []>} : vector<64x4xbf16>, vector<4x128xbf16>, vector<64x128xf32> -> vector<64x128xf32>
    %42 = arith.addf %35, %41 : vector<64x128xf32>
    %c0_42 = arith.constant 0 : index
    %c1_43 = arith.constant 1 : index
    %c0_44 = arith.constant 0 : index
    %c0_45 = arith.constant 0 : index
    %43 = vector.load %arg1[%c0_42, %c1_43, %c0_44, %c0_45] : memref<1x9x9x4xbf16, #tpu.memory_space<vmem>>, vector<1x8x8x4xbf16>
    %44 = vector.shape_cast %43 : vector<1x8x8x4xbf16> to vector<8x8x4xbf16>
    %45 = vector.shape_cast %44 : vector<8x8x4xbf16> to vector<64x4xbf16>
    %c6 = arith.constant 6 : index
    %c0_46 = arith.constant 0 : index
    %c0_47 = arith.constant 0 : index
    %46 = vector.load %arg5[%c6, %c0_46, %c0_47] : memref<9x4x128xbf16, #tpu.memory_space<vmem>>, vector<1x4x128xbf16>
    %47 = vector.shape_cast %46 : vector<1x4x128xbf16> to vector<4x128xbf16>
    %cst_48 = arith.constant dense<0.000000e+00> : vector<64x128xf32>
    %48 = tpu.matmul %45, %47, %cst_48 {dimension_numbers = #tpu.dot_dimension_numbers<[1], [0], [0], [1], [0, 0, 1, 1], [], []>} : vector<64x4xbf16>, vector<4x128xbf16>, vector<64x128xf32> -> vector<64x128xf32>
    %49 = arith.addf %42, %48 : vector<64x128xf32>
    %c0_49 = arith.constant 0 : index
    %c1_50 = arith.constant 1 : index
    %c0_51 = arith.constant 0 : index
    %c0_52 = arith.constant 0 : index
    %50 = vector.load %arg2[%c0_49, %c1_50, %c0_51, %c0_52] : memref<1x9x9x4xbf16, #tpu.memory_space<vmem>>, vector<1x8x8x4xbf16>
    %51 = vector.shape_cast %50 : vector<1x8x8x4xbf16> to vector<8x8x4xbf16>
    %52 = vector.shape_cast %51 : vector<8x8x4xbf16> to vector<64x4xbf16>
    %c7 = arith.constant 7 : index
    %c0_53 = arith.constant 0 : index
    %c0_54 = arith.constant 0 : index
    %53 = vector.load %arg5[%c7, %c0_53, %c0_54] : memref<9x4x128xbf16, #tpu.memory_space<vmem>>, vector<1x4x128xbf16>
    %54 = vector.shape_cast %53 : vector<1x4x128xbf16> to vector<4x128xbf16>
    %cst_55 = arith.constant dense<0.000000e+00> : vector<64x128xf32>
    %55 = tpu.matmul %52, %54, %cst_55 {dimension_numbers = #tpu.dot_dimension_numbers<[1], [0], [0], [1], [0, 0, 1, 1], [], []>} : vector<64x4xbf16>, vector<4x128xbf16>, vector<64x128xf32> -> vector<64x128xf32>
    %56 = arith.addf %49, %55 : vector<64x128xf32>
    %c0_56 = arith.constant 0 : index
    %c1_57 = arith.constant 1 : index
    %c1_58 = arith.constant 1 : index
    %c0_59 = arith.constant 0 : index
    %57 = vector.load %arg1[%c0_56, %c1_57, %c1_58, %c0_59] : memref<1x9x9x4xbf16, #tpu.memory_space<vmem>>, vector<1x8x8x4xbf16>
    %58 = vector.shape_cast %57 : vector<1x8x8x4xbf16> to vector<8x8x4xbf16>
    %59 = vector.shape_cast %58 : vector<8x8x4xbf16> to vector<64x4xbf16>
    %c8 = arith.constant 8 : index
    %c0_60 = arith.constant 0 : index
    %c0_61 = arith.constant 0 : index
    %60 = vector.load %arg5[%c8, %c0_60, %c0_61] : memref<9x4x128xbf16, #tpu.memory_space<vmem>>, vector<1x4x128xbf16>
    %61 = vector.shape_cast %60 : vector<1x4x128xbf16> to vector<4x128xbf16>
    %cst_62 = arith.constant dense<0.000000e+00> : vector<64x128xf32>
    %62 = tpu.matmul %59, %61, %cst_62 {dimension_numbers = #tpu.dot_dimension_numbers<[1], [0], [0], [1], [0, 0, 1, 1], [], []>} : vector<64x4xbf16>, vector<4x128xbf16>, vector<64x128xf32> -> vector<64x128xf32>
    %63 = arith.addf %56, %62 : vector<64x128xf32>
    %c0_63 = arith.constant 0 : index
    %c0_64 = arith.constant 0 : index
    %64 = vector.load %arg6[%c0_63, %c0_64] : memref<1x128xf32, #tpu.memory_space<vmem>>, vector<1x128xf32>
    %65 = vector.broadcast %64 : vector<1x128xf32> to vector<64x128xf32>
    %66 = arith.addf %63, %65 : vector<64x128xf32>
    %cst_65 = arith.constant 0.000000e+00 : f32
    %67 = vector.broadcast %cst_65 : f32 to vector<64x128xf32>
    %68 = arith.maximumf %66, %67 : vector<64x128xf32>
    %69 = vector.shape_cast %68 : vector<64x128xf32> to vector<1x8x8x128xf32>
    %c0_66 = arith.constant 0 : index
    %c0_67 = arith.constant 0 : index
    %c0_68 = arith.constant 0 : index
    %c0_69 = arith.constant 0 : index
    %70 = vector.load %arg7[%c0_66, %c0_67, %c0_68, %c0_69] : memref<1x8x8x128xf32, #tpu.memory_space<vmem>>, vector<1x8x8x128xf32>
    tpu.vector_store %arg7[%c0_66, %c0_67, %c0_68, %c0_69], %69 {strides = array<i32>} : memref<1x8x8x128xf32, #tpu.memory_space<vmem>>, vector<1x8x8x128xf32>,
    return
  }
  func.func @transform_0(%arg0: i32) -> (i32, i32, i32, i32) {
    %c0_i32 = arith.constant 0 : i32
    %c0_i32_0 = arith.constant 0 : i32
    %c0_i32_1 = arith.constant 0 : i32
    %c0_i32_2 = arith.constant 0 : i32
    return %arg0, %c0_i32, %c0_i32_0, %c0_i32_1 : i32, i32, i32, i32
  }
  func.func @transform_1(%arg0: i32) -> (i32, i32, i32, i32) {
    %c0_i32 = arith.constant 0 : i32
    %c0_i32_0 = arith.constant 0 : i32
    %c0_i32_1 = arith.constant 0 : i32
    %c0_i32_2 = arith.constant 0 : i32
    return %arg0, %c0_i32, %c0_i32_0, %c0_i32_1 : i32, i32, i32, i32
  }
  func.func @transform_2(%arg0: i32) -> (i32, i32, i32, i32) {
    %c0_i32 = arith.constant 0 : i32
    %c0_i32_0 = arith.constant 0 : i32
    %c0_i32_1 = arith.constant 0 : i32
    %c0_i32_2 = arith.constant 0 : i32
    return %arg0, %c0_i32, %c0_i32_0, %c0_i32_1 : i32, i32, i32, i32
  }
  func.func @transform_3(%arg0: i32) -> (i32, i32, i32, i32) {
    %c0_i32 = arith.constant 0 : i32
    %c0_i32_0 = arith.constant 0 : i32
    %c0_i32_1 = arith.constant 0 : i32
    %c0_i32_2 = arith.constant 0 : i32
    return %arg0, %c0_i32, %c0_i32_0, %c0_i32_1 : i32, i32, i32, i32
  }
  func.func @transform_4(%arg0: i32) -> (i32, i32, i32) {
    %c0_i32 = arith.constant 0 : i32
    %c0_i32_0 = arith.constant 0 : i32
    %c0_i32_1 = arith.constant 0 : i32
    %c0_i32_2 = arith.constant 0 : i32
    return %c0_i32, %c0_i32_0, %c0_i32_1 : i32, i32, i32
  }
  func.func @transform_5(%arg0: i32) -> (i32, i32) {
    %c0_i32 = arith.constant 0 : i32
    %c0_i32_0 = arith.constant 0 : i32
    %c0_i32_1 = arith.constant 0 : i32
    return %c0_i32, %c0_i32_0 : i32, i32
  }
  func.func @transform_6(%arg0: i32) -> (i32, i32, i32, i32) {
    %c0_i32 = arith.constant 0 : i32
    %c0_i32_0 = arith.constant 0 : i32
    %c0_i32_1 = arith.constant 0 : i32
    %c0_i32_2 = arith.constant 0 : i32
    return %arg0, %c0_i32, %c0_i32_0, %c0_i32_1 : i32, i32, i32, i32
  }
}

</mosaic_0001>

<bundles_post_ra>
// kernel: spade_down_block.7
= control target key start
LH: loop header
LB: loop body
LE: loop exit
PB: predicated region body
PF: predicated region fallthrough
CT: control target
= control target key end

     0   :  { %s570_s9 = smov 0   ;;  %s572_s10 = smov 0   ;;  %s715_s0 = inlined_call_operand.vmem [shape: f32[2,256,4], index: 0, kind: input, shape index: {}]   ;;  %s716_s1 = inlined_call_operand.vmem [shape: f32[2,1,4], index: 1, kind: output, shape index: {0}]   ;;  %s717_s2 = inlined_call_operand.vmem [shape: f32[2,1,4], index: 2, kind: output, shape index: {1}]  }
   0x1   :  { %s574_s11 = smov 0  }
   0x2 LB: > { %s25_s12 = sadd.s32 1, %s548_s10  ;;  %p497_p0 = scmp.ge.s32.totalorder %s552_s11, 1  ;;  %s552_s11 = sphi %s574_s11, %s13_s11   ;;  %s548_s10 = sphi %s572_s10, %s719_s10   ;;  %s544_s9 = sphi %s570_s9, %s718_s9  }
   0x3   : > { %p27_p1 = scmp.ge.s32.totalorder %s25_s12, 2  ;;  %p134_p2 = scmp.lt.s32.totalorder %s552_s11, 3 }
   0x5   : > { %s721_s12 = smov (%p27_p1, %s25_s12), 0  ;;  %p135_p3 = pnand %p497_p0, %p134_p2 }
   0x6   : > { %vm181_vm0 = vcmask (!%p135_p3), 24576   ;;  %p162_p4 = scmp.lt.s32.totalorder (!%p135_p3), %s544_s9, 1  ;;  %v554_v0 = vmov (!%p135_p3), 0.0   ;;  %vm217_vm1 = vcmask (!%p135_p3), 31744  }
   0x7   : > { %138 = sbr.rel (%p135_p3) target bundleno = 126 (0x7e), region = 24  ;;  %182 = vst.msk [vmem:[#allocation2] sm:$0x1] (!%p135_p3), %vm181_vm0, %v554_v0  ;;  %183 = vst.msk [vmem:[#allocation3] sm:$0x1] (!%p135_p3), %vm181_vm0, %v554_v0 }
   0xe   : > { %s723_s9 = smov (!%p162_p4, %s544_s9), 1 }
   0xf   : > { %s502_s13 = sshll.u32 %s723_s9, 8  ;;  %s173_s19 = scalar_lea.vmem %s716_s1, %s723_s9 }
  0x10   : > { %s596_s16 = scalar_lea.vmem %s715_s0, %s502_s13  ;;  %s176_s22 = scalar_lea.vmem %s717_s2, %s723_s9 }
  0x11   : > { %v184_v1 = vld [vmem:[%s596_s16] sm:$0xff]  ;;  %v185_v2 = vld [vmem:[%s596_s16 + $0x8] sm:$0xff]  ;;  %v186_v3 = vld [vmem:[%s596_s16 + $0x10] sm:$0xff] }
  0x12   : > { %v187_v4 = vld [vmem:[%s596_s16 + $0x18] sm:$0xff]  ;;  %v218_v5 = vsel %vm217_vm1, %v184_v1, 0.0  ;;  %v219_v6 = vsel %vm217_vm1, %v185_v2, 0.0  ;;  %v221_v7 = vsel %vm217_vm1, %v186_v3, 0.0  ;;  %v188_v8 = vld [vmem:[%s596_s16 + $0x20] sm:$0xff]  ;;  %v189_v11 = vld [vmem:[%s596_s16 + $0x28] sm:$0xff]  ;;  %v291_v30 = vmul.f32 %v184_v1, %v184_v1 }
  0x13   : > { %v220_v9 = vadd.f32 %v219_v6, %v218_v5  ;;  %v223_v10 = vsel %vm217_vm1, %v187_v4, 0.0  ;;  %v225_v13 = vsel %vm217_vm1, %v188_v8, 0.0  ;;  %v190_v14 = vld [vmem:[%s596_s16 + $0x30] sm:$0xff]  ;;  %v227_v16 = vsel %vm217_vm1, %v189_v11, 0.0  ;;  %v191_v17 = vld [vmem:[%s596_s16 + $0x38] sm:$0xff]  ;;  %v192_v20 = vld [vmem:[%s596_s16 + $0x40] sm:$0xff] }
  0x14   : > { %v229_v19 = vsel %vm217_vm1, %v190_v14, 0.0  ;;  %v231_v22 = vsel %vm217_vm1, %v191_v17, 0.0  ;;  %v193_v23 = vld [vmem:[%s596_s16 + $0x48] sm:$0xff]  ;;  %v233_v25 = vsel %vm217_vm1, %v192_v20, 0.0  ;;  %v194_v26 = vld [vmem:[%s596_s16 + $0x50] sm:$0xff]  ;;  %v195_v28 = vld [vmem:[%s596_s16 + $0x58] sm:$0xff]  ;;  %v292_v31 = vmul.f32 %v185_v2, %v185_v2 }
  0x15   : > { %v222_v12 = vadd.f32 %v221_v7, %v220_v9  ;;  %v235_v29 = vsel %vm217_vm1, %v193_v23, 0.0  ;;  %v293_v32 = vmul.f32 %v186_v3, %v186_v3  ;;  %v237_v34 = vsel %vm217_vm1, %v194_v26, 0.0  ;;  %v196_v36 = vld [vmem:[%s596_s16 + $0x60] sm:$0xff]  ;;  %v197_v43 = vld [vmem:[%s596_s16 + $0x68] sm:$0xff]  ;;  %v198_v49 = vld [vmem:[%s596_s16 + $0x70] sm:$0xff] }
  0x16   : > { %v294_v35 = vmul.f32 %v187_v4, %v187_v4  ;;  %v239_v38 = vsel %vm217_vm1, %v195_v28, 0.0  ;;  %v295_v39 = vmul.f32 %v188_v8, %v188_v8  ;;  %v323_v40 = vsel %vm217_vm1, %v291_v30, 0.0  ;;  %v199_v55 = vld [vmem:[%s596_s16 + $0x78] sm:$0xff]  ;;  %v200_v61 = vld [vmem:[%s596_s16 + $0x80] sm:$0xff]  ;;  %v201_v3 = vld [vmem:[%s596_s16 + $0x88] sm:$0xff] }
  0x17   : > { %v224_v15 = vadd.f32 %v223_v10, %v222_v12  ;;  %v324_v41 = vsel %vm217_vm1, %v292_v31, 0.0  ;;  %v326_v42 = vsel %vm217_vm1, %v293_v32, 0.0  ;;  %v241_v46 = vsel %vm217_vm1, %v196_v36, 0.0  ;;  %v202_v9 = vld [vmem:[%s596_s16 + $0x90] sm:$0xff] }
  0x18   : > { %v325_v45 = vadd.f32 %v324_v41, %v323_v40  ;;  %v296_v47 = vmul.f32 %v189_v11, %v189_v11  ;;  %v328_v48 = vsel %vm217_vm1, %v294_v35, 0.0  ;;  %v243_v52 = vsel %vm217_vm1, %v197_v43, 0.0 }
  0x19   : > { %v226_v18 = vadd.f32 %v225_v13, %v224_v15  ;;  %v297_v53 = vmul.f32 %v190_v14, %v190_v14  ;;  %v330_v54 = vsel %vm217_vm1, %v295_v39, 0.0  ;;  %v245_v58 = vsel %vm217_vm1, %v198_v49, 0.0  ;;  %v203_v15 = vld [vmem:[%s596_s16 + $0x98] sm:$0xff] }
  0x1a   : > { %v327_v51 = vadd.f32 %v326_v42, %v325_v45  ;;  %v298_v59 = vmul.f32 %v191_v17, %v191_v17  ;;  %v332_v60 = vsel %vm217_vm1, %v296_v47, 0.0  ;;  %v247_v0 = vsel %vm217_vm1, %v199_v55, 0.0  ;;  %v207_v39 = vld [vmem:[%s596_s16 + $0xb8] sm:$0xff]  ;;  %v208_v45 = vld [vmem:[%s596_s16 + $0xc0] sm:$0xff] }
  0x1b   : > { %v228_v21 = vadd.f32 %v227_v16, %v226_v18  ;;  %v299_v1 = vmul.f32 %v192_v20, %v192_v20  ;;  %v334_v2 = vsel %vm217_vm1, %v297_v53, 0.0  ;;  %v249_v6 = vsel %vm217_vm1, %v200_v61, 0.0 }
  0x1c   : > { %v329_v57 = vadd.f32 %v328_v48, %v327_v51  ;;  %v300_v7 = vmul.f32 %v193_v23, %v193_v23  ;;  %v336_v8 = vsel %vm217_vm1, %v298_v59, 0.0  ;;  %v251_v12 = vsel %vm217_vm1, %v201_v3, 0.0  ;;  %v209_v51 = vld [vmem:[%s596_s16 + $0xc8] sm:$0xff] }
  0x1d   : > { %v230_v24 = vadd.f32 %v229_v19, %v228_v21  ;;  %v301_v13 = vmul.f32 %v194_v26, %v194_v26  ;;  %v338_v14 = vsel %vm217_vm1, %v299_v1, 0.0  ;;  %v253_v18 = vsel %vm217_vm1, %v202_v9, 0.0  ;;  %v204_v21 = vld [vmem:[%s596_s16 + $0xa0] sm:$0xff] }
  0x1e   : > { %v331_v63 = vadd.f32 %v330_v54, %v329_v57  ;;  %v302_v19 = vmul.f32 %v195_v28, %v195_v28  ;;  %v340_v20 = vsel %vm217_vm1, %v300_v7, 0.0  ;;  %v257_v31 = vsel %vm217_vm1, %v204_v21, 0.0  ;;  %v210_v57 = vld [vmem:[%s596_s16 + $0xd0] sm:$0xff] }
  0x1f   : > { %v232_v27 = vadd.f32 %v231_v22, %v230_v24  ;;  %v255_v24 = vsel %vm217_vm1, %v203_v15, 0.0  ;;  %v342_v26 = vsel %vm217_vm1, %v301_v13, 0.0  ;;  %v304_v32 = vmul.f32 %v197_v43, %v197_v43 }
  0x20   : > { %v333_v5 = vadd.f32 %v332_v60, %v331_v63  ;;  %v344_v28 = vsel %vm217_vm1, %v302_v19, 0.0  ;;  %v263_v48 = vsel %vm217_vm1, %v207_v39, 0.0  ;;  %v265_v54 = vsel %vm217_vm1, %v208_v45, 0.0  ;;  %v211_v63 = vld [vmem:[%s596_s16 + $0xd8] sm:$0xff] }
  0x21   : > { %v234_v33 = vadd.f32 %v233_v25, %v232_v27  ;;  %v303_v25 = vmul.f32 %v196_v36, %v196_v36  ;;  %v205_v27 = vld [vmem:[%s596_s16 + $0xa8] sm:$0xff]  ;;  %v348_v43 = vsel %vm217_vm1, %v304_v32, 0.0  ;;  %v267_v60 = vsel %vm217_vm1, %v209_v51, 0.0 }
  0x22   : > { %v335_v11 = vadd.f32 %v334_v2, %v333_v5  ;;  %v269_v2 = vsel %vm217_vm1, %v210_v57, 0.0  ;;  %v212_v5 = vld [vmem:[%s596_s16 + $0xe0] sm:$0xff] }
  0x23   : > { %v236_v37 = vadd.f32 %v235_v29, %v234_v33  ;;  %v206_v33 = vld [vmem:[%s596_s16 + $0xb0] sm:$0xff]  ;;  %v346_v36 = vsel %vm217_vm1, %v303_v25, 0.0 }
  0x24   : > { %v337_v17 = vadd.f32 %v336_v8, %v335_v11  ;;  %v261_v42 = vsel %vm217_vm1, %v206_v33, 0.0  ;;  %v271_v8 = vsel %vm217_vm1, %v211_v63, 0.0  ;;  %v213_v11 = vld [vmem:[%s596_s16 + $0xe8] sm:$0xff] }
  0x25   : > { %v238_v44 = vadd.f32 %v237_v34, %v236_v37  ;;  %v259_v37 = vsel %vm217_vm1, %v205_v27, 0.0 }
  0x26   : > { %v339_v23 = vadd.f32 %v338_v14, %v337_v17  ;;  %v273_v14 = vsel %vm217_vm1, %v212_v5, 0.0 }
  0x27   : > { %v240_v50 = vadd.f32 %v239_v38, %v238_v44  ;;  %v305_v38 = vmul.f32 %v198_v49, %v198_v49  ;;  %v306_v44 = vmul.f32 %v199_v55, %v199_v55 }
  0x28   : > { %v341_v30 = vadd.f32 %v340_v20, %v339_v23  ;;  %v275_v20 = vsel %vm217_vm1, %v213_v11, 0.0 }
  0x29   : > { %v242_v56 = vadd.f32 %v241_v46, %v240_v50  ;;  %v307_v50 = vmul.f32 %v200_v61, %v200_v61  ;;  %v350_v49 = vsel %vm217_vm1, %v305_v38, 0.0  ;;  %v352_v55 = vsel %vm217_vm1, %v306_v44, 0.0 }
  0x2a   : > { %v343_v35 = vadd.f32 %v342_v26, %v341_v30 }
  0x2b   : > { %v244_v62 = vadd.f32 %v243_v52, %v242_v56  ;;  %v308_v56 = vmul.f32 %v201_v3, %v201_v3  ;;  %v354_v61 = vsel %vm217_vm1, %v307_v50, 0.0 }
  0x2c   : > { %v345_v41 = vadd.f32 %v344_v28, %v343_v35  ;;  %v315_v28 = vmul.f32 %v208_v45, %v208_v45  ;;  %v319_v45 = vmul.f32 %v212_v5, %v212_v5 }
  0x2d   : > { %v246_v4 = vadd.f32 %v245_v58, %v244_v62  ;;  %v309_v62 = vmul.f32 %v202_v9, %v202_v9  ;;  %v356_v3 = vsel %vm217_vm1, %v308_v56, 0.0 }
  0x2e   : > { %v347_v47 = vadd.f32 %v346_v36, %v345_v41  ;;  %v317_v41 = vmul.f32 %v210_v57, %v210_v57  ;;  %v378_v57 = vsel %vm217_vm1, %v319_v45, 0.0 }
  0x2f   : > { %v248_v10 = vadd.f32 %v247_v0, %v246_v4  ;;  %v310_v4 = vmul.f32 %v203_v15, %v203_v15  ;;  %v358_v9 = vsel %vm217_vm1, %v309_v62, 0.0  ;;  %v214_v15 = vld [vmem:[%s596_s16 + $0xf0] sm:$0xff] }
  0x30   : > { %v349_v53 = vadd.f32 %v348_v43, %v347_v47  ;;  %v277_v26 = vsel %vm217_vm1, %v214_v15, 0.0  ;;  %v318_v43 = vmul.f32 %v211_v63, %v211_v63  ;;  %v374_v50 = vsel %vm217_vm1, %v317_v41, 0.0 }
  0x31   : > { %v250_v16 = vadd.f32 %v249_v6, %v248_v10  ;;  %v311_v10 = vmul.f32 %v204_v21, %v204_v21  ;;  %v360_v17 = vsel %vm217_vm1, %v310_v4, 0.0 }
  0x32   : > { %v351_v59 = vadd.f32 %v350_v49, %v349_v53  ;;  %v376_v53 = vsel %vm217_vm1, %v318_v43, 0.0 }
  0x33   : > { %v252_v22 = vadd.f32 %v251_v12, %v250_v16  ;;  %v312_v16 = vmul.f32 %v205_v27, %v205_v27  ;;  %v362_v23 = vsel %vm217_vm1, %v311_v10, 0.0 }
  0x34   : > { %v353_v1 = vadd.f32 %v352_v55, %v351_v59  ;;  %v321_v55 = vmul.f32 %v214_v15, %v214_v15 }
  0x35   : > { %v254_v29 = vadd.f32 %v253_v18, %v252_v22  ;;  %v313_v22 = vmul.f32 %v206_v33, %v206_v33  ;;  %v364_v30 = vsel %vm217_vm1, %v312_v16, 0.0  ;;  %v316_v33 = vmul.f32 %v209_v51, %v209_v51 }
  0x36   : > { %v355_v7 = vadd.f32 %v354_v61, %v353_v1  ;;  %v320_v51 = vmul.f32 %v213_v11, %v213_v11  ;;  %v382_v1 = vsel %vm217_vm1, %v321_v55, 0.0 }
  0x37   : > { %v256_v34 = vadd.f32 %v255_v24, %v254_v29  ;;  %v215_v24 = vld [vmem:[%s596_s16 + $0xf8] sm:$0xff]  ;;  %v314_v29 = vmul.f32 %v207_v39, %v207_v39 }
  0x38   : > { %v357_v13 = vadd.f32 %v356_v3, %v355_v7  ;;  %v279_v32 = vsel %vm217_vm1, %v215_v24, 0.0  ;;  %v322_v62 = vmul.f32 %v215_v24, %v215_v24  ;;  %v380_v61 = vsel %vm217_vm1, %v320_v51, 0.0 }
  0x39   : > { %v258_v40 = vadd.f32 %v257_v31, %v256_v34  ;;  %v366_v34 = vsel %vm217_vm1, %v313_v22, 0.0  ;;  %v368_v38 = vsel %vm217_vm1, %v314_v29, 0.0 }
  0x3a   : > { %v359_v19 = vadd.f32 %v358_v9, %v357_v13  ;;  %v384_v3 = vsel %vm217_vm1, %v322_v62, 0.0 }
  0x3b   : > { %v260_v46 = vadd.f32 %v259_v37, %v258_v40 }
  0x3c   : > { %v361_v25 = vadd.f32 %v360_v17, %v359_v19 }
  0x3d   : > { %v262_v52 = vadd.f32 %v261_v42, %v260_v46  ;;  %v370_v42 = vsel %vm217_vm1, %v315_v28, 0.0  ;;  %v372_v46 = vsel %vm217_vm1, %v316_v33, 0.0 }
  0x3e   : > { %v363_v27 = vadd.f32 %v362_v23, %v361_v25 }
  0x3f   : > { %v264_v58 = vadd.f32 %v263_v48, %v262_v52 }
  0x40   : > { %v365_v37 = vadd.f32 %v364_v30, %v363_v27 }
  0x41   : > { %v266_v0 = vadd.f32 %v265_v54, %v264_v58 }
  0x42   : > { %v367_v40 = vadd.f32 %v366_v34, %v365_v37 }
  0x43   : > { %v268_v6 = vadd.f32 %v267_v60, %v266_v0  ;;  %v216_v60 = vld [vmem:[#allocation2] sm:$0x1] }
  0x44   : > { %v369_v44 = vadd.f32 %v368_v38, %v367_v40 }
  0x45   : > { %v270_v12 = vadd.f32 %v269_v2, %v268_v6 }
  0x46   : > { %v371_v48 = vadd.f32 %v370_v42, %v369_v44 }
  0x47   : > { %v272_v18 = vadd.f32 %v271_v8, %v270_v12 }
  0x48   : > { %v373_v52 = vadd.f32 %v372_v46, %v371_v48 }
  0x49   : > { %v274_v21 = vadd.f32 %v273_v14, %v272_v18  ;;  %v290_v14 = vld [vmem:[#allocation3] sm:$0x1] }
  0x4a   : > { %v375_v56 = vadd.f32 %v374_v50, %v373_v52 }
  0x4b   : > { %v276_v31 = vadd.f32 %v275_v20, %v274_v21 }
  0x4c   : > { %v377_v59 = vadd.f32 %v376_v53, %v375_v56 }
  0x4d   : > { %v278_v35 = vadd.f32 %v277_v26, %v276_v31 }
  0x4e   : > { %v379_v0 = vadd.f32 %v378_v57, %v377_v59 }
  0x4f   : > { %v280_v36 = vadd.f32 %v279_v32, %v278_v35 }
  0x50   : > { %v381_v4 = vadd.f32 %v380_v61, %v379_v0 }
  0x51   : > { %v281_v39 = vrot.slane %v280_v36, 4 }
  0x52   : > { %v383_v5 = vadd.f32 %v382_v1, %v381_v4 }
  0x53   : > { %v282_v47 = vadd.f32 %v281_v39, %v280_v36 }
  0x54   : > { %v385_v6 = vadd.f32 %v384_v3, %v383_v5 }
  0x55   : > { %v283_v49 = vrot.slane %v282_v47, 2 }
  0x56   : > { %v386_v7 = vrot.slane %v385_v6, 4 }
  0x57   : > { %v284_v54 = vadd.f32 %v283_v49, %v282_v47 }
  0x58   : > { %v387_v8 = vadd.f32 %v386_v7, %v385_v6 }
  0x59   : > { %v285_v58 = vrot.slane %v284_v54, 1 }
  0x5a   : > { %v388_v9 = vrot.slane %v387_v8, 2 }
  0x5b   : > { %v286_v63 = vadd.f32 %v285_v58, %v284_v54 }
  0x5c   : > { %v389_v12 = vadd.f32 %v388_v9, %v387_v8 }
  0x5d   : > { %v287_v2 = vadd.f32 %v286_v63, %v216_v60 }
  0x5e   : > { %v390_v13 = vrot.slane %v389_v12, 1 }
  0x5f   : > { %289 = vst.msk [vmem:[#allocation2] sm:$0x1] %vm181_vm0, %v287_v2 }
  0x60   : > { %v391_v16 = vadd.f32 %v390_v13, %v389_v12 }
  0x62   : > { %v392_v17 = vadd.f32 %v391_v16, %v290_v14 }
  0x64   : > { %393 = vst.msk [vmem:[#allocation3] sm:$0x1] %vm181_vm0, %v392_v17 }
  0x66   : > { %v397_v10 = vld [vmem:[#allocation2] sm:$0x1] }
  0x67   : > { %v398_v11 = vmul.f32 0.00390625, %v397_v10 }
  0x69   : > { %403 = vst.msk [vmem:[%s173_s19] sm:$0x1] %vm181_vm0, %v398_v11  ;;  %v401_v15 = vmul.f32 %v398_v11, %v398_v11 }
  0x6b   : > { %v399_v18 = vld [vmem:[#allocation3] sm:$0x1] }
  0x6c   : > { %v400_v19 = vmul.f32 0.00390625, %v399_v18 }
  0x6e   : > { %v402_v20 = vsub.f32 %v400_v19, %v401_v15 }
  0x70   : > { %v404_v22 = vadd.f32 1e-05, %v402_v20 }
  0x72   : > { %528 = vrsqrt.f32 %v404_v22 }
  0x7c   : > { %v529_v23 = vpop.eup %528 }
  0x7d   : > { %406 = vst.msk [vmem:[%s176_s22] sm:$0x1] %vm181_vm0, %v529_v23 }
  0x7e PF: > { %s13_s11 = sadd.s32 1, %s552_s11   ;;  %s718_s9 = smov %s548_s10 }
  0x7f   : > { %p10_p5 = scmp.ge.s32.totalorder %s13_s11, 4   ;;  %s719_s10 = smov %s721_s12 }
  0x81   :  { %12 = sbr.rel (!%p10_p5) target bundleno = 2 (0x2), region = 74 }

// kernel: spade_down_block.8
= control target key start
LH: loop header
LB: loop body
LE: loop exit
PB: predicated region body
PF: predicated region fallthrough
CT: control target
= control target key end

     0   :  { %s1331_s15 = smov 0   ;;  %s1333_s16 = smov 0   ;;  %s1885_s0 = inlined_call_operand.vmem [shape: f32[2,256,4], index: 0, kind: input, shape index: {}]   ;;  %s1886_s1 = inlined_call_operand.vmem [shape: bf16[2,256,128], index: 1, kind: input, shape index: {}]   ;;  %s1887_s2 = inlined_call_operand.vmem [shape: f32[2,1,4], index: 2, kind: input, shape index: {}]   ;;  %s1888_s3 = inlined_call_operand.vmem [shape: f32[2,1,4], index: 3, kind: input, shape index: {}]   ;;  %s1889_s4 = inlined_call_operand.vmem [shape: bf16[2,256,4], index: 4, kind: output, shape index: {}]  }
   0x1   :  { %s1335_s17 = smov 0  }
   0x2 LB: > { %s26_s18 = sadd.s32 1, %s1299_s16  ;;  %p987_p0 = scmp.ge.s32.totalorder %s1303_s17, 1  ;;  %s1303_s17 = sphi %s1335_s17, %s14_s17   ;;  %s1299_s16 = sphi %s1333_s16, %s1909_s16   ;;  %s1295_s15 = sphi %s1331_s15, %s1908_s15  }
   0x3   : > { %p28_p1 = scmp.ge.s32.totalorder %s26_s18, 2  ;;  %p216_p2 = scmp.lt.s32.totalorder %s1303_s17, 3 }
   0x5   : > { %s1911_s18 = smov (%p28_p1, %s26_s18), 0  ;;  %p217_p3 = pnand %p987_p0, %p216_p2 }
   0x6   : > { %p266_p4 = scmp.lt.s32.totalorder (!%p217_p3), %s1295_s15, 1  ;;  %s1305_s24 = smov (!%p217_p3), 124   ;;  %vm827_vm0 = vcmask (!%p217_p3), 27648  }
   0x7   : > { %220 = sbr.rel (%p217_p3) target bundleno = 171 (0xab), region = 36 }
   0xe   : > { %s1913_s15 = smov (!%p266_p4, %s1295_s15), 1 }
   0xf   : > { %s1031_s19 = sshll.u32 %s1913_s15, 7  ;;  %s1030_s23 = sshll.u32 %s1913_s15, 8 }
  0x10   : > { %s1357_s22 = scalar_lea.vmem %s1886_s1, %s1031_s19  ;;  %s287_s27 = scalar_lea.vmem %s1887_s2, %s1913_s15 }
  0x11   : > { %v1130_v0 = vld [vmem:[%s1357_s22 + $0x10] sm:$0xff]   ;;  %v1066_v1 = vld [vmem:[%s1357_s22] sm:$0xff]   ;;  %v1362_v6 = vld [vmem:[%s1357_s22 + $0x18] sm:$0xff]   ;;  %s1429_s30 = scalar_lea.vmem %s1885_s0, %s1030_s23  ;;  %s290_s7 = scalar_lea.vmem %s1888_s3, %s1913_s15 }
  0x12   : > { %v1075_v2 = vunpack.c.l.bf16 %v1130_v0  ;;  %v1076_v3 = vunpack.c.h.bf16 %v1130_v0  ;;  %v1067_v4 = vunpack.c.l.bf16 %v1066_v1  ;;  %v1068_v5 = vunpack.c.h.bf16 %v1066_v1  ;;  %v1365_v7 = vld [vmem:[%s1357_s22 + $0x8] sm:$0xff]   ;;  %v1375_v13 = vld [vmem:[%s1357_s22 + $0x20] sm:$0xff]   ;;  %v1384_v18 = vld [vmem:[%s1357_s22 + $0x38] sm:$0xff]   ;;  %s1780_s10 = scalar_lea.vmem %s1889_s4, %s1031_s19 }
  0x13   : > { %v1079_v8 = vunpack.c.l.bf16 %v1362_v6  ;;  %v1080_v9 = vunpack.c.h.bf16 %v1362_v6  ;;  %v1071_v10 = vunpack.c.l.bf16 %v1365_v7  ;;  %v1072_v11 = vunpack.c.h.bf16 %v1365_v7  ;;  %v1372_v12 = vld [vmem:[%s1357_s22 + $0x28] sm:$0xff]   ;;  %v1387_v19 = vld [vmem:[%s1357_s22 + $0x30] sm:$0xff]   ;;  %v1409_v29 = vld [vmem:[%s1357_s22 + $0x40] sm:$0xff]  }
  0x14   : > { %v1377_v14 = vadd.f32 1.0, %v1076_v3  ;;  %v1179_v15 = vpack.i.bf16 %v1076_v3, %v1075_v2  ;;  %v1379_v16 = vadd.f32 1.0, %v1075_v2  ;;  %v1381_v17 = vadd.f32 1.0, %v1068_v5  ;;  %v1401_v24 = vld [vmem:[%s1357_s22 + $0x48] sm:$0xff]   ;;  %v1417_v34 = vld [vmem:[%s1357_s22 + $0x58] sm:$0xff]   ;;  %v1420_v35 = vld [vmem:[%s1357_s22 + $0x50] sm:$0xff]  }
  0x15   : > { %v1169_v20 = vpack.i.bf16 %v1068_v5, %v1067_v4  ;;  %v1390_v21 = vadd.f32 1.0, %v1067_v4  ;;  %v1184_v22 = vpack.i.bf16 %v1080_v9, %v1079_v8  ;;  %v1174_v23 = vpack.i.bf16 %v1072_v11, %v1071_v10  ;;  %v1442_v40 = vld [vmem:[%s1357_s22 + $0x68] sm:$0xff]   ;;  %v1455_v45 = vld [vmem:[%s1357_s22 + $0x60] sm:$0xff]   ;;  %v1458_v46 = vld [vmem:[%s1357_s22 + $0x78] sm:$0xff]  }
  0x16   : > { %1180 = vrot.lane.b32.xlu1 %v1179_v15, %s1305_s24  ;;  %v1087_v25 = vunpack.c.l.bf16 %v1372_v12  ;;  %v1088_v26 = vunpack.c.h.bf16 %v1372_v12  ;;  %v1083_v27 = vunpack.c.l.bf16 %v1375_v13  ;;  %v1084_v28 = vunpack.c.h.bf16 %v1375_v13  ;;  %v1475_v51 = vld [vmem:[%s1357_s22 + $0x70] sm:$0xff]   ;;  %v1477_v52 = vld [vmem:[%s287_s27] ss:$0 sm:$0xff]  ;;  %v306_v58 = vld [vmem:[%s1429_s30 + $0x28] sm:$0xff] }
  0x17   : > { %1170 = vrot.lane.b32.xlu0 %v1169_v20, %s1305_s24  ;;  %v1095_v30 = vunpack.c.l.bf16 %v1384_v18  ;;  %v1096_v31 = vunpack.c.h.bf16 %v1384_v18  ;;  %v1091_v32 = vunpack.c.l.bf16 %v1387_v19  ;;  %v1092_v33 = vunpack.c.h.bf16 %v1387_v19  ;;  %v305_v57 = vld [vmem:[%s1429_s30 + $0x20] sm:$0xff]  ;;  %v302_v0 = vld [vmem:[%s1429_s30 + $0x8] sm:$0xff] }
  0x18   : > { %v1194_v36 = vpack.i.bf16 %v1088_v26, %v1087_v25  ;;  %v1189_v37 = vpack.i.bf16 %v1084_v28, %v1083_v27  ;;  %v1103_v38 = vunpack.c.l.bf16 %v1401_v24  ;;  %v1104_v39 = vunpack.c.h.bf16 %v1401_v24  ;;  %v301_v63 = vld [vmem:[%s1429_s30] sm:$0xff] }
  0x19   : > { %v1204_v41 = vpack.i.bf16 %v1096_v31, %v1095_v30  ;;  %v1199_v42 = vpack.i.bf16 %v1092_v33, %v1091_v32  ;;  %v1099_v43 = vunpack.c.l.bf16 %v1409_v29  ;;  %v1100_v44 = vunpack.c.h.bf16 %v1409_v29  ;;  %v1502_v1 = vld [vmem:[%s290_s7] ss:$0 sm:$0xff] }
  0x1a   : > { %1185 = vrot.lane.b32.xlu1 %v1184_v22, %s1305_s24  ;;  %v1469_v47 = vpack.i.bf16 %v1104_v39, %v1103_v38  ;;  %v1111_v48 = vunpack.c.l.bf16 %v1417_v34  ;;  %v1898_v49 = vunpack.c.h.bf16 %v1417_v34  ;;  %v1897_v50 = vunpack.c.l.bf16 %v1420_v35 }
  0x1b   : > { %1175 = vrot.lane.b32.xlu0 %v1174_v23, %s1305_s24  ;;  %v1484_v53 = vpack.i.bf16 %v1100_v44, %v1099_v43  ;;  %v1896_v54 = vunpack.c.h.bf16 %v1420_v35  ;;  %v1891_v55 = vunpack.c.l.bf16 %v1442_v40  ;;  %v1890_v56 = vunpack.c.h.bf16 %v1442_v40 }
  0x1c   : > { %v1495_v59 = vpack.i.bf16 %v1898_v49, %v1111_v48  ;;  %v1893_v60 = vunpack.c.l.bf16 %v1455_v45  ;;  %v1892_v61 = vunpack.c.h.bf16 %v1455_v45  ;;  %v1895_v62 = vunpack.c.l.bf16 %v1458_v46  ;;  %v304_v49 = vld [vmem:[%s1429_s30 + $0x18] sm:$0xff] }
  0x1d   : > { %v1508_v2 = vpack.i.bf16 %v1896_v54, %v1897_v50  ;;  %v1514_v3 = vpack.i.bf16 %v1890_v56, %v1891_v55  ;;  %v1894_v4 = vunpack.c.h.bf16 %v1458_v46  ;;  %v1123_v5 = vunpack.c.l.bf16 %v1475_v51  ;;  %v307_v56 = vld [vmem:[%s1429_s30 + $0x30] sm:$0xff]  ;;  %v308_v55 = vld [vmem:[%s1429_s30 + $0x38] sm:$0xff] }
  0x1e   : > { %1195 = vrot.lane.b32.xlu1 %v1194_v36, %s1305_s24  ;;  %v1523_v15 = vpack.i.bf16 %v1892_v61, %v1893_v60  ;;  %v1124_v20 = vunpack.c.h.bf16 %v1475_v51  ;;  %v408_v22 = vsub.f32 %v305_v57, %v1477_v52  ;;  %v409_v23 = vsub.f32 %v306_v58, %v1477_v52  ;;  %v303_v50 = vld [vmem:[%s1429_s30 + $0x10] sm:$0xff] }
  0x1f   : > { %1190 = vrot.lane.b32.xlu0 %v1189_v37, %s1305_s24  ;;  %v1535_v36 = vpack.i.bf16 %v1894_v4, %v1895_v62  ;;  %v404_v61 = vsub.f32 %v301_v63, %v1477_v52  ;;  %v405_v60 = vsub.f32 %v302_v0, %v1477_v52  ;;  %v481_v57 = vadd.f32 1.0, %v1079_v8 }
  0x20   : > { %v1545_v58 = vpack.i.bf16 %v1124_v20, %v1123_v5  ;;  %v447_v37 = vmul.f32 %v1502_v1, %v408_v22  ;;  %v448_v4 = vmul.f32 %v1502_v1, %v409_v23  ;;  %v482_v63 = vadd.f32 1.0, %v1080_v9 }
  0x21   : > { %v443_v0 = vmul.f32 %v1502_v1, %v404_v61  ;;  %v444_v62 = vmul.f32 %v1502_v1, %v405_v60  ;;  %v410_v8 = vsub.f32 %v307_v56, %v1477_v52  ;;  %v411_v54 = vsub.f32 %v308_v55, %v1477_v52  ;;  %v311_v60 = vld [vmem:[%s1429_s30 + $0x50] sm:$0xff]  ;;  %v312_v55 = vld [vmem:[%s1429_s30 + $0x58] sm:$0xff] }
  0x22   : > { %1205 = vrot.lane.b32.xlu1 %v1204_v41, %s1305_s24  ;;  %v1559_v22 = vmul.f32 %v1379_v16, %v447_v37  ;;  %v1562_v6 = vmul.f32 %v1377_v14, %v448_v4  ;;  %v477_v9 = vadd.f32 1.0, %v1071_v10  ;;  %v478_v56 = vadd.f32 1.0, %v1072_v11 }
  0x23   : > { %1200 = vrot.lane.b32.xlu0 %v1199_v42, %s1305_s24  ;;  %v1572_v41 = vmul.f32 %v1390_v21, %v443_v0  ;;  %v1575_v16 = vmul.f32 %v1381_v17, %v444_v62  ;;  %v449_v61 = vmul.f32 %v1502_v1, %v410_v8  ;;  %v450_v14 = vmul.f32 %v1502_v1, %v411_v54  ;;  %v309_v42 = vld [vmem:[%s1429_s30 + $0x40] sm:$0xff]  ;;  %v310_v21 = vld [vmem:[%s1429_s30 + $0x48] sm:$0xff]  ;;  %v316_v0 = vld [vmem:[%s1429_s30 + $0x78] sm:$0xff] }
  0x24   : > { %v406_v4 = vsub.f32 %v303_v50, %v1477_v52  ;;  %v407_v10 = vsub.f32 %v304_v49, %v1477_v52  ;;  %v485_v7 = vadd.f32 1.0, %v1087_v25  ;;  %v486_v11 = vadd.f32 1.0, %v1088_v26 }
  0x25   : > { %v1587_v17 = vmul.f32 %v481_v57, %v449_v61  ;;  %v1589_v62 = vmul.f32 %v482_v63, %v450_v14  ;;  %v414_v54 = vsub.f32 %v311_v60, %v1477_v52  ;;  %v415_v50 = vsub.f32 %v312_v55, %v1477_v52  ;;  %v315_v63 = vld [vmem:[%s1429_s30 + $0x70] sm:$0xff]  ;;  %v314_v60 = vld [vmem:[%s1429_s30 + $0x68] sm:$0xff] }
  0x26   : > { %1215 = vrot.lane.b32.xlu1 %v1469_v47, %s1305_s24  ;;  %v445_v25 = vmul.f32 %v1502_v1, %v406_v4  ;;  %v446_v12 = vmul.f32 %v1502_v1, %v407_v10  ;;  %v483_v26 = vadd.f32 1.0, %v1083_v27  ;;  %v484_v49 = vadd.f32 1.0, %v1084_v28  ;;  %v319_v4 = vld [vmem:[%s1429_s30 + $0x90] sm:$0xff]  ;;  %v320_v10 = vld [vmem:[%s1429_s30 + $0x98] sm:$0xff] }
  0x27   : > { %1210 = vrot.lane.b32.xlu0 %v1484_v53, %s1305_s24  ;;  %v453_v23 = vmul.f32 %v1502_v1, %v414_v54  ;;  %v454_v57 = vmul.f32 %v1502_v1, %v415_v50  ;;  %v412_v47 = vsub.f32 %v309_v42, %v1477_v52  ;;  %v413_v37 = vsub.f32 %v310_v21, %v1477_v52  ;;  %v313_v53 = vld [vmem:[%s1429_s30 + $0x60] sm:$0xff] }
  0x28   : > { %v1609_v8 = vmul.f32 %v477_v9, %v445_v25  ;;  %v1611_v27 = vmul.f32 %v478_v56, %v446_v12  ;;  %v489_v13 = vadd.f32 1.0, %v1095_v30  ;;  %v490_v28 = vadd.f32 1.0, %v1096_v31  ;;  %v317_v12 = vld [vmem:[%s1429_s30 + $0x80] sm:$0xff] }
  0x29   : > { %v1619_v55 = vmul.f32 %v485_v7, %v453_v23  ;;  %v1621_v61 = vmul.f32 %v486_v11, %v454_v57  ;;  %v451_v14 = vmul.f32 %v1502_v1, %v412_v47  ;;  %v452_v9 = vmul.f32 %v1502_v1, %v413_v37  ;;  %v323_v23 = vld [vmem:[%s1429_s30 + $0xb0] sm:$0xff]  ;;  %v324_v57 = vld [vmem:[%s1429_s30 + $0xb8] sm:$0xff] }
  0x2a   : > { %1225 = vrot.lane.b32.xlu1 %v1495_v59, %s1305_s24  ;;  %v418_v56 = vsub.f32 %v315_v63, %v1477_v52  ;;  %v419_v30 = vsub.f32 %v316_v0, %v1477_v52  ;;  %v487_v18 = vadd.f32 1.0, %v1091_v32  ;;  %v488_v31 = vadd.f32 1.0, %v1092_v33 }
  0x2b   : > { %1220 = vrot.lane.b32.xlu0 %v1508_v2, %s1305_s24  ;;  %v1637_v7 = vmul.f32 %v483_v26, %v451_v14  ;;  %v1639_v59 = vmul.f32 %v484_v49, %v452_v9  ;;  %v416_v11 = vsub.f32 %v313_v53, %v1477_v52  ;;  %v417_v42 = vsub.f32 %v314_v60, %v1477_v52  ;;  %v318_v26 = vld [vmem:[%s1429_s30 + $0x88] sm:$0xff] }
  0x2c   : > { %v457_v32 = vmul.f32 %v1502_v1, %v418_v56  ;;  %v458_v19 = vmul.f32 %v1502_v1, %v419_v30  ;;  %v493_v33 = vadd.f32 1.0, %v1103_v38  ;;  %v494_v2 = vadd.f32 1.0, %v1104_v39 }
  0x2d   : > { %v455_v21 = vmul.f32 %v1502_v1, %v416_v11  ;;  %v456_v54 = vmul.f32 %v1502_v1, %v417_v42  ;;  %v422_v50 = vsub.f32 %v319_v4, %v1477_v52  ;;  %v423_v25 = vsub.f32 %v320_v10, %v1477_v52  ;;  %v327_v42 = vld [vmem:[%s1429_s30 + $0xd0] sm:$0xff] }
  0x2e   : > { %1235 = vrot.lane.b32.xlu1 %v1514_v3, %s1305_s24  ;;  %v1657_v49 = vmul.f32 %v489_v13, %v457_v32  ;;  %v1659_v38 = vmul.f32 %v490_v28, %v458_v19  ;;  %v491_v24 = vadd.f32 1.0, %v1099_v43  ;;  %v492_v39 = vadd.f32 1.0, %v1100_v44  ;;  %v321_v28 = vld [vmem:[%s1429_s30 + $0xa0] sm:$0xff]  ;;  %v328_v32 = vld [vmem:[%s1429_s30 + $0xd8] sm:$0xff] }
  0x2f   : > { %1230 = vrot.lane.b32.xlu0 %v1523_v15, %s1305_s24  ;;  %v1669_v47 = vmul.f32 %v487_v18, %v455_v21  ;;  %v1671_v3 = vmul.f32 %v488_v31, %v456_v54  ;;  %v461_v37 = vmul.f32 %v1502_v1, %v422_v50  ;;  %v462_v63 = vmul.f32 %v1502_v1, %v423_v25  ;;  %v322_v15 = vld [vmem:[%s1429_s30 + $0xa8] sm:$0xff]  ;;  %v325_v54 = vld [vmem:[%s1429_s30 + $0xc0] sm:$0xff] }
  0x30   : > { %v420_v0 = vsub.f32 %v317_v12, %v1477_v52  ;;  %v421_v43 = vsub.f32 %v318_v26, %v1477_v52  ;;  %v497_v29 = vadd.f32 1.0, %v1111_v48  ;;  %v1899_v44 = vunpack.c.h.bf16 %v1417_v34  ;;  %v326_v50 = vld [vmem:[%s1429_s30 + $0xc8] sm:$0xff] }
  0x31   : > { %v1683_v53 = vmul.f32 %v493_v33, %v461_v37  ;;  %v1685_v60 = vmul.f32 %v494_v2, %v462_v63  ;;  %v426_v14 = vsub.f32 %v323_v23, %v1477_v52  ;;  %v427_v9 = vsub.f32 %v324_v57, %v1477_v52 }
  0x32   : > { %v498_v13 = vadd.f32 1.0, %v1899_v44  ;;  %1245 = vrot.lane.b32.xlu1 %v1535_v36, %s1305_s24  ;;  %v459_v48 = vmul.f32 %v1502_v1, %v420_v0  ;;  %v460_v34 = vmul.f32 %v1502_v1, %v421_v43  ;;  %v1900_v56 = vunpack.c.l.bf16 %v1420_v35  ;;  %v331_v0 = vld [vmem:[%s1429_s30 + $0xf0] sm:$0xff]  ;;  %v332_v43 = vld [vmem:[%s1429_s30 + $0xf8] sm:$0xff] }
  0x33   : > { %v1901_v18 = vunpack.c.h.bf16 %v1420_v35  ;;  %1240 = vrot.lane.b32.xlu0 %v1545_v58, %s1305_s24  ;;  %v465_v4 = vmul.f32 %v1502_v1, %v426_v14  ;;  %v466_v10 = vmul.f32 %v1502_v1, %v427_v9  ;;  %v424_v36 = vsub.f32 %v321_v28, %v1477_v52 }
  0x34   : > { %v495_v30 = vadd.f32 1.0, %v1900_v56  ;;  %v425_v11 = vsub.f32 %v322_v15, %v1477_v52  ;;  %v1705_v19 = vmul.f32 %v491_v24, %v459_v48  ;;  %v1707_v33 = vmul.f32 %v492_v39, %v460_v34 }
  0x35   : > { %v496_v31 = vadd.f32 1.0, %v1901_v18  ;;  %v1902_v35 = vunpack.c.l.bf16 %v1442_v40  ;;  %v1903_v58 = vunpack.c.h.bf16 %v1442_v40  ;;  %v1715_v25 = vmul.f32 %v497_v29, %v465_v4  ;;  %v329_v4 = vld [vmem:[%s1429_s30 + $0xe0] sm:$0xff] }
  0x36   : > { %v1717_v12 = vmul.f32 %v498_v13, %v466_v10  ;;  %v463_v26 = vmul.f32 %v1502_v1, %v424_v36  ;;  %v464_v23 = vmul.f32 %v1502_v1, %v425_v11  ;;  %v430_v24 = vsub.f32 %v327_v42, %v1477_v52  ;;  %v330_v10 = vld [vmem:[%s1429_s30 + $0xe8] sm:$0xff] }
  0x37   : > { %v501_v2 = vadd.f32 1.0, %v1902_v35  ;;  %v502_v21 = vadd.f32 1.0, %v1903_v58  ;;  %v431_v39 = vsub.f32 %v328_v32, %v1477_v52  ;;  %v1904_v57 = vunpack.c.l.bf16 %v1455_v45 }
  0x38   : > { %v1905_v40 = vunpack.c.h.bf16 %v1455_v45  ;;  %v1729_v29 = vmul.f32 %v495_v30, %v463_v26  ;;  %v1731_v44 = vmul.f32 %v496_v31, %v464_v23  ;;  %v428_v13 = vsub.f32 %v325_v54, %v1477_v52 }
  0x39   : > { %v499_v37 = vadd.f32 1.0, %v1904_v57  ;;  %v429_v28 = vsub.f32 %v326_v50, %v1477_v52  ;;  %v469_v15 = vmul.f32 %v1502_v1, %v430_v24  ;;  %v470_v14 = vmul.f32 %v1502_v1, %v431_v39 }
  0x3a   : > { %v500_v63 = vadd.f32 1.0, %v1905_v40  ;;  %v1906_v9 = vunpack.c.l.bf16 %v1458_v46  ;;  %v1907_v48 = vunpack.c.h.bf16 %v1458_v46  ;;  %v467_v56 = vmul.f32 %v1502_v1, %v428_v13 }
  0x3b   : > { %v468_v30 = vmul.f32 %v1502_v1, %v429_v28  ;;  %v434_v18 = vsub.f32 %v331_v0, %v1477_v52  ;;  %v435_v31 = vsub.f32 %v332_v43, %v1477_v52  ;;  %v1747_v36 = vmul.f32 %v501_v2, %v469_v15 }
  0x3c   : > { %v505_v45 = vadd.f32 1.0, %v1906_v9  ;;  %v506_v34 = vadd.f32 1.0, %v1907_v48  ;;  %v1749_v11 = vmul.f32 %v502_v21, %v470_v14  ;;  %v1751_v42 = vmul.f32 %v499_v37, %v467_v56 }
  0x3d   : > { %v1753_v32 = vmul.f32 %v500_v63, %v468_v30  ;;  %v473_v46 = vmul.f32 %v1502_v1, %v434_v18  ;;  %v474_v35 = vmul.f32 %v1502_v1, %v435_v31  ;;  %v503_v58 = vadd.f32 1.0, %v1123_v5 }
  0x3e   : > { %v504_v54 = vadd.f32 1.0, %v1124_v20  ;;  %v432_v2 = vsub.f32 %v329_v4, %v1477_v52  ;;  %v433_v21 = vsub.f32 %v330_v10, %v1477_v52 }
  0x3f   : > { %v1763_v50 = vmul.f32 %v505_v45, %v473_v46  ;;  %v1765_v26 = vmul.f32 %v506_v34, %v474_v35 }
  0x40   : > { %v471_v23 = vmul.f32 %v1502_v1, %v432_v2  ;;  %v472_v24 = vmul.f32 %v1502_v1, %v433_v21 }
  0x42   : > { %v1769_v39 = vmul.f32 %v503_v58, %v471_v23  ;;  %v1771_v57 = vmul.f32 %v504_v54, %v472_v24 }
  0x88   : > { %v1181_v5 = vpop.permute.xlu1 %1180 }
  0x89   : > { %v1171_v37 = vpop.permute.xlu0 %1170  ;;  %v1249_v51 = vadd.low.f32.bf16 %v1559_v22, %v1181_v5  ;;  %v1250_v20 = vadd.high.f32.bf16 %v1562_v6, %v1181_v5 }
  0x8a   : > { %v1251_v52 = vadd.low.f32.bf16 %v1572_v41, %v1171_v37  ;;  %v1252_v1 = vadd.high.f32.bf16 %v1575_v16, %v1171_v37 }
  0x8b   : > { %v1037_v63 = vpack.c.bf16 %v1249_v51, %v1249_v51  ;;  %v1038_v22 = vpack.c.bf16 %v1250_v20, %v1250_v20 }
  0x8c   : > { %v1186_v40 = vpop.permute.xlu1 %1185  ;;  %v1033_v6 = vpack.c.bf16 %v1251_v52, %v1251_v52  ;;  %v1034_v43 = vpack.c.bf16 %v1252_v1, %v1252_v1 }
  0x8d   : > { %v1176_v0 = vpop.permute.xlu0 %1175  ;;  %832 = vst.msk [vmem:[%s1780_s10 + $0x10] sm:$0xf] %vm827_vm0, %v1037_v63  ;;  %833 = vst.msk [vmem:[%s1780_s10 + $0x14] sm:$0xf] %vm827_vm0, %v1038_v22  ;;  %v1253_v13 = vadd.low.f32.bf16 %v1587_v17, %v1186_v40  ;;  %v1254_v28 = vadd.high.f32.bf16 %v1589_v62, %v1186_v40 }
  0x8e   : > { %828 = vst.msk [vmem:[%s1780_s10] sm:$0xf] %vm827_vm0, %v1033_v6  ;;  %829 = vst.msk [vmem:[%s1780_s10 + $0x4] sm:$0xf] %vm827_vm0, %v1034_v43  ;;  %v1255_v41 = vadd.low.f32.bf16 %v1609_v8, %v1176_v0  ;;  %v1256_v16 = vadd.high.f32.bf16 %v1611_v27, %v1176_v0 }
  0x8f   : > { %v1039_v14 = vpack.c.bf16 %v1253_v13, %v1253_v13  ;;  %v1040_v9 = vpack.c.bf16 %v1254_v28, %v1254_v28 }
  0x90   : > { %v1196_v15 = vpop.permute.xlu1 %1195  ;;  %v1035_v48 = vpack.c.bf16 %v1255_v41, %v1255_v41  ;;  %v1036_v34 = vpack.c.bf16 %v1256_v16, %v1256_v16 }
  0x91   : > { %v1191_v45 = vpop.permute.xlu0 %1190  ;;  %834 = vst.msk [vmem:[%s1780_s10 + $0x18] sm:$0xf] %vm827_vm0, %v1039_v14  ;;  %835 = vst.msk [vmem:[%s1780_s10 + $0x1c] sm:$0xf] %vm827_vm0, %v1040_v9  ;;  %v1257_v17 = vadd.low.f32.bf16 %v1619_v55, %v1196_v15  ;;  %v1258_v62 = vadd.high.f32.bf16 %v1621_v61, %v1196_v15 }
  0x92   : > { %830 = vst.msk [vmem:[%s1780_s10 + $0x8] sm:$0xf] %vm827_vm0, %v1035_v48  ;;  %831 = vst.msk [vmem:[%s1780_s10 + $0xc] sm:$0xf] %vm827_vm0, %v1036_v34  ;;  %v1259_v8 = vadd.low.f32.bf16 %v1637_v7, %v1191_v45  ;;  %v1260_v27 = vadd.high.f32.bf16 %v1639_v59, %v1191_v45 }
  0x93   : > { %v1043_v30 = vpack.c.bf16 %v1257_v17, %v1257_v17  ;;  %v1044_v18 = vpack.c.bf16 %v1258_v62, %v1258_v62 }
  0x94   : > { %v1206_v56 = vpop.permute.xlu1 %1205  ;;  %v1041_v4 = vpack.c.bf16 %v1259_v8, %v1259_v8  ;;  %v1042_v10 = vpack.c.bf16 %v1260_v27, %v1260_v27 }
  0x95   : > { %v1201_v31 = vpop.permute.xlu0 %1200  ;;  %838 = vst.msk [vmem:[%s1780_s10 + $0x28] sm:$0xf] %vm827_vm0, %v1043_v30  ;;  %839 = vst.msk [vmem:[%s1780_s10 + $0x2c] sm:$0xf] %vm827_vm0, %v1044_v18  ;;  %v1261_v55 = vadd.low.f32.bf16 %v1657_v49, %v1206_v56  ;;  %v1262_v61 = vadd.high.f32.bf16 %v1659_v38, %v1206_v56 }
  0x96   : > { %836 = vst.msk [vmem:[%s1780_s10 + $0x20] sm:$0xf] %vm827_vm0, %v1041_v4  ;;  %837 = vst.msk [vmem:[%s1780_s10 + $0x24] sm:$0xf] %vm827_vm0, %v1042_v10  ;;  %v1263_v7 = vadd.low.f32.bf16 %v1669_v47, %v1201_v31  ;;  %v1264_v59 = vadd.high.f32.bf16 %v1671_v3, %v1201_v31 }
  0x97   : > { %v1047_v35 = vpack.c.bf16 %v1261_v55, %v1261_v55  ;;  %v1048_v58 = vpack.c.bf16 %v1262_v61, %v1262_v61 }
  0x98   : > { %v1216_v46 = vpop.permute.xlu1 %1215  ;;  %v1045_v2 = vpack.c.bf16 %v1263_v7, %v1263_v7  ;;  %v1046_v21 = vpack.c.bf16 %v1264_v59, %v1264_v59 }
  0x99   : > { %v1211_v54 = vpop.permute.xlu0 %1210  ;;  %842 = vst.msk [vmem:[%s1780_s10 + $0x38] sm:$0xf] %vm827_vm0, %v1047_v35  ;;  %843 = vst.msk [vmem:[%s1780_s10 + $0x3c] sm:$0xf] %vm827_vm0, %v1048_v58  ;;  %v1265_v49 = vadd.low.f32.bf16 %v1683_v53, %v1216_v46  ;;  %v1266_v38 = vadd.high.f32.bf16 %v1685_v60, %v1216_v46 }
  0x9a   : > { %840 = vst.msk [vmem:[%s1780_s10 + $0x30] sm:$0xf] %vm827_vm0, %v1045_v2  ;;  %841 = vst.msk [vmem:[%s1780_s10 + $0x34] sm:$0xf] %vm827_vm0, %v1046_v21  ;;  %v1267_v47 = vadd.low.f32.bf16 %v1705_v19, %v1211_v54  ;;  %v1268_v3 = vadd.high.f32.bf16 %v1707_v33, %v1211_v54 }
  0x9b   : > { %v1051_v24 = vpack.c.bf16 %v1265_v49, %v1265_v49  ;;  %v1052_v5 = vpack.c.bf16 %v1266_v38, %v1266_v38 }
  0x9c   : > { %v1226_v23 = vpop.permute.xlu1 %1225  ;;  %v1049_v51 = vpack.c.bf16 %v1267_v47, %v1267_v47  ;;  %v1050_v20 = vpack.c.bf16 %v1268_v3, %v1268_v3 }
  0x9d   : > { %v1221_v37 = vpop.permute.xlu0 %1220  ;;  %846 = vst.msk [vmem:[%s1780_s10 + $0x48] sm:$0xf] %vm827_vm0, %v1051_v24  ;;  %847 = vst.msk [vmem:[%s1780_s10 + $0x4c] sm:$0xf] %vm827_vm0, %v1052_v5  ;;  %v1269_v53 = vadd.low.f32.bf16 %v1715_v25, %v1226_v23  ;;  %v1270_v60 = vadd.high.f32.bf16 %v1717_v12, %v1226_v23 }
  0x9e   : > { %844 = vst.msk [vmem:[%s1780_s10 + $0x40] sm:$0xf] %vm827_vm0, %v1049_v51  ;;  %845 = vst.msk [vmem:[%s1780_s10 + $0x44] sm:$0xf] %vm827_vm0, %v1050_v20  ;;  %v1271_v19 = vadd.low.f32.bf16 %v1729_v29, %v1221_v37  ;;  %v1272_v33 = vadd.high.f32.bf16 %v1731_v44, %v1221_v37 }
  0x9f   : > { %v1055_v1 = vpack.c.bf16 %v1269_v53, %v1269_v53  ;;  %v1056_v40 = vpack.c.bf16 %v1270_v60, %v1270_v60 }
  0xa0   : > { %v1236_v52 = vpop.permute.xlu1 %1235  ;;  %v1053_v22 = vpack.c.bf16 %v1271_v19, %v1271_v19  ;;  %v1054_v0 = vpack.c.bf16 %v1272_v33, %v1272_v33 }
  0xa1   : > { %v1231_v63 = vpop.permute.xlu0 %1230  ;;  %850 = vst.msk [vmem:[%s1780_s10 + $0x58] sm:$0xf] %vm827_vm0, %v1055_v1  ;;  %851 = vst.msk [vmem:[%s1780_s10 + $0x5c] sm:$0xf] %vm827_vm0, %v1056_v40  ;;  %v1273_v25 = vadd.low.f32.bf16 %v1747_v36, %v1236_v52  ;;  %v1274_v12 = vadd.high.f32.bf16 %v1749_v11, %v1236_v52 }
  0xa2   : > { %848 = vst.msk [vmem:[%s1780_s10 + $0x50] sm:$0xf] %vm827_vm0, %v1053_v22  ;;  %849 = vst.msk [vmem:[%s1780_s10 + $0x54] sm:$0xf] %vm827_vm0, %v1054_v0  ;;  %v1275_v29 = vadd.low.f32.bf16 %v1751_v42, %v1231_v63  ;;  %v1276_v44 = vadd.high.f32.bf16 %v1753_v32, %v1231_v63 }
  0xa3   : > { %v1059_v43 = vpack.c.bf16 %v1273_v25, %v1273_v25  ;;  %v1060_v13 = vpack.c.bf16 %v1274_v12, %v1274_v12 }
  0xa4   : > { %v1246_v6 = vpop.permute.xlu1 %1245  ;;  %v1057_v41 = vpack.c.bf16 %v1275_v29, %v1275_v29  ;;  %v1058_v36 = vpack.c.bf16 %v1276_v44, %v1276_v44 }
  0xa5   : > { %v1241_v28 = vpop.permute.xlu0 %1240  ;;  %854 = vst.msk [vmem:[%s1780_s10 + $0x68] sm:$0xf] %vm827_vm0, %v1059_v43  ;;  %855 = vst.msk [vmem:[%s1780_s10 + $0x6c] sm:$0xf] %vm827_vm0, %v1060_v13  ;;  %v1277_v11 = vadd.low.f32.bf16 %v1763_v50, %v1246_v6  ;;  %v1278_v42 = vadd.high.f32.bf16 %v1765_v26, %v1246_v6 }
  0xa6   : > { %852 = vst.msk [vmem:[%s1780_s10 + $0x60] sm:$0xf] %vm827_vm0, %v1057_v41  ;;  %853 = vst.msk [vmem:[%s1780_s10 + $0x64] sm:$0xf] %vm827_vm0, %v1058_v36  ;;  %v1279_v32 = vadd.low.f32.bf16 %v1769_v39, %v1241_v28  ;;  %v1280_v16 = vadd.high.f32.bf16 %v1771_v57, %v1241_v28 }
  0xa7   : > { %v1063_v15 = vpack.c.bf16 %v1277_v11, %v1277_v11  ;;  %v1064_v14 = vpack.c.bf16 %v1278_v42, %v1278_v42 }
  0xa8   : > { %v1061_v9 = vpack.c.bf16 %v1279_v32, %v1279_v32  ;;  %v1062_v45 = vpack.c.bf16 %v1280_v16, %v1280_v16 }
  0xa9   : > { %858 = vst.msk [vmem:[%s1780_s10 + $0x78] sm:$0xf] %vm827_vm0, %v1063_v15  ;;  %859 = vst.msk [vmem:[%s1780_s10 + $0x7c] sm:$0xf] %vm827_vm0, %v1064_v14 }
  0xaa   : > { %856 = vst.msk [vmem:[%s1780_s10 + $0x70] sm:$0xf] %vm827_vm0, %v1061_v9  ;;  %857 = vst.msk [vmem:[%s1780_s10 + $0x74] sm:$0xf] %vm827_vm0, %v1062_v45 }
  0xab PF: > { %s14_s17 = sadd.s32 1, %s1303_s17   ;;  %s1908_s15 = smov %s1299_s16 }
  0xac   : > { %p11_p5 = scmp.ge.s32.totalorder %s14_s17, 4   ;;  %s1909_s16 = smov %s1911_s18 }
  0xae   :  { %13 = sbr.rel (!%p11_p5) target bundleno = 2 (0x2), region = 75 }

// kernel: spade_down_block.5
= control target key start
LH: loop header
LB: loop body
LE: loop exit
PB: predicated region body
PF: predicated region fallthrough
CT: control target
= control target key end

     0   :  { %s6585_s12 = smov 0   ;;  %s8388_s0 = inlined_call_operand.vmem [shape: bf16[2,18,18,3], index: 0, kind: input, shape index: {}]   ;;  %s8389_s1 = inlined_call_operand.vmem [shape: bf16[9,3,128], index: 1, kind: input, shape index: {}]   ;;  %s8390_s2 = inlined_call_operand.vmem [shape: f32[1,128], index: 2, kind: input, shape index: {}]   ;;  %s8391_s3 = inlined_call_operand.vmem [shape: bf16[2,16,16,128], index: 3, kind: output, shape index: {}]  }
   0x1 LB: > { %s5020_s13 = sadd.s32 4294967295, %s6562_s12   ;;  %p5024_p0 = scmp.ge.s32.totalorder %s6562_s12, 1  ;;  %s6562_s12 = sphi %s6585_s12, %s13_s12  }
   0x2   : > { %p137_p1 = scmp.lt.s32.totalorder %s6562_s12, 3 }
   0x4   : > { %p138_p2 = pnand %p5024_p0, %p137_p1 }
   0x6   : > { %141 = sbr.rel (%p138_p2) target bundleno = 589 (0x24d), region = 32 }
   0xd   : > { %v5028_v0 = vld [vmem:[%s8389_s1 + $0x2] sm:$0x3]  ;;  %vm707_vm0 = vcmask 1040384   ;;  %vm708_vm1 = vcmask 1041408   ;;  %p161_p3 = scmp.lt.s32.totalorder %s5020_s13, 1  ;;  %v6564_v1 = vmov 65535  }
   0xe   : > { %v709_v2 = vsel %vm707_vm0, 4294967295, %v6564_v1  ;;  %v5255_v3 = vld [vmem:[%s8389_s1 + $0x8] sm:$0x3]  ;;  %v204_v5 = vld [vmem:[%s8389_s1] sm:$0x3]  ;;  %vm658_vm4 = vcmask 23552  }
   0xf   : > { %v6599_v4 = vsel %vm708_vm1, %v709_v2, 0  ;;  %s8470_s13 = smov (!%p161_p3, %s5020_s13), 1  ;;  %v5320_v9 = vld [vmem:[%s8389_s1 + $0xa] sm:$0x3]  ;;  %vm221_vm2 = vsmask.f32 3328 }
  0x10   : > { %v712_v6 = vand.u32 %v5028_v0, %v6599_v4  ;;  %v6608_v7 = vand.u32 %v5255_v3, %v6599_v4  ;;  %v6611_v8 = vand.u32 %v6599_v4, %v204_v5  ;;  %s6444_s22 = smul.u32 216, %s8470_s13  ;;  %v6618_v10 = vand.u32 %v5320_v9, %v6599_v4  ;;  %v5385_v26 = vld [vmem:[%s8389_s1 + $0xc] sm:$0x3]  ;;  %v5109_v31 = vld [vmem:[%s8389_s1 + $0x4] sm:$0x3]  ;;  %s5599_s11 = sshll.u32 %s8470_s13, 7 }
  0x11   : > { %vm222_vm3 = vsmask.f32 7440  ;;  %v6657_v42 = vand.u32 %v5385_v26, %v6599_v4  ;;  %v6660_v46 = vand.u32 %v5109_v31, %v6599_v4  ;;  %vm1215_vm6 = vcmask 1042432   ;;  %s8335_s16 = scalar_lea.vmem %s8391_s3, %s5599_s11 }
  0x12   : > { %8408 = vst [vmem:[#allocation2_spill] sm:$0xff] %v6608_v7  ;;  %5880 = vmatprep.subr.bf16.mxu1 %v712_v6  ;;  %6016 = vmatprep.subr.bf16.mxu0 %v6608_v7  ;;  %s6625_s25 = scalar_lea.vmem %s8388_s0, %s6444_s22  ;;  %vm6651_vm5 = vmor %vm221_vm2, %vm222_vm3  ;;  %vm1216_vm7 = vcmask 1046532  }
  0x13   : > { %5881 = vmatpush3.bf16.msra.mxu1 %v712_v6  ;;  %6017 = vmatpush3.bf16.msra.mxu0 %v6608_v7  ;;  %v172_v11 = vld [vmem:[%s6625_s25] sm:$0xf]  ;;  %v173_v12 = vld [vmem:[%s6625_s25 + $0x4] sm:$0xf]  ;;  %v205_v13 = vld [vmem:[%s6625_s25 + $0x8] sm:$0x1] }
  0x14   : > { %5914 = vmatprep.subr.bf16.mxu1 %v6611_v8  ;;  %6050 = vmatprep.subr.bf16.mxu0 %v6618_v10  ;;  %v225_v14 = vshrl.u32 %v172_v11, 16  ;;  %v228_v15 = vshll.u32 %v172_v11, 16  ;;  %v234_v16 = vshll.u32 %v173_v12, 16  ;;  %v238_v17 = vshrl.u32 %v173_v12, 16  ;;  %v5207_v18 = vld [vmem:[%s6625_s25 + $0xc] sm:$0xf]  ;;  %vm6872_vm8 = vmor %vm1215_vm6, %vm1216_vm7 }
  0x15   : > { %v244_v19 = vshll.u32 %v205_v13, 16  ;;  %v6634_v20 = vld [vmem:[%s6625_s25 + $0x10] sm:$0xf]  ;;  %v6637_v21 = vld [vmem:[%s6625_s25 + $0x14] sm:$0x1]  ;;  %v2032_v28 = vshrl.u32 %v5207_v18, 16 }
  0x16   : > { %v227_v22 = vrot.slane %v225_v14, 4  ;;  %v230_v23 = vrot.slane %v228_v15, 5  ;;  %v236_v24 = vrot.slane %v234_v16, 5  ;;  %v240_v25 = vrot.slane %v238_v17, 4  ;;  %v174_v36 = vld [vmem:[%s6625_s25 + $0xc] sm:$0xf] }
  0x17   : > { %v246_v27 = vrot.slane %v244_v19, 5  ;;  %v2035_v29 = vshll.u32 %v5207_v18, 16  ;;  %v2041_v30 = vshll.u32 %v6634_v20, 16  ;;  %v2045_v34 = vshrl.u32 %v6634_v20, 16  ;;  %v175_v41 = vld [vmem:[%s6625_s25 + $0x10] sm:$0xf] }
  0x18   : > { %v231_v32 = vor.u32 %v230_v23, %v227_v22  ;;  %v241_v33 = vor.u32 %v240_v25, %v236_v24  ;;  %v2051_v35 = vshll.u32 %v6637_v21, 16  ;;  %v2034_v38 = vrot.slane %v2032_v28, 4  ;;  %v206_v49 = vld [vmem:[%s6625_s25 + $0x14] sm:$0x1]  ;;  %v5210_v60 = vld [vmem:[%s6625_s25 + $0x18] sm:$0xf] }
  0x19   : > { %v2037_v39 = vrot.slane %v2035_v29, 5  ;;  %v2043_v40 = vrot.slane %v2041_v30, 5  ;;  %v2047_v45 = vrot.slane %v2045_v34, 4  ;;  %v249_v50 = vshrl.u32 %v174_v36, 16  ;;  %v6669_v1 = vld [vmem:[%s6625_s25 + $0x1c] sm:$0xf] }
  0x1a   : > { %v232_v43 = vrot.slane %v231_v32, 4  ;;  %v242_v44 = vrot.slane %v241_v33, 4  ;;  %v2053_v48 = vrot.slane %v2051_v35, 5  ;;  %v252_v51 = vshll.u32 %v174_v36, 16  ;;  %v6677_v9 = vld [vmem:[%s6625_s25 + $0x20] sm:$0x1] }
  0x1b   : > { %v2038_v47 = vor.u32 %v2037_v39, %v2034_v38  ;;  %v2048_v54 = vor.u32 %v2047_v45, %v2043_v40  ;;  %v258_v55 = vshll.u32 %v175_v41, 16  ;;  %v251_v58 = vrot.slane %v249_v50, 4  ;;  %v176_v25 = vld [vmem:[%s6625_s25 + $0x18] sm:$0xf]  ;;  %v177_v30 = vld [vmem:[%s6625_s25 + $0x1c] sm:$0xf] }
  0x1c   : > { %v237_v52 = vsel %vm6651_vm5, %v232_v43, %v236_v24  ;;  %v247_v53 = vsel %vm6651_vm5, %v242_v44, %v246_v27  ;;  %v254_v59 = vrot.slane %v252_v51, 5  ;;  %v262_v63 = vshrl.u32 %v175_v41, 16  ;;  %v207_v38 = vld [vmem:[%s6625_s25 + $0x20] sm:$0x1] }
  0x1d   : > { %v5029_v56 = vcombine.low %v237_v52, %v247_v53  ;;  %v2039_v57 = vrot.slane %v2038_v47, 4  ;;  %v2049_v61 = vrot.slane %v2048_v54, 4  ;;  %v260_v62 = vrot.slane %v258_v55, 5  ;;  %v5213_v47 = vld [vmem:[%s6625_s25 + $0x24] sm:$0xf] }
  0x1e   : > { %v268_v0 = vshll.u32 %v206_v49, 16  ;;  %v2775_v3 = vrot.slane %v6634_v20, 5  ;;  %v2778_v5 = vrot.slane %v6637_v21, 5  ;;  %v255_v6 = vor.u32 %v254_v59, %v251_v58  ;;  %v6700_v52 = vld [vmem:[%s6625_s25 + $0x28] sm:$0xf] }
  0x1f   : > { %5882 = vmatprep.mubr.msk.bf16.mxu1 %vm658_vm4, %v5029_v56  ;;  %v2044_v2 = vsel %vm6651_vm5, %v2039_v57, %v2043_v40  ;;  %v2054_v11 = vsel %vm6651_vm5, %v2049_v61, %v2053_v48  ;;  %v264_v12 = vrot.slane %v262_v63, 4  ;;  %v2056_v14 = vshrl.u32 %v5210_v60, 16  ;;  %v6706_v59 = vld [vmem:[%s6625_s25 + $0x2c] sm:$0x1]  ;;  %v6905_v21 = vld [vmem:[%s6625_s25 + $0x7c] sm:$0xf] }
  0x20   : > { %v270_v13 = vrot.slane %v268_v0, 5  ;;  %v5256_v15 = vcombine.low %v2044_v2, %v2054_v11  ;;  %v256_v16 = vrot.slane %v255_v6, 4  ;;  %v2059_v17 = vshll.u32 %v5210_v60, 16  ;;  %v178_v6 = vld [vmem:[%s6625_s25 + $0x24] sm:$0xf] }
  0x21   : > { %v2065_v18 = vshll.u32 %v6669_v1, 16  ;;  %v265_v19 = vor.u32 %v264_v12, %v260_v62  ;;  %v2058_v22 = vrot.slane %v2056_v14, 4  ;;  %v2069_v23 = vshrl.u32 %v6669_v1, 16 }
  0x22   : > { %v2075_v24 = vshll.u32 %v6677_v9, 16  ;;  %6018 = vmatprep.mubr.msk.bf16.mxu0 %vm658_vm4, %v5256_v15  ;;  %v261_v26 = vsel %vm6651_vm5, %v256_v16, %v260_v62  ;;  %v2061_v27 = vrot.slane %v2059_v17, 5  ;;  %v2782_v29 = vrot.slane %v6669_v1, 5  ;;  %v179_v15 = vld [vmem:[%s6625_s25 + $0x28] sm:$0xf] }
  0x23   : > { %v2067_v28 = vrot.slane %v2065_v18, 5  ;;  %v266_v31 = vrot.slane %v265_v19, 4  ;;  %v2071_v32 = vrot.slane %v2069_v23, 4  ;;  %v2785_v34 = vrot.slane %v6677_v9, 5  ;;  %v208_v23 = vld [vmem:[%s6625_s25 + $0x2c] sm:$0x1] }
  0x24   : > { %v2077_v33 = vrot.slane %v2075_v24, 5  ;;  %v2062_v35 = vor.u32 %v2061_v27, %v2058_v22  ;;  %v6693_v36 = vrot.slane %v2782_v29, 4  ;;  %v273_v39 = vshrl.u32 %v176_v25, 16 }
  0x25   : > { %v276_v40 = vshll.u32 %v176_v25, 16  ;;  %v271_v41 = vsel %vm6651_vm5, %v266_v31, %v270_v13  ;;  %v2072_v43 = vor.u32 %v2071_v32, %v2067_v28  ;;  %v282_v44 = vshll.u32 %v177_v30, 16  ;;  %v5216_v31 = vld [vmem:[%s6625_s25 + $0x30] sm:$0xf] }
  0x26   : > { %v286_v45 = vshrl.u32 %v177_v30, 16  ;;  %v5030_v48 = vcombine.low %v261_v26, %v271_v41  ;;  %v2063_v49 = vrot.slane %v2062_v35, 4  ;;  %v275_v50 = vrot.slane %v273_v39, 4  ;;  %v6726_v39 = vld [vmem:[%s6625_s25 + $0x34] sm:$0xf] }
  0x27   : > { %v278_v51 = vrot.slane %v276_v40, 5  ;;  %v2073_v53 = vrot.slane %v2072_v43, 4  ;;  %v284_v54 = vrot.slane %v282_v44, 5  ;;  %v292_v56 = vshll.u32 %v207_v38, 16 }
  0x28   : > { %v288_v55 = vrot.slane %v286_v45, 4  ;;  %5883 = vmatmul.mubr.msk.bf16.vlgmr.msra.gmra.mrb[0].mxu1 %vm658_vm4, %v5030_v48  ;;  %v2068_v57 = vsel %vm6651_vm5, %v2063_v49, %v2067_v28  ;;  %v2080_v60 = vshrl.u32 %v5213_v47, 16  ;;  %v2083_v61 = vshll.u32 %v5213_v47, 16  ;;  %v6733_v47 = vld [vmem:[%s6625_s25 + $0x38] sm:$0x1] }
  0x29   : > { %v279_v58 = vor.u32 %v278_v51, %v275_v50  ;;  %5915 = vmatpush3.bf16.msra.mxu1 %v6611_v8  ;;  %v2078_v62 = vsel %vm6651_vm5, %v2073_v53, %v2077_v33  ;;  %v294_v0 = vrot.slane %v292_v56, 5  ;;  %v2089_v2 = vshll.u32 %v6700_v52, 16 }
  0x2a   : > { %v289_v63 = vor.u32 %v288_v55, %v284_v54  ;;  %v5257_v11 = vcombine.low %v2068_v57, %v2078_v62  ;;  %v2082_v13 = vrot.slane %v2080_v60, 4  ;;  %v2085_v14 = vrot.slane %v2083_v61, 5  ;;  %5948 = vmatprep.subr.bf16.mxu1 %v6660_v46  ;;  %v180_v60 = vld [vmem:[%s6625_s25 + $0x30] sm:$0xf] }
  0x2b   : > { %v280_v12 = vrot.slane %v279_v58, 4  ;;  %v2091_v17 = vrot.slane %v2089_v2, 5  ;;  %v2093_v8 = vshrl.u32 %v6700_v52, 16  ;;  %v2099_v18 = vshll.u32 %v6706_v59, 16  ;;  %v181_v2 = vld [vmem:[%s6625_s25 + $0x34] sm:$0xf] }
  0x2c   : > { %v290_v16 = vrot.slane %v289_v63, 4  ;;  %6019 = vmatmul.mubr.msk.bf16.vlgmr.msra.gmra.mrb[0].mxu0 %vm658_vm4, %v5257_v11  ;;  %v2086_v22 = vor.u32 %v2085_v14, %v2082_v13  ;;  %v297_v24 = vshrl.u32 %v178_v6, 16  ;;  %v300_v25 = vshll.u32 %v178_v6, 16  ;;  %v209_v14 = vld [vmem:[%s6625_s25 + $0x38] sm:$0x1] }
  0x2d   : > { %v285_v19 = vsel %vm6651_vm5, %v280_v12, %v284_v54  ;;  %6051 = vmatpush3.bf16.msra.mxu0 %v6618_v10  ;;  %v2095_v27 = vrot.slane %v2093_v8, 4  ;;  %v2101_v28 = vrot.slane %v2099_v18, 5  ;;  %v306_v30 = vshll.u32 %v179_v15, 16 }
  0x2e   : > { %v295_v26 = vsel %vm6651_vm5, %v290_v16, %v294_v0  ;;  %v2087_v33 = vrot.slane %v2086_v22, 4  ;;  %v299_v35 = vrot.slane %v297_v24, 4  ;;  %v302_v38 = vrot.slane %v300_v25, 5  ;;  %6084 = vmatprep.subr.bf16.mxu0 %v6657_v42  ;;  %v5219_v24 = vld [vmem:[%s6625_s25 + $0x3c] sm:$0xf] }
  0x2f   : > { %v5031_v32 = vcombine.low %v285_v19, %v295_v26  ;;  %v2096_v40 = vor.u32 %v2095_v27, %v2091_v17  ;;  %v308_v41 = vrot.slane %v306_v30, 5  ;;  %v310_v43 = vshrl.u32 %v179_v15, 16  ;;  %v6750_v30 = vld [vmem:[%s6625_s25 + $0x40] sm:$0xf] }
  0x30   : > { %v316_v10 = vshll.u32 %v208_v23, 16  ;;  %v2092_v44 = vsel %vm6651_vm5, %v2087_v33, %v2091_v17  ;;  %v303_v45 = vor.u32 %v302_v38, %v299_v35  ;;  %v2104_v48 = vshrl.u32 %v5216_v31, 16 }
  0x31   : > { %5886 = vmatprep.mubr.msk.bf16.mxu1 %vm658_vm4, %v5031_v32  ;;  %v2107_v49 = vshll.u32 %v5216_v31, 16  ;;  %v2097_v50 = vrot.slane %v2096_v40, 4  ;;  %v312_v51 = vrot.slane %v310_v43, 4  ;;  %v2113_v54 = vshll.u32 %v6726_v39, 16  ;;  %v6755_v43 = vld [vmem:[%s6625_s25 + $0x44] sm:$0x1] }
  0x32   : > { %v318_v53 = vrot.slane %v316_v10, 5  ;;  %v304_v55 = vrot.slane %v303_v45, 4  ;;  %v2106_v56 = vrot.slane %v2104_v48, 4  ;;  %v2117_v58 = vshrl.u32 %v6726_v39, 16 }
  0x33   : > { %v2109_v57 = vrot.slane %v2107_v49, 5  ;;  %v2102_v61 = vsel %vm6651_vm5, %v2097_v50, %v2101_v28  ;;  %v313_v62 = vor.u32 %v312_v51, %v308_v41  ;;  %v2115_v63 = vrot.slane %v2113_v54, 5  ;;  %v182_v50 = vld [vmem:[%s6625_s25 + $0x3c] sm:$0xf] }
  0x34   : > { %v2123_v0 = vshll.u32 %v6733_v47, 16  ;;  %v5258_v6 = vcombine.low %v2092_v44, %v2102_v61  ;;  %v309_v11 = vsel %vm6651_vm5, %v304_v55, %v308_v41  ;;  %v2119_v13 = vrot.slane %v2117_v58, 4 }
  0x35   : > { %v2110_v12 = vor.u32 %v2109_v57, %v2106_v56  ;;  %v314_v15 = vrot.slane %v313_v62, 4  ;;  %v321_v17 = vshrl.u32 %v180_v60, 16  ;;  %v324_v8 = vshll.u32 %v180_v60, 16  ;;  %v183_v56 = vld [vmem:[%s6625_s25 + $0x40] sm:$0xf] }
  0x36   : > { %v2125_v16 = vrot.slane %v2123_v0, 5  ;;  %6022 = vmatprep.mubr.msk.bf16.mxu0 %vm658_vm4, %v5258_v6  ;;  %v2120_v19 = vor.u32 %v2119_v13, %v2115_v63  ;;  %v330_v22 = vshll.u32 %v181_v2, 16  ;;  %v334_v23 = vshrl.u32 %v181_v2, 16  ;;  %v210_v13 = vld [vmem:[%s6625_s25 + $0x44] sm:$0x1] }
  0x37   : > { %v2111_v18 = vrot.slane %v2110_v12, 4  ;;  %v319_v25 = vsel %vm6651_vm5, %v314_v15, %v318_v53  ;;  %v323_v26 = vrot.slane %v321_v17, 4  ;;  %v326_v27 = vrot.slane %v324_v8, 5  ;;  %v5222_v15 = vld [vmem:[%s6625_s25 + $0x48] sm:$0xf] }
  0x38   : > { %v340_v28 = vshll.u32 %v209_v14, 16  ;;  %v5032_v31 = vcombine.low %v309_v11, %v319_v25  ;;  %v2121_v33 = vrot.slane %v2120_v19, 4  ;;  %v332_v35 = vrot.slane %v330_v22, 5  ;;  %v6773_v19 = vld [vmem:[%s6625_s25 + $0x4c] sm:$0xf] }
  0x39   : > { %v2116_v32 = vsel %vm6651_vm5, %v2111_v18, %v2115_v63  ;;  %v327_v38 = vor.u32 %v326_v27, %v323_v26  ;;  %v336_v40 = vrot.slane %v334_v23, 4  ;;  %v2128_v10 = vshrl.u32 %v5219_v24, 16 }
  0x3a   : > { %v342_v41 = vrot.slane %v340_v28, 5  ;;  %5887 = vmatmul.mubr.msk.bf16.gmra.mrb[4].mxu1 %vm658_vm4, %v5032_v31  ;;  %v2126_v44 = vsel %vm6651_vm5, %v2121_v33, %v2125_v16  ;;  %v2131_v45 = vshll.u32 %v5219_v24, 16  ;;  %v2137_v48 = vshll.u32 %v6750_v30, 16 }
  0x3b   : > { %v2141_v49 = vshrl.u32 %v6750_v30, 16  ;;  %v5259_v51 = vcombine.low %v2116_v32, %v2126_v44  ;;  %v328_v53 = vrot.slane %v327_v38, 4  ;;  %v337_v54 = vor.u32 %v336_v40, %v332_v35 }
  0x3c   : > { %v2130_v55 = vrot.slane %v2128_v10, 4  ;;  %v2133_v57 = vrot.slane %v2131_v45, 5  ;;  %v2139_v58 = vrot.slane %v2137_v48, 5  ;;  %v2147_v61 = vshll.u32 %v6755_v43, 16 }
  0x3d   : > { %v2143_v60 = vrot.slane %v2141_v49, 4  ;;  %6023 = vmatmul.mubr.msk.bf16.gmra.mrb[4].mxu0 %vm658_vm4, %v5259_v51  ;;  %v333_v62 = vsel %vm6651_vm5, %v328_v53, %v332_v35  ;;  %v338_v63 = vrot.slane %v337_v54, 4  ;;  %v345_v0 = vshrl.u32 %v182_v50, 16  ;;  %v6781_v35 = vld [vmem:[%s6625_s25 + $0x50] sm:$0x1] }
  0x3e   : > { %v348_v2 = vshll.u32 %v182_v50, 16  ;;  %v2134_v6 = vor.u32 %v2133_v57, %v2130_v55  ;;  %v2149_v12 = vrot.slane %v2147_v61, 5  ;;  %v354_v14 = vshll.u32 %v183_v56, 16  ;;  %v6788_v49 = vld [vmem:[%s6625_s25 + $0x4c] sm:$0xf] }
  0x3f   : > { %v2144_v11 = vor.u32 %v2143_v60, %v2139_v58  ;;  %v343_v16 = vsel %vm6651_vm5, %v338_v63, %v342_v41  ;;  %v347_v17 = vrot.slane %v345_v0, 4  ;;  %v358_v18 = vshrl.u32 %v183_v56, 16  ;;  %v6785_v41 = vld [vmem:[%s6625_s25 + $0x48] sm:$0xf] }
  0x40   : > { %v350_v8 = vrot.slane %v348_v2, 5  ;;  %v5033_v22 = vcombine.low %v333_v62, %v343_v16  ;;  %v2135_v23 = vrot.slane %v2134_v6, 4  ;;  %v356_v25 = vrot.slane %v354_v14, 5  ;;  %v5225_v2 = vld [vmem:[%s6625_s25 + $0x54] sm:$0xf] }
  0x41   : > { %v2145_v24 = vrot.slane %v2144_v11, 4  ;;  %v360_v27 = vrot.slane %v358_v18, 4  ;;  %v364_v28 = vshll.u32 %v210_v13, 16  ;;  %v2152_v31 = vshrl.u32 %v5222_v15, 16 }
  0x42   : > { %v351_v26 = vor.u32 %v350_v8, %v347_v17  ;;  %5890 = vmatprep.mubr.msk.bf16.mxu1 %vm658_vm4, %v5033_v22  ;;  %v2140_v32 = vsel %vm6651_vm5, %v2135_v23, %v2139_v58  ;;  %v2155_v38 = vshll.u32 %v5222_v15, 16  ;;  %v2161_v40 = vshll.u32 %v6773_v19, 16  ;;  %v211_v58 = vld [vmem:[%s6625_s25 + $0x50] sm:$0x1]  ;;  %v6804_v8 = vld [vmem:[%s6625_s25 + $0x58] sm:$0xf] }
  0x43   : > { %v2150_v33 = vsel %vm6651_vm5, %v2145_v24, %v2149_v12  ;;  %v361_v45 = vor.u32 %v360_v27, %v356_v25  ;;  %v366_v48 = vrot.slane %v364_v28, 5  ;;  %v2154_v50 = vrot.slane %v2152_v31, 4  ;;  %v6810_v28 = vld [vmem:[%s6625_s25 + $0x5c] sm:$0x1] }
  0x44   : > { %v5260_v10 = vcombine.low %v2140_v32, %v2150_v33  ;;  %v352_v44 = vrot.slane %v351_v26, 4  ;;  %v2157_v51 = vrot.slane %v2155_v38, 5  ;;  %v2163_v53 = vrot.slane %v2161_v40, 5 }
  0x45   : > { %v2165_v54 = vshrl.u32 %v6773_v19, 16  ;;  %v362_v56 = vrot.slane %v361_v45, 4  ;;  %v2171_v57 = vshll.u32 %v6781_v35, 16  ;;  %v369_v60 = vshrl.u32 %v6785_v41, 16 }
  0x46   : > { %6026 = vmatprep.mubr.msk.bf16.mxu0 %vm658_vm4, %v5260_v10  ;;  %v357_v55 = vsel %vm6651_vm5, %v352_v44, %v356_v25  ;;  %v2158_v61 = vor.u32 %v2157_v51, %v2154_v50  ;;  %v372_v63 = vshll.u32 %v6785_v41, 16  ;;  %v378_v0 = vshll.u32 %v6788_v49, 16  ;;  %v6814_v10 = vld [vmem:[%s6625_s25 + $0x54] sm:$0xf]  ;;  %v6820_v51 = vld [vmem:[%s6625_s25 + $0x58] sm:$0xf] }
  0x47   : > { %v2167_v62 = vrot.slane %v2165_v54, 4  ;;  %v367_v6 = vsel %vm6651_vm5, %v362_v56, %v366_v48  ;;  %v2173_v11 = vrot.slane %v2171_v57, 5  ;;  %v371_v12 = vrot.slane %v369_v60, 4 }
  0x48   : > { %v382_v13 = vshrl.u32 %v6788_v49, 16  ;;  %v5034_v14 = vcombine.low %v357_v55, %v367_v6  ;;  %v2159_v15 = vrot.slane %v2158_v61, 4  ;;  %v374_v17 = vrot.slane %v372_v63, 5  ;;  %v212_v61 = vld [vmem:[%s6625_s25 + $0x5c] sm:$0x1] }
  0x49   : > { %v2168_v16 = vor.u32 %v2167_v62, %v2163_v53  ;;  %v380_v18 = vrot.slane %v378_v0, 5  ;;  %v388_v23 = vshll.u32 %v211_v58, 16  ;;  %v2176_v24 = vshrl.u32 %v5225_v2, 16 }
  0x4a   : > { %v384_v22 = vrot.slane %v382_v13, 4  ;;  %5891 = vmatmul.mubr.msk.bf16.gmra.mrb[8].mxu1 %vm658_vm4, %v5034_v14  ;;  %v2164_v25 = vsel %vm6651_vm5, %v2159_v15, %v2163_v53  ;;  %v375_v27 = vor.u32 %v374_v17, %v371_v12  ;;  %v2179_v31 = vshll.u32 %v5225_v2, 16 }
  0x4b   : > { %v2169_v26 = vrot.slane %v2168_v16, 4  ;;  %v390_v33 = vrot.slane %v388_v23, 5  ;;  %v2178_v38 = vrot.slane %v2176_v24, 4  ;;  %v2185_v40 = vshll.u32 %v6804_v8, 16  ;;  %v6834_v16 = vld [vmem:[%s6625_s25 + $0x64] sm:$0xf] }
  0x4c   : > { %v385_v32 = vor.u32 %v384_v22, %v380_v18  ;;  %v376_v45 = vrot.slane %v375_v27, 4  ;;  %v2181_v48 = vrot.slane %v2179_v31, 5  ;;  %v2189_v50 = vshrl.u32 %v6804_v8, 16 }
  0x4d   : > { %v2174_v44 = vsel %vm6651_vm5, %v2169_v26, %v2173_v11  ;;  %v2187_v55 = vrot.slane %v2185_v40, 5  ;;  %v2195_v56 = vshll.u32 %v6810_v28, 16  ;;  %v393_v62 = vshrl.u32 %v6814_v10, 16  ;;  %v5228_v11 = vld [vmem:[%s6625_s25 + $0x60] sm:$0xf] }
  0x4e   : > { %v5261_v53 = vcombine.low %v2164_v25, %v2174_v44  ;;  %v386_v54 = vrot.slane %v385_v32, 4  ;;  %v381_v57 = vsel %vm6651_vm5, %v376_v45, %v380_v18  ;;  %v2182_v58 = vor.u32 %v2181_v48, %v2178_v38  ;;  %v6841_v26 = vld [vmem:[%s6625_s25 + $0x68] sm:$0x1]  ;;  %v6845_v44 = vld [vmem:[%s6625_s25 + $0x60] sm:$0xf] }
  0x4f   : > { %v2191_v60 = vrot.slane %v2189_v50, 4  ;;  %v2197_v0 = vrot.slane %v2195_v56, 5  ;;  %v396_v2 = vshll.u32 %v6814_v10, 16  ;;  %v402_v6 = vshll.u32 %v6820_v51, 16 }
  0x50   : > { %6027 = vmatmul.mubr.msk.bf16.gmra.mrb[8].mxu0 %vm658_vm4, %v5261_v53  ;;  %v391_v63 = vsel %vm6651_vm5, %v386_v54, %v390_v33  ;;  %v2183_v13 = vrot.slane %v2182_v58, 4  ;;  %v395_v15 = vrot.slane %v393_v62, 4  ;;  %v406_v22 = vshrl.u32 %v6820_v51, 16  ;;  %v6851_v54 = vld [vmem:[%s6625_s25 + $0x64] sm:$0xf] }
  0x51   : > { %v5035_v12 = vcombine.low %v381_v57, %v391_v63  ;;  %v2192_v14 = vor.u32 %v2191_v60, %v2187_v55  ;;  %v398_v17 = vrot.slane %v396_v2, 5  ;;  %v404_v18 = vrot.slane %v402_v6, 5  ;;  %v213_v6 = vld [vmem:[%s6625_s25 + $0x68] sm:$0x1] }
  0x52   : > { %v412_v23 = vshll.u32 %v212_v61, 16  ;;  %v2188_v24 = vsel %vm6651_vm5, %v2183_v13, %v2187_v55  ;;  %v2200_v27 = vshrl.u32 %v5228_v11, 16  ;;  %v2203_v31 = vshll.u32 %v5228_v11, 16 }
  0x53   : > { %5894 = vmatprep.mubr.msk.bf16.mxu1 %vm658_vm4, %v5035_v12  ;;  %v2193_v25 = vrot.slane %v2192_v14, 4  ;;  %v399_v32 = vor.u32 %v398_v17, %v395_v15  ;;  %v408_v33 = vrot.slane %v406_v22, 4  ;;  %v2209_v40 = vshll.u32 %v6834_v16, 16  ;;  %v5288_v22 = vld [vmem:[%s6625_s25 + $0xc] sm:$0xe] }
  0x54   : > { %v414_v38 = vrot.slane %v412_v23, 5  ;;  %v2202_v48 = vrot.slane %v2200_v27, 4  ;;  %v2205_v50 = vrot.slane %v2203_v31, 5  ;;  %v2213_v53 = vshrl.u32 %v6834_v16, 16 }
  0x55   : > { %v2198_v45 = vsel %vm6651_vm5, %v2193_v25, %v2197_v0  ;;  %v400_v56 = vrot.slane %v399_v32, 4  ;;  %v409_v57 = vor.u32 %v408_v33, %v404_v18  ;;  %v2211_v58 = vrot.slane %v2209_v40, 5 }
  0x56   : > { %v5262_v55 = vcombine.low %v2188_v24, %v2198_v45  ;;  %v2206_v60 = vor.u32 %v2205_v50, %v2202_v48  ;;  %v2215_v61 = vrot.slane %v2213_v53, 4  ;;  %v2219_v62 = vshll.u32 %v6841_v26, 16 }
  0x57   : > { %v417_v63 = vshrl.u32 %v6845_v44, 16  ;;  %v405_v0 = vsel %vm6651_vm5, %v400_v56, %v404_v18  ;;  %v410_v2 = vrot.slane %v409_v57, 4  ;;  %v420_v11 = vshll.u32 %v6845_v44, 16  ;;  %v6866_v18 = vld [vmem:[%s6625_s25 + $0x6c] sm:$0xf] }
  0x58   : > { %6030 = vmatprep.mubr.msk.bf16.mxu0 %vm658_vm4, %v5262_v55  ;;  %v426_v12 = vshll.u32 %v6851_v54, 16  ;;  %v2207_v13 = vrot.slane %v2206_v60, 4  ;;  %v2216_v14 = vor.u32 %v2215_v61, %v2211_v58  ;;  %v2221_v15 = vrot.slane %v2219_v62, 5  ;;  %v6879_v55 = vld [vmem:[%s6625_s25 + $0x70] sm:$0xf] }
  0x59   : > { %v419_v17 = vrot.slane %v417_v63, 4  ;;  %v415_v23 = vsel %vm6651_vm5, %v410_v2, %v414_v38  ;;  %v422_v24 = vrot.slane %v420_v11, 5  ;;  %v430_v27 = vshrl.u32 %v6851_v54, 16  ;;  %v214_v2 = vld [vmem:[%s6625_s25 + $0x74] sm:$0x1] }
  0x5a   : > { %v428_v25 = vrot.slane %v426_v12, 5  ;;  %v5036_v31 = vcombine.low %v405_v0, %v415_v23  ;;  %v2212_v32 = vsel %vm6651_vm5, %v2207_v13, %v2211_v58  ;;  %v2217_v33 = vrot.slane %v2216_v14, 4  ;;  %v215_v23 = vld [vmem:[%s6625_s25 + $0x80] sm:$0x1] }
  0x5b   : > { %v436_v40 = vshll.u32 %v213_v6, 16  ;;  %v423_v38 = vor.u32 %v422_v24, %v419_v17  ;;  %v432_v48 = vrot.slane %v430_v27, 4  ;;  %v5304_v50 = vrot.slane %v5288_v22, 9  ;;  %v5289_v6 = vld [vmem:[%s6625_s25 + $0x18] sm:$0xe] }
  0x5c   : > { %v2777_v53 = vrot.slane %v2775_v3, 4  ;;  %5895 = vmatmul.mubr.msk.bf16.gmra.mrb[12].mxu1 %vm658_vm4, %v5036_v31  ;;  %v2222_v56 = vsel %vm6651_vm5, %v2217_v33, %v2221_v15  ;;  %v441_v58 = vshrl.u32 %v6866_v18, 16  ;;  %v444_v60 = vshll.u32 %v6866_v18, 16  ;;  %v6898_v15 = vld [vmem:[%s6625_s25 + $0x78] sm:$0xf] }
  0x5d   : > { %v438_v57 = vrot.slane %v436_v40, 5  ;;  %v5263_v61 = vcombine.low %v2212_v32, %v2222_v56  ;;  %v424_v62 = vrot.slane %v423_v38, 4  ;;  %v433_v63 = vor.u32 %v432_v48, %v428_v25  ;;  %v5290_v38 = vld [vmem:[%s6625_s25 + $0x24] sm:$0xe] }
  0x5e   : > { %v2776_v0 = vsel %vm6872_vm8, %v5304_v50, %v2775_v3  ;;  %v2779_v11 = vsel %vm6872_vm8, %v2777_v53, %v2778_v5  ;;  %v443_v12 = vrot.slane %v441_v58, 4  ;;  %v446_v13 = vrot.slane %v444_v60, 5 }
  0x5f   : > { %v450_v14 = vshll.u32 %v6879_v55, 16  ;;  %6031 = vmatmul.mubr.msk.bf16.gmra.mrb[12].mxu0 %vm658_vm4, %v5263_v61  ;;  %v429_v20 = vsel %vm6651_vm5, %v424_v62, %v428_v25  ;;  %v434_v3 = vrot.slane %v433_v63, 4  ;;  %v5321_v17 = vcombine.low %v2776_v0, %v2779_v11  ;;  %v6924_v61 = vld [vmem:[%s6625_s25 + $0x84] sm:$0xf] }
  0x60   : > { %v454_v22 = vshrl.u32 %v6879_v55, 16  ;;  %v447_v5 = vor.u32 %v446_v13, %v443_v12  ;;  %v460_v27 = vshll.u32 %v214_v2, 16  ;;  %v5305_v31 = vrot.slane %v5289_v6, 9 }
  0x61   : > { %v452_v24 = vrot.slane %v450_v14, 5  ;;  %v439_v32 = vsel %vm6651_vm5, %v434_v3, %v438_v57  ;;  %6052 = vmatprep.mubr.msk.bf16.mxu0 %vm658_vm4, %v5321_v17  ;;  %v2786_v25 = vsel %vm6872_vm8, %v6693_v36, %v2785_v34  ;;  %v465_v40 = vshrl.u32 %v6898_v15, 16 }
  0x62   : > { %v456_v33 = vrot.slane %v454_v22, 4  ;;  %v5037_v48 = vcombine.low %v429_v20, %v439_v32  ;;  %v448_v50 = vrot.slane %v447_v5, 4  ;;  %v462_v53 = vrot.slane %v460_v27, 5  ;;  %v216_v20 = vld [vmem:[%s6625_s25 + $0x8c] sm:$0x1] }
  0x63   : > { %v2783_v56 = vsel %vm6872_vm8, %v5305_v31, %v2782_v29  ;;  %v467_v60 = vrot.slane %v465_v40, 4  ;;  %v468_v9 = vshll.u32 %v6898_v15, 16  ;;  %v474_v36 = vshll.u32 %v6905_v21, 16  ;;  %v6932_v29 = vld [vmem:[%s6625_s25 + $0x88] sm:$0xf] }
  0x64   : > { %v457_v57 = vor.u32 %v456_v33, %v452_v24  ;;  %v5322_v58 = vcombine.low %v2783_v56, %v2786_v25  ;;  %5898 = vmatprep.mubr.msk.bf16.mxu1 %vm658_vm4, %v5037_v48  ;;  %v453_v34 = vsel %vm6651_vm5, %v448_v50, %v452_v24  ;;  %v478_v1 = vshrl.u32 %v6905_v21, 16  ;;  %v5291_v5 = vld [vmem:[%s6625_s25 + $0x30] sm:$0xe] }
  0x65   : > { %v484_v62 = vshll.u32 %v215_v23, 16  ;;  %v470_v0 = vrot.slane %v468_v9, 5  ;;  %v5306_v2 = vrot.slane %v5290_v38, 9  ;;  %v2789_v6 = vrot.slane %v6700_v52, 5  ;;  %v6951_v40 = vld [vmem:[%s6625_s25 + $0x90] sm:$0xf] }
  0x66   : > { %v458_v63 = vrot.slane %v457_v57, 4  ;;  %v476_v11 = vrot.slane %v474_v36, 5  ;;  %v480_v12 = vrot.slane %v478_v1, 4  ;;  %v2792_v14 = vrot.slane %v6706_v59, 5  ;;  %v6961_v1 = vld [vmem:[%s6625_s25 + $0x94] sm:$0xf] }
  0x67   : > { %v486_v13 = vrot.slane %v484_v62, 5  ;;  %6053 = vmatmul.mubr.msk.bf16.vlgmr.msra.gmra.mrb[0].mxu0 %vm658_vm4, %v5322_v58  ;;  %v471_v17 = vor.u32 %v470_v0, %v467_v60  ;;  %v2790_v22 = vsel %vm6872_vm8, %v5306_v2, %v2789_v6  ;;  %v2791_v23 = vrot.slane %v2789_v6, 4  ;;  %v217_v62 = vld [vmem:[%s6625_s25 + $0x98] sm:$0x1] }
  0x68   : > { %v463_v3 = vsel %vm6651_vm5, %v458_v63, %v462_v53  ;;  %6085 = vmatpush3.bf16.msra.mxu0 %v6657_v42  ;;  %v481_v52 = vor.u32 %v480_v12, %v476_v11  ;;  %v489_v27 = vshrl.u32 %v6924_v61, 16  ;;  %v492_v59 = vshll.u32 %v6924_v61, 16 }
  0x69   : > { %v5038_v24 = vcombine.low %v453_v34, %v463_v3  ;;  %v472_v31 = vrot.slane %v471_v17, 4  ;;  %v2793_v32 = vsel %vm6872_vm8, %v2791_v23, %v2792_v14  ;;  %v498_v33 = vshll.u32 %v6932_v29, 16  ;;  %v6970_v3 = vld [vmem:[%s6625_s25 + $0x9c] sm:$0xf] }
  0x6a   : > { %v502_v25 = vshrl.u32 %v6932_v29, 16  ;;  %v482_v42 = vrot.slane %v481_v52, 4  ;;  %v5323_v38 = vcombine.low %v2790_v22, %v2793_v32  ;;  %v491_v48 = vrot.slane %v489_v27, 4  ;;  %v6981_v27 = vld [vmem:[%s6625_s25 + $0xa0] sm:$0xf] }
  0x6b   : > { %5899 = vmatmul.mubr.msk.bf16.gmra.mrb[16].mxu1 %vm658_vm4, %v5038_v24  ;;  %v494_v50 = vrot.slane %v492_v59, 5  ;;  %v477_v53 = vsel %vm6651_vm5, %v472_v31, %v476_v11  ;;  %v500_v56 = vrot.slane %v498_v33, 5  ;;  %v508_v58 = vshll.u32 %v216_v20, 16  ;;  %v5292_v11 = vld [vmem:[%s6625_s25 + $0x3c] sm:$0xe] }
  0x6c   : > { %v504_v57 = vrot.slane %v502_v25, 4  ;;  %v487_v60 = vsel %vm6651_vm5, %v482_v42, %v486_v13  ;;  %6056 = vmatprep.mubr.msk.bf16.mxu0 %vm658_vm4, %v5323_v38  ;;  %v5307_v34 = vrot.slane %v5291_v5, 9  ;;  %v2796_v36 = vrot.slane %v6726_v39, 5 }
  0x6d   : > { %v495_v9 = vor.u32 %v494_v50, %v491_v48  ;;  %v5039_v63 = vcombine.low %v477_v53, %v487_v60  ;;  %v510_v2 = vrot.slane %v508_v58, 5  ;;  %v2799_v6 = vrot.slane %v6733_v47, 5  ;;  %v218_v50 = vld [vmem:[%s6625_s25 + $0xa4] sm:$0x1]  ;;  %v5293_v53 = vld [vmem:[%s6625_s25 + $0x48] sm:$0xe] }
  0x6e   : > { %v505_v0 = vor.u32 %v504_v57, %v500_v56  ;;  %v2797_v13 = vsel %vm6872_vm8, %v5307_v34, %v2796_v36  ;;  %v2798_v14 = vrot.slane %v2796_v36, 4  ;;  %v513_v20 = vshrl.u32 %v6951_v40, 16 }
  0x6f   : > { %v496_v12 = vrot.slane %v495_v9, 4  ;;  %5902 = vmatprep.mubr.msk.bf16.mxu1 %vm658_vm4, %v5039_v63  ;;  %v516_v17 = vshll.u32 %v6951_v40, 16  ;;  %v522_v22 = vshll.u32 %v6961_v1, 16  ;;  %v526_v47 = vshrl.u32 %v6961_v1, 16 }
  0x70   : > { %v506_v39 = vrot.slane %v505_v0, 4  ;;  %v2800_v5 = vsel %vm6872_vm8, %v2798_v14, %v2799_v6  ;;  %v515_v24 = vrot.slane %v513_v20, 4  ;;  %v532_v52 = vshll.u32 %v217_v62, 16 }
  0x71   : > { %v501_v23 = vsel %vm6651_vm5, %v496_v12, %v500_v56  ;;  %v5324_v31 = vcombine.low %v2797_v13, %v2800_v5  ;;  %v518_v32 = vrot.slane %v516_v17, 5  ;;  %v524_v33 = vrot.slane %v522_v22, 5  ;;  %v7002_v17 = vld [vmem:[%s6625_s25 + $0xa8] sm:$0xf] }
  0x72   : > { %v511_v59 = vsel %vm6651_vm5, %v506_v39, %v510_v2  ;;  %v528_v42 = vrot.slane %v526_v47, 4  ;;  %v534_v38 = vrot.slane %v532_v52, 5  ;;  %v5308_v48 = vrot.slane %v5292_v11, 9 }
  0x73   : > { %v5040_v25 = vcombine.low %v501_v23, %v511_v59  ;;  %6057 = vmatmul.mubr.msk.bf16.gmra.mrb[4].mxu0 %vm658_vm4, %v5324_v31  ;;  %v519_v56 = vor.u32 %v518_v32, %v515_v24  ;;  %v2803_v57 = vrot.slane %v6750_v30, 5  ;;  %v2806_v58 = vrot.slane %v6755_v43, 5  ;;  %v7007_v24 = vld [vmem:[%s6625_s25 + $0xac] sm:$0xf] }
  0x74   : > { %v537_v60 = vshrl.u32 %v6970_v3, 16  ;;  %v529_v9 = vor.u32 %v528_v42, %v524_v33  ;;  %v540_v34 = vshll.u32 %v6970_v3, 16  ;;  %v546_v36 = vshll.u32 %v6981_v27, 16 }
  0x75   : > { %5903 = vmatmul.mubr.msk.bf16.gmra.mrb[20].mxu1 %vm658_vm4, %v5040_v25  ;;  %v550_v62 = vshrl.u32 %v6981_v27, 16  ;;  %v520_v63 = vrot.slane %v519_v56, 4  ;;  %v2804_v0 = vsel %vm6872_vm8, %v5308_v48, %v2803_v57  ;;  %v2805_v30 = vrot.slane %v2803_v57, 4  ;;  %v5294_v25 = vld [vmem:[%s6625_s25 + $0x54] sm:$0xe] }
  0x76   : > { %v539_v2 = vrot.slane %v537_v60, 4  ;;  %v530_v43 = vrot.slane %v529_v9, 4  ;;  %v542_v6 = vrot.slane %v540_v34, 5  ;;  %v548_v11 = vrot.slane %v546_v36, 5  ;;  %v7022_v57 = vld [vmem:[%s6625_s25 + $0xb4] sm:$0xf] }
  0x77   : > { %v552_v12 = vrot.slane %v550_v62, 4  ;;  %v525_v13 = vsel %vm6651_vm5, %v520_v63, %v524_v33  ;;  %v2807_v14 = vsel %vm6872_vm8, %v2805_v30, %v2806_v58  ;;  %v556_v20 = vshll.u32 %v218_v50, 16  ;;  %v219_v33 = vld [vmem:[%s6625_s25 + $0xb0] sm:$0x1]  ;;  %v7031_v30 = vld [vmem:[%s6625_s25 + $0xb8] sm:$0xf] }
  0x78   : > { %v5309_v39 = vrot.slane %v5293_v53, 9  ;;  %v535_v22 = vsel %vm6651_vm5, %v530_v43, %v534_v38  ;;  %v5325_v47 = vcombine.low %v2804_v0, %v2807_v14  ;;  %v543_v23 = vor.u32 %v542_v6, %v539_v2 }
  0x79   : > { %v553_v5 = vor.u32 %v552_v12, %v548_v11  ;;  %v5041_v52 = vcombine.low %v525_v13, %v535_v22  ;;  %v558_v59 = vrot.slane %v556_v20, 5  ;;  %v2810_v31 = vrot.slane %v6773_v19, 5  ;;  %v7037_v20 = vld [vmem:[%s6625_s25 + $0xbc] sm:$0x1] }
  0x7a   : > { %v2813_v32 = vrot.slane %v6781_v35, 5  ;;  %6060 = vmatprep.mubr.msk.bf16.mxu0 %vm658_vm4, %v5325_v47  ;;  %v544_v42 = vrot.slane %v543_v23, 4  ;;  %v561_v38 = vshrl.u32 %v7002_v17, 16  ;;  %v564_v50 = vshll.u32 %v7002_v17, 16 }
  0x7b   : > { %v554_v48 = vrot.slane %v553_v5, 4  ;;  %5906 = vmatprep.mubr.msk.bf16.mxu1 %vm658_vm4, %v5041_v52  ;;  %v2811_v53 = vsel %vm6872_vm8, %v5309_v39, %v2810_v31  ;;  %v2812_v56 = vrot.slane %v2810_v31, 4  ;;  %v570_v19 = vshll.u32 %v7007_v24, 16  ;;  %v5295_v52 = vld [vmem:[%s6625_s25 + $0x60] sm:$0xe] }
  0x7c   : > { %v574_v35 = vshrl.u32 %v7007_v24, 16  ;;  %v549_v58 = vsel %vm6651_vm5, %v544_v42, %v548_v11  ;;  %v563_v9 = vrot.slane %v561_v38, 4  ;;  %v566_v34 = vrot.slane %v564_v50, 5 }
  0x7d   : > { %v559_v60 = vsel %vm6651_vm5, %v554_v48, %v558_v59  ;;  %v2814_v62 = vsel %vm6872_vm8, %v2812_v56, %v2813_v32  ;;  %v572_v63 = vrot.slane %v570_v19, 5  ;;  %v580_v6 = vshll.u32 %v219_v33, 16  ;;  %v5296_v48 = vld [vmem:[%s6625_s25 + $0x6c] sm:$0xe]  ;;  %v5232_v19 = vld [vmem:[%s6625_s25 + $0x70] sm:$0xf] }
  0x7e   : > { %v5042_v36 = vcombine.low %v549_v58, %v559_v60  ;;  %v576_v0 = vrot.slane %v574_v35, 4  ;;  %v5326_v2 = vcombine.low %v2811_v53, %v2814_v62  ;;  %v567_v43 = vor.u32 %v566_v34, %v563_v9  ;;  %v5233_v35 = vld [vmem:[%s6625_s25 + $0x74] sm:$0x1] }
  0x7f   : > { %v5310_v12 = vrot.slane %v5294_v25, 9  ;;  %v2817_v13 = vrot.slane %v6804_v8, 5  ;;  %v2820_v14 = vrot.slane %v6810_v28, 5  ;;  %v585_v39 = vshrl.u32 %v7022_v57, 16 }
  0x80   : > { %5907 = vmatmul.mubr.msk.bf16.gmra.mrb[24].mxu1 %vm658_vm4, %v5042_v36  ;;  %v577_v11 = vor.u32 %v576_v0, %v572_v63  ;;  %6061 = vmatmul.mubr.msk.bf16.gmra.mrb[8].mxu0 %vm658_vm4, %v5326_v2  ;;  %v568_v22 = vrot.slane %v567_v43, 4  ;;  %v582_v47 = vrot.slane %v580_v6, 5  ;;  %v588_v23 = vshll.u32 %v7022_v57, 16 }
  0x81   : > { %v594_v5 = vshll.u32 %v7031_v30, 16  ;;  %v2818_v8 = vsel %vm6872_vm8, %v5310_v12, %v2817_v13  ;;  %v2819_v28 = vrot.slane %v2817_v13, 4  ;;  %v587_v31 = vrot.slane %v585_v39, 4  ;;  %v5297_v13 = vld [vmem:[%s6625_s25 + $0x78] sm:$0xe] }
  0x82   : > { %v578_v59 = vrot.slane %v577_v11, 4  ;;  %v573_v32 = vsel %vm6651_vm5, %v568_v22, %v572_v63  ;;  %v590_v33 = vrot.slane %v588_v23, 5  ;;  %v598_v42 = vshrl.u32 %v7031_v30, 16  ;;  %v6502_v23 = vld [vmem:[%s6625_s25] sm:$0xf] }
  0x83   : > { %v596_v25 = vrot.slane %v594_v5, 5  ;;  %v2821_v50 = vsel %vm6872_vm8, %v2819_v28, %v2820_v14  ;;  %v604_v53 = vshll.u32 %v7037_v20, 16  ;;  %v5311_v56 = vrot.slane %v5295_v52, 9  ;;  %v7072_v5 = vld [vmem:[%s6625_s25 + $0x4] sm:$0xf] }
  0x84   : > { %v583_v38 = vsel %vm6651_vm5, %v578_v59, %v582_v47  ;;  %v5327_v60 = vcombine.low %v2818_v8, %v2821_v50  ;;  %v591_v9 = vor.u32 %v590_v33, %v587_v31  ;;  %v600_v34 = vrot.slane %v598_v42, 4  ;;  %v7076_v59 = vld [vmem:[%s6625_s25 + $0x7c] sm:$0xf]  ;;  %v7079_v8 = vld [vmem:[%s6625_s25 + $0x80] sm:$0x1] }
  0x85   : > { %v5043_v58 = vcombine.low %v573_v32, %v583_v38  ;;  %v606_v36 = vrot.slane %v604_v53, 5  ;;  %v2824_v62 = vrot.slane %v6834_v16, 5  ;;  %v2827_v63 = vrot.slane %v6841_v26, 5  ;;  %v5298_v28 = vld [vmem:[%s6625_s25 + $0x84] sm:$0xe] }
  0x86   : > { %v5312_v0 = vrot.slane %v5296_v48, 9  ;;  %6064 = vmatprep.mubr.msk.bf16.mxu0 %vm658_vm4, %v5327_v60  ;;  %v592_v2 = vrot.slane %v591_v9, 4  ;;  %v601_v43 = vor.u32 %v600_v34, %v596_v25  ;;  %v2831_v6 = vrot.slane %v5232_v19, 5  ;;  %v5238_v42 = vld [vmem:[%s6625_s25 + $0x88] sm:$0xf] }
  0x87   : > { %5910 = vmatprep.mubr.msk.bf16.mxu1 %vm658_vm4, %v5043_v58  ;;  %v2834_v12 = vrot.slane %v5233_v35, 5  ;;  %v2825_v11 = vsel %vm6872_vm8, %v5311_v56, %v2824_v62  ;;  %v2826_v16 = vrot.slane %v2824_v62, 4  ;;  %v5061_v52 = vcombine.low %v6502_v23, %v7072_v5  ;;  %v5239_v48 = vld [vmem:[%s6625_s25 + $0x8c] sm:$0x1]  ;;  %v5241_v53 = vld [vmem:[%s6625_s25 + $0x94] sm:$0xf] }
  0x88   : > { %v597_v26 = vsel %vm6651_vm5, %v592_v2, %v596_v25  ;;  %v602_v14 = vrot.slane %v601_v43, 4  ;;  %v2832_v39 = vsel %vm6872_vm8, %v5312_v0, %v2831_v6  ;;  %v2833_v22 = vrot.slane %v2831_v6, 4  ;;  %v5242_v9 = vld [vmem:[%s6625_s25 + $0x98] sm:$0x1]  ;;  %v5299_v34 = vld [vmem:[%s6625_s25 + $0x90] sm:$0xe] }
  0x89   : > { %v2828_v47 = vsel %vm6872_vm8, %v2826_v16, %v2827_v63  ;;  %v5313_v25 = vrot.slane %v5297_v13, 9  ;;  %v2838_v56 = vrot.slane %v7076_v59, 5  ;;  %v2841_v19 = vrot.slane %v7079_v8, 5  ;;  %v5244_v0 = vld [vmem:[%s6625_s25 + $0xa0] sm:$0xf] }
  0x8a   : > { %v607_v31 = vsel %vm6651_vm5, %v602_v14, %v606_v36  ;;  %v5328_v32 = vcombine.low %v2825_v11, %v2828_v47  ;;  %v2835_v33 = vsel %vm6872_vm8, %v2833_v22, %v2834_v12  ;;  %v5314_v35 = vrot.slane %v5298_v28, 9  ;;  %v5245_v6 = vld [vmem:[%s6625_s25 + $0xa4] sm:$0x1]  ;;  %v5300_v12 = vld [vmem:[%s6625_s25 + $0x9c] sm:$0xe] }
  0x8b   : > { %v5044_v38 = vcombine.low %v597_v26, %v607_v31  ;;  %v5329_v50 = vcombine.low %v2832_v39, %v2835_v33  ;;  %v2845_v58 = vrot.slane %v5238_v42, 5  ;;  %v2848_v60 = vrot.slane %v5239_v48, 5  ;;  %v6504_v11 = vld [vmem:[%s6625_s25 + $0xc] sm:$0xf]  ;;  %v7106_v16 = vld [vmem:[%s6625_s25 + $0x10] sm:$0xf] }
  0x8c   : > { %6065 = vmatmul.mubr.msk.bf16.gmra.mrb[12].mxu0 %vm658_vm4, %v5328_v32  ;;  %v2839_v36 = vsel %vm6872_vm8, %v5313_v25, %v2838_v56  ;;  %v2840_v62 = vrot.slane %v2838_v56, 4  ;;  %v2852_v63 = vrot.slane %v5241_v53, 5  ;;  %v5062_v13 = vcombine.low %v6504_v11, %v7106_v16  ;;  %v6506_v28 = vld [vmem:[%s6625_s25 + $0x18] sm:$0xf]  ;;  %v7115_v31 = vld [vmem:[%s6625_s25 + $0x1c] sm:$0xf] }
  0x8d   : > { %5911 = vmatmul.mubr.msk.bf16.gmra.mrb[28].mxu1 %vm658_vm4, %v5044_v38  ;;  %6068 = vmatprep.mubr.msk.bf16.mxu0 %vm658_vm4, %v5329_v50  ;;  %v2846_v2 = vsel %vm6872_vm8, %v5314_v35, %v2845_v58  ;;  %v2847_v43 = vrot.slane %v2845_v58, 4  ;;  %v5315_v14 = vrot.slane %v5299_v34, 9  ;;  %v2855_v39 = vrot.slane %v5242_v9, 5  ;;  %v5247_v48 = vld [vmem:[%s6625_s25 + $0xac] sm:$0xf] }
  0x8e   : > { %5916 = vmatprep.mubr.msk.bf16.mxu1 %vm658_vm4, %v5061_v52  ;;  %v2842_v26 = vsel %vm6872_vm8, %v2840_v62, %v2841_v19  ;;  %v2854_v23 = vrot.slane %v2852_v63, 4  ;;  %v2859_v52 = vrot.slane %v5244_v0, 5  ;;  %v5063_v32 = vcombine.low %v6506_v28, %v7115_v31  ;;  %v5250_v50 = vld [vmem:[%s6625_s25 + $0xb8] sm:$0xf]  ;;  %v5248_v53 = vld [vmem:[%s6625_s25 + $0xb0] sm:$0x1] }
  0x8f   : > { %v5330_v22 = vcombine.low %v2839_v36, %v2842_v26  ;;  %v2849_v47 = vsel %vm6872_vm8, %v2847_v43, %v2848_v60  ;;  %v5316_v25 = vrot.slane %v5300_v12, 9  ;;  %v2862_v42 = vrot.slane %v5245_v6, 5  ;;  %v5301_v56 = vld [vmem:[%s6625_s25 + $0xa8] sm:$0xe]  ;;  %v5466_v60 = vld [vmem:[%s8389_s1 + $0xe] sm:$0x3] }
  0x90   : > { %v5331_v33 = vcombine.low %v2846_v2, %v2849_v47  ;;  %v2861_v38 = vrot.slane %v2859_v52, 4  ;;  %v2853_v19 = vsel %vm6872_vm8, %v5315_v14, %v2852_v63  ;;  %v2856_v35 = vsel %vm6872_vm8, %v2854_v23, %v2855_v39  ;;  %v5302_v36 = vld [vmem:[%s6625_s25 + $0xb4] sm:$0xe]  ;;  %v5251_v63 = vld [vmem:[%s6625_s25 + $0xbc] sm:$0x1] }
  0x91   : > { %v2866_v58 = vrot.slane %v5247_v48, 5  ;;  %v2860_v9 = vsel %vm6872_vm8, %v5316_v25, %v2859_v52  ;;  %v2873_v62 = vrot.slane %v5250_v50, 5  ;;  %v6508_v0 = vld [vmem:[%s6625_s25 + $0x24] sm:$0xf]  ;;  %v7142_v2 = vld [vmem:[%s6625_s25 + $0x28] sm:$0xf]  ;;  %v5332_v6 = vcombine.low %v2853_v19, %v2856_v35 }
  0x92   : > { %v2863_v34 = vsel %vm6872_vm8, %v2861_v38, %v2862_v42  ;;  %v5064_v43 = vcombine.low %v6508_v0, %v7142_v2  ;;  %v5253_v12 = vld [vmem:[%s6625_s25 + $0xc4] sm:$0xf]  ;;  %v7147_v11 = vand.u32 %v5466_v60, %v6599_v4  ;;  %v2869_v14 = vrot.slane %v5248_v53, 5  ;;  %v6510_v47 = vld [vmem:[%s6625_s25 + $0x30] sm:$0xf] }
  0x93   : > { %v2868_v26 = vrot.slane %v2866_v58, 4  ;;  %v5318_v39 = vrot.slane %v5302_v36, 9  ;;  %v7154_v23 = vld [vmem:[%s6625_s25 + $0x34] sm:$0xf]  ;;  %v2875_v28 = vrot.slane %v2873_v62, 4  ;;  %v2880_v48 = vrot.slane %v5253_v12, 5 }
  0x94   : > { %6069 = vmatmul.mubr.msk.bf16.gmra.mrb[16].mxu0 %vm658_vm4, %v5330_v22  ;;  %v5174_v22 = vld [vmem:[%s8389_s1 + $0x6] sm:$0x3]  ;;  %v5065_v52 = vcombine.low %v6510_v47, %v7154_v23  ;;  %6118 = vmatprep.subr.bf16.mxu0 %v7147_v11  ;;  %v5254_v53 = vld [vmem:[%s6625_s25 + $0xc8] sm:$0x1]  ;;  %v6512_v19 = vld [vmem:[%s6625_s25 + $0x3c] sm:$0xf] }
  0x95   : > { %5917 = vmatmul.mubr.msk.bf16.vlgmr.msra.gmra.mrb[0].mxu1 %vm658_vm4, %v5062_v13  ;;  %6072 = vmatprep.mubr.msk.bf16.mxu0 %vm658_vm4, %v5331_v33  ;;  %v5333_v13 = vcombine.low %v2860_v9, %v2863_v34  ;;  %v7160_v33 = vand.u32 %v5174_v22, %v6599_v4  ;;  %v2870_v42 = vsel %vm6872_vm8, %v2868_v26, %v2869_v14  ;;  %v7178_v35 = vld [vmem:[%s6625_s25 + $0x40] sm:$0xf]  ;;  %v2882_v36 = vrot.slane %v2880_v48, 4  ;;  %v6463_v12 = vld [vmem:[%s6625_s25 + $0x18] sm:$0xff]   ;;  %v6514_v47 = vld [vmem:[%s6625_s25 + $0x8] sm:$0x1] }
  0x96   : > { %5949 = vmatpush3.bf16.msra.mxu1 %v6660_v46  ;;  %5920 = vmatprep.mubr.msk.bf16.mxu1 %vm658_vm4, %v5063_v32  ;;  %v5317_v46 = vrot.slane %v5301_v56, 9  ;;  %v2876_v32 = vrot.slane %v5251_v63, 5  ;;  %v2874_v38 = vsel %vm6872_vm8, %v5318_v39, %v2873_v62  ;;  %v5303_v56 = vld [vmem:[%s6625_s25 + $0xc0] sm:$0xe]  ;;  %v2883_v63 = vrot.slane %v5254_v53, 5 }
  0x97   : > { %5982 = vmatprep.subr.bf16.mxu1 %v7160_v33  ;;  %v5319_v34 = vrot.slane %v5303_v56, 9  ;;  %v5067_v62 = vcombine.low %v6785_v41, %v6788_v49  ;;  %v2261_v41 = vshrl.u32 %v7076_v59, 16  ;;  %v5069_v26 = vcombine.low %v6845_v44, %v6851_v54  ;;  %v1167_v22 = vld [vmem:[%s6625_s25] sm:$0xe]  ;;  %v6515_v44 = vld [vmem:[%s6625_s25 + $0x14] sm:$0x1] }
  0x98   : > { %v2867_v25 = vsel %vm6872_vm8, %v5317_v46, %v2866_v58  ;;  %v2877_v50 = vsel %vm6872_vm8, %v2875_v28, %v2876_v32  ;;  %v5066_v58 = vcombine.low %v6512_v19, %v7178_v35  ;;  %v5068_v46 = vcombine.low %v6814_v10, %v6820_v51  ;;  %v1169_v51 = vld [vmem:[%s6625_s25 + $0x18] sm:$0xe]  ;;  %v1171_v53 = vld [vmem:[%s6625_s25 + $0x30] sm:$0xe] }
  0x99   : > { %v5334_v60 = vcombine.low %v2867_v25, %v2870_v42  ;;  %v5335_v9 = vcombine.low %v2874_v38, %v2877_v50  ;;  %v2881_v0 = vsel %vm6872_vm8, %v5319_v34, %v2880_v48  ;;  %v2263_v39 = vrot.slane %v2261_v41, 4  ;;  %v1170_v25 = vld [vmem:[%s6625_s25 + $0x24] sm:$0xe]  ;;  %v6467_v56 = vld [vmem:[%s6625_s25 + $0x30] sm:$0xff]  }
  0x9a   : > { %v1220_v10 = vrot.slane %v7072_v5, 5  ;;  %v1230_v54 = vrot.slane %v6515_v44, 5  ;;  %v5093_v28 = vrot.slane %v1167_v22, 9  ;;  %v1234_v32 = vrot.slane %v7115_v31, 5  ;;  %v6465_v38 = vld [vmem:[%s6625_s25 + $0x24] sm:$0xff]  }
  0x9b   : > { %v5070_v48 = vcombine.low %v6866_v18, %v6879_v55  ;;  %v1241_v50 = vrot.slane %v7142_v2, 5  ;;  %v5072_v31 = vcombine.low %v6924_v61, %v6932_v29  ;;  %v5531_v18 = vld [vmem:[%s8389_s1 + $0x10] sm:$0x3]  ;;  %v5095_v2 = vrot.slane %v1169_v51, 9  ;;  %v6519_v22 = vld [vmem:[%s6625_s25 + $0x4c] sm:$0xf] }
  0x9c   : > { %6073 = vmatmul.mubr.msk.bf16.gmra.mrb[20].mxu0 %vm658_vm4, %v5332_v6  ;;  %v2257_v6 = vshll.u32 %v7076_v59, 16  ;;  %v1168_v59 = vld [vmem:[%s6625_s25 + $0xc] sm:$0xe]  ;;  %v1222_v55 = vrot.slane %v1220_v10, 4  ;;  %v5096_v34 = vrot.slane %v1170_v25, 9  ;;  %v6469_v25 = vld [vmem:[%s6625_s25 + $0x3c] sm:$0xff]  }
  0x9d   : > { %5921 = vmatmul.mubr.msk.bf16.gmra.mrb[4].mxu1 %vm658_vm4, %v5064_v43  ;;  %6076 = vmatprep.mubr.msk.bf16.mxu0 %vm658_vm4, %v5333_v13  ;;  %v2884_v43 = vsel %vm6872_vm8, %v2882_v36, %v2883_v63  ;;  %v1227_v13 = vrot.slane %v7106_v16, 5  ;;  %v2267_v16 = vshll.u32 %v7079_v8, 16  ;;  %v5094_v5 = vrot.slane %v1168_v59, 9  ;;  %v1172_v63 = vld [vmem:[%s6625_s25 + $0x3c] sm:$0xe] }
  0x9e   : > { %5924 = vmatprep.mubr.msk.bf16.mxu1 %vm658_vm4, %v5065_v52  ;;  %v5336_v49 = vcombine.low %v2881_v0, %v2884_v43  ;;  %v7199_v14 = vrot.slane %v2257_v6, 5  ;;  %v1223_v52 = vrot.slane %v6514_v47, 5  ;;  %v5071_v8 = vcombine.low %v6898_v15, %v6905_v21  ;;  %v6517_v6 = vld [vmem:[%s6625_s25 + $0x2c] sm:$0x1]  ;;  %v6525_v61 = vld [vmem:[%s6625_s25 + $0x68] sm:$0x1] }
  0x9f   : > { %v1229_v19 = vrot.slane %v1227_v13, 4  ;;  %v5073_v15 = vcombine.low %v6951_v40, %v6961_v1  ;;  %v7234_v21 = vsel %vm6872_vm8, %v5093_v28, %v1220_v10  ;;  %v1236_v36 = vrot.slane %v1234_v32, 4 }
  0xa0   : > { %8413 = vst [vmem:[#allocation3_spill] sm:$0xff] %v7199_v14  ;;  %v2264_v42 = vor.u32 %v2263_v39, %v7199_v14  ;;  %v7240_v0 = vsel %vm6872_vm8, %v5094_v5, %v1227_v13  ;;  %v1243_v43 = vrot.slane %v1241_v50, 4  ;;  %v1244_v41 = vrot.slane %v6517_v6, 5  ;;  %v6521_v5 = vld [vmem:[%s6625_s25 + $0x50] sm:$0x1] }
  0xa1   : > { %v1255_v39 = vrot.slane %v7178_v35, 5  ;;  %v1262_v59 = vrot.slane %v6519_v22, 5  ;;  %v7250_v47 = vrot.slane %v2267_v16, 5  ;;  %v7260_v13 = vsel %vm6872_vm8, %v1229_v19, %v1230_v54  ;;  %v6520_v16 = vld [vmem:[%s6625_s25 + $0x44] sm:$0x1] }
  0xa2   : > { %v7264_v35 = vsel %vm6872_vm8, %v5095_v2, %v1234_v32  ;;  %v7266_v10 = vrot.slane %v2264_v42, 4  ;;  %v7284_v44 = vsel %vm6872_vm8, %v1243_v43, %v1244_v41  ;;  %v5098_v54 = vrot.slane %v1172_v63, 9 }
  0xa3   : > { %8414 = vst [vmem:[#allocation4_spill] sm:$0xff] %v7250_v47  ;;  %v1258_v28 = vrot.slane %v6520_v16, 5  ;;  %v1279_v29 = vrot.slane %v6525_v61, 5  ;;  %v6475_v61 = vld [vmem:[%s6625_s25 + $0x60] sm:$0xff]  }
  0xa4   : > { %6077 = vmatmul.mubr.msk.bf16.gmra.mrb[24].mxu0 %vm658_vm4, %v5334_v60  ;;  %v6516_v60 = vld [vmem:[%s6625_s25 + $0x20] sm:$0x1]  ;;  %8415 = vst [vmem:[#allocation5_spill] sm:$0xff] %v7266_v10  ;;  %v7318_v6 = vsel %vm6872_vm8, %v5098_v54, %v1255_v39  ;;  %v5421_v54 = vld [vmem:[%s6625_s25 + $0x24] sm:$0xf] }
  0xa5   : > { %5925 = vmatmul.mubr.msk.bf16.gmra.mrb[8].mxu1 %vm658_vm4, %v5066_v58  ;;  %6080 = vmatprep.mubr.msk.bf16.mxu0 %vm658_vm4, %v5335_v9  ;;  %v1248_v58 = vrot.slane %v7154_v23, 5  ;;  %v1237_v9 = vrot.slane %v6516_v60, 5  ;;  %v5097_v23 = vrot.slane %v1171_v53, 9  ;;  %v6471_v53 = vld [vmem:[%s6625_s25 + $0x48] sm:$0xff]   ;;  %v3614_v40 = vshll.u32 %v5421_v54, 16 }
  0xa6   : > { %5928 = vmatprep.mubr.msk.bf16.mxu1 %vm658_vm4, %v5067_v62  ;;  %v1173_v62 = vld [vmem:[%s6625_s25 + $0x48] sm:$0xe]  ;;  %v1178_v10 = vld [vmem:[%s6625_s25 + $0x84] sm:$0xe] }
  0xa7   : > { %v7280_v51 = vsel %vm6872_vm8, %v5097_v23, %v1248_v58  ;;  %v5099_v32 = vrot.slane %v1173_v62, 9  ;;  %v6523_v23 = vld [vmem:[%s6625_s25 + $0x64] sm:$0xf]  ;;  %v6526_v62 = vld [vmem:[%s6625_s25 + $0x70] sm:$0xf] }
  0xa8   : > { %v1276_v63 = vrot.slane %v6523_v23, 5 }
  0xa9   : > { %v7322_v41 = vsel %vm6872_vm8, %v5099_v32, %v1262_v59 }
  0xac   : > { %6081 = vmatmul.mubr.msk.bf16.gmra.mrb[28].mxu0 %vm658_vm4, %v5336_v49  ;;  %v7244_v49 = vand.u32 %v5531_v18, %v6599_v4  ;;  %v7256_v4 = vsel %vm6872_vm8, %v1222_v55, %v1223_v52  ;;  %v7276_v52 = vsel %vm6872_vm8, %v5096_v34, %v1241_v50  ;;  %v1265_v50 = vrot.slane %v6521_v5, 5  ;;  %v5418_v55 = vld [vmem:[%s6625_s25 + $0x18] sm:$0xf]  ;;  %v1174_v34 = vld [vmem:[%s6625_s25 + $0x54] sm:$0xe] }
  0xad   : > { %5929 = vmatmul.mubr.msk.bf16.gmra.mrb[12].mxu1 %vm658_vm4, %v5068_v46  ;;  %6086 = vmatprep.mubr.msk.bf16.mxu0 %vm658_vm4, %v6463_v12  ;;  %v1250_v46 = vrot.slane %v1248_v58, 4  ;;  %v6518_v12 = vld [vmem:[%s6625_s25 + $0x38] sm:$0x1]  ;;  %v3590_v22 = vshll.u32 %v5418_v55, 16  ;;  %v5420_v5 = vld [vmem:[%s6625_s25 + $0x20] sm:$0x1] }
  0xae   : > { %5932 = vmatprep.mubr.msk.bf16.mxu1 %vm658_vm4, %v5069_v26  ;;  %v1251_v26 = vrot.slane %v6518_v12, 5  ;;  %v6522_v58 = vld [vmem:[%s6625_s25 + $0x58] sm:$0xf] }
  0xaf   : > { %v1269_v18 = vrot.slane %v6522_v58, 5 }
  0xb0   : > { %v7291_v42 = vsel %vm6872_vm8, %v1250_v46, %v1251_v26  ;;  %v5419_v46 = vld [vmem:[%s6625_s25 + $0x1c] sm:$0xf] }
  0xb1   : > { %v1271_v16 = vrot.slane %v1269_v18, 4 }
  0xb4   : > { %6087 = vmatmul.mubr.msk.bf16.vlgmr.msra.gmra.mrb[0].mxu0 %vm658_vm4, %v6465_v38  ;;  %v1264_v38 = vrot.slane %v1262_v59, 4  ;;  %v5100_v59 = vrot.slane %v1174_v34, 9  ;;  %v3611_v34 = vshrl.u32 %v5421_v54, 16  ;;  %v1176_v54 = vld [vmem:[%s6625_s25 + $0x6c] sm:$0xe] }
  0xb5   : > { %5933 = vmatmul.mubr.msk.bf16.gmra.mrb[16].mxu1 %vm658_vm4, %v5070_v48  ;;  %6119 = vmatpush3.bf16.msra.mxu0 %v7147_v11  ;;  %v7272_v11 = vsel %vm6872_vm8, %v1236_v36, %v1237_v9  ;;  %v1257_v48 = vrot.slane %v1255_v39, 4  ;;  %v1175_v36 = vld [vmem:[%s6625_s25 + $0x60] sm:$0xe]  ;;  %v3587_v39 = vshrl.u32 %v5418_v55, 16  ;;  %v5423_v9 = vld [vmem:[%s6625_s25 + $0x2c] sm:$0x1] }
  0xb6   : > { %5936 = vmatprep.mubr.msk.bf16.mxu1 %vm658_vm4, %v5071_v8  ;;  %6090 = vmatprep.mubr.msk.bf16.mxu0 %vm658_vm4, %v6467_v56  ;;  %v5074_v8 = vcombine.low %v6970_v3, %v6981_v27  ;;  %v5075_v56 = vcombine.low %v7002_v17, %v7007_v24  ;;  %v7332_v26 = vsel %vm6872_vm8, %v1264_v38, %v1265_v50  ;;  %v1278_v38 = vrot.slane %v1276_v63, 4 }
  0xb7   : > { %6152 = vmatprep.subr.bf16.mxu0 %v7244_v49  ;;  %v7328_v12 = vsel %vm6872_vm8, %v1257_v48, %v1258_v28  ;;  %v6524_v28 = vld [vmem:[%s6625_s25 + $0x5c] sm:$0x1]  ;;  %v5422_v48 = vld [vmem:[%s6625_s25 + $0x28] sm:$0xf]  ;;  %v3600_v50 = vshrl.u32 %v5419_v46, 16  ;;  %v3589_v1 = vrot.slane %v3587_v39, 4 }
  0xb8   : > { %v1272_v32 = vrot.slane %v6524_v28, 5  ;;  %v3624_v23 = vshrl.u32 %v5422_v48, 16  ;;  %v5424_v28 = vld [vmem:[%s6625_s25 + $0x30] sm:$0xf]  ;;  %v3606_v39 = vshll.u32 %v5420_v5, 16  ;;  %v3613_v60 = vrot.slane %v3611_v34, 4 }
  0xb9   : > { %v3602_v43 = vrot.slane %v3600_v50, 4  ;;  %v3638_v2 = vshll.u32 %v5424_v28, 16  ;;  %v3630_v34 = vshll.u32 %v5423_v9, 16  ;;  %v7406_v9 = vld [vmem:[%s6625_s25 + $0x38] sm:$0x1] }
  0xba   : > { %v7361_v58 = vsel %vm6872_vm8, %v1271_v16, %v1272_v32  ;;  %v3616_v16 = vrot.slane %v3614_v40, 5  ;;  %v3635_v32 = vshrl.u32 %v5424_v28, 16  ;;  %v5427_v40 = vld [vmem:[%s6625_s25 + $0x3c] sm:$0xf]  ;;  %8416 = vst [vmem:[#allocation6_spill] sm:$0xff] %v7406_v9  ;;  %v3654_v14 = vshll.u32 %v7406_v9, 16 }
  0xbb   : > { %v6484_v9 = vld [vmem:[%s6625_s25 + $0xc0] sm:$0xff]  }
  0xbc   : > { %6091 = vmatmul.mubr.msk.bf16.gmra.mrb[4].mxu0 %vm658_vm4, %v6469_v25  ;;  %v5101_v25 = vrot.slane %v1175_v36, 9  ;;  %v3620_v36 = vshll.u32 %v5422_v48, 16  ;;  %v3637_v28 = vrot.slane %v3635_v32, 4  ;;  %v3662_v32 = vshll.u32 %v5427_v40, 16 }
  0xbd   : > { %5937 = vmatmul.mubr.msk.bf16.gmra.mrb[20].mxu1 %vm658_vm4, %v5072_v31  ;;  %6094 = vmatprep.mubr.msk.bf16.mxu0 %vm658_vm4, %v6471_v53  ;;  %v3596_v31 = vshll.u32 %v5419_v46, 16  ;;  %v6473_v53 = vld [vmem:[%s6625_s25 + $0x54] sm:$0xff]   ;;  %v7357_v46 = vsel %vm6872_vm8, %v5100_v59, %v1269_v18  ;;  %v1283_v18 = vrot.slane %v6526_v62, 5  ;;  %v6529_v62 = vld [vmem:[%s6625_s25 + $0x80] sm:$0x1] }
  0xbe   : > { %5940 = vmatprep.mubr.msk.bf16.mxu1 %vm658_vm4, %v5073_v15  ;;  %v3592_v15 = vrot.slane %v3590_v22, 5  ;;  %v7365_v55 = vsel %vm6872_vm8, %v5101_v25, %v1276_v63  ;;  %v7370_v22 = vsel %vm6872_vm8, %v1278_v38, %v1279_v29  ;;  %v5425_v59 = vld [vmem:[%s6625_s25 + $0x34] sm:$0xf]  ;;  %v5102_v25 = vrot.slane %v1176_v54, 9  ;;  %v6477_v54 = vld [vmem:[%s6625_s25 + $0x6c] sm:$0xff]  }
  0xbf   : > { %v7372_v48 = vrot.slane %v3596_v31, 5  ;;  %v7378_v5 = vrot.slane %v3620_v36, 5  ;;  %v3626_v38 = vrot.slane %v3624_v23, 4  ;;  %v3644_v31 = vshll.u32 %v5425_v59, 16  ;;  %v6528_v36 = vld [vmem:[%s6625_s25 + $0x7c] sm:$0xf] }
  0xc0   : > { %v3593_v63 = vor.u32 %v3592_v15, %v3589_v1  ;;  %v3648_v50 = vshrl.u32 %v5425_v59, 16  ;;  %v1285_v27 = vrot.slane %v1283_v18, 4  ;;  %v3617_v1 = vor.u32 %v3616_v16, %v3613_v60  ;;  %v1177_v15 = vld [vmem:[%s6625_s25 + $0x78] sm:$0xe]  ;;  %v7411_v16 = vld [vmem:[%s6625_s25 + $0x40] sm:$0xf] }
  0xc1   : > { %v3603_v3 = vor.u32 %v3602_v43, %v7372_v48  ;;  %v1290_v23 = vrot.slane %v6528_v36, 5  ;;  %v6478_v59 = vld [vmem:[%s6625_s25 + $0x78] sm:$0xff]   ;;  %v7402_v43 = vsel %vm6872_vm8, %v5102_v25, %v1283_v18  ;;  %v7408_v29 = vrot.slane %v3644_v31, 5  ;;  %8417 = vst [vmem:[#allocation7_spill] sm:$0xff] %v7411_v16 }
  0xc2   : > { %v3594_v17 = vrot.slane %v3593_v63, 4  ;;  %v3650_v60 = vrot.slane %v3648_v50, 4  ;;  %v3632_v63 = vrot.slane %v3630_v34, 5  ;;  %v5103_v18 = vrot.slane %v1177_v15, 9 }
  0xc3   : > { %v3604_v36 = vrot.slane %v3603_v3, 4  ;;  %v3618_v25 = vrot.slane %v3617_v1, 4  ;;  %v1293_v19 = vrot.slane %v6529_v62, 5  ;;  %v3668_v3 = vshll.u32 %v7411_v16, 16 }
  0xc4   : > { %6095 = vmatmul.mubr.msk.bf16.gmra.mrb[8].mxu0 %vm658_vm4, %v6473_v53  ;;  %v3651_v62 = vor.u32 %v3650_v60, %v7408_v29  ;;  %v3664_v15 = vrot.slane %v3662_v32, 5  ;;  %v6479_v60 = vld [vmem:[%s6625_s25 + $0x84] sm:$0xff]  }
  0xc5   : > { %5941 = vmatmul.mubr.msk.bf16.gmra.mrb[24].mxu1 %vm658_vm4, %v5074_v8  ;;  %6098 = vmatprep.mubr.msk.bf16.mxu0 %vm658_vm4, %v6475_v61  ;;  %v6527_v8 = vld [vmem:[%s6625_s25 + $0x74] sm:$0x1]  ;;  %v3640_v61 = vrot.slane %v3638_v2, 5  ;;  %v3659_v2 = vshrl.u32 %v5427_v40, 16  ;;  %v3672_v40 = vshrl.u32 %v7411_v16, 16  ;;  %v7459_v32 = vrot.slane %v3668_v3, 5 }
  0xc6   : > { %5944 = vmatprep.mubr.msk.bf16.mxu1 %vm658_vm4, %v5075_v56  ;;  %v1286_v53 = vrot.slane %v6527_v8, 5  ;;  %v3608_v56 = vrot.slane %v3606_v39, 5  ;;  %v3627_v8 = vor.u32 %v3626_v38, %v7378_v5  ;;  %v1292_v38 = vrot.slane %v1290_v23, 4 }
  0xc7   : > { %v3641_v31 = vor.u32 %v3640_v61, %v3637_v28  ;;  %v3661_v1 = vrot.slane %v3659_v2, 4  ;;  %v8419_v28 = vcombine.low %v7234_v21, %v7256_v4  ;;  %v3623_v21 = vsel %vm6651_vm5, %v3618_v25, %v7378_v5  ;;  %v6480_v5 = vld [vmem:[%s6625_s25 + $0x90] sm:$0xff]   ;;  %v6531_v25 = vld [vmem:[%s6625_s25 + $0x8c] sm:$0x1] }
  0xc8   : > { %v7415_v39 = vsel %vm6872_vm8, %v1285_v27, %v1286_v53  ;;  %v3628_v50 = vrot.slane %v3627_v8, 4  ;;  %v8418_v27 = vcombine.low %v7022_v57, %v7031_v30  ;;  %v6530_v53 = vld [vmem:[%s6625_s25 + $0x88] sm:$0xf]  ;;  %v3599_v57 = vsel %vm6651_vm5, %v3594_v17, %v7372_v48 }
  0xc9   : > { %v1297_v34 = vrot.slane %v6530_v53, 5  ;;  %v3609_v61 = vsel %vm6651_vm5, %v3604_v36, %v3608_v56  ;;  %v7450_v4 = vsel %vm6872_vm8, %v1292_v38, %v1293_v19  ;;  %v3642_v48 = vrot.slane %v3641_v31, 4  ;;  %v7453_v56 = vld [vmem:[%s6625_s25 + $0x44] sm:$0x1]  ;;  %v5430_v8 = vld [vmem:[%s6625_s25 + $0x48] sm:$0xf] }
  0xca   : > { %v5104_v17 = vrot.slane %v1178_v10, 9  ;;  %8420 = vst [vmem:[#allocation8_spill] sm:$0xff] %v7453_v56  ;;  %v3656_v2 = vrot.slane %v3654_v14, 5  ;;  %v3674_v36 = vrot.slane %v3672_v40, 4  ;;  %v1300_v38 = vrot.slane %v6531_v25, 5 }
  0xcb   : > { %v1299_v19 = vrot.slane %v1297_v34, 4  ;;  %v3665_v10 = vor.u32 %v3664_v15, %v3661_v1  ;;  %v7464_v31 = vld [vmem:[%s6625_s25 + $0x4c] sm:$0xf]  ;;  %v3678_v53 = vshll.u32 %v7453_v56, 16  ;;  %v3683_v14 = vshrl.u32 %v5430_v8, 16 }
  0xcc   : > { %6099 = vmatmul.mubr.msk.bf16.gmra.mrb[12].mxu0 %vm658_vm4, %v6477_v54  ;;  %v7479_v1 = vsel %vm6872_vm8, %v5104_v17, %v1297_v34  ;;  %v5433_v15 = vld [vmem:[%s6625_s25 + $0x54] sm:$0xf] }
  0xcd   : > { %5945 = vmatmul.mubr.msk.bf16.gmra.mrb[28].mxu1 %vm658_vm4, %v8418_v27  ;;  %6102 = vmatprep.mubr.msk.bf16.mxu0 %vm658_vm4, %v6478_v59  ;;  %v7443_v59 = vsel %vm6872_vm8, %v5103_v18, %v1290_v23  ;;  %v3633_v23 = vsel %vm6651_vm5, %v3628_v50, %v3632_v63  ;;  %v3652_v18 = vrot.slane %v3651_v62, 4  ;;  %v7466_v27 = vcombine.low %v3599_v57, %v3609_v61  ;;  %v1179_v63 = vld [vmem:[%s6625_s25 + $0x90] sm:$0xe]  ;;  %v6532_v57 = vld [vmem:[%s6625_s25 + $0x94] sm:$0xf] }
  0xce   : > { %5950 = vmatprep.mubr.msk.bf16.mxu1 %vm658_vm4, %v8419_v28  ;;  %v3686_v50 = vshll.u32 %v5430_v8, 16  ;;  %v7470_v3 = vcombine.low %v3623_v21, %v3633_v23  ;;  %v3647_v62 = vsel %vm6651_vm5, %v3642_v48, %v7408_v29  ;;  %v3675_v28 = vor.u32 %v3674_v36, %v7459_v32  ;;  %v7488_v23 = vld [vmem:[%s6625_s25 + $0x58] sm:$0xf] }
  0xcf   : > { %v1304_v61 = vrot.slane %v6532_v57, 5  ;;  %v3692_v21 = vshll.u32 %v7464_v31, 16  ;;  %v3696_v8 = vshrl.u32 %v7464_v31, 16  ;;  %v8421_v29 = vcombine.low %v7240_v0, %v7260_v13  ;;  %v6533_v36 = vld [vmem:[%s6625_s25 + $0x98] sm:$0x1] }
  0xd0   : > { %v3657_v34 = vsel %vm6651_vm5, %v3652_v18, %v3656_v2  ;;  %v7499_v48 = vsel %vm6872_vm8, %v1299_v19, %v1300_v38  ;;  %v7501_v17 = vrot.slane %v3665_v10, 4  ;;  %v8422_v0 = vcombine.low %v7264_v35, %v7272_v11  ;;  %v5436_v10 = vld [vmem:[%s6625_s25 + $0x60] sm:$0xf] }
  0xd1   : > { %v7508_v13 = vrot.slane %v3678_v53, 5  ;;  %v1307_v2 = vrot.slane %v6533_v36, 5  ;;  %v3688_v18 = vrot.slane %v3686_v50, 5  ;;  %v3707_v19 = vshrl.u32 %v5433_v15, 16  ;;  %v6481_v35 = vld [vmem:[%s6625_s25 + $0x9c] sm:$0xff]   ;;  %v6482_v50 = vld [vmem:[%s6625_s25 + $0xa8] sm:$0xff]  }
  0xd2   : > { %v3710_v25 = vshll.u32 %v5433_v15, 16  ;;  %v3716_v38 = vshll.u32 %v7488_v23, 16  ;;  %v7516_v11 = vrot.slane %v3675_v28, 4  ;;  %v1306_v53 = vrot.slane %v1304_v61, 4  ;;  %v7534_v28 = vld [vmem:[%s6625_s25 + $0x50] sm:$0x1] }
  0xd3   : > { %v7521_v57 = vcombine.low %v3647_v62, %v3657_v34  ;;  %v6534_v36 = vld [vmem:[%s6625_s25 + $0xa0] sm:$0xf]  ;;  %v7539_v34 = vld [vmem:[%s6625_s25 + $0x64] sm:$0xf]  ;;  %v3731_v15 = vshrl.u32 %v5436_v10, 16  ;;  %v3734_v40 = vshll.u32 %v5436_v10, 16 }
  0xd4   : > { %6103 = vmatmul.mubr.msk.bf16.gmra.mrb[16].mxu0 %vm658_vm4, %v6479_v60  ;;  %v5105_v60 = vrot.slane %v1179_v63, 9  ;;  %v7518_v63 = vrot.slane %v3692_v21, 5  ;;  %v1180_v21 = vld [vmem:[%s6625_s25 + $0x9c] sm:$0xe]  ;;  %v1311_v62 = vrot.slane %v6534_v36, 5  ;;  %8423 = vst [vmem:[#allocation9_spill] sm:$0xff] %v7539_v34 }
  0xd5   : > { %5951 = vmatmul.mubr.msk.bf16.vlgmr.msra.gmra.mrb[0].mxu1 %vm658_vm4, %v8421_v29  ;;  %6106 = vmatprep.mubr.msk.bf16.mxu0 %vm658_vm4, %v6480_v5  ;;  %v3685_v5 = vrot.slane %v3683_v14, 4  ;;  %v3698_v14 = vrot.slane %v3696_v8, 4  ;;  %v3709_v54 = vrot.slane %v3707_v19, 4  ;;  %v3712_v56 = vrot.slane %v3710_v25, 5  ;;  %v7555_v19 = vld [vmem:[%s6625_s25 + $0x5c] sm:$0x1] }
  0xd6   : > { %5983 = vmatpush3.bf16.msra.mxu1 %v7160_v33  ;;  %5954 = vmatprep.mubr.msk.bf16.mxu1 %vm658_vm4, %v8422_v0  ;;  %v3720_v33 = vshrl.u32 %v7488_v23, 16  ;;  %v7531_v0 = vsel %vm6872_vm8, %v5105_v60, %v1304_v61  ;;  %v7541_v16 = vrot.slane %v3716_v38, 5  ;;  %v3681_v61 = vsel %vm6651_vm5, %v7516_v11, %v7508_v13  ;;  %v1181_v13 = vld [vmem:[%s6625_s25 + $0xa8] sm:$0xe] }
  0xd7   : > { %6186 = vmatprep.subr.bf16.mxu1 %v6608_v7  ;;  %v3689_v8 = vor.u32 %v3688_v18, %v3685_v5  ;;  %v7550_v60 = vsel %vm6872_vm8, %v1306_v53, %v1307_v2  ;;  %v3699_v5 = vor.u32 %v3698_v14, %v7518_v63  ;;  %v3702_v18 = vshll.u32 %v7534_v28, 16  ;;  %v7578_v7 = vld [vmem:[%s6625_s25 + $0x68] sm:$0x1] }
  0xd8   : > { %v3722_v29 = vrot.slane %v3720_v33, 4  ;;  %v8424_v25 = vcombine.low %v7276_v52, %v7284_v44  ;;  %v5106_v38 = vrot.slane %v1180_v21, 9  ;;  %v1318_v2 = vrot.slane %v7007_v24, 5  ;;  %v6535_v44 = vld [vmem:[%s6625_s25 + $0xa4] sm:$0x1]  ;;  %8426 = vst [vmem:[#allocation10_spill] sm:$0xff] %v7578_v7 }
  0xd9   : > { %v3740_v33 = vshll.u32 %v7539_v34, 16  ;;  %v3744_v10 = vshrl.u32 %v7539_v34, 16  ;;  %v3690_v52 = vrot.slane %v3689_v8, 4  ;;  %v1314_v11 = vrot.slane %v6535_v44, 5 }
  0xda   : > { %v3733_v53 = vrot.slane %v3731_v15, 4  ;;  %v3736_v14 = vrot.slane %v3734_v40, 5  ;;  %v1313_v21 = vrot.slane %v1311_v62, 4  ;;  %v3713_v24 = vor.u32 %v3712_v56, %v3709_v54  ;;  %v6536_v40 = vld [vmem:[%s6625_s25 + $0xb0] sm:$0x1] }
  0xdb   : > { %v3723_v36 = vor.u32 %v3722_v29, %v7541_v16  ;;  %v3704_v8 = vrot.slane %v3702_v18, 5  ;;  %v1320_v15 = vrot.slane %v1318_v2, 4  ;;  %v1321_v44 = vrot.slane %v6536_v40, 5  ;;  %v1182_v56 = vld [vmem:[%s6625_s25 + $0xb4] sm:$0xe] }
  0xdc   : > { %6107 = vmatmul.mubr.msk.bf16.gmra.mrb[20].mxu0 %vm658_vm4, %v6481_v35  ;;  %v8425_v35 = vcombine.low %v7280_v51, %v7291_v42  ;;  %v3700_v42 = vrot.slane %v3699_v5, 4  ;;  %v7581_v47 = vrot.slane %v3740_v33, 5  ;;  %v3746_v54 = vrot.slane %v3744_v10, 4 }
  0xdd   : > { %5955 = vmatmul.mubr.msk.bf16.gmra.mrb[4].mxu1 %vm658_vm4, %v8424_v25  ;;  %6110 = vmatprep.mubr.msk.bf16.mxu0 %vm658_vm4, %v6482_v50  ;;  %v6483_v50 = vld [vmem:[%s6625_s25 + $0xb4] sm:$0xff]   ;;  %v3726_v25 = vshll.u32 %v7555_v19, 16  ;;  %v3695_v29 = vsel %vm6651_vm5, %v3690_v52, %v7518_v63  ;;  %v7589_v34 = vsel %vm6872_vm8, %v5106_v38, %v1311_v62  ;;  %v3737_v5 = vor.u32 %v3736_v14, %v3733_v53 }
  0xde   : > { %5958 = vmatprep.mubr.msk.bf16.mxu1 %vm658_vm4, %v8425_v35  ;;  %v5107_v35 = vrot.slane %v1181_v13, 9  ;;  %v1325_v18 = vrot.slane %v7031_v30, 5  ;;  %v5439_v13 = vld [vmem:[%s6625_s25 + $0x6c] sm:$0xf]  ;;  %v7595_v40 = vsel %vm6872_vm8, %v1313_v21, %v1314_v11  ;;  %v7597_v33 = vrot.slane %v3713_v24, 4 }
  0xdf   : > { %8427 = vst [vmem:[#allocation11_spill] sm:$0xff] %v7595_v40  ;;  %v7599_v10 = vrot.slane %v3723_v36, 4  ;;  %v7601_v51 = vrot.slane %v3726_v25, 5  ;;  %v3705_v63 = vsel %vm6651_vm5, %v3700_v42, %v3704_v8  ;;  %v3750_v62 = vshll.u32 %v7578_v7, 16  ;;  %v6485_v25 = vld [vmem:[%s6625_s25 + $0xcc] sm:$0xff]  }
  0xe0   : > { %v7608_v30 = vsel %vm6872_vm8, %v5107_v35, %v1318_v2  ;;  %v5108_v38 = vrot.slane %v1182_v56, 9  ;;  %v8429_v52 = vcombine.low %v7318_v6, %v7328_v12  ;;  %v7618_v11 = vsel %vm6872_vm8, %v1320_v15, %v1321_v44  ;;  %v7622_v2 = vld [vmem:[%s6625_s25 + $0x70] sm:$0xf]  ;;  %v7665_v44 = vld [vmem:[%s6625_s25 + $0x7c] sm:$0xf] }
  0xe1   : > { %8428 = vst [vmem:[#allocation12_spill] sm:$0xff] %v7608_v30  ;;  %8430 = vst [vmem:[#allocation13_spill] sm:$0xff] %v7618_v11  ;;  %v3747_v53 = vor.u32 %v3746_v54, %v7581_v47  ;;  %v3755_v14 = vshrl.u32 %v5439_v13, 16  ;;  %v8432_v21 = vcombine.low %v7322_v41, %v7332_v26  ;;  %v8433_v6 = vsel %vm6651_vm5, %v7501_v17, %v7459_v32  ;;  %v7652_v17 = vld [vmem:[%s6625_s25 + $0x74] sm:$0x1] }
  0xe2   : > { %8431 = vst [vmem:[#allocation14_spill] sm:$0xff] %v7622_v2  ;;  %v7633_v12 = vcombine.low %v8433_v6, %v3681_v61  ;;  %v1327_v24 = vrot.slane %v1325_v18, 4  ;;  %v1328_v36 = vrot.slane %v7037_v20, 5  ;;  %v7639_v42 = vcombine.low %v3695_v29, %v3705_v63  ;;  %8434 = vst [vmem:[#allocation15_spill] sm:$0xff] %v7652_v17  ;;  %v5442_v20 = vld [vmem:[%s6625_s25 + $0x78] sm:$0xf] }
  0xe3   : > { %v7657_v8 = vrot.slane %v3750_v62, 5  ;;  %v7661_v35 = vsel %vm6872_vm8, %v5108_v38, %v1325_v18  ;;  %v3764_v15 = vshll.u32 %v7622_v2, 16  ;;  %8435 = vst [vmem:[#allocation16_spill] sm:$0xff] %v7665_v44  ;;  %v5445_v54 = vld [vmem:[%s6625_s25 + $0x84] sm:$0xf]  ;;  %v7668_v56 = vrot.slane %v3747_v53, 4 }
  0xe4   : > { %6111 = vmatmul.mubr.msk.bf16.gmra.mrb[24].mxu0 %vm658_vm4, %v6483_v50  ;;  %v3758_v50 = vshll.u32 %v5439_v13, 16  ;;  %v7670_v29 = vrot.slane %v3755_v14, 4  ;;  %v3768_v13 = vshrl.u32 %v7622_v2, 16  ;;  %v7676_v63 = vld [vmem:[%s6625_s25 + $0x88] sm:$0xf]  ;;  %v7684_v62 = vsel %vm6872_vm8, %v1327_v24, %v1328_v36 }
  0xe5   : > { %5959 = vmatmul.mubr.msk.bf16.gmra.mrb[8].mxu1 %vm658_vm4, %v8429_v52  ;;  %6114 = vmatprep.mubr.msk.bf16.mxu0 %vm658_vm4, %v6484_v9  ;;  %v7635_v9 = vrot.slane %v3737_v5, 4  ;;  %8436 = vst [vmem:[#allocation17_spill] sm:$0xff] %v7676_v63  ;;  %v3779_v38 = vshrl.u32 %v5442_v20, 16  ;;  %v3782_v52 = vshll.u32 %v5442_v20, 16  ;;  %v5448_v53 = vld [vmem:[%s6625_s25 + $0x90] sm:$0xf]  ;;  %v8438_v18 = vcombine.low %v7357_v46, %v7361_v58 }
  0xe6   : > { %5962 = vmatprep.mubr.msk.bf16.mxu1 %vm658_vm4, %v8432_v21  ;;  %v7672_v5 = vrot.slane %v3758_v50, 5  ;;  %v7688_v14 = vld [vmem:[%s6625_s25 + $0x94] sm:$0xf]  ;;  %v3788_v50 = vshll.u32 %v7665_v44, 16  ;;  %v3792_v21 = vshrl.u32 %v7665_v44, 16  ;;  %v3803_v6 = vshrl.u32 %v5445_v54, 16 }
  0xe7   : > { %8437 = vst [vmem:[#allocation18_spill] sm:$0xff] %v7688_v14  ;;  %v3806_v61 = vshll.u32 %v5445_v54, 16  ;;  %v7693_v41 = vrot.slane %v3764_v15, 5  ;;  %v3774_v24 = vshll.u32 %v7652_v17, 16  ;;  %v3812_v36 = vshll.u32 %v7676_v63, 16 }
  0xe8   : > { %v3816_v20 = vshrl.u32 %v7676_v63, 16  ;;  %v3827_v54 = vshrl.u32 %v5448_v53, 16  ;;  %v3836_v15 = vshll.u32 %v7688_v14, 16  ;;  %v3840_v26 = vshrl.u32 %v7688_v14, 16  ;;  %v5451_v32 = vld [vmem:[%s6625_s25 + $0x9c] sm:$0xf] }
  0xe9   : > { %v8439_v44 = vcombine.low %v7365_v55, %v7370_v22  ;;  %v3770_v46 = vrot.slane %v3768_v13, 4  ;;  %v7718_v63 = vrot.slane %v3788_v50, 5  ;;  %v3794_v14 = vrot.slane %v3792_v21, 4  ;;  %v7721_v55 = vld [vmem:[%s6625_s25 + $0x8c] sm:$0x1] }
  0xea   : > { %v3805_v17 = vrot.slane %v3803_v6, 4  ;;  %v3808_v2 = vrot.slane %v3806_v61, 5  ;;  %v7723_v22 = vrot.slane %v3812_v36, 5  ;;  %v3851_v7 = vshrl.u32 %v5451_v32, 16  ;;  %v7726_v58 = vld [vmem:[%s6625_s25 + $0x98] sm:$0x1] }
  0xeb   : > { %v3854_v11 = vshll.u32 %v5451_v32, 16  ;;  %v3829_v13 = vrot.slane %v3827_v54, 4  ;;  %v3842_v50 = vrot.slane %v3840_v26, 4  ;;  %v3761_v21 = vor.u32 %v7672_v5, %v7670_v29 }
  0xec   : > { %6115 = vmatmul.mubr.msk.bf16.gmra.mrb[28].mxu0 %vm658_vm4, %v6485_v25  ;;  %v3830_v25 = vshll.u32 %v5448_v53, 16  ;;  %v7716_v53 = vld [vmem:[%s6625_s25 + $0x80] sm:$0x1]  ;;  %v3771_v61 = vor.u32 %v3770_v46, %v7693_v41  ;;  %v7733_v6 = vrot.slane %v3774_v24, 5  ;;  %v3795_v32 = vor.u32 %v3794_v14, %v7718_v63 }
  0xed   : > { %5963 = vmatmul.mubr.msk.bf16.gmra.mrb[12].mxu1 %vm658_vm4, %v8438_v18  ;;  %6120 = vmatprep.mubr.msk.bf16.mxu0 %vm658_vm4, %v7466_v27  ;;  %v3781_v27 = vrot.slane %v3779_v38, 4  ;;  %v3784_v18 = vrot.slane %v3782_v52, 5  ;;  %v7728_v52 = vrot.slane %v3836_v15, 5  ;;  %v3798_v36 = vshll.u32 %v7716_v53, 16 }
  0xee   : > { %5966 = vmatprep.mubr.msk.bf16.mxu1 %vm658_vm4, %v8439_v44  ;;  %v3818_v44 = vrot.slane %v3816_v20, 4  ;;  %v3832_v38 = vrot.slane %v3830_v25, 5  ;;  %v7737_v20 = vld [vmem:[%s6625_s25 + $0xa0] sm:$0xf]  ;;  %v3809_v40 = vor.u32 %v3808_v2, %v3805_v17  ;;  %v3822_v54 = vshll.u32 %v7721_v55, 16 }
  0xef   : > { %8440 = vst [vmem:[#allocation19_spill] sm:$0xff] %v7737_v20  ;;  %v3785_v30 = vor.u32 %v3784_v18, %v3781_v27  ;;  %v5454_v25 = vld [vmem:[%s6625_s25 + $0xa8] sm:$0xf]  ;;  %v3846_v29 = vshll.u32 %v7726_v58, 16  ;;  %v3853_v5 = vrot.slane %v3851_v7, 4  ;;  %v3856_v24 = vrot.slane %v3854_v11, 5 }
  0xf0   : > { %v3819_v26 = vor.u32 %v3818_v44, %v7723_v22  ;;  %v8441_v15 = vcombine.low %v7402_v43, %v7415_v39  ;;  %v3833_v2 = vor.u32 %v3832_v38, %v3829_v13  ;;  %v3843_v17 = vor.u32 %v3842_v50, %v7728_v52 }
  0xf1   : > { %v3860_v14 = vshll.u32 %v7737_v20, 16  ;;  %v8442_v46 = vcombine.low %v7443_v59, %v7450_v4  ;;  %v3762_v7 = vrot.slane %v3761_v21, 4  ;;  %v3772_v43 = vrot.slane %v3771_v61, 4  ;;  %v7766_v21 = vld [vmem:[%s6625_s25 + $0xac] sm:$0xf] }
  0xf2   : > { %v3878_v39 = vshll.u32 %v5454_v25, 16  ;;  %v3786_v11 = vrot.slane %v3785_v30, 4  ;;  %v3796_v27 = vrot.slane %v3795_v32, 4  ;;  %v3800_v18 = vrot.slane %v3798_v36, 5  ;;  %v7775_v61 = vld [vmem:[%s6625_s25 + $0xb0] sm:$0x1] }
  0xf3   : > { %v3810_v44 = vrot.slane %v3809_v40, 4  ;;  %v3820_v13 = vrot.slane %v3819_v26, 4  ;;  %v3824_v38 = vrot.slane %v3822_v54, 5  ;;  %v3848_v50 = vrot.slane %v3846_v29, 5 }
  0xf4   : > { %6121 = vmatmul.mubr.msk.bf16.vlgmr.msra.gmra.mrb[0].mxu0 %vm658_vm4, %v7470_v3  ;;  %v3864_v3 = vshrl.u32 %v7737_v20, 16  ;;  %v3857_v59 = vor.u32 %v3856_v24, %v3853_v5  ;;  %v3834_v4 = vrot.slane %v3833_v2, 4  ;;  %v7763_v20 = vrot.slane %v3860_v14, 5 }
  0xf5   : > { %5967 = vmatmul.mubr.msk.bf16.gmra.mrb[16].mxu1 %vm658_vm4, %v8441_v15  ;;  %6153 = vmatpush3.bf16.msra.mxu0 %v7244_v49  ;;  %v3875_v49 = vshrl.u32 %v5454_v25, 16  ;;  %v7761_v15 = vld [vmem:[%s6625_s25 + $0xa4] sm:$0x1]  ;;  %v3767_v30 = vsel %vm6651_vm5, %v3762_v7, %v7693_v41  ;;  %v3777_v40 = vsel %vm6651_vm5, %v3772_v43, %v7733_v6  ;;  %v3880_v32 = vrot.slane %v3878_v39, 5 }
  0xf6   : > { %5970 = vmatprep.mubr.msk.bf16.mxu1 %vm658_vm4, %v8442_v46  ;;  %6124 = vmatprep.mubr.msk.bf16.mxu0 %vm658_vm4, %v7521_v57  ;;  %v3844_v46 = vrot.slane %v3843_v17, 4  ;;  %v3866_v57 = vrot.slane %v3864_v3, 4  ;;  %v3791_v54 = vsel %vm6651_vm5, %v3786_v11, %v7718_v63  ;;  %v3801_v25 = vsel %vm6651_vm5, %v3796_v27, %v3800_v18  ;;  %v5457_v3 = vld [vmem:[%s6625_s25 + $0xb4] sm:$0xf] }
  0xf7   : > { %v3877_v36 = vrot.slane %v3875_v49, 4  ;;  %v3815_v26 = vsel %vm6651_vm5, %v3810_v44, %v7723_v22  ;;  %v3870_v41 = vshll.u32 %v7761_v15, 16  ;;  %v3825_v6 = vsel %vm6651_vm5, %v3820_v13, %v3824_v38  ;;  %v5504_v11 = vld [vmem:[%s6625_s25 + $0x54] sm:$0xe]  ;;  %v5505_v38 = vld [vmem:[%s6625_s25 + $0x60] sm:$0xe] }
  0xf8   : > { %v7790_v29 = vrot.slane %v3857_v59, 4  ;;  %v3884_v63 = vshll.u32 %v7766_v21, 16  ;;  %v3888_v5 = vshrl.u32 %v7766_v21, 16  ;;  %v8443_v24 = vcombine.low %v7479_v1, %v7499_v48 }
  0xf9   : > { %v3849_v22 = vsel %vm6651_vm5, %v3844_v46, %v3848_v50  ;;  %v3867_v2 = vor.u32 %v3866_v57, %v7763_v20  ;;  %v3894_v17 = vshll.u32 %v7775_v61, 16  ;;  %v8444_v1 = vcombine.low %v7531_v0, %v7550_v60 }
  0xfa   : > { %v8445_v48 = vsel %vm6651_vm5, %v7599_v10, %v7601_v51  ;;  %v8447_v14 = vsel %vm6651_vm5, %v7668_v56, %v7657_v8  ;;  %v8448_v0 = vsel %vm6651_vm5, %v7635_v9, %v7581_v47  ;;  %v5125_v51 = vcombine.low %v7661_v35, %v7684_v62  ;;  %v7844_v56 = vld [vmem:[%s6625_s25 + $0xb8] sm:$0xf] }
  0xfb   : > { %v5473_v60 = vcombine.low %v8448_v0, %v8447_v14  ;;  %v3881_v10 = vor.u32 %v3880_v32, %v3877_v36  ;;  %v7837_v7 = vcombine.low %v3791_v54, %v3801_v25  ;;  %v7839_v43 = vcombine.low %v3815_v26, %v3825_v6  ;;  %v5506_v32 = vld [vmem:[%s6625_s25 + $0x6c] sm:$0xe] }
  0xfc   : > { %6125 = vmatmul.mubr.msk.bf16.gmra.mrb[4].mxu0 %vm658_vm4, %v7633_v12  ;;  %v3839_v12 = vsel %vm6651_vm5, %v3834_v4, %v7728_v52  ;;  %v7841_v8 = vrot.slane %v3870_v41, 5  ;;  %v3863_v47 = vsel %vm6651_vm5, %v7790_v29, %v7763_v20  ;;  %v7852_v9 = vrot.slane %v3884_v63, 5  ;;  %v8451_v63 = vld [vmem:[#allocation9_spill] sm:$0xff]  ;;  %v5463_v29 = vld [vmem:[%s6625_s25 + $0xcc] sm:$0xf] }
  0xfd   : > { %5971 = vmatmul.mubr.msk.bf16.gmra.mrb[20].mxu1 %vm658_vm4, %v8443_v24  ;;  %6128 = vmatprep.mubr.msk.bf16.mxu0 %vm658_vm4, %v7639_v42  ;;  %v8446_v42 = vsel %vm6651_vm5, %v7597_v33, %v7541_v16  ;;  %v5503_v16 = vld [vmem:[%s6625_s25 + $0x48] sm:$0xe]  ;;  %v7835_v33 = vcombine.low %v3767_v30, %v3777_v40  ;;  %v7846_v49 = vcombine.low %v3839_v12, %v3849_v22  ;;  %v3890_v39 = vrot.slane %v3888_v5, 4  ;;  %v8452_v24 = vld [vmem:[#allocation12_spill] sm:$0xff]  ;;  %v8453_v12 = vld [vmem:[#allocation13_spill] sm:$0xff] }
  0xfe   : > { %5974 = vmatprep.mubr.msk.bf16.mxu1 %vm658_vm4, %v8444_v1  ;;  %v5472_v52 = vcombine.low %v8446_v42, %v8445_v48  ;;  %v7855_v27 = vrot.slane %v3867_v2, 4  ;;  %v7857_v18 = vrot.slane %v3894_v17, 5  ;;  %v3899_v44 = vshrl.u32 %v5457_v3, 16  ;;  %v8455_v2 = vld [vmem:[#allocation10_spill] sm:$0xff] }
  0xff   : > { %v5519_v13 = vrot.slane %v5503_v16, 9  ;;  %v7860_v50 = vrot.slane %v3881_v10, 4  ;;  %v3902_v59 = vshll.u32 %v5457_v3, 16  ;;  %v3908_v4 = vshll.u32 %v7844_v56, 16  ;;  %v8456_v48 = vld [vmem:[#allocation14_spill] sm:$0xff] }
 0x100   : > { %v4358_v46 = vrot.slane %v7464_v31, 5  ;;  %v4361_v57 = vrot.slane %v7534_v28, 5  ;;  %v5520_v30 = vrot.slane %v5504_v11, 9  ;;  %v4365_v40 = vrot.slane %v7488_v23, 5  ;;  %v8449_v31 = vld [vmem:[#allocation11_spill] sm:$0xff] }
 0x101   : > { %v4368_v36 = vrot.slane %v7555_v19, 5  ;;  %v3891_v54 = vor.u32 %v3890_v39, %v7852_v9  ;;  %v5521_v41 = vrot.slane %v5505_v38, 9  ;;  %v8450_v28 = vcombine.low %v7589_v34, %v8449_v31  ;;  %v7907_v3 = vld [vmem:[%s6625_s25 + $0xbc] sm:$0x1] }
 0x102   : > { %v7872_v25 = vsel %vm6872_vm8, %v5519_v13, %v4358_v46  ;;  %v4360_v26 = vrot.slane %v4358_v46, 4  ;;  %v3912_v23 = vshrl.u32 %v7844_v56, 16  ;;  %v7882_v19 = vsel %vm6872_vm8, %v5520_v30, %v4365_v40  ;;  %v8457_v13 = vld [vmem:[#allocation15_spill] sm:$0xff] }
 0x103   : > { %v4367_v6 = vrot.slane %v4365_v40, 4  ;;  %v4372_v5 = vrot.slane %v8451_v63, 5  ;;  %v8454_v22 = vcombine.low %v8452_v24, %v8453_v12  ;;  %v4375_v17 = vrot.slane %v8455_v2, 5  ;;  %v7925_v40 = vld [vmem:[%s6625_s25 + $0xc4] sm:$0xf]  ;;  %v8458_v12 = vld [vmem:[#allocation16_spill] sm:$0xff] }
 0x104   : > { %6129 = vmatmul.mubr.msk.bf16.gmra.mrb[8].mxu0 %vm658_vm4, %v5472_v52  ;;  %v7891_v34 = vsel %vm6872_vm8, %v4360_v26, %v4361_v57  ;;  %v5522_v1 = vrot.slane %v5506_v32, 9  ;;  %v4379_v42 = vrot.slane %v8456_v48, 5  ;;  %v5460_v52 = vld [vmem:[%s6625_s25 + $0xc0] sm:$0xf]  ;;  %v4382_v38 = vrot.slane %v8457_v13, 5  ;;  %v6486_v26 = vld [vmem:[%s6625_s25 + $0xc] sm:$0xff]  }
 0x105   : > { %5975 = vmatmul.mubr.msk.bf16.gmra.mrb[24].mxu1 %vm658_vm4, %v8450_v28  ;;  %6132 = vmatprep.mubr.msk.bf16.mxu0 %vm658_vm4, %v5473_v60  ;;  %v5536_v14 = vcombine.low %v7872_v25, %v7891_v34  ;;  %v7900_v0 = vsel %vm6872_vm8, %v4367_v6, %v4368_v36  ;;  %v7904_v60 = vsel %vm6872_vm8, %v5521_v41, %v4372_v5  ;;  %v4374_v10 = vrot.slane %v4372_v5, 4  ;;  %v5507_v32 = vld [vmem:[%s6625_s25 + $0x78] sm:$0xe]  ;;  %v5508_v2 = vld [vmem:[%s6625_s25 + $0x84] sm:$0xe] }
 0x106   : > { %5978 = vmatprep.mubr.msk.bf16.mxu1 %vm658_vm4, %v8454_v22  ;;  %v5537_v16 = vcombine.low %v7882_v19, %v7900_v0  ;;  %v7913_v39 = vsel %vm6872_vm8, %v5522_v1, %v4379_v42  ;;  %v4381_v11 = vrot.slane %v4379_v42, 4  ;;  %v3873_v46 = vsel %vm6651_vm5, %v7855_v27, %v7841_v8  ;;  %v5234_v27 = vld [vmem:[%s6625_s25 + $0x78] sm:$0xf]  ;;  %v6547_v0 = vld [vmem:[%s6625_s25 + $0xa0] sm:$0xf] }
 0x107   : > { %v7920_v57 = vrot.slane %v3899_v44, 4  ;;  %v7922_v30 = vrot.slane %v3902_v59, 5  ;;  %v7929_v36 = vsel %vm6872_vm8, %v4374_v10, %v4375_v17  ;;  %v7933_v41 = vrot.slane %v3908_v4, 5  ;;  %v8460_v48 = vld [vmem:[#allocation5_spill] sm:$0xff] }
 0x108   : > { %v3923_v31 = vshrl.u32 %v5460_v52, 16  ;;  %v5538_v28 = vcombine.low %v7904_v60, %v7929_v36  ;;  %v7939_v8 = vsel %vm6872_vm8, %v4381_v11, %v4382_v38  ;;  %v7942_v44 = vrot.slane %v3891_v54, 4  ;;  %v8461_v38 = vld [vmem:[#allocation17_spill] sm:$0xff] }
 0x109   : > { %v3918_v59 = vshll.u32 %v7907_v3, 16  ;;  %v3926_v6 = vshll.u32 %v5460_v52, 16  ;;  %v5539_v63 = vcombine.low %v7913_v39, %v7939_v8  ;;  %v7949_v4 = vrot.slane %v3912_v23, 4  ;;  %v6550_v8 = vld [vmem:[%s6625_s25 + $0xac] sm:$0xf] }
 0x10a   : > { %v3932_v5 = vshll.u32 %v7925_v40, 16  ;;  %v5523_v24 = vrot.slane %v5507_v32, 9  ;;  %v4386_v22 = vrot.slane %v8458_v12, 5  ;;  %v3936_v54 = vshrl.u32 %v7925_v40, 16 }
 0x10b   : > { %v2248_v23 = vshrl.u32 %v5234_v27, 16  ;;  %v2251_v17 = vshll.u32 %v5234_v27, 16  ;;  %v3925_v1 = vrot.slane %v3923_v31, 4  ;;  %v5524_v10 = vrot.slane %v5508_v2, 9  ;;  %v6487_v31 = vld [vmem:[%s6625_s25 + $0x18] sm:$0xff]  }
 0x10c   : > { %6133 = vmatmul.mubr.msk.bf16.gmra.mrb[12].mxu0 %vm658_vm4, %v7835_v33  ;;  %v4389_v33 = vrot.slane %v7716_v53, 5  ;;  %v7965_v35 = vsel %vm6872_vm8, %v5523_v24, %v4386_v22  ;;  %v4388_v62 = vrot.slane %v4386_v22, 4  ;;  %v3928_v53 = vrot.slane %v3926_v6, 5  ;;  %v6488_v24 = vld [vmem:[%s6625_s25 + $0x24] sm:$0xff]  }
 0x10d   : > { %5979 = vmatmul.mubr.msk.bf16.gmra.mrb[28].mxu1 %vm658_vm4, %v5125_v51  ;;  %6136 = vmatprep.mubr.msk.bf16.mxu0 %vm658_vm4, %v7837_v7  ;;  %v8459_v51 = vld [vmem:[#allocation4_spill] sm:$0xff]  ;;  %v2250_v42 = vrot.slane %v2248_v23, 4  ;;  %v2253_v52 = vrot.slane %v2251_v17, 5  ;;  %v5478_v11 = vcombine.low %v3863_v47, %v3873_v46  ;;  %v4393_v32 = vrot.slane %v8461_v38, 5  ;;  %v8464_v38 = vld [vmem:[#allocation18_spill] sm:$0xff] }
 0x10e   : > { %5984 = vmatprep.mubr.msk.bf16.mxu1 %vm658_vm4, %v6486_v26  ;;  %v2270_v7 = vsel %vm6651_vm5, %v8460_v48, %v8459_v51  ;;  %v7978_v13 = vsel %vm6872_vm8, %v4388_v62, %v4389_v33  ;;  %v4396_v26 = vrot.slane %v7721_v55, 5  ;;  %v3887_v27 = vsel %vm6651_vm5, %v7860_v50, %v7852_v9  ;;  %v7991_v47 = vld [vmem:[%s6625_s25 + $0xd0] sm:$0xf]  ;;  %v8463_v51 = vld [vmem:[#allocation2_spill] sm:$0xff] }
 0x10f   : > { %v3905_v20 = vor.u32 %v7922_v30, %v7920_v57  ;;  %v5540_v46 = vcombine.low %v7965_v35, %v7978_v13  ;;  %v2254_v6 = vor.u32 %v2253_v52, %v2250_v42  ;;  %v7996_v12 = vrot.slane %v3932_v5, 5  ;;  %v5509_v9 = vld [vmem:[%s6625_s25 + $0x90] sm:$0xe]  ;;  %v8010_v30 = vld [vmem:[%s6625_s25 + $0xc8] sm:$0x1] }
 0x110   : > { %v3938_v55 = vrot.slane %v3936_v54, 4  ;;  %v8000_v22 = vsel %vm6872_vm8, %v5524_v10, %v4393_v32  ;;  %v4395_v2 = vrot.slane %v4393_v32, 4  ;;  %v3897_v50 = vsel %vm6651_vm5, %v7942_v44, %v7857_v18  ;;  %v8462_v44 = vld [vmem:[#allocation3_spill] sm:$0xff] }
 0x111   : > { %v3915_v57 = vor.u32 %v7949_v4, %v7933_v41  ;;  %v3929_v33 = vor.u32 %v3928_v53, %v3925_v1  ;;  %v2255_v5 = vrot.slane %v2254_v6, 4  ;;  %v3947_v54 = vshrl.u32 %v5463_v29, 16 }
 0x112   : > { %v3950_v23 = vshll.u32 %v5463_v29, 16  ;;  %v3956_v17 = vshll.u32 %v7991_v47, 16  ;;  %v8017_v62 = vsel %vm6872_vm8, %v4395_v2, %v4396_v26  ;;  %v3960_v18 = vshrl.u32 %v7991_v47, 16 }
 0x113   : > { %v2260_v4 = vsel %vm6651_vm5, %v2255_v5, %v8462_v44  ;;  %v5525_v1 = vrot.slane %v5509_v9, 9  ;;  %v3920_v48 = vrot.slane %v3918_v59, 5  ;;  %v3942_v53 = vshll.u32 %v8010_v30, 16  ;;  %v5510_v9 = vld [vmem:[%s6625_s25 + $0x9c] sm:$0xe]  ;;  %v8465_v44 = vld [vmem:[#allocation19_spill] sm:$0xff] }
 0x114   : > { %6137 = vmatmul.mubr.msk.bf16.gmra.mrb[16].mxu0 %vm658_vm4, %v7839_v43  ;;  %v5541_v43 = vcombine.low %v8000_v22, %v8017_v62  ;;  %v8032_v42 = vcombine.low %v2260_v4, %v2270_v7  ;;  %v5479_v52 = vcombine.low %v3887_v27, %v3897_v50  ;;  %v3906_v10 = vrot.slane %v3905_v20, 4  ;;  %v8039_v59 = vld [vmem:[%s6625_s25 + $0xd4] sm:$0x1]  ;;  %v6490_v20 = vld [vmem:[%s6625_s25 + $0x3c] sm:$0xff]  }
 0x115   : > { %5985 = vmatmul.mubr.msk.bf16.vlgmr.msra.gmra.mrb[0].mxu1 %vm658_vm4, %v6487_v31  ;;  %6140 = vmatprep.mubr.msk.bf16.mxu0 %vm658_vm4, %v7846_v49  ;;  %v3939_v49 = vor.u32 %v3938_v55, %v7996_v12  ;;  %v4400_v32 = vrot.slane %v8464_v38, 5  ;;  %v4403_v26 = vrot.slane %v7726_v58, 5  ;;  %v3916_v31 = vrot.slane %v3915_v57, 4  ;;  %v5511_v38 = vld [vmem:[%s6625_s25 + $0xa8] sm:$0xe] }
 0x116   : > { %6187 = vmatpush3.bf16.msra.mxu1 %v8463_v51  ;;  %5988 = vmatprep.mubr.msk.bf16.mxu1 %vm658_vm4, %v6488_v24  ;;  %v3930_v29 = vrot.slane %v3929_v33, 4  ;;  %v3949_v6 = vrot.slane %v3947_v54, 4  ;;  %v3952_v2 = vrot.slane %v3950_v23, 5  ;;  %v6489_v24 = vld [vmem:[%s6625_s25 + $0x30] sm:$0xff]   ;;  %v8041_v55 = vrot.slane %v3956_v17, 5 }
 0x117   : > { %v3962_v5 = vrot.slane %v3960_v18, 4  ;;  %v8045_v7 = vsel %vm6872_vm8, %v5525_v1, %v4400_v32  ;;  %v4402_v27 = vrot.slane %v4400_v32, 4  ;;  %v3940_v50 = vrot.slane %v3939_v49, 4  ;;  %v5499_v51 = vld [vmem:[%s6625_s25 + $0x18] sm:$0xe] }
 0x118   : > { %v3944_v58 = vrot.slane %v3942_v53, 5  ;;  %v3911_v57 = vsel %vm6651_vm5, %v3906_v10, %v7933_v41  ;;  %v5526_v54 = vrot.slane %v5510_v9, 9  ;;  %v3921_v23 = vsel %vm6651_vm5, %v3916_v31, %v3920_v48  ;;  %v6537_v53 = vld [vmem:[%s6625_s25 + $0x1c] sm:$0xf] }
 0x119   : > { %v8053_v33 = vsel %vm6872_vm8, %v4402_v27, %v4403_v26  ;;  %v3966_v17 = vshll.u32 %v8039_v59, 16  ;;  %v4407_v4 = vrot.slane %v8465_v44, 5  ;;  %v3935_v41 = vsel %vm6651_vm5, %v3930_v29, %v7996_v12  ;;  %v6491_v29 = vld [vmem:[%s6625_s25 + $0x48] sm:$0xff]  }
 0x11a   : > { %v5542_v18 = vcombine.low %v8045_v7, %v8053_v33  ;;  %v3963_v1 = vor.u32 %v3962_v5, %v8041_v55  ;;  %v4410_v48 = vrot.slane %v7761_v15, 5  ;;  %v3945_v49 = vsel %vm6651_vm5, %v3940_v50, %v3944_v58  ;;  %v6492_v5 = vld [vmem:[%s6625_s25 + $0x54] sm:$0xff]  }
 0x11b   : > { %v8076_v10 = vsel %vm6872_vm8, %v5526_v54, %v4407_v4  ;;  %v4409_v12 = vrot.slane %v4407_v4, 4  ;;  %v5480_v32 = vcombine.low %v3911_v57, %v3921_v23  ;;  %v3968_v26 = vrot.slane %v3966_v17, 5  ;;  %v5500_v23 = vld [vmem:[%s6625_s25 + $0x24] sm:$0xe]  ;;  %v6539_v4 = vld [vmem:[%s6625_s25 + $0x28] sm:$0xf] }
 0x11c   : > { %6141 = vmatmul.mubr.msk.bf16.gmra.mrb[20].mxu0 %vm658_vm4, %v5478_v11  ;;  %v3953_v11 = vor.u32 %v3952_v2, %v3949_v6  ;;  %v5515_v31 = vrot.slane %v5499_v51, 9  ;;  %v5481_v6 = vcombine.low %v3935_v41, %v3945_v49  ;;  %v3964_v9 = vrot.slane %v3963_v1, 4  ;;  %v6540_v49 = vld [vmem:[%s6625_s25 + $0x34] sm:$0xf] }
 0x11d   : > { %5989 = vmatmul.mubr.msk.bf16.gmra.mrb[4].mxu1 %vm658_vm4, %v6489_v24  ;;  %6144 = vmatprep.mubr.msk.bf16.mxu0 %vm658_vm4, %v5479_v52  ;;  %v4330_v52 = vrot.slane %v6537_v53, 5  ;;  %v8081_v15 = vsel %vm6872_vm8, %v4409_v12, %v4410_v48  ;;  %v5527_v58 = vrot.slane %v5511_v38, 9  ;;  %v4414_v57 = vrot.slane %v7766_v21, 5  ;;  %v5501_v48 = vld [vmem:[%s6625_s25 + $0x30] sm:$0xe] }
 0x11e   : > { %5992 = vmatprep.mubr.msk.bf16.mxu1 %vm658_vm4, %v6490_v20  ;;  %v3954_v2 = vrot.slane %v3953_v11, 4  ;;  %v5543_v24 = vcombine.low %v8076_v10, %v8081_v15  ;;  %v6538_v20 = vld [vmem:[%s6625_s25 + $0x20] sm:$0x1]  ;;  %v4417_v54 = vrot.slane %v7775_v61, 5  ;;  %v3969_v61 = vsel %vm6651_vm5, %v3964_v9, %v3968_v26  ;;  %v5512_v11 = vld [vmem:[%s6625_s25 + $0xb4] sm:$0xe] }
 0x11f   : > { %v4332_v27 = vrot.slane %v4330_v52, 4  ;;  %v4333_v50 = vrot.slane %v6538_v20, 5  ;;  %v8094_v17 = vsel %vm6872_vm8, %v5527_v58, %v4414_v57  ;;  %v4416_v44 = vrot.slane %v4414_v57, 4  ;;  %v6541_v26 = vld [vmem:[%s6625_s25 + $0x2c] sm:$0x1]  ;;  %v8466_v58 = vld [vmem:[#allocation6_spill] sm:$0xff] }
 0x120   : > { %v3959_v21 = vsel %vm6651_vm5, %v3954_v2, %v8041_v55  ;;  %v4337_v41 = vrot.slane %v6539_v4, 5  ;;  %v4331_v1 = vsel %vm6872_vm8, %v5515_v31, %v4330_v52  ;;  %v4344_v53 = vrot.slane %v6540_v49, 5  ;;  %v6494_v20 = vld [vmem:[%s6625_s25 + $0x6c] sm:$0xff]   ;;  %v6555_v10 = vld [vmem:[%s6625_s25 + $0xc8] sm:$0x1] }
 0x121   : > { %v4334_v51 = vsel %vm6872_vm8, %v4332_v27, %v4333_v50  ;;  %v8114_v55 = vsel %vm6872_vm8, %v4416_v44, %v4417_v54  ;;  %v5516_v12 = vrot.slane %v5500_v23, 9  ;;  %v5528_v52 = vrot.slane %v5512_v11, 9  ;;  %v5513_v44 = vld [vmem:[%s6625_s25 + $0xc0] sm:$0xe]  ;;  %v5502_v11 = vld [vmem:[%s6625_s25 + $0x3c] sm:$0xe] }
 0x122   : > { %v5544_v38 = vcombine.low %v8094_v17, %v8114_v55  ;;  %v4421_v31 = vrot.slane %v7844_v56, 5  ;;  %v5532_v2 = vcombine.low %v4331_v1, %v4334_v51  ;;  %v4339_v9 = vrot.slane %v4337_v41, 4  ;;  %v8467_v56 = vld [vmem:[#allocation7_spill] sm:$0xff] }
 0x123   : > { %v4424_v27 = vrot.slane %v7907_v3, 5  ;;  %v4346_v50 = vrot.slane %v4344_v53, 4  ;;  %v4347_v57 = vrot.slane %v8466_v58, 5  ;;  %v4338_v3 = vsel %vm6872_vm8, %v5516_v12, %v4337_v41 }
 0x124   : > { %6145 = vmatmul.mubr.msk.bf16.gmra.mrb[24].mxu0 %vm658_vm4, %v5480_v32  ;;  %v5482_v32 = vcombine.low %v3959_v21, %v3969_v61  ;;  %v8126_v54 = vsel %vm6872_vm8, %v5528_v52, %v4421_v31  ;;  %v4423_v23 = vrot.slane %v4421_v31, 4  ;;  %v4351_v21 = vrot.slane %v8467_v56, 5  ;;  %v8468_v31 = vld [vmem:[#allocation8_spill] sm:$0xff] }
 0x125   : > { %5993 = vmatmul.mubr.msk.bf16.gmra.mrb[8].mxu1 %vm658_vm4, %v6491_v29  ;;  %6148 = vmatprep.mubr.msk.bf16.mxu0 %vm658_vm4, %v5481_v6  ;;  %v4340_v29 = vrot.slane %v6541_v26, 5  ;;  %v6493_v6 = vld [vmem:[%s6625_s25 + $0x60] sm:$0xff]   ;;  %v5529_v49 = vrot.slane %v5513_v44, 9  ;;  %v4428_v41 = vrot.slane %v7925_v40, 5  ;;  %v4431_v12 = vrot.slane %v8010_v30, 5 }
 0x126   : > { %5996 = vmatprep.mubr.msk.bf16.mxu1 %vm658_vm4, %v6492_v5  ;;  %v5517_v5 = vrot.slane %v5501_v48, 9  ;;  %v8133_v61 = vsel %vm6872_vm8, %v4423_v23, %v4424_v27  ;;  %v4348_v48 = vsel %vm6872_vm8, %v4346_v50, %v4347_v57  ;;  %v4353_v52 = vrot.slane %v4351_v21, 4  ;;  %v6542_v56 = vld [vmem:[%s6625_s25 + $0x70] sm:$0xf] }
 0x127   : > { %v4341_v4 = vsel %vm6872_vm8, %v4339_v9, %v4340_v29  ;;  %v5545_v1 = vcombine.low %v8126_v54, %v8133_v61  ;;  %v5518_v29 = vrot.slane %v5502_v11, 9  ;;  %v6495_v9 = vld [vmem:[%s6625_s25 + $0x78] sm:$0xff]   ;;  %v4435_v11 = vrot.slane %v7991_v47, 5 }
 0x128   : > { %v4345_v51 = vsel %vm6872_vm8, %v5517_v5, %v4344_v53  ;;  %v5533_v26 = vcombine.low %v4338_v3, %v4341_v4  ;;  %v8157_v53 = vsel %vm6872_vm8, %v5529_v49, %v4428_v41  ;;  %v4430_v5 = vrot.slane %v4428_v41, 4 }
 0x129   : > { %v5534_v27 = vcombine.low %v4345_v51, %v4348_v48  ;;  %v4352_v57 = vsel %vm6872_vm8, %v5518_v29, %v4351_v21  ;;  %v2233_v3 = vshll.u32 %v6542_v56, 16  ;;  %v2237_v4 = vshrl.u32 %v6542_v56, 16 }
 0x12a   : > { %v8162_v40 = vsel %vm6872_vm8, %v4430_v5, %v4431_v12  ;;  %v4438_v21 = vrot.slane %v8039_v59, 5  ;;  %v6497_v12 = vld [vmem:[%s6625_s25 + $0x90] sm:$0xff]   ;;  %v6498_v59 = vld [vmem:[%s6625_s25 + $0x9c] sm:$0xff]   ;;  %v2411_v15 = vshll.u32 %v6555_v10, 16 }
 0x12b   : > { %v5546_v44 = vcombine.low %v8157_v53, %v8162_v40  ;;  %v2239_v29 = vrot.slane %v2237_v4, 4  ;;  %v6500_v4 = vld [vmem:[%s6625_s25 + $0xb4] sm:$0xff]  }
 0x12c   : > { %6149 = vmatmul.mubr.msk.bf16.gmra.mrb[28].mxu0 %vm658_vm4, %v5482_v32  ;;  %v5231_v32 = vld [vmem:[%s6625_s25 + $0x6c] sm:$0xf] }
 0x12d   : > { %5997 = vmatmul.mubr.msk.bf16.gmra.mrb[12].mxu1 %vm658_vm4, %v6493_v6  ;;  %6154 = vmatprep.mubr.msk.bf16.mxu0 %vm658_vm4, %v5532_v2  ;;  %v4354_v6 = vrot.slane %v8468_v31, 5  ;;  %v5514_v2 = vld [vmem:[%s6625_s25 + $0xcc] sm:$0xe]  ;;  %v2224_v50 = vshrl.u32 %v5231_v32, 16  ;;  %v2227_v58 = vshll.u32 %v5231_v32, 16  ;;  %v4437_v32 = vrot.slane %v4435_v11, 4 }
 0x12e   : > { %6000 = vmatprep.mubr.msk.bf16.mxu1 %vm658_vm4, %v6494_v20  ;;  %v6496_v20 = vld [vmem:[%s6625_s25 + $0x84] sm:$0xff]   ;;  %v5530_v30 = vrot.slane %v5514_v2, 9  ;;  %v6543_v2 = vld [vmem:[%s6625_s25 + $0x74] sm:$0x1] }
 0x12f   : > { %v4355_v23 = vsel %vm6872_vm8, %v4353_v52, %v4354_v6  ;;  %v2226_v51 = vrot.slane %v2224_v50, 4  ;;  %v2229_v48 = vrot.slane %v2227_v58, 5  ;;  %v8184_v47 = vsel %vm6872_vm8, %v4437_v32, %v4438_v21  ;;  %v5237_v52 = vld [vmem:[%s6625_s25 + $0x84] sm:$0xf] }
 0x130   : > { %v8179_v49 = vsel %vm6872_vm8, %v5530_v30, %v4435_v11  ;;  %v5535_v41 = vcombine.low %v4352_v57, %v4355_v23  ;;  %v2275_v5 = vshll.u32 %v5237_v52, 16  ;;  %v5240_v57 = vld [vmem:[%s6625_s25 + $0x90] sm:$0xf]  ;;  %v6499_v23 = vld [vmem:[%s6625_s25 + $0xa8] sm:$0xff]  }
 0x131   : > { %v5547_v31 = vcombine.low %v8179_v49, %v8184_v47  ;;  %v2230_v6 = vor.u32 %v2229_v48, %v2226_v51  ;;  %v2296_v51 = vshrl.u32 %v5240_v57, 16  ;;  %v2299_v48 = vshll.u32 %v5240_v57, 16 }
 0x133   : > { %v2231_v30 = vrot.slane %v2230_v6, 4  ;;  %v6546_v6 = vld [vmem:[%s6625_s25 + $0x8c] sm:$0x1]  ;;  %v2301_v60 = vrot.slane %v2299_v48, 5  ;;  %v6549_v48 = vld [vmem:[%s6625_s25 + $0xa4] sm:$0x1] }
 0x134   : > { %6155 = vmatmul.mubr.msk.bf16.vlgmr.msra.gmra.mrb[0].mxu0 %vm658_vm4, %v5533_v26  ;;  %v2235_v26 = vrot.slane %v2233_v3, 5  ;;  %v5243_v3 = vld [vmem:[%s6625_s25 + $0x9c] sm:$0xf]  ;;  %v2291_v19 = vshll.u32 %v6546_v6, 16 }
 0x135   : > { %6001 = vmatmul.mubr.msk.bf16.gmra.mrb[16].mxu1 %vm658_vm4, %v6495_v9  ;;  %6158 = vmatprep.mubr.msk.bf16.mxu0 %vm658_vm4, %v5534_v27  ;;  %v2243_v9 = vshll.u32 %v6543_v2, 16  ;;  %v2272_v27 = vshrl.u32 %v5237_v52, 16  ;;  %v2323_v52 = vshll.u32 %v5243_v3, 16 }
 0x136   : > { %6004 = vmatprep.mubr.msk.bf16.mxu1 %vm658_vm4, %v6496_v20  ;;  %v2240_v45 = vor.u32 %v2239_v29, %v2235_v26  ;;  %v6544_v20 = vld [vmem:[%s6625_s25 + $0x88] sm:$0xf]  ;;  %v2236_v32 = vsel %vm6651_vm5, %v2231_v30, %v2235_v26  ;;  %v2293_v30 = vrot.slane %v2291_v19, 5 }
 0x137   : > { %v2281_v50 = vshll.u32 %v6544_v20, 16  ;;  %v2285_v58 = vshrl.u32 %v6544_v20, 16  ;;  %v2245_v25 = vrot.slane %v2243_v9, 5  ;;  %v2274_v34 = vrot.slane %v2272_v27, 4 }
 0x138   : > { %v2241_v56 = vrot.slane %v2240_v45, 4  ;;  %v2333_v45 = vshrl.u32 %v6547_v0, 16  ;;  %v2298_v27 = vrot.slane %v2296_v51, 4  ;;  %v2325_v20 = vrot.slane %v2323_v52, 5 }
 0x139   : > { %v8203_v11 = vrot.slane %v2281_v50, 5  ;;  %v2287_v21 = vrot.slane %v2285_v58, 4  ;;  %v6501_v50 = vld [vmem:[%s6625_s25 + $0xc0] sm:$0xff]  }
 0x13a   : > { %v2246_v26 = vsel %vm6651_vm5, %v2241_v56, %v2245_v25  ;;  %v5246_v56 = vld [vmem:[%s6625_s25 + $0xa8] sm:$0xf] }
 0x13b   : > { %v2288_v9 = vor.u32 %v2287_v21, %v8203_v11  ;;  %v5264_v58 = vcombine.low %v2236_v32, %v2246_v26  ;;  %v2339_v32 = vshll.u32 %v6549_v48, 16  ;;  %v2347_v39 = vshll.u32 %v5246_v56, 16 }
 0x13c   : > { %6159 = vmatmul.mubr.msk.bf16.gmra.mrb[4].mxu0 %vm658_vm4, %v5535_v41  ;;  %v6545_v41 = vld [vmem:[%s6625_s25 + $0x94] sm:$0xf] }
 0x13d   : > { %6005 = vmatmul.mubr.msk.bf16.gmra.mrb[20].mxu1 %vm658_vm4, %v6497_v12  ;;  %6162 = vmatprep.mubr.msk.bf16.mxu0 %vm658_vm4, %v5536_v14  ;;  %v2277_v14 = vrot.slane %v2275_v5, 5  ;;  %v2305_v12 = vshll.u32 %v6545_v41, 16  ;;  %v2309_v29 = vshrl.u32 %v6545_v41, 16  ;;  %v2344_v41 = vshrl.u32 %v5246_v56, 16  ;;  %v5252_v56 = vld [vmem:[%s6625_s25 + $0xc0] sm:$0xf] }
 0x13e   : > { %6008 = vmatprep.mubr.msk.bf16.mxu1 %vm658_vm4, %v6498_v59  ;;  %v2320_v59 = vshrl.u32 %v5243_v3, 16  ;;  %v6548_v3 = vld [vmem:[%s6625_s25 + $0x98] sm:$0x1] }
 0x13f   : > { %v2278_v2 = vor.u32 %v2277_v14, %v2274_v34  ;;  %v8223_v36 = vrot.slane %v2305_v12, 5  ;;  %v2289_v34 = vrot.slane %v2288_v9, 4  ;;  %v2302_v14 = vor.u32 %v2301_v60, %v2298_v27  ;;  %v5249_v12 = vld [vmem:[%s6625_s25 + $0xb4] sm:$0xf] }
 0x140   : > { %v2322_v5 = vrot.slane %v2320_v59, 4  ;;  %v2357_v59 = vshrl.u32 %v6550_v8, 16  ;;  %v2368_v35 = vshrl.u32 %v5249_v12, 16  ;;  %v2371_v13 = vshll.u32 %v5249_v12, 16 }
 0x141   : > { %v2279_v25 = vrot.slane %v2278_v2, 4  ;;  %v2294_v26 = vsel %vm6651_vm5, %v2289_v34, %v2293_v30  ;;  %v2303_v6 = vrot.slane %v2302_v14, 4  ;;  %v2341_v9 = vrot.slane %v2339_v32, 5 }
 0x142   : > { %v2326_v51 = vor.u32 %v2325_v20, %v2322_v5  ;;  %v2346_v27 = vrot.slane %v2344_v41, 4  ;;  %v2359_v20 = vrot.slane %v2357_v59, 4  ;;  %v6554_v41 = vld [vmem:[%s6625_s25 + $0xbc] sm:$0x1] }
 0x143   : > { %v2284_v52 = vsel %vm6651_vm5, %v2279_v25, %v8203_v11  ;;  %v2308_v25 = vsel %vm6651_vm5, %v2303_v6, %v8223_v36  ;;  %v2387_v7 = vshll.u32 %v6554_v41, 16 }
 0x144   : > { %6163 = vmatmul.mubr.msk.bf16.gmra.mrb[8].mxu0 %vm658_vm4, %v5537_v16  ;;  %v2329_v16 = vshll.u32 %v6547_v0, 16  ;;  %v2327_v2 = vrot.slane %v2326_v51, 4  ;;  %v5266_v11 = vcombine.low %v2284_v52, %v2294_v26 }
 0x145   : > { %6009 = vmatmul.mubr.msk.bf16.gmra.mrb[24].mxu1 %vm658_vm4, %v6499_v23  ;;  %6166 = vmatprep.mubr.msk.bf16.mxu0 %vm658_vm4, %v5538_v28  ;;  %v2311_v28 = vrot.slane %v2309_v29, 4  ;;  %v2335_v23 = vrot.slane %v2333_v45, 4 }
 0x146   : > { %6012 = vmatprep.mubr.msk.bf16.mxu1 %vm658_vm4, %v6500_v4  ;;  %v8226_v57 = vrot.slane %v2329_v16, 5  ;;  %v2315_v4 = vshll.u32 %v6548_v3, 16 }
 0x147   : > { %v2312_v21 = vor.u32 %v2311_v28, %v8223_v36  ;;  %v2349_v28 = vrot.slane %v2347_v39, 5  ;;  %v6552_v36 = vld [vmem:[%s6625_s25 + $0xb0] sm:$0x1] }
 0x148   : > { %v2336_v29 = vor.u32 %v2335_v23, %v8226_v57  ;;  %v2317_v19 = vrot.slane %v2315_v4, 5  ;;  %v2332_v14 = vsel %vm6651_vm5, %v2327_v2, %v8226_v57  ;;  %v2363_v3 = vshll.u32 %v6552_v36, 16 }
 0x149   : > { %v2313_v45 = vrot.slane %v2312_v21, 4  ;;  %v2350_v62 = vor.u32 %v2349_v28, %v2346_v27  ;;  %v2392_v4 = vshrl.u32 %v5252_v56, 16  ;;  %v2395_v57 = vshll.u32 %v5252_v56, 16  ;;  %v6553_v21 = vld [vmem:[%s6625_s25 + $0xc4] sm:$0xf] }
 0x14a   : > { %v2337_v60 = vrot.slane %v2336_v29, 4  ;;  %v2401_v51 = vshll.u32 %v6553_v21, 16  ;;  %v2405_v48 = vshrl.u32 %v6553_v21, 16  ;;  %v2365_v39 = vrot.slane %v2363_v3, 5 }
 0x14b   : > { %v2318_v34 = vsel %vm6651_vm5, %v2313_v45, %v2317_v19  ;;  %v2351_v12 = vrot.slane %v2350_v62, 4  ;;  %v2389_v19 = vrot.slane %v2387_v7, 5  ;;  %v2413_v2 = vrot.slane %v2411_v15, 5 }
 0x14c   : > { %6167 = vmatmul.mubr.msk.bf16.gmra.mrb[12].mxu0 %vm658_vm4, %v5539_v63  ;;  %v2353_v63 = vshll.u32 %v6550_v8, 16  ;;  %v2342_v22 = vsel %vm6651_vm5, %v2337_v60, %v2341_v9  ;;  %v5267_v33 = vcombine.low %v2308_v25, %v2318_v34  ;;  %v2394_v8 = vrot.slane %v2392_v4, 4 }
 0x14d   : > { %6013 = vmatmul.mubr.msk.bf16.gmra.mrb[28].mxu1 %vm658_vm4, %v6501_v50  ;;  %6170 = vmatprep.mubr.msk.bf16.mxu0 %vm658_vm4, %v5540_v46  ;;  %v6551_v46 = vld [vmem:[%s6625_s25 + $0xb8] sm:$0xf]  ;;  %v2370_v50 = vrot.slane %v2368_v35, 4  ;;  %v2403_v59 = vrot.slane %v2401_v51, 5  ;;  %v2407_v52 = vrot.slane %v2405_v48, 4 }
 0x14e   : > { %6034 = vmatprep.mubr.msk.bf16.mxu1 %vm658_vm4, %v5264_v58  ;;  %v2377_v0 = vshll.u32 %v6551_v46, 16  ;;  %v2381_v16 = vshrl.u32 %v6551_v46, 16  ;;  %v2355_v5 = vrot.slane %v2353_v63, 5  ;;  %v2373_v58 = vrot.slane %v2371_v13, 5 }
 0x14f   : > { %v2397_v63 = vrot.slane %v2395_v57, 5 }
 0x150   : > { %v2379_v30 = vrot.slane %v2377_v0, 5  ;;  %v2383_v23 = vrot.slane %v2381_v16, 4  ;;  %v2356_v35 = vsel %vm6651_vm5, %v2351_v12, %v2355_v5  ;;  %v2408_v0 = vor.u32 %v2407_v52, %v2403_v59 }
 0x151   : > { %v2398_v46 = vor.u32 %v2397_v63, %v2394_v8 }
 0x152   : > { %v2384_v32 = vor.u32 %v2383_v23, %v2379_v30  ;;  %v2409_v45 = vrot.slane %v2408_v0, 4  ;;  %v8325_v23 = vld [vmem:[%s8390_s2] ss:$0 sm:$0xff] }
 0x153   : > { %v2399_v16 = vrot.slane %v2398_v46, 4 }
 0x154   : > { %6171 = vmatmul.mubr.msk.bf16.gmra.mrb[16].mxu0 %vm658_vm4, %v5541_v43  ;;  %v2360_v43 = vor.u32 %v2359_v20, %v2355_v5  ;;  %v2385_v6 = vrot.slane %v2384_v32, 4  ;;  %v2414_v27 = vsel %vm6651_vm5, %v2409_v45, %v2413_v2 }
 0x155   : > { %6035 = vmatmul.mubr.msk.bf16.vlgmr.msra.gmra.mrb[16].mxu1 %vm658_vm4, %v8032_v42  ;;  %6174 = vmatprep.mubr.msk.bf16.mxu0 %vm658_vm4, %v5542_v18  ;;  %v2374_v42 = vor.u32 %v2373_v58, %v2370_v50  ;;  %v5268_v18 = vcombine.low %v2332_v14, %v2342_v22  ;;  %v2404_v9 = vsel %vm6651_vm5, %v2399_v16, %v2403_v59 }
 0x156   : > { %6038 = vmatprep.mubr.msk.bf16.mxu1 %vm658_vm4, %v5266_v11  ;;  %v2361_v29 = vrot.slane %v2360_v43, 4  ;;  %v2390_v17 = vsel %vm6651_vm5, %v2385_v6, %v2389_v19  ;;  %v5271_v60 = vcombine.low %v2404_v9, %v2414_v27 }
 0x157   : > { %v2375_v26 = vrot.slane %v2374_v42, 4 }
 0x158   : > { %v2366_v13 = vsel %vm6651_vm5, %v2361_v29, %v2365_v39 }
 0x159   : > { %v5269_v55 = vcombine.low %v2356_v35, %v2366_v13 }
 0x15c   : > { %6175 = vmatmul.mubr.msk.bf16.gmra.mrb[20].mxu0 %vm658_vm4, %v5543_v24  ;;  %v2380_v24 = vsel %vm6651_vm5, %v2375_v26, %v2379_v30 }
 0x15d   : > { %6039 = vmatmul.mubr.msk.bf16.gmra.mrb[20].mxu1 %vm658_vm4, %v5267_v33  ;;  %6178 = vmatprep.mubr.msk.bf16.mxu0 %vm658_vm4, %v5544_v38  ;;  %v5270_v38 = vcombine.low %v2380_v24, %v2390_v17 }
 0x15e   : > { %6042 = vmatprep.mubr.msk.bf16.mxu1 %vm658_vm4, %v5268_v18 }
 0x164   : > { %6179 = vmatmul.mubr.msk.bf16.gmra.mrb[24].mxu0 %vm658_vm4, %v5545_v1 }
 0x165   : > { %6043 = vmatmul.mubr.msk.bf16.gmra.mrb[24].mxu1 %vm658_vm4, %v5269_v55  ;;  %6182 = vmatprep.mubr.msk.bf16.mxu0 %vm658_vm4, %v5546_v44 }
 0x166   : > { %6046 = vmatprep.mubr.msk.bf16.mxu1 %vm658_vm4, %v5270_v38 }
 0x16c   : > { %6183 = vmatmul.mubr.msk.bf16.gmra.mrb[28].mxu0 %vm658_vm4, %v5547_v31 }
 0x16d   : > { %6047 = vmatmul.mubr.msk.bf16.gmra.mrb[28].mxu1 %vm658_vm4, %v5271_v60 }
 0x1e8   : > { %v5986_v54 = vpop.f32.mrb[0].mxu1 }
 0x1e9   : > { %v1824_v61 = vpop.f32.mrb[1].mxu1 }
 0x1ea   : > { %v5987_v1 = vpop.f32.mrb[2].mxu1 }
 0x1eb   : > { %v1827_v53 = vpop.f32.mrb[3].mxu1 }
 0x1f0   : > { %v5990_v40 = vpop.f32.mrb[4].mxu1 }
 0x1f1   : > { %v1840_v44 = vpop.f32.mrb[5].mxu1 }
 0x1f2   : > { %v5991_v28 = vpop.f32.mrb[6].mxu1 }
 0x1f3   : > { %v1843_v5 = vpop.f32.mrb[7].mxu1 }
 0x1f8   : > { %v5994_v20 = vpop.f32.mrb[8].mxu1 }
 0x1f9   : > { %v1856_v11 = vpop.f32.mrb[9].mxu1 }
 0x1fa   : > { %v5995_v37 = vpop.f32.mrb[10].mxu1 }
 0x1fb   : > { %v1859_v50 = vpop.f32.mrb[11].mxu1 }
 0x200   : > { %v8314_v58 = vpop.f32.mrb[12].mxu1 }
 0x201   : > { %v8316_v49 = vpop.f32.mrb[13].mxu1 }
 0x202   : > { %v8318_v47 = vpop.f32.mrb[14].mxu1 }
 0x203   : > { %v8320_v31 = vpop.f32.mrb[15].mxu1 }
 0x207   : > { %v6156_v30 = vpop.f32.mrb[0].mxu0 }
 0x208   : > { %v6188_v56 = vadd.f32 %v6156_v30, %v5986_v54  ;;  %v4575_v25 = vpop.f32.mrb[1].mxu0 }
 0x209   : > { %v6189_v34 = vadd.f32 %v4575_v25, %v1824_v61  ;;  %v6157_v14 = vpop.f32.mrb[2].mxu0 }
 0x20a   : > { %v4743_v22 = vadd.f32 %v6188_v56, %v8325_v23  ;;  %v6190_v62 = vadd.f32 %v6157_v14, %v5987_v1  ;;  %v4578_v43 = vpop.f32.mrb[3].mxu0 }
 0x20b   : > { %v4741_v36 = vadd.f32 %v6189_v34, %v8325_v23  ;;  %v6191_v3 = vadd.f32 %v4578_v43, %v1827_v53 }
 0x20c   : > { %v4744_v4 = vadd.f32 %v6190_v62, %v8325_v23  ;;  %v4775_v21 = vmax.f32 %v4743_v22, 0.0 }
 0x20d   : > { %v4742_v57 = vadd.f32 %v6191_v3, %v8325_v23  ;;  %v4773_v48 = vmax.f32 %v4741_v36, 0.0 }
 0x20e   : > { %v4776_v51 = vmax.f32 %v4744_v4, 0.0 }
 0x20f   : > { %v4774_v42 = vmax.f32 %v4742_v57, 0.0  ;;  %v6160_v32 = vpop.f32.mrb[4].mxu0 }
 0x210   : > { %v5640_v41 = vpack.c.bf16 %v4776_v51, %v4775_v21  ;;  %v6192_v7 = vadd.f32 %v6160_v32, %v5990_v40  ;;  %v4591_v33 = vpop.f32.mrb[5].mxu0 }
 0x211   : > { %v5635_v18 = vpack.c.bf16 %v4774_v42, %v4773_v48  ;;  %v6193_v12 = vadd.f32 %v4591_v33, %v1840_v44  ;;  %v6161_v29 = vpop.f32.mrb[6].mxu0 }
 0x212   : > { %5712 = vst [vmem:[%s8335_s16 + $0x8] sm:$0xff] %v5640_v41   ;;  %v4747_v39 = vadd.f32 %v6192_v7, %v8325_v23  ;;  %v6194_v8 = vadd.f32 %v6161_v29, %v5991_v28  ;;  %v4594_v63 = vpop.f32.mrb[7].mxu0 }
 0x213   : > { %5636 = vst [vmem:[%s8335_s16] sm:$0xff] %v5635_v18   ;;  %v4745_v59 = vadd.f32 %v6193_v12, %v8325_v23  ;;  %v6195_v52 = vadd.f32 %v4594_v63, %v1843_v5 }
 0x214   : > { %v4748_v26 = vadd.f32 %v6194_v8, %v8325_v23  ;;  %v4779_v19 = vmax.f32 %v4747_v39, 0.0 }
 0x215   : > { %v4746_v6 = vadd.f32 %v6195_v52, %v8325_v23  ;;  %v4777_v13 = vmax.f32 %v4745_v59, 0.0 }
 0x216   : > { %v4780_v35 = vmax.f32 %v4748_v26, 0.0 }
 0x217   : > { %v4778_v46 = vmax.f32 %v4746_v6, 0.0  ;;  %v6164_v0 = vpop.f32.mrb[8].mxu0 }
 0x218   : > { %v5650_v10 = vpack.c.bf16 %v4780_v35, %v4779_v19  ;;  %v6196_v15 = vadd.f32 %v6164_v0, %v5994_v20  ;;  %v4607_v24 = vpop.f32.mrb[9].mxu0 }
 0x219   : > { %v5645_v17 = vpack.c.bf16 %v4778_v46, %v4777_v13  ;;  %v6197_v55 = vadd.f32 %v4607_v24, %v1856_v11  ;;  %v6165_v38 = vpop.f32.mrb[10].mxu0 }
 0x21a   : > { %5714 = vst [vmem:[%s8335_s16 + $0x18] sm:$0xff] %v5650_v10   ;;  %v4751_v16 = vadd.f32 %v6196_v15, %v8325_v23  ;;  %v6198_v45 = vadd.f32 %v6165_v38, %v5995_v37  ;;  %v4610_v2 = vpop.f32.mrb[11].mxu0 }
 0x21b   : > { %5713 = vst [vmem:[%s8335_s16 + $0x10] sm:$0xff] %v5645_v17   ;;  %v4749_v9 = vadd.f32 %v6197_v55, %v8325_v23  ;;  %v6199_v27 = vadd.f32 %v4610_v2, %v1859_v50 }
 0x21c   : > { %v4752_v60 = vadd.f32 %v6198_v45, %v8325_v23  ;;  %v4783_v61 = vmax.f32 %v4751_v16, 0.0 }
 0x21d   : > { %v4750_v54 = vadd.f32 %v6199_v27, %v8325_v23  ;;  %v4781_v53 = vmax.f32 %v4749_v9, 0.0 }
 0x21e   : > { %v4784_v1 = vmax.f32 %v4752_v60, 0.0 }
 0x21f   : > { %v4782_v40 = vmax.f32 %v4750_v54, 0.0  ;;  %v6168_v44 = vpop.f32.mrb[12].mxu0 }
 0x220   : > { %v5660_v28 = vpack.c.bf16 %v4784_v1, %v4783_v61  ;;  %v6200_v5 = vadd.f32 %v6168_v44, %v8314_v58  ;;  %v4623_v20 = vpop.f32.mrb[13].mxu0 }
 0x221   : > { %v5655_v11 = vpack.c.bf16 %v4782_v40, %v4781_v53  ;;  %v6201_v37 = vadd.f32 %v4623_v20, %v8316_v49  ;;  %v6169_v30 = vpop.f32.mrb[14].mxu0 }
 0x222   : > { %5716 = vst [vmem:[%s8335_s16 + $0x28] sm:$0xff] %v5660_v28   ;;  %v4755_v50 = vadd.f32 %v6200_v5, %v8325_v23  ;;  %v6202_v56 = vadd.f32 %v6169_v30, %v8318_v47  ;;  %v4626_v25 = vpop.f32.mrb[15].mxu0 }
 0x223   : > { %5715 = vst [vmem:[%s8335_s16 + $0x20] sm:$0xff] %v5655_v11   ;;  %v4753_v34 = vadd.f32 %v6201_v37, %v8325_v23  ;;  %v6203_v14 = vadd.f32 %v4626_v25, %v8320_v31 }
 0x224   : > { %v4756_v22 = vadd.f32 %v6202_v56, %v8325_v23  ;;  %v4787_v62 = vmax.f32 %v4755_v50, 0.0 }
 0x225   : > { %v4754_v58 = vadd.f32 %v6203_v14, %v8325_v23  ;;  %v4785_v43 = vmax.f32 %v4753_v34, 0.0 }
 0x226   : > { %v4788_v49 = vmax.f32 %v4756_v22, 0.0 }
 0x227   : > { %v4786_v36 = vmax.f32 %v4754_v58, 0.0  ;;  %v6172_v3 = vpop.f32.mrb[16].mxu0 }
 0x228   : > { %v5670_v4 = vpack.c.bf16 %v4788_v49, %v4787_v62  ;;  %v6036_v57 = vpop.f32.mrb[16].mxu1  ;;  %v4639_v47 = vpop.f32.mrb[17].mxu0 }
 0x229   : > { %v5665_v21 = vpack.c.bf16 %v4786_v36, %v4785_v43  ;;  %v6204_v51 = vadd.f32 %v6172_v3, %v6036_v57  ;;  %v2614_v48 = vpop.f32.mrb[17].mxu1  ;;  %v6173_v42 = vpop.f32.mrb[18].mxu0 }
 0x22a   : > { %5718 = vst [vmem:[%s8335_s16 + $0x38] sm:$0xff] %v5670_v4   ;;  %v6205_v32 = vadd.f32 %v4639_v47, %v2614_v48  ;;  %v6037_v31 = vpop.f32.mrb[18].mxu1  ;;  %v4642_v41 = vpop.f32.mrb[19].mxu0 }
 0x22b   : > { %5717 = vst [vmem:[%s8335_s16 + $0x30] sm:$0xff] %v5665_v21   ;;  %v4759_v7 = vadd.f32 %v6204_v51, %v8325_v23  ;;  %v6206_v33 = vadd.f32 %v6173_v42, %v6037_v31  ;;  %v2617_v18 = vpop.f32.mrb[19].mxu1 }
 0x22c   : > { %v4757_v12 = vadd.f32 %v6205_v32, %v8325_v23  ;;  %v6207_v29 = vadd.f32 %v4642_v41, %v2617_v18 }
 0x22d   : > { %v4760_v39 = vadd.f32 %v6206_v33, %v8325_v23  ;;  %v4791_v63 = vmax.f32 %v4759_v7, 0.0 }
 0x22e   : > { %v4758_v8 = vadd.f32 %v6207_v29, %v8325_v23  ;;  %v4789_v26 = vmax.f32 %v4757_v12, 0.0 }
 0x22f   : > { %v4792_v59 = vmax.f32 %v4760_v39, 0.0  ;;  %v6176_v52 = vpop.f32.mrb[20].mxu0 }
 0x230   : > { %v4790_v6 = vmax.f32 %v4758_v8, 0.0  ;;  %v6040_v19 = vpop.f32.mrb[20].mxu1  ;;  %v4655_v35 = vpop.f32.mrb[21].mxu0 }
 0x231   : > { %v5680_v13 = vpack.c.bf16 %v4792_v59, %v4791_v63  ;;  %v6208_v46 = vadd.f32 %v6176_v52, %v6040_v19  ;;  %v2630_v0 = vpop.f32.mrb[21].mxu1  ;;  %v6177_v10 = vpop.f32.mrb[22].mxu0 }
 0x232   : > { %v5675_v15 = vpack.c.bf16 %v4790_v6, %v4789_v26  ;;  %v6209_v24 = vadd.f32 %v4655_v35, %v2630_v0  ;;  %v6041_v17 = vpop.f32.mrb[22].mxu1  ;;  %v4658_v55 = vpop.f32.mrb[23].mxu0 }
 0x233   : > { %5720 = vst [vmem:[%s8335_s16 + $0x48] sm:$0xff] %v5680_v13   ;;  %v4763_v38 = vadd.f32 %v6208_v46, %v8325_v23  ;;  %v6210_v16 = vadd.f32 %v6177_v10, %v6041_v17  ;;  %v2633_v45 = vpop.f32.mrb[23].mxu1 }
 0x234   : > { %5719 = vst [vmem:[%s8335_s16 + $0x40] sm:$0xff] %v5675_v15   ;;  %v4761_v2 = vadd.f32 %v6209_v24, %v8325_v23  ;;  %v6211_v9 = vadd.f32 %v4658_v55, %v2633_v45 }
 0x235   : > { %v4764_v27 = vadd.f32 %v6210_v16, %v8325_v23  ;;  %v4795_v54 = vmax.f32 %v4763_v38, 0.0 }
 0x236   : > { %v4762_v60 = vadd.f32 %v6211_v9, %v8325_v23  ;;  %v4793_v53 = vmax.f32 %v4761_v2, 0.0 }
 0x237   : > { %v4796_v61 = vmax.f32 %v4764_v27, 0.0  ;;  %v6180_v1 = vpop.f32.mrb[24].mxu0 }
 0x238   : > { %v4794_v40 = vmax.f32 %v4762_v60, 0.0  ;;  %v6044_v44 = vpop.f32.mrb[24].mxu1  ;;  %v4671_v28 = vpop.f32.mrb[25].mxu0 }
 0x239   : > { %v5690_v5 = vpack.c.bf16 %v4796_v61, %v4795_v54  ;;  %v6212_v20 = vadd.f32 %v6180_v1, %v6044_v44  ;;  %v2646_v11 = vpop.f32.mrb[25].mxu1  ;;  %v6181_v37 = vpop.f32.mrb[26].mxu0 }
 0x23a   : > { %v5685_v30 = vpack.c.bf16 %v4794_v40, %v4793_v53  ;;  %v6213_v50 = vadd.f32 %v4671_v28, %v2646_v11  ;;  %v6045_v56 = vpop.f32.mrb[26].mxu1  ;;  %v4674_v25 = vpop.f32.mrb[27].mxu0 }
 0x23b   : > { %5722 = vst [vmem:[%s8335_s16 + $0x58] sm:$0xff] %v5690_v5   ;;  %v4767_v34 = vadd.f32 %v6212_v20, %v8325_v23  ;;  %v6214_v14 = vadd.f32 %v6181_v37, %v6045_v56  ;;  %v2649_v22 = vpop.f32.mrb[27].mxu1 }
 0x23c   : > { %5721 = vst [vmem:[%s8335_s16 + $0x50] sm:$0xff] %v5685_v30   ;;  %v4765_v58 = vadd.f32 %v6213_v50, %v8325_v23  ;;  %v6215_v62 = vadd.f32 %v4674_v25, %v2649_v22 }
 0x23d   : > { %v4768_v49 = vadd.f32 %v6214_v14, %v8325_v23  ;;  %v4799_v36 = vmax.f32 %v4767_v34, 0.0 }
 0x23e   : > { %v4766_v43 = vadd.f32 %v6215_v62, %v8325_v23  ;;  %v4797_v57 = vmax.f32 %v4765_v58, 0.0 }
 0x23f   : > { %v4800_v3 = vmax.f32 %v4768_v49, 0.0  ;;  %v6184_v4 = vpop.f32.mrb[28].mxu0 }
 0x240   : > { %v4798_v47 = vmax.f32 %v4766_v43, 0.0  ;;  %v6048_v21 = vpop.f32.mrb[28].mxu1  ;;  %v4687_v51 = vpop.f32.mrb[29].mxu0 }
 0x241   : > { %v5700_v48 = vpack.c.bf16 %v4800_v3, %v4799_v36  ;;  %v6216_v42 = vadd.f32 %v6184_v4, %v6048_v21  ;;  %v2662_v32 = vpop.f32.mrb[29].mxu1  ;;  %v6185_v31 = vpop.f32.mrb[30].mxu0 }
 0x242   : > { %v5695_v41 = vpack.c.bf16 %v4798_v47, %v4797_v57  ;;  %v6217_v7 = vadd.f32 %v4687_v51, %v2662_v32  ;;  %v6049_v33 = vpop.f32.mrb[30].mxu1  ;;  %v4690_v18 = vpop.f32.mrb[31].mxu0 }
 0x243   : > { %5724 = vst [vmem:[%s8335_s16 + $0x68] sm:$0xff] %v5700_v48   ;;  %v4771_v12 = vadd.f32 %v6216_v42, %v8325_v23  ;;  %v6218_v29 = vadd.f32 %v6185_v31, %v6049_v33  ;;  %v2665_v39 = vpop.f32.mrb[31].mxu1 }
 0x244   : > { %5723 = vst [vmem:[%s8335_s16 + $0x60] sm:$0xff] %v5695_v41   ;;  %v4769_v8 = vadd.f32 %v6217_v7, %v8325_v23  ;;  %v6219_v63 = vadd.f32 %v4690_v18, %v2665_v39 }
 0x245   : > { %v4772_v59 = vadd.f32 %v6218_v29, %v8325_v23  ;;  %v4803_v26 = vmax.f32 %v4771_v12, 0.0 }
 0x246   : > { %v4770_v52 = vadd.f32 %v6219_v63, %v8325_v23  ;;  %v4801_v19 = vmax.f32 %v4769_v8, 0.0 }
 0x247   : > { %v4804_v6 = vmax.f32 %v4772_v59, 0.0 }
 0x248   : > { %v4802_v35 = vmax.f32 %v4770_v52, 0.0 }
 0x249   : > { %v5710_v13 = vpack.c.bf16 %v4804_v6, %v4803_v26 }
 0x24a   : > { %v5705_v46 = vpack.c.bf16 %v4802_v35, %v4801_v19 }
 0x24b   : > { %5726 = vst [vmem:[%s8335_s16 + $0x78] sm:$0xff] %v5710_v13  }
 0x24c   : > { %5725 = vst [vmem:[%s8335_s16 + $0x70] sm:$0xff] %v5705_v46  }
 0x24d PF: > { %s13_s12 = sadd.s32 1, %s6562_s12  }
 0x24e   : > { %p10_p4 = scmp.ge.s32.totalorder %s13_s12, 4  }
 0x250   :  { %12 = sbr.rel (!%p10_p4) target bundleno = 1 (0x1), region = 72 }

// kernel: spade_down_block.6
= control target key start
LH: loop header
LB: loop body
LE: loop exit
PB: predicated region body
PF: predicated region fallthrough
CT: control target
= control target key end

     0   :  { %s7137_s12 = smov 0   ;;  %s8971_s0 = inlined_call_operand.vmem [shape: bf16[2,18,18,128], index: 0, kind: input, shape index: {}]   ;;  %s8972_s1 = inlined_call_operand.vmem [shape: bf16[9,128,128], index: 1, kind: input, shape index: {}]   ;;  %s8973_s2 = inlined_call_operand.vmem [shape: f32[1,128], index: 2, kind: input, shape index: {}]   ;;  %s8974_s3 = inlined_call_operand.vmem [shape: bf16[2,16,16,128], index: 3, kind: output, shape index: {}]  }
   0x1 LB: > { %s5235_s13 = sadd.s32 4294967295, %s7115_s12   ;;  %p5239_p0 = scmp.ge.s32.totalorder %s7115_s12, 1  ;;  %s7115_s12 = sphi %s7137_s12, %s13_s12  }
   0x2   : > { %p137_p1 = scmp.lt.s32.totalorder %s7115_s12, 3 }
   0x4   : > { %p138_p2 = pnand %p5239_p0, %p137_p1 }
   0x6   : > { %141 = sbr.rel (%p138_p2) target bundleno = 587 (0x24b), region = 32 }
   0xd   : > { %v6919_v0 = vld [vmem:[%s8972_s1 + $0x40] sm:$0xff]   ;;  %p161_p3 = scmp.lt.s32.totalorder %s5235_s13, 1  ;;  %v6921_v2 = vld [vmem:[%s8972_s1 + $0x48] sm:$0xff]   ;;  %v6923_v4 = vld [vmem:[%s8972_s1 + $0x50] sm:$0xff]   ;;  %vm236_vm0 = vsmask.f32 3328 }
   0xe   : > { %v6920_v1 = vld [vmem:[%s8972_s1 + $0x100] sm:$0xff]   ;;  %6206 = vmatprep.subr.bf16.mxu1 %v6919_v0  ;;  %v6922_v3 = vld [vmem:[%s8972_s1 + $0x108] sm:$0xff]   ;;  %v6924_v5 = vld [vmem:[%s8972_s1 + $0x110] sm:$0xff]   ;;  %vm237_vm1 = vsmask.f32 7440  ;;  %vm1266_vm3 = vcmask 1042432  }
   0xf   : > { %6398 = vmatprep.subr.bf16.mxu0 %v6920_v1  ;;  %6207 = vmatpush3.bf16.msra.mxu1 %v6919_v0  ;;  %s9042_s13 = smov (!%p161_p3, %s5235_s13), 1  ;;  %v6925_v6 = vld [vmem:[%s8972_s1 + $0x58] sm:$0xff]   ;;  %v6927_v8 = vld [vmem:[%s8972_s1 + $0x60] sm:$0xff]   ;;  %v6929_v10 = vld [vmem:[%s8972_s1 + $0x68] sm:$0xff]   ;;  %vm1267_vm4 = vcmask 1046532  }
  0x10   : > { %6399 = vmatpush3.bf16.msra.mxu0 %v6920_v1  ;;  %6208 = vmatprep.subr.bf16.mxu1 %v6921_v2  ;;  %v6926_v7 = vld [vmem:[%s8972_s1 + $0x118] sm:$0xff]   ;;  %s6910_s30 = smul.u32 216, %s9042_s13  ;;  %v6928_v9 = vld [vmem:[%s8972_s1 + $0x120] sm:$0xff]   ;;  %v6930_v11 = vld [vmem:[%s8972_s1 + $0x128] sm:$0xff]   ;;  %s5862_s7 = sshll.u32 %s9042_s13, 7 }
  0x11   : > { %6400 = vmatprep.subr.bf16.mxu0 %v6922_v3  ;;  %v6931_v25 = vld [vmem:[%s8972_s1 + $0x70] sm:$0xff]   ;;  %v6933_v36 = vld [vmem:[%s8972_s1 + $0x78] sm:$0xff]   ;;  %vm7213_vm2 = vmor %vm236_vm0, %vm237_vm1  ;;  %s8921_s11 = scalar_lea.vmem %s8974_s3, %s5862_s7 }
  0x12   : > { %s7181_s10 = scalar_lea.vmem %s8971_s0, %s6910_s30  ;;  %v6932_v30 = vld [vmem:[%s8972_s1 + $0x130] sm:$0xff]   ;;  %v6934_v51 = vld [vmem:[%s8972_s1 + $0x138] sm:$0xff]   ;;  %vm7459_vm5 = vmor %vm1266_vm3, %vm1267_vm4 }
  0x13   : > { %6209 = vmatpush3.bf16.msra.mxu1 %v6921_v2  ;;  %v172_v12 = vld [vmem:[%s7181_s10] sm:$0xf]  ;;  %v173_v13 = vld [vmem:[%s7181_s10 + $0x4] sm:$0xf]  ;;  %v220_v14 = vld [vmem:[%s7181_s10 + $0x8] sm:$0x1] }
  0x14   : > { %6401 = vmatpush3.bf16.msra.mxu0 %v6922_v3  ;;  %6210 = vmatprep.subr.bf16.mxu1 %v6923_v4  ;;  %v240_v15 = vshrl.u32 %v172_v12, 16  ;;  %v243_v16 = vshll.u32 %v172_v12, 16  ;;  %v249_v17 = vshll.u32 %v173_v13, 16  ;;  %v253_v18 = vshrl.u32 %v173_v13, 16  ;;  %v5435_v20 = vld [vmem:[%s7181_s10 + $0xc] sm:$0xf] }
  0x15   : > { %6402 = vmatprep.subr.bf16.mxu0 %v6924_v5  ;;  %v259_v19 = vshll.u32 %v220_v14, 16  ;;  %v7194_v23 = vld [vmem:[%s7181_s10 + $0x10] sm:$0xf]  ;;  %v7197_v24 = vld [vmem:[%s7181_s10 + $0x14] sm:$0x1]  ;;  %v2139_v29 = vshrl.u32 %v5435_v20, 16 }
  0x16   : > { %v242_v21 = vrot.slane %v240_v15, 4  ;;  %v245_v22 = vrot.slane %v243_v16, 5  ;;  %v251_v26 = vrot.slane %v249_v17, 5  ;;  %v255_v27 = vrot.slane %v253_v18, 4  ;;  %v174_v35 = vld [vmem:[%s7181_s10 + $0xc] sm:$0xf] }
  0x17   : > { %6211 = vmatpush3.bf16.msra.mxu1 %v6923_v4  ;;  %v261_v28 = vrot.slane %v259_v19, 5  ;;  %v2142_v32 = vshll.u32 %v5435_v20, 16  ;;  %v2148_v33 = vshll.u32 %v7194_v23, 16  ;;  %v2152_v34 = vshrl.u32 %v7194_v23, 16  ;;  %v175_v42 = vld [vmem:[%s7181_s10 + $0x10] sm:$0xf] }
  0x18   : > { %6403 = vmatpush3.bf16.msra.mxu0 %v6924_v5  ;;  %6212 = vmatprep.subr.bf16.mxu1 %v6925_v6  ;;  %v246_v31 = vor.u32 %v245_v22, %v242_v21  ;;  %v256_v38 = vor.u32 %v255_v27, %v251_v26  ;;  %v2141_v39 = vrot.slane %v2139_v29, 4  ;;  %v2158_v40 = vshll.u32 %v7197_v24, 16  ;;  %v221_v55 = vld [vmem:[%s7181_s10 + $0x14] sm:$0x1]  ;;  %v5438_v57 = vld [vmem:[%s7181_s10 + $0x18] sm:$0xf] }
  0x19   : > { %6404 = vmatprep.subr.bf16.mxu0 %v6926_v7  ;;  %v2913_v41 = vrot.slane %v7197_v24, 5  ;;  %v2144_v44 = vrot.slane %v2142_v32, 5  ;;  %v2150_v45 = vrot.slane %v2148_v33, 5  ;;  %v2154_v46 = vrot.slane %v2152_v34, 4  ;;  %v7230_v62 = vld [vmem:[%s7181_s10 + $0x1c] sm:$0xf] }
  0x1a   : > { %v247_v43 = vrot.slane %v246_v31, 4  ;;  %v257_v47 = vrot.slane %v256_v38, 4  ;;  %v2160_v48 = vrot.slane %v2158_v40, 5  ;;  %v264_v49 = vshrl.u32 %v174_v35, 16  ;;  %v6935_v3 = vld [vmem:[%s8972_s1] sm:$0xff]  }
  0x1b   : > { %6213 = vmatpush3.bf16.msra.mxu1 %v6925_v6  ;;  %v267_v50 = vshll.u32 %v174_v35, 16  ;;  %v2145_v53 = vor.u32 %v2144_v44, %v2141_v39  ;;  %v2155_v54 = vor.u32 %v2154_v46, %v2150_v45  ;;  %v273_v56 = vshll.u32 %v175_v42, 16  ;;  %v7238_v4 = vld [vmem:[%s8972_s1 + $0x140] sm:$0xff]   ;;  %v176_v21 = vld [vmem:[%s7181_s10 + $0x18] sm:$0xf]  ;;  %v6938_v46 = vld [vmem:[%s8972_s1 + $0x8] sm:$0xff]  }
  0x1c   : > { %6405 = vmatpush3.bf16.msra.mxu0 %v6926_v7  ;;  %6214 = vmatprep.subr.bf16.mxu1 %v6927_v8  ;;  %v252_v52 = vsel %vm7213_vm2, %v247_v43, %v251_v26  ;;  %v262_v58 = vsel %vm7213_vm2, %v257_v47, %v261_v28  ;;  %v266_v59 = vrot.slane %v264_v49, 4  ;;  %v277_v61 = vshrl.u32 %v175_v42, 16  ;;  %v177_v28 = vld [vmem:[%s7181_s10 + $0x1c] sm:$0xf]  ;;  %v222_v33 = vld [vmem:[%s7181_s10 + $0x20] sm:$0x1] }
  0x1d   : > { %6406 = vmatprep.subr.bf16.mxu0 %v6928_v9  ;;  %v269_v60 = vrot.slane %v267_v50, 5  ;;  %v5259_v63 = vcombine.low %v252_v52, %v262_v58  ;;  %v2146_v0 = vrot.slane %v2145_v53, 4  ;;  %v2156_v1 = vrot.slane %v2155_v54, 4  ;;  %v5441_v39 = vld [vmem:[%s7181_s10 + $0x24] sm:$0xf] }
  0x1e   : > { %v275_v2 = vrot.slane %v273_v56, 5  ;;  %v279_v6 = vrot.slane %v277_v61, 4  ;;  %v283_v7 = vshll.u32 %v221_v55, 16  ;;  %v2166_v12 = vshll.u32 %v5438_v57, 16  ;;  %v178_v52 = vld [vmem:[%s7181_s10 + $0x24] sm:$0xf] }
  0x1f   : > { %6215 = vmatpush3.bf16.msra.mxu1 %v6927_v8  ;;  %v270_v5 = vor.u32 %v269_v60, %v266_v59  ;;  %v7241_v8 = vld [vmem:[%s7181_s10 + $0x20] sm:$0x1]  ;;  %6222 = vmatprep.mubr.bf16.mxu1 %v5259_v63  ;;  %v2172_v19 = vshll.u32 %v7230_v62, 16  ;;  %v2176_v20 = vshrl.u32 %v7230_v62, 16  ;;  %v2917_v27 = vrot.slane %v7230_v62, 5  ;;  %v6937_v63 = vld [vmem:[%s8972_s1 + $0x148] sm:$0xff]  }
  0x20   : > { %6407 = vmatpush3.bf16.msra.mxu0 %v6928_v9  ;;  %6216 = vmatprep.subr.bf16.mxu1 %v6929_v10  ;;  %v2151_v9 = vsel %vm7213_vm2, %v2146_v0, %v2150_v45  ;;  %v280_v15 = vor.u32 %v279_v6, %v275_v2  ;;  %v285_v16 = vrot.slane %v283_v7, 5  ;;  %v2168_v18 = vrot.slane %v2166_v12, 5  ;;  %v7266_v45 = vld [vmem:[%s7181_s10 + $0x28] sm:$0xf] }
  0x21   : > { %6408 = vmatprep.subr.bf16.mxu0 %v6930_v11  ;;  %v271_v14 = vrot.slane %v270_v5, 4  ;;  %v2182_v26 = vshll.u32 %v7241_v8, 16  ;;  %v2178_v31 = vrot.slane %v2176_v20, 4  ;;  %v2920_v32 = vrot.slane %v7241_v8, 5  ;;  %v179_v5 = vld [vmem:[%s7181_s10 + $0x28] sm:$0xf] }
  0x22   : > { %v288_v38 = vshrl.u32 %v176_v21, 16  ;;  %v291_v44 = vshll.u32 %v176_v21, 16  ;;  %v301_v49 = vshrl.u32 %v177_v28, 16  ;;  %v307_v50 = vshll.u32 %v222_v33, 16  ;;  %v7297_v33 = vld [vmem:[%s7181_s10 + $0x34] sm:$0xf] }
  0x23   : > { %6217 = vmatpush3.bf16.msra.mxu1 %v6929_v10  ;;  %v2161_v10 = vsel %vm7213_vm2, %v2156_v1, %v2160_v48  ;;  %v276_v22 = vsel %vm7213_vm2, %v271_v14, %v275_v2  ;;  %v2184_v35 = vrot.slane %v2182_v26, 5  ;;  %v297_v48 = vshll.u32 %v177_v28, 16 }
  0x24   : > { %6409 = vmatpush3.bf16.msra.mxu0 %v6930_v11  ;;  %6218 = vmatprep.subr.bf16.mxu1 %v6931_v25  ;;  %v2163_v11 = vshrl.u32 %v5438_v57, 16  ;;  %v5499_v13 = vcombine.low %v2151_v9, %v2161_v10  ;;  %v290_v47 = vrot.slane %v288_v38, 4  ;;  %v293_v55 = vrot.slane %v291_v44, 5 }
  0x25   : > { %6410 = vmatprep.subr.bf16.mxu0 %v6932_v30  ;;  %v2187_v56 = vshrl.u32 %v5441_v39, 16  ;;  %v299_v57 = vrot.slane %v297_v48, 5  ;;  %v303_v58 = vrot.slane %v301_v49, 4  ;;  %v309_v59 = vrot.slane %v307_v50, 5  ;;  %v6940_v48 = vld [vmem:[%s8972_s1 + $0x158] sm:$0xff]  }
  0x26   : > { %v2165_v17 = vrot.slane %v2163_v11, 4  ;;  %6414 = vmatprep.mubr.bf16.mxu0 %v5499_v13  ;;  %v2190_v60 = vshll.u32 %v5441_v39, 16  ;;  %v294_v0 = vor.u32 %v293_v55, %v290_v47  ;;  %v2196_v2 = vshll.u32 %v7266_v45, 16  ;;  %v223_v11 = vld [vmem:[%s7181_s10 + $0x2c] sm:$0x1] }
  0x27   : > { %6219 = vmatpush3.bf16.msra.mxu1 %v6931_v25  ;;  %v281_v25 = vrot.slane %v280_v15, 4  ;;  %v2189_v1 = vrot.slane %v2187_v56, 4  ;;  %v304_v7 = vor.u32 %v303_v58, %v299_v57  ;;  %v2200_v10 = vshrl.u32 %v7266_v45, 16 }
  0x28   : > { %6411 = vmatpush3.bf16.msra.mxu0 %v6932_v30  ;;  %6220 = vmatprep.subr.bf16.mxu1 %v6933_v36  ;;  %v2169_v29 = vor.u32 %v2168_v18, %v2165_v17  ;;  %v2174_v30 = vrot.slane %v2172_v19, 5  ;;  %v2192_v9 = vrot.slane %v2190_v60, 5  ;;  %v295_v12 = vrot.slane %v294_v0, 4  ;;  %v6947_v60 = vld [vmem:[%s8972_s1 + $0x20] sm:$0xff]  }
  0x29   : > { %6412 = vmatprep.subr.bf16.mxu0 %v6934_v51  ;;  %v286_v34 = vsel %vm7213_vm2, %v281_v25, %v285_v16  ;;  %v2198_v13 = vrot.slane %v2196_v2, 5  ;;  %v312_v15 = vshrl.u32 %v178_v52, 16  ;;  %v5444_v16 = vld [vmem:[%s7181_s10 + $0x30] sm:$0xf]  ;;  %v305_v17 = vrot.slane %v304_v7, 4 }
  0x2a   : > { %v5260_v40 = vcombine.low %v276_v22, %v286_v34  ;;  %v2170_v42 = vrot.slane %v2169_v29, 4  ;;  %v2179_v43 = vor.u32 %v2178_v31, %v2174_v30  ;;  %v2193_v18 = vor.u32 %v2192_v9, %v2189_v1  ;;  %v6944_v34 = vld [vmem:[%s8972_s1 + $0x18] sm:$0xff]  }
  0x2b   : > { %6221 = vmatpush3.bf16.msra.mxu1 %v6933_v36  ;;  %v7262_v36 = vrot.slane %v2917_v27, 4  ;;  %v2202_v19 = vrot.slane %v2200_v10, 4  ;;  %v315_v20 = vshll.u32 %v178_v52, 16  ;;  %v300_v21 = vsel %vm7213_vm2, %v295_v12, %v299_v57  ;;  %v224_v2 = vld [vmem:[%s7181_s10 + $0x38] sm:$0x1] }
  0x2c   : > { %6413 = vmatpush3.bf16.msra.mxu0 %v6934_v51  ;;  %6254 = vmatprep.subr.bf16.mxu1 %v6935_v3  ;;  %v7272_v51 = vld [vmem:[%s7181_s10 + $0x2c] sm:$0x1]  ;;  %v2175_v53 = vsel %vm7213_vm2, %v2170_v42, %v2174_v30  ;;  %v2180_v54 = vrot.slane %v2179_v43, 4  ;;  %v314_v25 = vrot.slane %v312_v15, 4  ;;  %v321_v26 = vshll.u32 %v179_v5, 16 }
  0x2d   : > { %6446 = vmatprep.subr.bf16.mxu0 %v7238_v4  ;;  %v2206_v14 = vshll.u32 %v7272_v51, 16  ;;  %v310_v28 = vsel %vm7213_vm2, %v305_v17, %v309_v59  ;;  %v2194_v29 = vrot.slane %v2193_v18, 4  ;;  %v2203_v30 = vor.u32 %v2202_v19, %v2198_v13  ;;  %v181_v59 = vld [vmem:[%s7181_s10 + $0x34] sm:$0xf]  ;;  %v5447_v9 = vld [vmem:[%s7181_s10 + $0x3c] sm:$0xf] }
  0x2e   : > { %6223 = vmatmul.mubr.bf16.vlgmr.msra.gmra.mrb[0].mxu1 %v5260_v40  ;;  %v2185_v61 = vsel %vm7213_vm2, %v2180_v54, %v2184_v35  ;;  %v317_v31 = vrot.slane %v315_v20, 5  ;;  %v5261_v35 = vcombine.low %v300_v21, %v310_v28  ;;  %v323_v38 = vrot.slane %v321_v26, 5  ;;  %v180_v54 = vld [vmem:[%s7181_s10 + $0x30] sm:$0xf]  ;;  %v7331_v19 = vld [vmem:[%s7181_s10 + $0x40] sm:$0xf] }
  0x2f   : > { %6255 = vmatpush3.bf16.msra.mxu1 %v6935_v3  ;;  %v6941_v3 = vld [vmem:[%s8972_s1 + $0x10] sm:$0xff]   ;;  %v5500_v6 = vcombine.low %v2175_v53, %v2185_v61  ;;  %v2208_v22 = vrot.slane %v2206_v14, 5  ;;  %v325_v39 = vshrl.u32 %v179_v5, 16  ;;  %v331_v40 = vshll.u32 %v223_v11, 16  ;;  %v6949_v14 = vld [vmem:[%s8972_s1 + $0x28] sm:$0xff]   ;;  %v6942_v20 = vld [vmem:[%s8972_s1 + $0x160] sm:$0xff]  }
  0x30   : > { %6256 = vmatprep.subr.bf16.mxu1 %v6938_v46  ;;  %v2199_v42 = vsel %vm7213_vm2, %v2194_v29, %v2198_v13  ;;  %v2204_v43 = vrot.slane %v2203_v30, 4  ;;  %v318_v44 = vor.u32 %v317_v31, %v314_v25  ;;  %v2211_v47 = vshrl.u32 %v5444_v16, 16  ;;  %6226 = vmatprep.mubr.bf16.mxu1 %v5261_v35  ;;  %v7339_v28 = vld [vmem:[%s7181_s10 + $0x44] sm:$0x1]  ;;  %v6951_v35 = vld [vmem:[%s8972_s1 + $0x30] sm:$0xff]  }
  0x31   : > { %6415 = vmatmul.mubr.bf16.vlgmr.msra.gmra.mrb[0].mxu0 %v5500_v6  ;;  %v327_v49 = vrot.slane %v325_v39, 4  ;;  %v333_v50 = vrot.slane %v331_v40, 5  ;;  %v2214_v52 = vshll.u32 %v5444_v16, 16  ;;  %v2220_v53 = vshll.u32 %v7297_v33, 16 }
  0x32   : > { %6447 = vmatpush3.bf16.msra.mxu0 %v7238_v4  ;;  %v6939_v4 = vld [vmem:[%s8972_s1 + $0x150] sm:$0xff]   ;;  %v2209_v55 = vsel %vm7213_vm2, %v2204_v43, %v2208_v22  ;;  %v319_v56 = vrot.slane %v318_v44, 4  ;;  %v2213_v57 = vrot.slane %v2211_v47, 4  ;;  %v2224_v58 = vshrl.u32 %v7297_v33, 16 }
  0x33   : > { %6257 = vmatpush3.bf16.msra.mxu1 %v6938_v46  ;;  %6448 = vmatprep.subr.bf16.mxu0 %v6937_v63  ;;  %v7308_v46 = vld [vmem:[%s7181_s10 + $0x38] sm:$0x1]  ;;  %v5501_v61 = vcombine.low %v2199_v42, %v2209_v55  ;;  %v2216_v0 = vrot.slane %v2214_v52, 5  ;;  %v2222_v1 = vrot.slane %v2220_v53, 5  ;;  %v336_v7 = vshrl.u32 %v180_v54, 16 }
  0x34   : > { %6258 = vmatprep.subr.bf16.mxu1 %v6941_v3  ;;  %v324_v5 = vsel %vm7213_vm2, %v319_v56, %v323_v38  ;;  %v2230_v6 = vshll.u32 %v7308_v46, 16  ;;  %v339_v12 = vshll.u32 %v180_v54, 16  ;;  %v345_v13 = vshll.u32 %v181_v59, 16  ;;  %v183_v55 = vld [vmem:[%s7181_s10 + $0x40] sm:$0xf] }
  0x35   : > { %6418 = vmatprep.mubr.bf16.mxu0 %v5501_v61  ;;  %v2217_v11 = vor.u32 %v2216_v0, %v2213_v57  ;;  %v338_v17 = vrot.slane %v336_v7, 4  ;;  %v349_v18 = vshrl.u32 %v181_v59, 16  ;;  %v2235_v40 = vshrl.u32 %v5447_v9, 16 }
  0x36   : > { %6449 = vmatpush3.bf16.msra.mxu0 %v6937_v63  ;;  %v328_v63 = vor.u32 %v327_v49, %v323_v38  ;;  %v2232_v16 = vrot.slane %v2230_v6, 5  ;;  %v341_v25 = vrot.slane %v339_v12, 5  ;;  %v347_v26 = vrot.slane %v345_v13, 5 }
  0x37   : > { %6259 = vmatpush3.bf16.msra.mxu1 %v6941_v3  ;;  %6450 = vmatprep.subr.bf16.mxu0 %v6939_v4  ;;  %v2226_v3 = vrot.slane %v2224_v58, 4  ;;  %v2218_v22 = vrot.slane %v2217_v11, 4  ;;  %v351_v31 = vrot.slane %v349_v18, 4  ;;  %v2238_v42 = vshll.u32 %v5447_v9, 16  ;;  %v5450_v9 = vld [vmem:[%s7181_s10 + $0x48] sm:$0xf] }
  0x38   : > { %6260 = vmatprep.subr.bf16.mxu1 %v6944_v34  ;;  %v329_v10 = vrot.slane %v328_v63, 4  ;;  %v342_v39 = vor.u32 %v341_v25, %v338_v17  ;;  %v2244_v49 = vshll.u32 %v7331_v19, 16  ;;  %v2237_v53 = vrot.slane %v2235_v40, 4  ;;  %v225_v63 = vld [vmem:[%s7181_s10 + $0x44] sm:$0x1] }
  0x39   : > { %v2227_v15 = vor.u32 %v2226_v3, %v2222_v1  ;;  %v2223_v38 = vsel %vm7213_vm2, %v2218_v22, %v2222_v1  ;;  %v352_v44 = vor.u32 %v351_v31, %v347_v26  ;;  %v2240_v54 = vrot.slane %v2238_v42, 5  ;;  %v7372_v22 = vld [vmem:[%s7181_s10 + $0x50] sm:$0x1]  ;;  %v6946_v31 = vld [vmem:[%s8972_s1 + $0x178] sm:$0xff]  }
  0x3a   : > { %6451 = vmatpush3.bf16.msra.mxu0 %v6939_v4  ;;  %v334_v21 = vsel %vm7213_vm2, %v329_v10, %v333_v50  ;;  %v355_v4 = vshll.u32 %v224_v2, 16  ;;  %v343_v52 = vrot.slane %v342_v39, 4  ;;  %v2246_v57 = vrot.slane %v2244_v49, 5  ;;  %v6953_v2 = vld [vmem:[%s8972_s1 + $0x38] sm:$0xff]  }
  0x3b   : > { %6261 = vmatpush3.bf16.msra.mxu1 %v6944_v34  ;;  %6452 = vmatprep.subr.bf16.mxu0 %v6940_v48  ;;  %v5262_v29 = vcombine.low %v324_v5, %v334_v21  ;;  %v2228_v30 = vrot.slane %v2227_v15, 4  ;;  %v182_v34 = vld [vmem:[%s7181_s10 + $0x3c] sm:$0xf]  ;;  %v353_v56 = vrot.slane %v352_v44, 4  ;;  %v2248_v58 = vshrl.u32 %v7331_v19, 16  ;;  %v6945_v15 = vld [vmem:[%s8972_s1 + $0x170] sm:$0xff]  }
  0x3c   : > { %6262 = vmatprep.subr.bf16.mxu1 %v6947_v60  ;;  %v357_v47 = vrot.slane %v355_v4, 5  ;;  %v2254_v59 = vshll.u32 %v7339_v28, 16  ;;  %v2241_v61 = vor.u32 %v2240_v54, %v2237_v53  ;;  %v360_v0 = vshrl.u32 %v182_v34, 16  ;;  %v7383_v4 = vld [vmem:[%s8972_s1 + $0x80] sm:$0xff]   ;;  %v185_v53 = vld [vmem:[%s7181_s10 + $0x4c] sm:$0xf] }
  0x3d   : > { %6227 = vmatmul.mubr.bf16.gmra.mrb[4].mxu1 %v5262_v29  ;;  %v2233_v43 = vsel %vm7213_vm2, %v2228_v30, %v2232_v16  ;;  %v363_v1 = vshll.u32 %v182_v34, 16  ;;  %v2250_v3 = vrot.slane %v2248_v58, 4  ;;  %v369_v7 = vshll.u32 %v183_v55, 16  ;;  %v184_v30 = vld [vmem:[%s7181_s10 + $0x48] sm:$0xf] }
  0x3e   : > { %6453 = vmatpush3.bf16.msra.mxu0 %v6940_v48  ;;  %v5502_v50 = vcombine.low %v2223_v38, %v2233_v43  ;;  %v6943_v48 = vld [vmem:[%s8972_s1 + $0x168] sm:$0xff]   ;;  %v358_v5 = vsel %vm7213_vm2, %v353_v56, %v357_v47  ;;  %v2256_v6 = vrot.slane %v2254_v59, 5  ;;  %v2242_v11 = vrot.slane %v2241_v61, 4  ;;  %v226_v54 = vld [vmem:[%s7181_s10 + $0x50] sm:$0x1] }
  0x3f   : > { %6263 = vmatpush3.bf16.msra.mxu1 %v6947_v60  ;;  %6454 = vmatprep.subr.bf16.mxu0 %v6942_v20  ;;  %v348_v60 = vsel %vm7213_vm2, %v343_v52, %v347_v26  ;;  %v362_v12 = vrot.slane %v360_v0, 4  ;;  %v365_v13 = vrot.slane %v363_v1, 5  ;;  %v2251_v16 = vor.u32 %v2250_v3, %v2246_v57  ;;  %v5453_v58 = vld [vmem:[%s7181_s10 + $0x54] sm:$0xf]  ;;  %v7397_v0 = vld [vmem:[%s7181_s10 + $0x58] sm:$0xf] }
  0x40   : > { %6264 = vmatprep.subr.bf16.mxu1 %v6949_v14  ;;  %6419 = vmatmul.mubr.bf16.gmra.mrb[4].mxu0 %v5502_v50  ;;  %v5263_v10 = vcombine.low %v348_v60, %v358_v5  ;;  %v371_v17 = vrot.slane %v369_v7, 5  ;;  %v373_v18 = vshrl.u32 %v183_v55, 16  ;;  %v379_v21 = vshll.u32 %v225_v63, 16 }
  0x41   : > { %v366_v25 = vor.u32 %v365_v13, %v362_v12  ;;  %v2259_v26 = vshrl.u32 %v5450_v9, 16  ;;  %v2262_v29 = vshll.u32 %v5450_v9, 16  ;;  %v2252_v34 = vrot.slane %v2251_v16, 4 }
  0x42   : > { %6455 = vmatpush3.bf16.msra.mxu0 %v6942_v20  ;;  %6230 = vmatprep.mubr.bf16.mxu1 %v5263_v10  ;;  %v2247_v20 = vsel %vm7213_vm2, %v2242_v11, %v2246_v57  ;;  %v381_v38 = vrot.slane %v379_v21, 5  ;;  %v2278_v52 = vshll.u32 %v7372_v22, 16  ;;  %v384_v61 = vshrl.u32 %v184_v30, 16 }
  0x43   : > { %6265 = vmatpush3.bf16.msra.mxu1 %v6949_v14  ;;  %v7366_v14 = vld [vmem:[%s7181_s10 + $0x4c] sm:$0xf]  ;;  %6456 = vmatprep.subr.bf16.mxu0 %v6943_v48  ;;  %v367_v40 = vrot.slane %v366_v25, 4  ;;  %v2261_v42 = vrot.slane %v2259_v26, 4  ;;  %v2264_v43 = vrot.slane %v2262_v29, 5  ;;  %v2257_v47 = vsel %vm7213_vm2, %v2252_v34, %v2256_v6  ;;  %v7402_v6 = vld [vmem:[%s8972_s1 + $0x180] sm:$0xff]  }
  0x44   : > { %6266 = vmatprep.subr.bf16.mxu1 %v6951_v35  ;;  %v2268_v39 = vshll.u32 %v7366_v14, 16  ;;  %v2272_v44 = vshrl.u32 %v7366_v14, 16  ;;  %v5503_v55 = vcombine.low %v2247_v20, %v2257_v47  ;;  %v2280_v60 = vrot.slane %v2278_v52, 5  ;;  %v7409_v20 = vld [vmem:[%s7181_s10 + $0x5c] sm:$0x1] }
  0x45   : > { %v2265_v56 = vor.u32 %v2264_v43, %v2261_v42  ;;  %v387_v63 = vshll.u32 %v184_v30, 16  ;;  %v397_v3 = vshrl.u32 %v185_v53, 16  ;;  %v386_v9 = vrot.slane %v384_v61, 4  ;;  %v187_v43 = vld [vmem:[%s7181_s10 + $0x58] sm:$0xf] }
  0x46   : > { %6457 = vmatpush3.bf16.msra.mxu0 %v6943_v48  ;;  %v2270_v50 = vrot.slane %v2268_v39, 5  ;;  %v372_v48 = vsel %vm7213_vm2, %v367_v40, %v371_v17  ;;  %v2274_v57 = vrot.slane %v2272_v44, 4  ;;  %6422 = vmatprep.mubr.bf16.mxu0 %v5503_v55  ;;  %v403_v11 = vshll.u32 %v226_v54, 16  ;;  %v5456_v52 = vld [vmem:[%s7181_s10 + $0x60] sm:$0xf] }
  0x47   : > { %6267 = vmatpush3.bf16.msra.mxu1 %v6951_v35  ;;  %v375_v35 = vrot.slane %v373_v18, 4  ;;  %6458 = vmatprep.subr.bf16.mxu0 %v6945_v15  ;;  %v2266_v1 = vrot.slane %v2265_v56, 4  ;;  %v389_v10 = vrot.slane %v387_v63, 5  ;;  %v399_v18 = vrot.slane %v397_v3, 4 }
  0x48   : > { %6268 = vmatprep.subr.bf16.mxu1 %v6953_v2  ;;  %v2275_v5 = vor.u32 %v2274_v57, %v2270_v50  ;;  %v405_v21 = vrot.slane %v403_v11, 5  ;;  %v2283_v25 = vshrl.u32 %v5453_v58, 16  ;;  %v2286_v29 = vshll.u32 %v5453_v58, 16 }
  0x49   : > { %v376_v49 = vor.u32 %v375_v35, %v371_v17  ;;  %v2271_v13 = vsel %vm7213_vm2, %v2266_v1, %v2270_v50  ;;  %v390_v17 = vor.u32 %v389_v10, %v386_v9  ;;  %v2292_v30 = vshll.u32 %v7397_v0, 16  ;;  %v186_v35 = vld [vmem:[%s7181_s10 + $0x54] sm:$0xf]  ;;  %v227_v50 = vld [vmem:[%s7181_s10 + $0x5c] sm:$0x1] }
  0x4a   : > { %6459 = vmatpush3.bf16.msra.mxu0 %v6945_v15  ;;  %v2276_v15 = vrot.slane %v2275_v5, 4  ;;  %v2296_v34 = vshrl.u32 %v7397_v0, 16  ;;  %v2285_v42 = vrot.slane %v2283_v25, 4  ;;  %v408_v55 = vshrl.u32 %v186_v35, 16  ;;  %v7437_v25 = vld [vmem:[%s7181_s10 + $0x60] sm:$0xf] }
  0x4b   : > { %6269 = vmatpush3.bf16.msra.mxu1 %v6953_v2  ;;  %v377_v59 = vrot.slane %v376_v49, 4  ;;  %v393_v2 = vshll.u32 %v185_v53, 16  ;;  %6460 = vmatprep.subr.bf16.mxu0 %v6946_v31  ;;  %v391_v39 = vrot.slane %v390_v17, 4  ;;  %v2294_v44 = vrot.slane %v2292_v30, 5  ;;  %v7433_v17 = vld [vmem:[%s7181_s10 + $0x68] sm:$0x1] }
  0x4c   : > { %6302 = vmatprep.subr.bf16.mxu1 %v7383_v4  ;;  %v2281_v26 = vsel %vm7213_vm2, %v2276_v15, %v2280_v60  ;;  %v2298_v47 = vrot.slane %v2296_v34, 4  ;;  %v2302_v49 = vshll.u32 %v7409_v20, 16  ;;  %v7424_v60 = vld [vmem:[%s7181_s10 + $0x64] sm:$0xf]  ;;  %v410_v63 = vrot.slane %v408_v55, 4 }
  0x4d   : > { %v382_v7 = vsel %vm7213_vm2, %v377_v59, %v381_v38  ;;  %v395_v16 = vrot.slane %v393_v2, 5  ;;  %v5504_v38 = vcombine.low %v2271_v13, %v2281_v26  ;;  %v417_v59 = vshll.u32 %v187_v43, 16 }
  0x4e   : > { %v5264_v12 = vcombine.low %v372_v48, %v382_v7  ;;  %6461 = vmatpush3.bf16.msra.mxu0 %v6946_v31  ;;  %v2288_v31 = vrot.slane %v2286_v29, 5  ;;  %v411_v48 = vshll.u32 %v186_v35, 16  ;;  %v2299_v57 = vor.u32 %v2298_v47, %v2294_v44  ;;  %v7440_v35 = vld [vmem:[%s7181_s10 + $0x64] sm:$0xf] }
  0x4f   : > { %6494 = vmatprep.subr.bf16.mxu0 %v7402_v6  ;;  %v400_v40 = vor.u32 %v399_v18, %v395_v16  ;;  %6423 = vmatmul.mubr.bf16.gmra.mrb[8].mxu0 %v5504_v38  ;;  %v396_v53 = vsel %vm7213_vm2, %v391_v39, %v395_v16  ;;  %v2304_v58 = vrot.slane %v2302_v49, 5  ;;  %v421_v5 = vshrl.u32 %v187_v43, 16  ;;  %v228_v43 = vld [vmem:[%s7181_s10 + $0x68] sm:$0x1] }
  0x50   : > { %6231 = vmatmul.mubr.bf16.gmra.mrb[8].mxu1 %v5264_v12  ;;  %v2289_v56 = vor.u32 %v2288_v31, %v2285_v42  ;;  %v413_v1 = vrot.slane %v411_v48, 5  ;;  %v2300_v7 = vrot.slane %v2299_v57, 4  ;;  %v419_v9 = vrot.slane %v417_v59, 5 }
  0x51   : > { %v401_v54 = vrot.slane %v400_v40, 4  ;;  %v423_v11 = vrot.slane %v421_v5, 4  ;;  %v427_v12 = vshll.u32 %v227_v50, 16  ;;  %v2307_v13 = vshrl.u32 %v5456_v52, 16  ;;  %v5523_v50 = vld [vmem:[%s7181_s10 + $0xc] sm:$0xe] }
  0x52   : > { %v2290_v3 = vrot.slane %v2289_v56, 4  ;;  %v414_v10 = vor.u32 %v413_v1, %v410_v63  ;;  %v2305_v16 = vsel %vm7213_vm2, %v2300_v7, %v2304_v58  ;;  %v2310_v18 = vshll.u32 %v5456_v52, 16  ;;  %v7455_v5 = vld [vmem:[%s7181_s10 + $0x6c] sm:$0xf] }
  0x53   : > { %v406_v61 = vsel %vm7213_vm2, %v401_v54, %v405_v21  ;;  %v2316_v21 = vshll.u32 %v7424_v60, 16  ;;  %v424_v30 = vor.u32 %v423_v11, %v419_v9  ;;  %v429_v34 = vrot.slane %v427_v12, 5 }
  0x54   : > { %v5265_v2 = vcombine.low %v396_v53, %v406_v61  ;;  %v2295_v15 = vsel %vm7213_vm2, %v2290_v3, %v2294_v44  ;;  %v415_v29 = vrot.slane %v414_v10, 4  ;;  %v2309_v38 = vrot.slane %v2307_v13, 4 }
  0x55   : > { %v5505_v26 = vcombine.low %v2295_v15, %v2305_v16  ;;  %v2312_v39 = vrot.slane %v2310_v18, 5  ;;  %v2318_v40 = vrot.slane %v2316_v21, 5  ;;  %v2320_v42 = vshrl.u32 %v7424_v60, 16  ;;  %v7467_v21 = vld [vmem:[%s7181_s10 + $0x70] sm:$0xf] }
  0x56   : > { %6234 = vmatprep.mubr.bf16.mxu1 %v5265_v2  ;;  %v420_v31 = vsel %vm7213_vm2, %v415_v29, %v419_v9  ;;  %v425_v44 = vrot.slane %v424_v30, 4  ;;  %v2326_v47 = vshll.u32 %v7433_v17, 16  ;;  %v432_v49 = vshrl.u32 %v7437_v25, 16  ;;  %v7037_v9 = vld [vmem:[%s7181_s10 + $0xb4] sm:$0xff]  }
  0x57   : > { %6426 = vmatprep.mubr.bf16.mxu0 %v5505_v26  ;;  %v2313_v52 = vor.u32 %v2312_v39, %v2309_v38  ;;  %v2322_v53 = vrot.slane %v2320_v42, 4  ;;  %v435_v54 = vshll.u32 %v7437_v25, 16  ;;  %v441_v55 = vshll.u32 %v7440_v35, 16 }
  0x58   : > { %v430_v48 = vsel %vm7213_vm2, %v425_v44, %v429_v34  ;;  %v2328_v56 = vrot.slane %v2326_v47, 5  ;;  %v434_v57 = vrot.slane %v432_v49, 4  ;;  %v445_v58 = vshrl.u32 %v7440_v35, 16  ;;  %v7478_v47 = vld [vmem:[%s7181_s10 + $0x78] sm:$0xf] }
  0x59   : > { %v5266_v59 = vcombine.low %v420_v31, %v430_v48  ;;  %v2314_v61 = vrot.slane %v2313_v52, 4  ;;  %v2323_v63 = vor.u32 %v2322_v53, %v2318_v40  ;;  %v437_v1 = vrot.slane %v435_v54, 5  ;;  %v7489_v54 = vld [vmem:[%s7181_s10 + $0x7c] sm:$0xf] }
  0x5a   : > { %v443_v2 = vrot.slane %v441_v55, 5  ;;  %v447_v3 = vrot.slane %v445_v58, 4  ;;  %v451_v7 = vshll.u32 %v228_v43, 16  ;;  %v5539_v10 = vrot.slane %v5523_v50, 9  ;;  %v230_v58 = vld [vmem:[%s7181_s10 + $0x80] sm:$0x1] }
  0x5b   : > { %6235 = vmatmul.mubr.bf16.gmra.mrb[12].mxu1 %v5266_v59  ;;  %v2319_v11 = vsel %vm7213_vm2, %v2314_v61, %v2318_v40  ;;  %v2324_v12 = vrot.slane %v2323_v63, 4  ;;  %v438_v13 = vor.u32 %v437_v1, %v434_v57  ;;  %v2910_v15 = vrot.slane %v7194_v23, 5  ;;  %v229_v40 = vld [vmem:[%s7181_s10 + $0x74] sm:$0x1]  ;;  %v5524_v23 = vld [vmem:[%s7181_s10 + $0x18] sm:$0xe] }
  0x5c   : > { %v448_v16 = vor.u32 %v447_v3, %v443_v2  ;;  %v453_v18 = vrot.slane %v451_v7, 5  ;;  %v456_v26 = vshrl.u32 %v7455_v5, 16  ;;  %v459_v29 = vshll.u32 %v7455_v5, 16 }
  0x5d   : > { %v2329_v30 = vsel %vm7213_vm2, %v2324_v12, %v2328_v56  ;;  %v439_v34 = vrot.slane %v438_v13, 4  ;;  %v2911_v38 = vsel %vm7459_vm5, %v5539_v10, %v2910_v15  ;;  %v2912_v39 = vrot.slane %v2910_v15, 4  ;;  %v5525_v13 = vld [vmem:[%s7181_s10 + $0x24] sm:$0xe] }
  0x5e   : > { %v5506_v42 = vcombine.low %v2319_v11, %v2329_v30  ;;  %v449_v43 = vrot.slane %v448_v16, 4  ;;  %v458_v31 = vrot.slane %v456_v26, 4  ;;  %v461_v44 = vrot.slane %v459_v29, 5  ;;  %v7511_v16 = vld [vmem:[%s7181_s10 + $0x84] sm:$0xf]  ;;  %v6950_v29 = vld [vmem:[%s8972_s1 + $0x188] sm:$0xff]  }
  0x5f   : > { %v444_v49 = vsel %vm7213_vm2, %v439_v34, %v443_v2  ;;  %v2914_v50 = vsel %vm7459_vm5, %v2912_v39, %v2913_v41  ;;  %v465_v52 = vshll.u32 %v7467_v21, 16  ;;  %v469_v53 = vshrl.u32 %v7467_v21, 16 }
  0x60   : > { %6427 = vmatmul.mubr.bf16.gmra.mrb[12].mxu0 %v5506_v42  ;;  %v454_v55 = vsel %vm7213_vm2, %v449_v43, %v453_v18  ;;  %v5571_v48 = vcombine.low %v2911_v38, %v2914_v50  ;;  %v462_v56 = vor.u32 %v461_v44, %v458_v31  ;;  %v475_v57 = vshll.u32 %v229_v40, 16  ;;  %v7519_v40 = vld [vmem:[%s7181_s10 + $0x88] sm:$0xf]  ;;  %v231_v31 = vld [vmem:[%s7181_s10 + $0x8c] sm:$0x1] }
  0x61   : > { %v5267_v59 = vcombine.low %v444_v49, %v454_v55  ;;  %v467_v24 = vrot.slane %v465_v52, 5  ;;  %v471_v61 = vrot.slane %v469_v53, 4  ;;  %v5540_v63 = vrot.slane %v5524_v23, 9 }
  0x62   : > { %6462 = vmatprep.mubr.bf16.mxu0 %v5571_v48  ;;  %v463_v41 = vrot.slane %v462_v56, 4  ;;  %v477_v1 = vrot.slane %v475_v57, 5  ;;  %v2921_v2 = vsel %vm7459_vm5, %v7262_v36, %v2920_v32  ;;  %v480_v3 = vshrl.u32 %v7478_v47, 16 }
  0x63   : > { %6238 = vmatprep.mubr.bf16.mxu1 %v5267_v59  ;;  %v472_v7 = vor.u32 %v471_v61, %v467_v24  ;;  %v2918_v10 = vsel %vm7459_vm5, %v5540_v63, %v2917_v27  ;;  %v483_v11 = vshll.u32 %v7478_v47, 16  ;;  %v489_v12 = vshll.u32 %v7489_v54, 16 }
  0x64   : > { %v468_v8 = vsel %vm7213_vm2, %v463_v41, %v467_v24  ;;  %v5572_v15 = vcombine.low %v2918_v10, %v2921_v2  ;;  %v482_v32 = vrot.slane %v480_v3, 4  ;;  %v493_v36 = vshrl.u32 %v7489_v54, 16  ;;  %v7540_v2 = vld [vmem:[%s7181_s10 + $0x90] sm:$0xf]  ;;  %v7543_v3 = vld [vmem:[%s7181_s10 + $0x94] sm:$0xf] }
  0x65   : > { %v473_v62 = vrot.slane %v472_v7, 4  ;;  %v485_v18 = vrot.slane %v483_v11, 5  ;;  %v491_v26 = vrot.slane %v489_v12, 5  ;;  %v499_v27 = vshll.u32 %v230_v58, 16 }
  0x66   : > { %v495_v30 = vrot.slane %v493_v36, 4  ;;  %v5541_v34 = vrot.slane %v5525_v13, 9  ;;  %v2924_v38 = vrot.slane %v7266_v45, 5  ;;  %v2927_v39 = vrot.slane %v7272_v51, 5  ;;  %v5526_v45 = vld [vmem:[%s7181_s10 + $0x30] sm:$0xe] }
  0x67   : > { %v478_v23 = vsel %vm7213_vm2, %v473_v62, %v477_v1  ;;  %v486_v42 = vor.u32 %v485_v18, %v482_v32  ;;  %v501_v43 = vrot.slane %v499_v27, 5  ;;  %v504_v44 = vshrl.u32 %v7511_v16, 16  ;;  %v232_v62 = vld [vmem:[%s7181_s10 + $0x98] sm:$0x1] }
  0x68   : > { %v5268_v49 = vcombine.low %v468_v8, %v478_v23  ;;  %6463 = vmatmul.mubr.bf16.vlgmr.msra.gmra.mrb[0].mxu0 %v5572_v15  ;;  %v496_v50 = vor.u32 %v495_v30, %v491_v26  ;;  %v2925_v52 = vsel %vm7459_vm5, %v5541_v34, %v2924_v38  ;;  %v2926_v53 = vrot.slane %v2924_v38, 4  ;;  %v6954_v30 = vld [vmem:[%s8972_s1 + $0x198] sm:$0xff]  }
  0x69   : > { %6495 = vmatpush3.bf16.msra.mxu0 %v7402_v6  ;;  %v487_v51 = vrot.slane %v486_v42, 4  ;;  %v506_v55 = vrot.slane %v504_v44, 4  ;;  %v507_v48 = vshll.u32 %v7511_v16, 16  ;;  %v513_v56 = vshll.u32 %v7519_v40, 16  ;;  %v6952_v6 = vld [vmem:[%s8972_s1 + $0x190] sm:$0xff]  }
  0x6a   : > { %6239 = vmatmul.mubr.bf16.gmra.mrb[16].mxu1 %v5268_v49  ;;  %v497_v57 = vrot.slane %v496_v50, 4  ;;  %v2928_v58 = vsel %vm7459_vm5, %v2926_v53, %v2927_v39  ;;  %v517_v59 = vshrl.u32 %v7519_v40, 16  ;;  %v523_v24 = vshll.u32 %v231_v31, 16  ;;  %6496 = vmatprep.subr.bf16.mxu0 %v6950_v29  ;;  %v5527_v38 = vld [vmem:[%s7181_s10 + $0x3c] sm:$0xe] }
  0x6b   : > { %v492_v61 = vsel %vm7213_vm2, %v487_v51, %v491_v26  ;;  %v5573_v63 = vcombine.low %v2925_v52, %v2928_v58  ;;  %v509_v41 = vrot.slane %v507_v48, 5  ;;  %v515_v1 = vrot.slane %v513_v56, 5  ;;  %v7561_v31 = vld [vmem:[%s7181_s10 + $0x9c] sm:$0xf]  ;;  %v7570_v48 = vld [vmem:[%s7181_s10 + $0xa0] sm:$0xf] }
  0x6c   : > { %v502_v7 = vsel %vm7213_vm2, %v497_v57, %v501_v43  ;;  %v519_v10 = vrot.slane %v517_v59, 4  ;;  %v525_v11 = vrot.slane %v523_v24, 5  ;;  %v5542_v12 = vrot.slane %v5526_v45, 9  ;;  %v6958_v56 = vld [vmem:[%s8972_s1 + $0x1a0] sm:$0xff]  }
  0x6d   : > { %v5269_v13 = vcombine.low %v492_v61, %v502_v7  ;;  %6466 = vmatprep.mubr.bf16.mxu0 %v5573_v63  ;;  %v510_v8 = vor.u32 %v509_v41, %v506_v55  ;;  %v2931_v15 = vrot.slane %v7297_v33, 5  ;;  %v2934_v32 = vrot.slane %v7308_v46, 5  ;;  %6497 = vmatpush3.bf16.msra.mxu0 %v6950_v29  ;;  %v233_v61 = vld [vmem:[%s7181_s10 + $0xa4] sm:$0x1] }
  0x6e   : > { %v520_v36 = vor.u32 %v519_v10, %v515_v1  ;;  %v528_v18 = vshrl.u32 %v7540_v2, 16  ;;  %v531_v26 = vshll.u32 %v7540_v2, 16  ;;  %v537_v27 = vshll.u32 %v7543_v3, 16  ;;  %6498 = vmatprep.subr.bf16.mxu0 %v6952_v6 }
  0x6f   : > { %6242 = vmatprep.mubr.bf16.mxu1 %v5269_v13  ;;  %v511_v34 = vrot.slane %v510_v8, 4  ;;  %v2932_v33 = vsel %vm7459_vm5, %v5542_v12, %v2931_v15  ;;  %v2933_v46 = vrot.slane %v2931_v15, 4  ;;  %v541_v29 = vshrl.u32 %v7543_v3, 16  ;;  %v5528_v15 = vld [vmem:[%s7181_s10 + $0x48] sm:$0xe] }
  0x70   : > { %v521_v39 = vrot.slane %v520_v36, 4  ;;  %v530_v23 = vrot.slane %v528_v18, 4  ;;  %v533_v42 = vrot.slane %v531_v26, 5  ;;  %v539_v43 = vrot.slane %v537_v27, 5  ;;  %v7595_v27 = vld [vmem:[%s7181_s10 + $0xa8] sm:$0xf] }
  0x71   : > { %v516_v44 = vsel %vm7213_vm2, %v511_v34, %v515_v1  ;;  %v2935_v49 = vsel %vm7459_vm5, %v2933_v46, %v2934_v32  ;;  %v543_v50 = vrot.slane %v541_v29, 4  ;;  %v547_v52 = vshll.u32 %v232_v62, 16  ;;  %6499 = vmatpush3.bf16.msra.mxu0 %v6952_v6  ;;  %v6962_v32 = vld [vmem:[%s8972_s1 + $0x1a8] sm:$0xff]  }
  0x72   : > { %v526_v53 = vsel %vm7213_vm2, %v521_v39, %v525_v11  ;;  %v5574_v45 = vcombine.low %v2932_v33, %v2935_v49  ;;  %v534_v51 = vor.u32 %v533_v42, %v530_v23  ;;  %v5543_v55 = vrot.slane %v5527_v38, 9  ;;  %6500 = vmatprep.subr.bf16.mxu0 %v6954_v30  ;;  %v7598_v29 = vld [vmem:[%s7181_s10 + $0xac] sm:$0xf] }
  0x73   : > { %v5270_v57 = vcombine.low %v516_v44, %v526_v53  ;;  %v544_v58 = vor.u32 %v543_v50, %v539_v43  ;;  %v549_v59 = vrot.slane %v547_v52, 5  ;;  %v2938_v24 = vrot.slane %v7331_v19, 5  ;;  %v5529_v53 = vld [vmem:[%s7181_s10 + $0x54] sm:$0xe] }
  0x74   : > { %6467 = vmatmul.mubr.bf16.gmra.mrb[4].mxu0 %v5574_v45  ;;  %v535_v6 = vrot.slane %v534_v51, 4  ;;  %v2941_v63 = vrot.slane %v7339_v28, 5  ;;  %v552_v41 = vshrl.u32 %v7561_v31, 16  ;;  %v555_v1 = vshll.u32 %v7561_v31, 16  ;;  %v6966_v45 = vld [vmem:[%s8972_s1 + $0x1b0] sm:$0xff]  }
  0x75   : > { %6243 = vmatmul.mubr.bf16.gmra.mrb[20].mxu1 %v5270_v57  ;;  %v545_v7 = vrot.slane %v544_v58, 4  ;;  %v2939_v10 = vsel %vm7459_vm5, %v5543_v55, %v2938_v24  ;;  %v2940_v11 = vrot.slane %v2938_v24, 4  ;;  %v561_v12 = vshll.u32 %v7570_v48, 16  ;;  %6501 = vmatpush3.bf16.msra.mxu0 %v6954_v30 }
  0x76   : > { %v540_v19 = vsel %vm7213_vm2, %v535_v6, %v539_v43  ;;  %v554_v13 = vrot.slane %v552_v41, 4  ;;  %v557_v28 = vrot.slane %v555_v1, 5  ;;  %v565_v8 = vshrl.u32 %v7570_v48, 16  ;;  %6502 = vmatprep.subr.bf16.mxu0 %v6958_v56  ;;  %v234_v43 = vld [vmem:[%s7181_s10 + $0xb0] sm:$0x1] }
  0x77   : > { %v550_v36 = vsel %vm7213_vm2, %v545_v7, %v549_v59  ;;  %v2942_v62 = vsel %vm7459_vm5, %v2940_v11, %v2941_v63  ;;  %v563_v18 = vrot.slane %v561_v12, 5  ;;  %v571_v26 = vshll.u32 %v233_v61, 16  ;;  %v7618_v41 = vld [vmem:[%s7181_s10 + $0xb4] sm:$0xf]  ;;  %v7623_v12 = vld [vmem:[%s7181_s10 + $0xb8] sm:$0xf] }
  0x78   : > { %v5271_v30 = vcombine.low %v540_v19, %v550_v36  ;;  %v5575_v34 = vcombine.low %v2939_v10, %v2942_v62  ;;  %v558_v33 = vor.u32 %v557_v28, %v554_v13  ;;  %v567_v46 = vrot.slane %v565_v8, 4  ;;  %v235_v19 = vld [vmem:[%s7181_s10 + $0xbc] sm:$0x1] }
  0x79   : > { %v573_v38 = vrot.slane %v571_v26, 5  ;;  %v5544_v39 = vrot.slane %v5528_v15, 9  ;;  %v2945_v23 = vrot.slane %v7366_v14, 5  ;;  %v2948_v42 = vrot.slane %v7372_v22, 5  ;;  %6503 = vmatpush3.bf16.msra.mxu0 %v6958_v56  ;;  %v6970_v13 = vld [vmem:[%s8972_s1 + $0x1b8] sm:$0xff]  }
  0x7a   : > { %6246 = vmatprep.mubr.bf16.mxu1 %v5271_v30  ;;  %6470 = vmatprep.mubr.bf16.mxu0 %v5575_v34  ;;  %v559_v44 = vrot.slane %v558_v33, 4  ;;  %v568_v49 = vor.u32 %v567_v46, %v563_v18  ;;  %v576_v50 = vshrl.u32 %v7595_v27, 16  ;;  %v579_v52 = vshll.u32 %v7595_v27, 16  ;;  %v5530_v30 = vld [vmem:[%s7181_s10 + $0x60] sm:$0xe] }
  0x7b   : > { %v2946_v14 = vsel %vm7459_vm5, %v5544_v39, %v2945_v23  ;;  %v2947_v22 = vrot.slane %v2945_v23, 4  ;;  %v585_v51 = vshll.u32 %v7598_v29, 16  ;;  %v589_v55 = vshrl.u32 %v7598_v29, 16  ;;  %6504 = vmatprep.subr.bf16.mxu0 %v6962_v32  ;;  %v5460_v39 = vld [vmem:[%s7181_s10 + $0x70] sm:$0xf] }
  0x7c   : > { %v564_v56 = vsel %vm7213_vm2, %v559_v44, %v563_v18  ;;  %v569_v57 = vrot.slane %v568_v49, 4  ;;  %v578_v58 = vrot.slane %v576_v50, 4  ;;  %v581_v59 = vrot.slane %v579_v52, 5  ;;  %v7645_v44 = vld [vmem:[%s8972_s1 + $0x1c0] sm:$0xff]  }
  0x7d   : > { %v2949_v24 = vsel %vm7459_vm5, %v2947_v22, %v2948_v42  ;;  %v587_v61 = vrot.slane %v585_v51, 5  ;;  %v591_v6 = vrot.slane %v589_v55, 4  ;;  %v595_v63 = vshll.u32 %v234_v43, 16  ;;  %6505 = vmatpush3.bf16.msra.mxu0 %v6962_v32  ;;  %v5531_v43 = vld [vmem:[%s7181_s10 + $0x6c] sm:$0xe] }
  0x7e   : > { %v574_v1 = vsel %vm7213_vm2, %v569_v57, %v573_v38  ;;  %v5576_v7 = vcombine.low %v2946_v14, %v2949_v24  ;;  %v582_v10 = vor.u32 %v581_v59, %v578_v58  ;;  %v5545_v11 = vrot.slane %v5529_v53, 9  ;;  %6506 = vmatprep.subr.bf16.mxu0 %v6966_v45  ;;  %v5461_v55 = vld [vmem:[%s7181_s10 + $0x74] sm:$0x1]  ;;  %v5532_v24 = vld [vmem:[%s7181_s10 + $0x78] sm:$0xe] }
  0x7f   : > { %v5272_v28 = vcombine.low %v564_v56, %v574_v1  ;;  %v592_v8 = vor.u32 %v591_v6, %v587_v61  ;;  %v597_v15 = vrot.slane %v595_v63, 5  ;;  %v2952_v32 = vrot.slane %v7397_v0, 5 }
  0x80   : > { %6471 = vmatmul.mubr.bf16.gmra.mrb[8].mxu0 %v5576_v7  ;;  %v583_v36 = vrot.slane %v582_v10, 4  ;;  %v2955_v62 = vrot.slane %v7409_v20, 5  ;;  %v600_v18 = vshrl.u32 %v7618_v41, 16  ;;  %v603_v26 = vshll.u32 %v7618_v41, 16 }
  0x81   : > { %6247 = vmatmul.mubr.bf16.gmra.mrb[24].mxu1 %v5272_v28  ;;  %v593_v34 = vrot.slane %v592_v8, 4  ;;  %v2953_v33 = vsel %vm7459_vm5, %v5545_v11, %v2952_v32  ;;  %v2954_v46 = vrot.slane %v2952_v32, 4  ;;  %v609_v38 = vshll.u32 %v7623_v12, 16  ;;  %6507 = vmatpush3.bf16.msra.mxu0 %v6966_v45  ;;  %v7658_v11 = vld [vmem:[%s7181_s10 + $0x7c] sm:$0xf] }
  0x82   : > { %v588_v0 = vsel %vm7213_vm2, %v583_v36, %v587_v61  ;;  %v602_v20 = vrot.slane %v600_v18, 4  ;;  %v605_v23 = vrot.slane %v603_v26, 5  ;;  %v613_v42 = vshrl.u32 %v7623_v12, 16  ;;  %6508 = vmatprep.subr.bf16.mxu0 %v6970_v13  ;;  %v7039_v36 = vld [vmem:[%s7181_s10] sm:$0xf] }
  0x83   : > { %v598_v49 = vsel %vm7213_vm2, %v593_v34, %v597_v15  ;;  %v2956_v50 = vsel %vm7459_vm5, %v2954_v46, %v2955_v62  ;;  %v611_v52 = vrot.slane %v609_v38, 5  ;;  %v619_v53 = vshll.u32 %v235_v19, 16  ;;  %v5466_v15 = vld [vmem:[%s7181_s10 + $0x88] sm:$0xf]  ;;  %v7673_v62 = vld [vmem:[%s7181_s10 + $0x4] sm:$0xf] }
  0x84   : > { %v5273_v45 = vcombine.low %v588_v0, %v598_v49  ;;  %v5577_v14 = vcombine.low %v2953_v33, %v2956_v50  ;;  %v606_v22 = vor.u32 %v605_v23, %v602_v20  ;;  %v615_v51 = vrot.slane %v613_v42, 4  ;;  %v5467_v26 = vld [vmem:[%s7181_s10 + $0x8c] sm:$0x1]  ;;  %v5470_v23 = vld [vmem:[%s7181_s10 + $0x98] sm:$0x1] }
  0x85   : > { %v621_v56 = vrot.slane %v619_v53, 5  ;;  %v5546_v57 = vrot.slane %v5530_v30, 9  ;;  %v2959_v58 = vrot.slane %v7424_v60, 5  ;;  %v2962_v59 = vrot.slane %v7433_v17, 5  ;;  %6509 = vmatpush3.bf16.msra.mxu0 %v6970_v13  ;;  %v7661_v17 = vld [vmem:[%s7181_s10 + $0x80] sm:$0x1] }
  0x86   : > { %6250 = vmatprep.mubr.bf16.mxu1 %v5273_v45  ;;  %6474 = vmatprep.mubr.bf16.mxu0 %v5577_v14  ;;  %v607_v61 = vrot.slane %v606_v22, 4  ;;  %v616_v6 = vor.u32 %v615_v51, %v611_v52  ;;  %v5547_v63 = vrot.slane %v5531_v43, 9  ;;  %v2966_v1 = vrot.slane %v5460_v39, 5  ;;  %v5533_v30 = vld [vmem:[%s7181_s10 + $0x84] sm:$0xe] }
  0x87   : > { %v2960_v7 = vsel %vm7459_vm5, %v5546_v57, %v2959_v58  ;;  %v2961_v10 = vrot.slane %v2959_v58, 4  ;;  %v2969_v60 = vrot.slane %v5461_v55, 5  ;;  %6542 = vmatprep.subr.bf16.mxu0 %v7645_v44  ;;  %v5283_v18 = vcombine.low %v7039_v36, %v7673_v62  ;;  %v5469_v39 = vld [vmem:[%s7181_s10 + $0x94] sm:$0xf]  ;;  %v5534_v42 = vld [vmem:[%s7181_s10 + $0x90] sm:$0xe] }
  0x88   : > { %v612_v19 = vsel %vm7213_vm2, %v607_v61, %v611_v52  ;;  %v617_v13 = vrot.slane %v616_v6, 4  ;;  %v2967_v28 = vsel %vm7459_vm5, %v5547_v63, %v2966_v1  ;;  %v2968_v8 = vrot.slane %v2966_v1, 4  ;;  %v5535_v50 = vld [vmem:[%s7181_s10 + $0x9c] sm:$0xe]  ;;  %v5472_v14 = vld [vmem:[%s7181_s10 + $0xa0] sm:$0xf] }
  0x89   : > { %v2963_v32 = vsel %vm7459_vm5, %v2961_v10, %v2962_v59  ;;  %v5548_v38 = vrot.slane %v5532_v24, 9  ;;  %v2973_v43 = vrot.slane %v7658_v11, 5  ;;  %v2976_v49 = vrot.slane %v7661_v17, 5  ;;  %v5473_v22 = vld [vmem:[%s7181_s10 + $0xa4] sm:$0x1] }
  0x8a   : > { %v622_v34 = vsel %vm7213_vm2, %v617_v13, %v621_v56  ;;  %v5578_v33 = vcombine.low %v2960_v7, %v2963_v32  ;;  %v2970_v46 = vsel %vm7459_vm5, %v2968_v8, %v2969_v60  ;;  %v5549_v52 = vrot.slane %v5533_v30, 9  ;;  %v5475_v59 = vld [vmem:[%s7181_s10 + $0xac] sm:$0xf]  ;;  %v7697_v61 = vld [vmem:[%s7181_s10 + $0x10] sm:$0xf] }
  0x8b   : > { %v5274_v0 = vcombine.low %v612_v19, %v622_v34  ;;  %v5579_v20 = vcombine.low %v2967_v28, %v2970_v46  ;;  %v2980_v53 = vrot.slane %v5466_v15, 5  ;;  %v2983_v45 = vrot.slane %v5467_v26, 5  ;;  %v7041_v24 = vld [vmem:[%s7181_s10 + $0xc] sm:$0xf]  ;;  %v7043_v8 = vld [vmem:[%s7181_s10 + $0x18] sm:$0xf] }
  0x8c   : > { %6475 = vmatmul.mubr.bf16.gmra.mrb[12].mxu0 %v5578_v33  ;;  %v2974_v51 = vsel %vm7459_vm5, %v5548_v38, %v2973_v43  ;;  %v2975_v55 = vrot.slane %v2973_v43, 4  ;;  %v2987_v58 = vrot.slane %v5469_v39, 5  ;;  %v5284_v6 = vcombine.low %v7041_v24, %v7697_v61  ;;  %v6961_v19 = vld [vmem:[%s8972_s1 + $0x88] sm:$0xff]   ;;  %v7709_v15 = vld [vmem:[%s7181_s10 + $0x1c] sm:$0xf] }
  0x8d   : > { %6251 = vmatmul.mubr.bf16.gmra.mrb[28].mxu1 %v5274_v0  ;;  %6478 = vmatprep.mubr.bf16.mxu0 %v5579_v20  ;;  %v2981_v56 = vsel %vm7459_vm5, %v5549_v52, %v2980_v53  ;;  %v2982_v57 = vrot.slane %v2980_v53, 4  ;;  %v5550_v1 = vrot.slane %v5534_v42, 9  ;;  %v2990_v7 = vrot.slane %v5470_v23, 5  ;;  %v5476_v30 = vld [vmem:[%s7181_s10 + $0xb0] sm:$0x1] }
  0x8e   : > { %6270 = vmatprep.mubr.bf16.mxu1 %v5283_v18  ;;  %v2977_v63 = vsel %vm7459_vm5, %v2975_v55, %v2976_v49  ;;  %v2989_v13 = vrot.slane %v2987_v58, 4  ;;  %v5551_v28 = vrot.slane %v5535_v50, 9  ;;  %v5285_v32 = vcombine.low %v7043_v8, %v7709_v15  ;;  %v5536_v34 = vld [vmem:[%s7181_s10 + $0xa8] sm:$0xe]  ;;  %v5478_v33 = vld [vmem:[%s7181_s10 + $0xb8] sm:$0xf] }
  0x8f   : > { %v5580_v10 = vcombine.low %v2974_v51, %v2977_v63  ;;  %v2984_v60 = vsel %vm7459_vm5, %v2982_v57, %v2983_v45  ;;  %v2994_v18 = vrot.slane %v5472_v14, 5  ;;  %v2997_v26 = vrot.slane %v5473_v22, 5  ;;  %v5479_v20 = vld [vmem:[%s7181_s10 + $0xbc] sm:$0x1]  ;;  %v5537_v23 = vld [vmem:[%s7181_s10 + $0xb4] sm:$0xe] }
  0x90   : > { %v5581_v36 = vcombine.low %v2981_v56, %v2984_v60  ;;  %v3001_v38 = vrot.slane %v5475_v59, 5  ;;  %v2988_v39 = vsel %vm7459_vm5, %v5550_v1, %v2987_v58  ;;  %v2991_v0 = vsel %vm7459_vm5, %v2989_v13, %v2990_v7  ;;  %v6965_v50 = vld [vmem:[%s8972_s1 + $0x90] sm:$0xff]   ;;  %v5481_v53 = vld [vmem:[%s7181_s10 + $0xc4] sm:$0xf]  ;;  %v7732_v51 = vld [vmem:[%s7181_s10 + $0x28] sm:$0xf] }
  0x91   : > { %v2996_v46 = vrot.slane %v2994_v18, 4  ;;  %v2995_v42 = vsel %vm7459_vm5, %v5551_v28, %v2994_v18  ;;  %v3008_v49 = vrot.slane %v5478_v33, 5  ;;  %v5552_v52 = vrot.slane %v5536_v34, 9  ;;  %v7045_v22 = vld [vmem:[%s7181_s10 + $0x24] sm:$0xf]  ;;  %v6969_v1 = vld [vmem:[%s8972_s1 + $0x98] sm:$0xff]  }
  0x92   : > { %v5582_v45 = vcombine.low %v2988_v39, %v2991_v0  ;;  %v3003_v14 = vrot.slane %v3001_v38, 4  ;;  %v5286_v55 = vcombine.low %v7045_v22, %v7732_v51  ;;  %v7047_v57 = vld [vmem:[%s7181_s10 + $0x30] sm:$0xf]  ;;  %v7737_v58 = vld [vmem:[%s7181_s10 + $0x34] sm:$0xf]  ;;  %v5553_v24 = vrot.slane %v5537_v23, 9 }
  0x93   : > { %v2998_v43 = vsel %vm7459_vm5, %v2996_v46, %v2997_v26  ;;  %v5287_v59 = vcombine.low %v7047_v57, %v7737_v58  ;;  %v3011_v63 = vrot.slane %v5479_v20, 5  ;;  %v5538_v7 = vld [vmem:[%s7181_s10 + $0xc0] sm:$0xe]  ;;  %v3002_v60 = vsel %vm7459_vm5, %v5552_v52, %v3001_v38  ;;  %v5482_v8 = vld [vmem:[%s7181_s10 + $0xc8] sm:$0x1]  ;;  %v6972_v22 = vld [vmem:[%s7181_s10 + $0x18] sm:$0xff]  }
  0x94   : > { %6479 = vmatmul.mubr.bf16.gmra.mrb[16].mxu0 %v5580_v10  ;;  %v5583_v56 = vcombine.low %v2995_v42, %v2998_v43  ;;  %v3015_v10 = vrot.slane %v5481_v53, 5  ;;  %v3009_v13 = vsel %vm7459_vm5, %v5553_v24, %v3008_v49  ;;  %v5554_v18 = vrot.slane %v5538_v7, 9  ;;  %v7049_v26 = vld [vmem:[%s7181_s10 + $0x3c] sm:$0xf]  ;;  %v7051_v39 = vld [vmem:[%s7181_s10 + $0x48] sm:$0xf] }
  0x95   : > { %6271 = vmatmul.mubr.bf16.vlgmr.msra.gmra.mrb[0].mxu1 %v5284_v6  ;;  %6482 = vmatprep.mubr.bf16.mxu0 %v5581_v36  ;;  %v3010_v6 = vrot.slane %v3008_v49, 4  ;;  %v3018_v38 = vrot.slane %v5482_v8, 5  ;;  %v7763_v0 = vld [vmem:[%s7181_s10 + $0x4c] sm:$0xf]  ;;  %v6986_v49 = vld [vmem:[%s8972_s1 + $0xb0] sm:$0xff]   ;;  %v2368_v52 = vshrl.u32 %v7658_v11, 16 }
  0x96   : > { %6303 = vmatpush3.bf16.msra.mxu1 %v7383_v4  ;;  %6274 = vmatprep.mubr.bf16.mxu1 %v5285_v32  ;;  %v3004_v4 = vrot.slane %v5476_v30, 5  ;;  %v6974_v32 = vld [vmem:[%s8972_s1 + $0xa0] sm:$0xff]   ;;  %v3017_v46 = vrot.slane %v3015_v10, 4  ;;  %v5289_v20 = vcombine.low %v7051_v39, %v7763_v0  ;;  %v6980_v23 = vld [vmem:[%s8972_s1 + $0xa8] sm:$0xff]   ;;  %v3016_v42 = vsel %vm7459_vm5, %v5554_v18, %v3015_v10  ;;  %v6978_v18 = vld [vmem:[%s7181_s10 + $0x30] sm:$0xff]  }
  0x97   : > { %6304 = vmatprep.subr.bf16.mxu1 %v6961_v19  ;;  %v3012_v28 = vsel %vm7459_vm5, %v3010_v6, %v3011_v63  ;;  %v7758_v30 = vld [vmem:[%s7181_s10 + $0x40] sm:$0xf]  ;;  %v7791_v57 = vrot.slane %v2368_v52, 4  ;;  %v6975_v6 = vld [vmem:[%s7181_s10 + $0x24] sm:$0xff]   ;;  %v1278_v7 = vrot.slane %v7697_v61, 5  ;;  %v2374_v8 = vshll.u32 %v7661_v17, 16 }
  0x98   : > { %v5288_v34 = vcombine.low %v7049_v26, %v7758_v30  ;;  %v5585_v33 = vcombine.low %v3009_v13, %v3012_v28  ;;  %v3019_v43 = vsel %vm7459_vm5, %v3017_v46, %v3018_v38  ;;  %v1218_v63 = vld [vmem:[%s7181_s10] sm:$0xe]  ;;  %v1219_v10 = vld [vmem:[%s7181_s10 + $0xc] sm:$0xe]  ;;  %v1285_v13 = vrot.slane %v7709_v15, 5 }
  0x99   : > { %v5586_v53 = vcombine.low %v3016_v42, %v3019_v43  ;;  %v1221_v61 = vld [vmem:[%s7181_s10 + $0x24] sm:$0xe]  ;;  %v5294_v15 = vcombine.low %v7511_v16, %v7519_v40  ;;  %v5295_v26 = vcombine.low %v7540_v2, %v7543_v3  ;;  %v5307_v17 = vrot.slane %v1218_v63, 9  ;;  %v7057_v38 = vld [vmem:[%s7181_s10 + $0x20] sm:$0x1]  ;;  %v6987_v2 = vld [vmem:[%s7181_s10 + $0x54] sm:$0xff]  }
  0x9a   : > { %6305 = vmatpush3.bf16.msra.mxu1 %v6961_v19  ;;  %v3005_v19 = vsel %vm7459_vm5, %v3003_v14, %v3004_v4  ;;  %v7780_v14 = vld [vmem:[%s7181_s10 + $0x58] sm:$0xf]  ;;  %v1287_v46 = vrot.slane %v1285_v13, 4  ;;  %v1288_v39 = vrot.slane %v7057_v38, 5  ;;  %v7058_v43 = vld [vmem:[%s7181_s10 + $0x2c] sm:$0x1] }
  0x9b   : > { %6306 = vmatprep.subr.bf16.mxu1 %v6965_v50  ;;  %v5584_v36 = vcombine.low %v3002_v60, %v3005_v19  ;;  %v7806_v60 = vld [vmem:[%s8972_s1 + $0xc0] sm:$0xff]   ;;  %v1220_v19 = vld [vmem:[%s7181_s10 + $0x18] sm:$0xe]  ;;  %v7061_v38 = vld [vmem:[%s7181_s10 + $0x50] sm:$0x1]  ;;  %v1320_v16 = vrot.slane %v7780_v14, 5 }
  0x9c   : > { %6483 = vmatmul.mubr.bf16.gmra.mrb[20].mxu0 %v5582_v45  ;;  %v7053_v45 = vld [vmem:[%s7181_s10 + $0x54] sm:$0xf]  ;;  %v7929_v40 = vld [vmem:[%s7181_s10 + $0x64] sm:$0xf] }
  0x9d   : > { %6275 = vmatmul.mubr.bf16.gmra.mrb[4].mxu1 %v5286_v55  ;;  %6486 = vmatprep.mubr.bf16.mxu0 %v5583_v56  ;;  %v5290_v4 = vcombine.low %v7053_v45, %v7780_v14  ;;  %v5291_v55 = vcombine.low %v7437_v25, %v7440_v35  ;;  %v6992_v56 = vld [vmem:[%s8972_s1 + $0xb8] sm:$0xff]   ;;  %v7056_v25 = vld [vmem:[%s7181_s10 + $0x14] sm:$0x1]  ;;  %v6990_v3 = vld [vmem:[%s7181_s10 + $0x60] sm:$0xff]  }
  0x9e   : > { %6278 = vmatprep.mubr.bf16.mxu1 %v5287_v59  ;;  %6307 = vmatpush3.bf16.msra.mxu1 %v6965_v50  ;;  %v2364_v50 = vshll.u32 %v7658_v11, 16  ;;  %v7794_v59 = vld [vmem:[%s7181_s10 + $0x8] sm:$0x1]  ;;  %v1281_v35 = vrot.slane %v7056_v25, 5 }
  0x9f   : > { %6308 = vmatprep.subr.bf16.mxu1 %v6969_v1  ;;  %v1274_v24 = vrot.slane %v7794_v59, 5 }
  0xa0   : > { %v7789_v11 = vrot.slane %v2364_v50, 5 }
  0xa2   : > { %6309 = vmatpush3.bf16.msra.mxu1 %v6969_v1  ;;  %v1271_v1 = vrot.slane %v7673_v62, 5  ;;  %v5292_v62 = vcombine.low %v7455_v5, %v7467_v21  ;;  %v5308_v21 = vrot.slane %v1219_v10, 9  ;;  %v5667_v10 = vld [vmem:[%s7181_s10 + $0x18] sm:$0xf] }
  0xa3   : > { %6310 = vmatprep.subr.bf16.mxu1 %v6974_v32 }
  0xa4   : > { %6487 = vmatmul.mubr.bf16.gmra.mrb[24].mxu0 %v5584_v36  ;;  %v5293_v36 = vcombine.low %v7478_v47, %v7489_v54  ;;  %v1273_v5 = vrot.slane %v1271_v1, 4  ;;  %v6982_v47 = vld [vmem:[%s8972_s1 + $0x1c8] sm:$0xff]   ;;  %v5309_v54 = vrot.slane %v1220_v19, 9  ;;  %v7849_v59 = vsel %vm7459_vm5, %v5307_v17, %v1271_v1  ;;  %v5668_v19 = vld [vmem:[%s7181_s10 + $0x1c] sm:$0xf] }
  0xa5   : > { %6279 = vmatmul.mubr.bf16.gmra.mrb[8].mxu1 %v5288_v34  ;;  %6490 = vmatprep.mubr.bf16.mxu0 %v5585_v33  ;;  %v1299_v34 = vrot.slane %v7737_v58, 5  ;;  %v1280_v33 = vrot.slane %v1278_v7, 4  ;;  %v5310_v58 = vrot.slane %v1221_v61, 9  ;;  %v1313_v1 = vrot.slane %v7763_v0, 5  ;;  %v6984_v0 = vld [vmem:[%s7181_s10 + $0x48] sm:$0xff]  }
  0xa6   : > { %6282 = vmatprep.mubr.bf16.mxu1 %v5289_v20  ;;  %6311 = vmatpush3.bf16.msra.mxu1 %v6974_v32  ;;  %v1292_v32 = vrot.slane %v7732_v51, 5  ;;  %v1222_v51 = vld [vmem:[%s7181_s10 + $0x30] sm:$0xe]  ;;  %v5296_v20 = vcombine.low %v7561_v31, %v7570_v48  ;;  %v7857_v25 = vsel %vm7459_vm5, %v1273_v5, %v1274_v24  ;;  %v7865_v63 = vsel %vm7459_vm5, %v5309_v54, %v1285_v13  ;;  %v1224_v13 = vld [vmem:[%s7181_s10 + $0x48] sm:$0xe] }
  0xa7   : > { %6312 = vmatprep.subr.bf16.mxu1 %v6980_v23  ;;  %v5311_v50 = vrot.slane %v1222_v51, 9  ;;  %v1301_v52 = vrot.slane %v1299_v34, 4  ;;  %v3778_v5 = vshrl.u32 %v5667_v10, 16  ;;  %v3791_v51 = vshrl.u32 %v5668_v19, 16  ;;  %v6993_v48 = vld [vmem:[%s7181_s10 + $0x6c] sm:$0xff]  }
  0xa8   : > { %v1294_v42 = vrot.slane %v1292_v32, 4  ;;  %v7877_v24 = vsel %vm7459_vm5, %v5310_v58, %v1292_v32  ;;  %v7060_v32 = vld [vmem:[%s7181_s10 + $0x44] sm:$0x1]  ;;  %v5313_v54 = vrot.slane %v1224_v13, 9  ;;  %v5671_v13 = vld [vmem:[%s7181_s10 + $0x28] sm:$0xf] }
  0xa9   : > { %v7887_v61 = vsel %vm7459_vm5, %v5311_v50, %v1299_v34  ;;  %v1309_v17 = vrot.slane %v7060_v32, 5  ;;  %v5669_v50 = vld [vmem:[%s7181_s10 + $0x20] sm:$0x1]  ;;  %v1226_v32 = vld [vmem:[%s7181_s10 + $0x60] sm:$0xe] }
  0xaa   : > { %6313 = vmatpush3.bf16.msra.mxu1 %v6980_v23  ;;  %v5297_v23 = vcombine.low %v7595_v27, %v7598_v29 }
  0xab   : > { %6314 = vmatprep.subr.bf16.mxu1 %v6986_v49 }
  0xac   : > { %6491 = vmatmul.mubr.bf16.gmra.mrb[28].mxu0 %v5586_v53  ;;  %v7059_v53 = vld [vmem:[%s7181_s10 + $0x38] sm:$0x1] }
  0xad   : > { %6283 = vmatmul.mubr.bf16.gmra.mrb[12].mxu1 %v5290_v4  ;;  %6510 = vmatprep.mubr.bf16.mxu0 %v6972_v22  ;;  %v1302_v45 = vrot.slane %v7059_v53, 5  ;;  %v1223_v4 = vld [vmem:[%s7181_s10 + $0x3c] sm:$0xe]  ;;  %v1306_v22 = vrot.slane %v7758_v30, 5  ;;  %v7853_v30 = vsel %vm7459_vm5, %v5308_v21, %v1278_v7  ;;  %v3781_v21 = vshll.u32 %v5667_v10, 16  ;;  %v6998_v53 = vld [vmem:[%s8972_s1 + $0x1e0] sm:$0xff]  }
  0xae   : > { %6286 = vmatprep.mubr.bf16.mxu1 %v5291_v55  ;;  %6315 = vmatpush3.bf16.msra.mxu1 %v6986_v49  ;;  %v1295_v49 = vrot.slane %v7058_v43, 5  ;;  %v7840_v55 = vrot.slane %v2374_v8, 5  ;;  %v6981_v7 = vld [vmem:[%s7181_s10 + $0x3c] sm:$0xff]   ;;  %v7873_v8 = vsel %vm7459_vm5, %v1287_v46, %v1288_v39  ;;  %v1315_v46 = vrot.slane %v1313_v1, 4  ;;  %v5673_v43 = vld [vmem:[%s7181_s10 + $0x30] sm:$0xf] }
  0xaf   : > { %6316 = vmatprep.subr.bf16.mxu1 %v6992_v56  ;;  %v1316_v39 = vrot.slane %v7061_v38, 5  ;;  %v3780_v10 = vrot.slane %v3778_v5, 4 }
  0xb0   : > { %8993 = vst [vmem:[#allocation2_spill] sm:$0xff] %v7840_v55 }
  0xb2   : > { %6317 = vmatpush3.bf16.msra.mxu1 %v6992_v56  ;;  %v6988_v56 = vld [vmem:[%s8972_s1 + $0x1d0] sm:$0xff]  }
  0xb3   : > { %6350 = vmatprep.subr.bf16.mxu1 %v7806_v60 }
  0xb4   : > { %6511 = vmatmul.mubr.bf16.vlgmr.msra.gmra.mrb[0].mxu0 %v6975_v6  ;;  %v7861_v6 = vsel %vm7459_vm5, %v1280_v33, %v1281_v35  ;;  %v7881_v35 = vsel %vm7459_vm5, %v1294_v42, %v1295_v49  ;;  %v3787_v33 = vshll.u32 %v5668_v19, 16  ;;  %v3783_v19 = vrot.slane %v3781_v21, 5  ;;  %v1227_v21 = vld [vmem:[%s7181_s10 + $0x6c] sm:$0xe] }
  0xb5   : > { %6287 = vmatmul.mubr.bf16.gmra.mrb[16].mxu1 %v5292_v62  ;;  %6543 = vmatpush3.bf16.msra.mxu0 %v7645_v44  ;;  %v5312_v62 = vrot.slane %v1223_v4, 9  ;;  %v5316_v58 = vrot.slane %v1227_v21, 9 }
  0xb6   : > { %6290 = vmatprep.mubr.bf16.mxu1 %v5293_v36  ;;  %6514 = vmatprep.mubr.bf16.mxu0 %v6978_v18  ;;  %v7891_v36 = vsel %vm7459_vm5, %v1301_v52, %v1302_v45  ;;  %v1308_v18 = vrot.slane %v1306_v22, 4  ;;  %v5670_v52 = vld [vmem:[%s7181_s10 + $0x24] sm:$0xf]  ;;  %v3815_v45 = vshrl.u32 %v5671_v13, 16 }
  0xb7   : > { %6544 = vmatprep.subr.bf16.mxu0 %v6982_v47  ;;  %v7908_v49 = vsel %vm7459_vm5, %v5312_v62, %v1306_v22  ;;  %v7925_v22 = vld [vmem:[%s7181_s10 + $0x54] sm:$0xe]  ;;  %v3793_v62 = vrot.slane %v3791_v51, 4  ;;  %v3802_v38 = vshrl.u32 %v5670_v52, 16  ;;  %v3805_v28 = vshll.u32 %v5670_v52, 16 }
  0xb8   : > { %v7922_v4 = vsel %vm7459_vm5, %v1308_v18, %v1309_v17  ;;  %v3797_v17 = vshll.u32 %v5669_v50, 16  ;;  %v5314_v5 = vrot.slane %v7925_v22, 9  ;;  %v7002_v50 = vld [vmem:[%s8972_s1 + $0x1e8] sm:$0xff]   ;;  %v1322_v52 = vrot.slane %v1320_v16, 4 }
  0xb9   : > { %6545 = vmatpush3.bf16.msra.mxu0 %v6982_v47  ;;  %v6994_v47 = vld [vmem:[%s8972_s1 + $0x1d8] sm:$0xff]   ;;  %v3784_v22 = vor.u32 %v3783_v19, %v3780_v10  ;;  %v3804_v34 = vrot.slane %v3802_v38, 4  ;;  %v3807_v44 = vrot.slane %v3805_v28, 5  ;;  %v7066_v10 = vld [vmem:[%s7181_s10 + $0x74] sm:$0x1]  ;;  %v3817_v28 = vrot.slane %v3815_v45, 4 }
  0xba   : > { %6546 = vmatprep.subr.bf16.mxu0 %v6988_v56  ;;  %v7963_v42 = vrot.slane %v3797_v17, 5  ;;  %v1337_v19 = vrot.slane %v7066_v10, 5  ;;  %v3826_v38 = vshrl.u32 %v5673_v43, 16  ;;  %v7988_v27 = vsel %vm7459_vm5, %v5314_v5, %v1320_v16 }
  0xbb   : > { %v3785_v21 = vrot.slane %v3784_v22, 4 }
  0xbc   : > { %6515 = vmatmul.mubr.bf16.gmra.mrb[4].mxu0 %v6981_v7  ;;  %v7935_v7 = vrot.slane %v3787_v33, 5  ;;  %v7064_v33 = vld [vmem:[%s7181_s10 + $0x70] sm:$0xf] }
  0xbd   : > { %6291 = vmatmul.mubr.bf16.gmra.mrb[20].mxu1 %v5294_v15  ;;  %6518 = vmatprep.mubr.bf16.mxu0 %v6984_v0  ;;  %v1327_v15 = vrot.slane %v7929_v40, 5  ;;  %v7063_v0 = vld [vmem:[%s7181_s10 + $0x5c] sm:$0x1]  ;;  %v1334_v51 = vrot.slane %v7064_v33, 5 }
  0xbe   : > { %6294 = vmatprep.mubr.bf16.mxu1 %v5295_v26  ;;  %6547 = vmatpush3.bf16.msra.mxu0 %v6988_v56  ;;  %v1323_v18 = vrot.slane %v7063_v0, 5  ;;  %v7944_v26 = vsel %vm7459_vm5, %v5313_v54, %v1313_v1  ;;  %v7948_v56 = vsel %vm7459_vm5, %v1315_v46, %v1316_v39  ;;  %v7065_v1 = vld [vmem:[%s7181_s10 + $0x68] sm:$0x1]  ;;  %v3811_v0 = vshll.u32 %v5671_v13, 16  ;;  %v7010_v40 = vld [vmem:[%s8972_s1 + $0x1f8] sm:$0xff]  }
  0xbf   : > { %6548 = vmatprep.subr.bf16.mxu0 %v6994_v47  ;;  %v1330_v54 = vrot.slane %v7065_v1, 5  ;;  %v5315_v46 = vrot.slane %v1226_v32, 9  ;;  %v1329_v39 = vrot.slane %v1327_v15, 4  ;;  %v3794_v33 = vor.u32 %v3793_v62, %v7935_v7  ;;  %v5674_v1 = vld [vmem:[%s7181_s10 + $0x34] sm:$0xf] }
  0xc0   : > { %v1336_v32 = vrot.slane %v1334_v51, 4  ;;  %v5672_v62 = vld [vmem:[%s7181_s10 + $0x2c] sm:$0x1]  ;;  %v7975_v17 = vrot.slane %v3811_v0, 5  ;;  %v3835_v13 = vshll.u32 %v5674_v1, 16  ;;  %v3839_v31 = vshrl.u32 %v5674_v1, 16 }
  0xc1   : > { %v3795_v10 = vrot.slane %v3794_v33, 4  ;;  %v7992_v29 = vsel %vm7459_vm5, %v1322_v52, %v1323_v18  ;;  %v7999_v45 = vsel %vm7459_vm5, %v5315_v46, %v1327_v15  ;;  %v8003_v14 = vsel %vm7459_vm5, %v1329_v39, %v1330_v54  ;;  %v1228_v18 = vld [vmem:[%s7181_s10 + $0x78] sm:$0xe] }
  0xc2   : > { %6549 = vmatpush3.bf16.msra.mxu0 %v6994_v47  ;;  %v8007_v16 = vsel %vm7459_vm5, %v5316_v58, %v1334_v51  ;;  %v8017_v15 = vsel %vm7459_vm5, %v1336_v32, %v1337_v19  ;;  %v3818_v5 = vor.u32 %v3817_v28, %v7975_v17  ;;  %v3828_v52 = vrot.slane %v3826_v38, 4  ;;  %v5676_v58 = vld [vmem:[%s7181_s10 + $0x3c] sm:$0xf]  ;;  %v5677_v51 = vld [vmem:[%s7181_s10 + $0x40] sm:$0xf] }
  0xc3   : > { %6550 = vmatprep.subr.bf16.mxu0 %v6998_v53  ;;  %v3790_v0 = vsel %vm7213_vm2, %v3785_v21, %v7935_v7  ;;  %v3800_v46 = vsel %vm7213_vm2, %v3795_v10, %v7963_v42  ;;  %v8028_v39 = vrot.slane %v3835_v13, 5  ;;  %v3841_v22 = vrot.slane %v3839_v31, 4  ;;  %v7068_v19 = vld [vmem:[%s7181_s10 + $0x80] sm:$0x1]  ;;  %v8187_v47 = vld [vmem:[%s7181_s10 + $0x68] sm:$0x1] }
  0xc4   : > { %6519 = vmatmul.mubr.bf16.gmra.mrb[8].mxu0 %v6987_v2  ;;  %v3829_v2 = vshll.u32 %v5673_v43, 16  ;;  %v3821_v43 = vshll.u32 %v5672_v62, 16  ;;  %v5317_v32 = vrot.slane %v1228_v18, 9  ;;  %v1229_v62 = vld [vmem:[%s7181_s10 + $0x84] sm:$0xe]  ;;  %v3850_v28 = vshrl.u32 %v5676_v58, 16 }
  0xc5   : > { %6295 = vmatmul.mubr.bf16.gmra.mrb[24].mxu1 %v5296_v20  ;;  %6522 = vmatprep.mubr.bf16.mxu0 %v6990_v3  ;;  %v7006_v20 = vld [vmem:[%s8972_s1 + $0x1f0] sm:$0xff]   ;;  %v7067_v3 = vld [vmem:[%s7181_s10 + $0x7c] sm:$0xf]  ;;  %v3853_v7 = vshll.u32 %v5676_v58, 16  ;;  %v3859_v38 = vshll.u32 %v5677_v51, 16  ;;  %v8994_v42 = vcombine.low %v7618_v41, %v7623_v12  ;;  %v8039_v13 = vrot.slane %v3818_v5, 4 }
  0xc6   : > { %6298 = vmatprep.mubr.bf16.mxu1 %v5297_v23  ;;  %6551 = vmatpush3.bf16.msra.mxu0 %v6998_v53  ;;  %v3808_v23 = vor.u32 %v3807_v44, %v3804_v34  ;;  %v6995_v53 = vld [vmem:[%s7181_s10 + $0x78] sm:$0xff]   ;;  %v1341_v44 = vrot.slane %v7067_v3, 5  ;;  %v3831_v54 = vrot.slane %v3829_v2, 5  ;;  %v8032_v1 = vrot.slane %v3821_v43, 5  ;;  %v8044_v21 = vld [vmem:[%s8972_s1 + $0x200] sm:$0xff]   ;;  %9002 = vst [vmem:[#allocation5_spill] sm:$0xff] %v8187_v47 }
  0xc7   : > { %6552 = vmatprep.subr.bf16.mxu0 %v7002_v50  ;;  %v5675_v34 = vld [vmem:[%s7181_s10 + $0x38] sm:$0x1]  ;;  %v3863_v2 = vshrl.u32 %v5677_v51, 16  ;;  %v6997_v43 = vld [vmem:[%s7181_s10 + $0x84] sm:$0xff]   ;;  %v3842_v12 = vor.u32 %v3841_v22, %v8028_v39  ;;  %v3855_v58 = vrot.slane %v3853_v7, 5  ;;  %v8066_v51 = vrot.slane %v3859_v38, 5 }
  0xc8   : > { %v8030_v33 = vrot.slane %v3808_v23, 4  ;;  %v1343_v10 = vrot.slane %v1341_v44, 4  ;;  %v3832_v31 = vor.u32 %v3831_v54, %v3828_v52  ;;  %v8995_v23 = vcombine.low %v7849_v59, %v7857_v25  ;;  %v7069_v18 = vld [vmem:[%s7181_s10 + $0x88] sm:$0xf]  ;;  %v5678_v5 = vld [vmem:[%s7181_s10 + $0x44] sm:$0x1] }
  0xc9   : > { %v1348_v3 = vrot.slane %v7069_v18, 5  ;;  %v8057_v59 = vcombine.low %v3790_v0, %v3800_v46  ;;  %v5679_v52 = vld [vmem:[%s7181_s10 + $0x48] sm:$0xf]  ;;  %v3852_v54 = vrot.slane %v3850_v28, 4  ;;  %v3865_v22 = vrot.slane %v3863_v2, 4 }
  0xca   : > { %6553 = vmatpush3.bf16.msra.mxu0 %v7002_v50  ;;  %v1344_v50 = vrot.slane %v7068_v19, 5  ;;  %v6999_v19 = vld [vmem:[%s7181_s10 + $0x90] sm:$0xff]   ;;  %v3814_v0 = vsel %vm7213_vm2, %v8030_v33, %v7975_v17  ;;  %v3833_v46 = vrot.slane %v3832_v31, 4  ;;  %v3824_v28 = vsel %vm7213_vm2, %v8039_v13, %v8032_v1  ;;  %v8088_v33 = vld [vmem:[%s7181_s10 + $0x58] sm:$0xf]  ;;  %v7000_v31 = vld [vmem:[%s8972_s1 + $0xc8] sm:$0xff]  }
  0xcb   : > { %6554 = vmatprep.subr.bf16.mxu0 %v7006_v20  ;;  %v3843_v38 = vrot.slane %v3842_v12, 4  ;;  %v1350_v2 = vrot.slane %v1348_v3, 4  ;;  %v5682_v17 = vld [vmem:[%s7181_s10 + $0x54] sm:$0xf]  ;;  %v3869_v1 = vshll.u32 %v5678_v5, 16  ;;  %v3874_v13 = vshrl.u32 %v5679_v52, 16 }
  0xcc   : > { %6523 = vmatmul.mubr.bf16.gmra.mrb[12].mxu0 %v6993_v48  ;;  %v3845_v48 = vshll.u32 %v5675_v34, 16  ;;  %v8084_v7 = vsel %vm7459_vm5, %v1343_v10, %v1344_v50  ;;  %v3877_v50 = vshll.u32 %v5679_v52, 16  ;;  %v3856_v10 = vor.u32 %v3855_v58, %v3852_v54  ;;  %v7001_v54 = vld [vmem:[%s7181_s10 + $0x9c] sm:$0xff]   ;;  %v7075_v41 = vld [vmem:[%s7181_s10 + $0xac] sm:$0xf] }
  0xcd   : > { %6299 = vmatmul.mubr.bf16.gmra.mrb[28].mxu1 %v8994_v42  ;;  %6526 = vmatprep.mubr.bf16.mxu0 %v6995_v53  ;;  %v5318_v53 = vrot.slane %v1229_v62, 9  ;;  %v7070_v42 = vld [vmem:[%s7181_s10 + $0x8c] sm:$0x1]  ;;  %v3907_v5 = vshll.u32 %v8088_v33, 16  ;;  %v8997_v52 = vcombine.low %v7865_v63, %v7873_v8  ;;  %v8124_v63 = vld [vmem:[%s7181_s10 + $0x50] sm:$0x1] }
  0xce   : > { %6318 = vmatprep.mubr.bf16.mxu1 %v8995_v23  ;;  %6555 = vmatpush3.bf16.msra.mxu0 %v7006_v20  ;;  %v8063_v20 = vsel %vm7459_vm5, %v5317_v32, %v1341_v44  ;;  %v3847_v62 = vrot.slane %v3845_v48, 5  ;;  %v1351_v23 = vrot.slane %v7070_v42, 5  ;;  %v1230_v44 = vld [vmem:[%s7181_s10 + $0x90] sm:$0xe]  ;;  %v8076_v32 = vld [vmem:[%s7181_s10 + $0x4c] sm:$0xf]  ;;  %v3866_v48 = vor.u32 %v3865_v22, %v8066_v51 }
  0xcf   : > { %6556 = vmatprep.subr.bf16.mxu0 %v7010_v40  ;;  %v3883_v12 = vshll.u32 %v8076_v32, 16  ;;  %v3887_v18 = vshrl.u32 %v8076_v32, 16  ;;  %v8996_v42 = vcombine.low %v7853_v30, %v7861_v6  ;;  %v7004_v30 = vld [vmem:[%s8972_s1 + $0xd0] sm:$0xff]   ;;  %v3838_v6 = vsel %vm7213_vm2, %v3833_v46, %v8028_v39  ;;  %v7003_v8 = vld [vmem:[%s7181_s10 + $0xa8] sm:$0xff]   ;;  %v8131_v39 = vld [vmem:[%s7181_s10 + $0x5c] sm:$0x1] }
  0xd0   : > { %v3848_v58 = vsel %vm7213_vm2, %v3843_v38, %v3847_v62  ;;  %v5319_v22 = vrot.slane %v1230_v44, 9  ;;  %v3879_v25 = vrot.slane %v3877_v50, 5  ;;  %8998 = vst [vmem:[#allocation3_spill] sm:$0xff] %v8131_v39  ;;  %v3857_v46 = vrot.slane %v3856_v10, 4 }
  0xd1   : > { %v3867_v62 = vrot.slane %v3866_v48, 4  ;;  %v8133_v38 = vrot.slane %v3883_v12, 5  ;;  %v8135_v34 = vrot.slane %v3907_v5, 5  ;;  %v8140_v50 = vcombine.low %v3814_v0, %v3824_v28  ;;  %v5685_v28 = vld [vmem:[%s7181_s10 + $0x60] sm:$0xf] }
  0xd2   : > { %6557 = vmatpush3.bf16.msra.mxu0 %v7010_v40  ;;  %v8096_v40 = vsel %vm7459_vm5, %v5318_v53, %v1348_v3  ;;  %v3898_v53 = vshrl.u32 %v5682_v17, 16  ;;  %v3901_v3 = vshll.u32 %v5682_v17, 16  ;;  %v7071_v17 = vld [vmem:[%s7181_s10 + $0x94] sm:$0xf]  ;;  %v8144_v48 = vcombine.low %v3838_v6, %v3848_v58 }
  0xd3   : > { %6590 = vmatprep.subr.bf16.mxu0 %v8044_v21  ;;  %v3893_v0 = vshll.u32 %v8124_v63, 16  ;;  %v3862_v6 = vsel %vm7213_vm2, %v3857_v46, %v8066_v51  ;;  %v9001_v46 = vcombine.low %v7887_v61, %v7891_v36 }
  0xd4   : > { %6527 = vmatmul.mubr.bf16.gmra.mrb[16].mxu0 %v6997_v43  ;;  %v3911_v43 = vshrl.u32 %v8088_v33, 16  ;;  %v3900_v44 = vrot.slane %v3898_v53, 4  ;;  %v7072_v53 = vld [vmem:[%s7181_s10 + $0x98] sm:$0x1] }
  0xd5   : > { %6319 = vmatmul.mubr.bf16.vlgmr.msra.gmra.mrb[0].mxu1 %v8996_v42  ;;  %6530 = vmatprep.mubr.bf16.mxu0 %v6999_v19  ;;  %v8127_v19 = vrot.slane %v3869_v1, 5  ;;  %v1355_v42 = vrot.slane %v7071_v17, 5  ;;  %v7073_v17 = vld [vmem:[%s7181_s10 + $0xa0] sm:$0xf]  ;;  %v3895_v36 = vrot.slane %v3893_v0, 5 }
  0xd6   : > { %6351 = vmatpush3.bf16.msra.mxu1 %v7806_v60  ;;  %6322 = vmatprep.mubr.bf16.mxu1 %v8997_v52  ;;  %v8121_v60 = vsel %vm7459_vm5, %v1350_v2, %v1351_v23  ;;  %v3876_v52 = vrot.slane %v3874_v13, 4  ;;  %v3889_v23 = vrot.slane %v3887_v18, 4  ;;  %v3903_v2 = vrot.slane %v3901_v3, 5  ;;  %v7008_v13 = vld [vmem:[%s8972_s1 + $0xd8] sm:$0xff]  }
  0xd7   : > { %6352 = vmatprep.subr.bf16.mxu1 %v7000_v31  ;;  %v3913_v1 = vrot.slane %v3911_v43, 4  ;;  %v1231_v18 = vld [vmem:[%s7181_s10 + $0x9c] sm:$0xe]  ;;  %v1358_v3 = vrot.slane %v7072_v53, 5  ;;  %v8157_v43 = vld [vmem:[%s7181_s10 + $0x64] sm:$0xf] }
  0xd8   : > { %v3880_v5 = vor.u32 %v3879_v25, %v3876_v52  ;;  %8999 = vst [vmem:[#allocation4_spill] sm:$0xff] %v8157_v43  ;;  %v3890_v58 = vor.u32 %v3889_v23, %v8133_v38  ;;  %v1362_v12 = vrot.slane %v7073_v17, 5  ;;  %v9000_v25 = vcombine.low %v7877_v24, %v7881_v35  ;;  %v7005_v23 = vld [vmem:[%s7181_s10 + $0xb4] sm:$0xff]   ;;  %v7011_v24 = vld [vmem:[%s8972_s1 + $0xe0] sm:$0xff]   ;;  %v5688_v17 = vld [vmem:[%s7181_s10 + $0x6c] sm:$0xf] }
  0xd9   : > { %v1357_v52 = vrot.slane %v1355_v42, 4  ;;  %v3904_v53 = vor.u32 %v3903_v2, %v3900_v44  ;;  %v3914_v51 = vor.u32 %v3913_v1, %v8135_v34  ;;  %v3922_v35 = vshrl.u32 %v5685_v28, 16  ;;  %v7074_v2 = vld [vmem:[%s7181_s10 + $0xa4] sm:$0x1] }
  0xda   : > { %6353 = vmatpush3.bf16.msra.mxu1 %v7000_v31  ;;  %v8151_v31 = vsel %vm7459_vm5, %v5319_v22, %v1355_v42  ;;  %v3917_v22 = vshll.u32 %v8131_v39, 16  ;;  %v3935_v42 = vshrl.u32 %v8157_v43, 16  ;;  %v3881_v61 = vrot.slane %v3880_v5, 4  ;;  %v8326_v39 = vld [vmem:[%s7181_s10 + $0x98] sm:$0x1] }
  0xdb   : > { %6354 = vmatprep.subr.bf16.mxu1 %v7004_v30  ;;  %v5320_v44 = vrot.slane %v1231_v18, 9  ;;  %v1365_v1 = vrot.slane %v7074_v2, 5  ;;  %v3905_v5 = vrot.slane %v3904_v53, 4  ;;  %v3915_v18 = vrot.slane %v3914_v51, 4  ;;  %9015 = vst [vmem:[#allocation14_spill] sm:$0xff] %v8326_v39 }
  0xdc   : > { %6531 = vmatmul.mubr.bf16.gmra.mrb[20].mxu0 %v7001_v54  ;;  %v3872_v54 = vsel %vm7213_vm2, %v3867_v62, %v8127_v19  ;;  %v3931_v19 = vshll.u32 %v8157_v43, 16  ;;  %v7007_v62 = vld [vmem:[%s7181_s10 + $0xc0] sm:$0xff]   ;;  %v3919_v10 = vrot.slane %v3917_v22, 5  ;;  %v8193_v43 = vsel %vm7459_vm5, %v1357_v52, %v1358_v3 }
  0xdd   : > { %6323 = vmatmul.mubr.bf16.gmra.mrb[4].mxu1 %v9000_v25  ;;  %6534 = vmatprep.mubr.bf16.mxu0 %v7003_v8  ;;  %v3925_v8 = vshll.u32 %v5685_v28, 16  ;;  %v3891_v25 = vrot.slane %v3890_v58, 4  ;;  %v1369_v28 = vrot.slane %v7075_v41, 5  ;;  %v8189_v55 = vcombine.low %v3862_v6, %v3872_v54  ;;  %v7013_v41 = vld [vmem:[%s8972_s1 + $0xe8] sm:$0xff]  }
  0xde   : > { %6326 = vmatprep.mubr.bf16.mxu1 %v9001_v46  ;;  %6355 = vmatpush3.bf16.msra.mxu1 %v7004_v30  ;;  %v1232_v30 = vld [vmem:[%s7181_s10 + $0xa8] sm:$0xe]  ;;  %v1364_v46 = vrot.slane %v1362_v12, 4  ;;  %v3924_v0 = vrot.slane %v3922_v35, 4  ;;  %v8195_v58 = vrot.slane %v3931_v19, 5  ;;  %v3937_v22 = vrot.slane %v3935_v42, 4 }
  0xdf   : > { %6356 = vmatprep.subr.bf16.mxu1 %v7008_v13  ;;  %v3927_v2 = vrot.slane %v3925_v8, 5  ;;  %v3886_v3 = vsel %vm7213_vm2, %v3881_v61, %v8133_v38  ;;  %v8205_v6 = vsel %vm7459_vm5, %v5320_v44, %v1362_v12  ;;  %v3946_v54 = vshrl.u32 %v5688_v17, 16  ;;  %v7076_v38 = vld [vmem:[%s7181_s10 + $0xb0] sm:$0x1]  ;;  %v1233_v19 = vld [vmem:[%s7181_s10 + $0xb4] sm:$0xe] }
  0xe0   : > { %v3949_v52 = vshll.u32 %v5688_v17, 16  ;;  %v3896_v53 = vsel %vm7213_vm2, %v3891_v25, %v3895_v36  ;;  %v8214_v51 = vsel %vm7459_vm5, %v1364_v46, %v1365_v1  ;;  %v5321_v35 = vrot.slane %v1232_v30, 9  ;;  %v8236_v30 = vld [vmem:[%s7181_s10 + $0x74] sm:$0x1]  ;;  %v7077_v25 = vld [vmem:[%s7181_s10 + $0xb8] sm:$0xf] }
  0xe1   : > { %v1372_v8 = vrot.slane %v7076_v38, 5  ;;  %v9004_v12 = vcombine.low %v7908_v49, %v7922_v4  ;;  %v3910_v42 = vsel %vm7213_vm2, %v3905_v5, %v8135_v34  ;;  %v3920_v61 = vsel %vm7213_vm2, %v3915_v18, %v3919_v10  ;;  %v7009_v4 = vld [vmem:[%s7181_s10 + $0xcc] sm:$0xff]   ;;  %9006 = vst [vmem:[#allocation7_spill] sm:$0xff] %v8236_v30  ;;  %v5694_v38 = vld [vmem:[%s7181_s10 + $0x84] sm:$0xf] }
  0xe2   : > { %6357 = vmatpush3.bf16.msra.mxu1 %v7008_v13  ;;  %v8208_v13 = vld [vmem:[%s7181_s10 + $0x70] sm:$0xf]  ;;  %v1371_v36 = vrot.slane %v1369_v28, 4  ;;  %v3941_v44 = vshll.u32 %v8187_v47, 16  ;;  %v9005_v49 = vcombine.low %v7944_v26, %v7948_v56  ;;  %v3938_v1 = vor.u32 %v3937_v22, %v8195_v58  ;;  %v8253_v22 = vld [vmem:[%s7181_s10 + $0x7c] sm:$0xf] }
  0xe3   : > { %6358 = vmatprep.subr.bf16.mxu1 %v7011_v24  ;;  %9003 = vst [vmem:[#allocation6_spill] sm:$0xff] %v8208_v13  ;;  %v3955_v34 = vshll.u32 %v8208_v13, 16  ;;  %v3959_v10 = vshrl.u32 %v8208_v13, 16  ;;  %v5322_v17 = vrot.slane %v1233_v19, 9  ;;  %v1376_v46 = vrot.slane %v7077_v25, 5  ;;  %9007 = vst [vmem:[#allocation8_spill] sm:$0xff] %v8253_v22 }
  0xe4   : > { %6535 = vmatmul.mubr.bf16.gmra.mrb[24].mxu0 %v7005_v23  ;;  %v7015_v23 = vld [vmem:[%s8972_s1 + $0xf0] sm:$0xff]   ;;  %v3948_v26 = vrot.slane %v3946_v54, 4  ;;  %v3951_v56 = vrot.slane %v3949_v52, 5  ;;  %v8244_v18 = vcombine.low %v3886_v3, %v3896_v53  ;;  %v8256_v19 = vcombine.low %v3910_v42, %v3920_v61  ;;  %v7078_v3 = vld [vmem:[%s7181_s10 + $0xbc] sm:$0x1] }
  0xe5   : > { %6327 = vmatmul.mubr.bf16.gmra.mrb[8].mxu1 %v9004_v12  ;;  %6538 = vmatprep.mubr.bf16.mxu0 %v7007_v62  ;;  %v3928_v62 = vor.u32 %v3927_v2, %v3924_v0  ;;  %v8250_v2 = vsel %vm7459_vm5, %v5321_v35, %v1369_v28  ;;  %v8260_v54 = vsel %vm7459_vm5, %v1371_v36, %v1372_v8  ;;  %v8262_v52 = vrot.slane %v3941_v44, 5  ;;  %v7017_v12 = vld [vmem:[%s8972_s1 + $0xf8] sm:$0xff]   ;;  %v8269_v28 = vld [vmem:[%s7181_s10 + $0x88] sm:$0xf] }
  0xe6   : > { %6330 = vmatprep.mubr.bf16.mxu1 %v9005_v49  ;;  %6359 = vmatpush3.bf16.msra.mxu1 %v7011_v24  ;;  %v5691_v24 = vld [vmem:[%s7181_s10 + $0x78] sm:$0xf]  ;;  %v1379_v53 = vrot.slane %v7078_v3, 5  ;;  %9008 = vst [vmem:[#allocation9_spill] sm:$0xff] %v8269_v28  ;;  %v8273_v42 = vrot.slane %v3938_v1, 4  ;;  %v8275_v61 = vrot.slane %v3955_v34, 5  ;;  %v8279_v36 = vsel %vm7459_vm5, %v5322_v17, %v1376_v46 }
  0xe7   : > { %6360 = vmatprep.subr.bf16.mxu1 %v7013_v41  ;;  %v8271_v35 = vrot.slane %v3928_v62, 4  ;;  %v3961_v8 = vrot.slane %v3959_v10, 4  ;;  %v1378_v44 = vrot.slane %v1376_v46, 4  ;;  %v3952_v49 = vor.u32 %v3951_v56, %v3948_v26  ;;  %v5697_v3 = vld [vmem:[%s7181_s10 + $0x90] sm:$0xf] }
  0xe8   : > { %v3965_v25 = vshll.u32 %v8236_v30, 16  ;;  %v3973_v0 = vshll.u32 %v5691_v24, 16  ;;  %v3979_v62 = vshll.u32 %v8253_v22, 16  ;;  %v3983_v1 = vshrl.u32 %v8253_v22, 16  ;;  %v8286_v34 = vld [vmem:[%s7181_s10 + $0x94] sm:$0xf] }
  0xe9   : > { %9009 = vst [vmem:[#allocation10_spill] sm:$0xff] %v8286_v34  ;;  %v9010_v10 = vcombine.low %v7988_v27, %v7992_v29  ;;  %v3994_v17 = vshrl.u32 %v5694_v38, 16  ;;  %v3997_v46 = vshll.u32 %v5694_v38, 16  ;;  %v4007_v26 = vshrl.u32 %v8269_v28, 16  ;;  %v5700_v38 = vld [vmem:[%s7181_s10 + $0x9c] sm:$0xf] }
  0xea   : > { %6361 = vmatpush3.bf16.msra.mxu1 %v7013_v41  ;;  %v3970_v41 = vshrl.u32 %v5691_v24, 16  ;;  %v9011_v56 = vcombine.low %v7999_v45, %v8003_v14  ;;  %v3962_v29 = vor.u32 %v3961_v8, %v8275_v61  ;;  %v4021_v24 = vshll.u32 %v5697_v3, 16  ;;  %v8308_v45 = vld [vmem:[%s7181_s10 + $0x80] sm:$0x1] }
  0xeb   : > { %6362 = vmatprep.subr.bf16.mxu1 %v7015_v23  ;;  %v8305_v5 = vrot.slane %v3965_v25, 5  ;;  %9012 = vst [vmem:[#allocation11_spill] sm:$0xff] %v8308_v45  ;;  %v4027_v14 = vshll.u32 %v8286_v34, 16  ;;  %v3975_v27 = vrot.slane %v3973_v0, 5  ;;  %v3985_v8 = vrot.slane %v3983_v1, 4 }
  0xec   : > { %6539 = vmatmul.mubr.bf16.gmra.mrb[28].mxu0 %v7009_v4  ;;  %v4003_v4 = vshll.u32 %v8269_v28, 16  ;;  %v8312_v28 = vrot.slane %v3979_v62, 5  ;;  %v8318_v22 = vld [vmem:[%s7181_s10 + $0xa0] sm:$0xf]  ;;  %v3996_v25 = vrot.slane %v3994_v17, 4  ;;  %v3999_v30 = vrot.slane %v3997_v46, 5 }
  0xed   : > { %6331 = vmatmul.mubr.bf16.gmra.mrb[12].mxu1 %v9010_v10  ;;  %6558 = vmatprep.mubr.bf16.mxu0 %v8057_v59  ;;  %v4018_v59 = vshrl.u32 %v5697_v3, 16  ;;  %v8303_v10 = vrot.slane %v3952_v49, 4  ;;  %v8315_v3 = vld [vmem:[%s7181_s10 + $0x8c] sm:$0x1]  ;;  %9014 = vst [vmem:[#allocation13_spill] sm:$0xff] %v8318_v22  ;;  %v4009_v47 = vrot.slane %v4007_v26, 4  ;;  %v8335_v62 = vsel %vm7459_vm5, %v1378_v44, %v1379_v53 }
  0xee   : > { %6334 = vmatprep.mubr.bf16.mxu1 %v9011_v56  ;;  %6363 = vmatpush3.bf16.msra.mxu1 %v7015_v23  ;;  %v4031_v23 = vshrl.u32 %v8286_v34, 16  ;;  %v3972_v56 = vrot.slane %v3970_v41, 4  ;;  %9013 = vst [vmem:[#allocation12_spill] sm:$0xff] %v8315_v3  ;;  %v7014_v49 = vld [vmem:[%s8972_s1 + $0x208] sm:$0xff]   ;;  %v8323_v13 = vrot.slane %v4003_v4, 5  ;;  %v4023_v34 = vrot.slane %v4021_v24, 5 }
  0xef   : > { %6364 = vmatprep.subr.bf16.mxu1 %v7017_v12  ;;  %v5703_v41 = vld [vmem:[%s7181_s10 + $0xa8] sm:$0xf]  ;;  %v4020_v1 = vrot.slane %v4018_v59, 4  ;;  %v8340_v17 = vld [vmem:[%s8972_s1 + $0x100] sm:$0xff]   ;;  %v8343_v46 = vrot.slane %v4027_v14, 5  ;;  %v4042_v26 = vshrl.u32 %v5700_v38, 16  ;;  %v9017_v24 = vcombine.low %v8007_v16, %v8017_v15 }
  0xf0   : > { %9016 = vst [vmem:[#allocation15_spill] sm:$0xff] %v8340_v17  ;;  %v4033_v4 = vrot.slane %v4031_v23, 4  ;;  %v4045_v0 = vshll.u32 %v5700_v38, 16  ;;  %v8346_v53 = vrot.slane %v3962_v29, 4  ;;  %v4051_v44 = vshll.u32 %v8318_v22, 16  ;;  %v7016_v16 = vld [vmem:[%s8972_s1 + $0x210] sm:$0xff]  }
  0xf1   : > { %v4055_v59 = vshrl.u32 %v8318_v22, 16  ;;  %v3976_v14 = vor.u32 %v3975_v27, %v3972_v56  ;;  %v3986_v38 = vor.u32 %v3985_v8, %v8312_v28  ;;  %v4000_v23 = vor.u32 %v3999_v30, %v3996_v25  ;;  %v8358_v29 = vld [vmem:[%s7181_s10 + $0xac] sm:$0xf]  ;;  %v8371_v25 = vld [vmem:[%s7181_s10 + $0xa4] sm:$0x1] }
  0xf2   : > { %6365 = vmatpush3.bf16.msra.mxu1 %v7017_v12  ;;  %v3989_v12 = vshll.u32 %v8308_v45, 16  ;;  %9018 = vst [vmem:[#allocation16_spill] sm:$0xff] %v8358_v29  ;;  %v4010_v15 = vor.u32 %v4009_v47, %v8323_v13  ;;  %v4066_v27 = vshrl.u32 %v5703_v41, 16  ;;  %v4069_v30 = vshll.u32 %v5703_v41, 16 }
  0xf3   : > { %6638 = vmatprep.subr.bf16.mxu1 %v8340_v17  ;;  %v9019_v17 = vcombine.low %v8063_v20, %v8084_v7  ;;  %v4024_v56 = vor.u32 %v4023_v34, %v4020_v1  ;;  %v4034_v8 = vor.u32 %v4033_v4, %v8343_v46  ;;  %v4044_v20 = vrot.slane %v4042_v26, 4 }
  0xf4   : > { %6559 = vmatmul.mubr.bf16.vlgmr.msra.gmra.mrb[0].mxu0 %v8140_v50  ;;  %v4013_v50 = vshll.u32 %v8315_v3, 16  ;;  %v4047_v7 = vrot.slane %v4045_v0, 5  ;;  %v4079_v22 = vshrl.u32 %v8358_v29, 16  ;;  %v3977_v47 = vrot.slane %v3976_v14, 4  ;;  %v7018_v0 = vld [vmem:[%s8972_s1 + $0x218] sm:$0xff]  }
  0xf5   : > { %6335 = vmatmul.mubr.bf16.gmra.mrb[16].mxu1 %v9017_v24  ;;  %6591 = vmatpush3.bf16.msra.mxu0 %v8044_v21  ;;  %v4037_v21 = vshll.u32 %v8326_v39, 16  ;;  %v4075_v24 = vshll.u32 %v8358_v29, 16  ;;  %v3987_v39 = vrot.slane %v3986_v38, 4  ;;  %v3991_v3 = vrot.slane %v3989_v12, 5 }
  0xf6   : > { %6338 = vmatprep.mubr.bf16.mxu1 %v9019_v17  ;;  %6562 = vmatprep.mubr.bf16.mxu0 %v8144_v48  ;;  %v8373_v17 = vrot.slane %v4051_v44, 5  ;;  %v4057_v48 = vrot.slane %v4055_v59, 4  ;;  %v4015_v41 = vrot.slane %v4013_v50, 5  ;;  %v4001_v34 = vrot.slane %v4000_v23, 4 }
  0xf7   : > { %6592 = vmatprep.subr.bf16.mxu0 %v7014_v49  ;;  %v4011_v1 = vrot.slane %v4010_v15, 4  ;;  %v4068_v4 = vrot.slane %v4066_v27, 4  ;;  %v4071_v45 = vrot.slane %v4069_v30, 5  ;;  %v4025_v26 = vrot.slane %v4024_v56, 4  ;;  %v8439_v27 = vld [vmem:[%s7181_s10 + $0xbc] sm:$0x1] }
  0xf8   : > { %v4039_v44 = vrot.slane %v4037_v21, 5  ;;  %v4048_v59 = vor.u32 %v4047_v7, %v4044_v20  ;;  %v4061_v29 = vshll.u32 %v8371_v25, 16  ;;  %v4058_v12 = vor.u32 %v4057_v48, %v8373_v17  ;;  %v8406_v21 = vld [vmem:[%s7181_s10 + $0xb0] sm:$0x1] }
  0xf9   : > { %6593 = vmatpush3.bf16.msra.mxu0 %v7014_v49  ;;  %v4035_v49 = vrot.slane %v4034_v8, 4  ;;  %v8383_v14 = vrot.slane %v4075_v24, 5  ;;  %v4081_v38 = vrot.slane %v4079_v22, 4  ;;  %v9020_v23 = vor.u32 %v7791_v57, %v7789_v11 }
  0xfa   : > { %6594 = vmatprep.subr.bf16.mxu0 %v7016_v16  ;;  %v9021_v15 = vcombine.low %v8096_v40, %v8121_v60  ;;  %v3968_v22 = vsel %vm7213_vm2, %v8346_v53, %v8305_v5  ;;  %v3982_v57 = vsel %vm7213_vm2, %v3977_v47, %v8312_v28  ;;  %v9022_v40 = vcombine.low %v8151_v31, %v8193_v43  ;;  %v7021_v31 = vld [vmem:[%s8972_s1 + $0x220] sm:$0xff]  }
  0xfb   : > { %v8388_v50 = vrot.slane %v9020_v23, 4  ;;  %v3992_v60 = vsel %vm7213_vm2, %v3987_v39, %v3991_v3  ;;  %v4072_v5 = vor.u32 %v4071_v45, %v4068_v4  ;;  %v4016_v28 = vsel %vm7213_vm2, %v4011_v1, %v4015_v41  ;;  %v5759_v41 = vld [vmem:[%s7181_s10 + $0x48] sm:$0xe] }
  0xfc   : > { %6563 = vmatmul.mubr.bf16.gmra.mrb[4].mxu0 %v8189_v55  ;;  %v3958_v55 = vsel %vm7213_vm2, %v8303_v10, %v8275_v61  ;;  %v5706_v61 = vld [vmem:[%s7181_s10 + $0xb4] sm:$0xf]  ;;  %v8418_v10 = vld [vmem:[%s7181_s10 + $0xb8] sm:$0xf]  ;;  %v4030_v39 = vsel %vm7213_vm2, %v4025_v26, %v8343_v46  ;;  %v8428_v43 = vrot.slane %v4048_v59, 4  ;;  %v8430_v3 = vrot.slane %v4061_v29, 5 }
  0xfd   : > { %6339 = vmatmul.mubr.bf16.gmra.mrb[20].mxu1 %v9021_v15  ;;  %6566 = vmatprep.mubr.bf16.mxu0 %v8244_v18  ;;  %v4006_v18 = vsel %vm7213_vm2, %v4001_v34, %v8323_v13  ;;  %v4040_v13 = vsel %vm7213_vm2, %v4035_v49, %v4039_v44  ;;  %v8434_v45 = vrot.slane %v4058_v12, 4  ;;  %v4082_v53 = vor.u32 %v4081_v38, %v8383_v14  ;;  %v5760_v26 = vld [vmem:[%s7181_s10 + $0x54] sm:$0xe] }
  0xfe   : > { %6342 = vmatprep.mubr.bf16.mxu1 %v9022_v40  ;;  %6595 = vmatpush3.bf16.msra.mxu0 %v7016_v16  ;;  %v4085_v16 = vshll.u32 %v8406_v21, 16  ;;  %v9023_v46 = vsel %vm7213_vm2, %v8273_v42, %v8262_v52  ;;  %v9024_v29 = vsel %vm7213_vm2, %v8271_v35, %v8195_v58  ;;  %v4090_v56 = vshrl.u32 %v5706_v61, 16 }
  0xff   : > { %6596 = vmatprep.subr.bf16.mxu0 %v7018_v0  ;;  %v5737_v30 = vcombine.low %v9024_v29, %v9023_v46  ;;  %v4093_v8 = vshll.u32 %v5706_v61, 16  ;;  %v4099_v20 = vshll.u32 %v8418_v10, 16  ;;  %v5353_v7 = vcombine.low %v8250_v2, %v8260_v54  ;;  %v7024_v2 = vld [vmem:[%s8972_s1 + $0x228] sm:$0xff]   ;;  %v5709_v54 = vld [vmem:[%s7181_s10 + $0xc0] sm:$0xf]  ;;  %v9028_v29 = vld [vmem:[#allocation5_spill] sm:$0xff] }
 0x100   : > { %v5354_v48 = vcombine.low %v8279_v36, %v8335_v62  ;;  %v5738_v24 = vcombine.low %v3958_v55, %v3968_v22  ;;  %v8456_v52 = vrot.slane %v4072_v5, 4  ;;  %v5739_v42 = vcombine.low %v3982_v57, %v3992_v60 }
 0x101   : > { %v8458_v58 = vcombine.low %v4006_v18, %v4016_v28  ;;  %v8460_v35 = vcombine.low %v4030_v39, %v4040_v13  ;;  %v4054_v47 = vsel %vm7213_vm2, %v8428_v43, %v8373_v17  ;;  %v4064_v34 = vsel %vm7213_vm2, %v8434_v45, %v8430_v3  ;;  %v5762_v28 = vld [vmem:[%s7181_s10 + $0x6c] sm:$0xe] }
 0x102   : > { %6597 = vmatpush3.bf16.msra.mxu0 %v7018_v0  ;;  %v8476_v1 = vrot.slane %v4082_v53, 4  ;;  %v8478_v4 = vrot.slane %v4085_v16, 5  ;;  %v4103_v0 = vshrl.u32 %v8418_v10, 16  ;;  %v9025_v44 = vcombine.low %v8205_v6, %v8214_v51  ;;  %v7027_v6 = vld [vmem:[%s8972_s1 + $0x230] sm:$0xff]   ;;  %v8500_v51 = vld [vmem:[%s7181_s10 + $0xc4] sm:$0xf] }
 0x103   : > { %6598 = vmatprep.subr.bf16.mxu0 %v7021_v31  ;;  %v8485_v59 = vrot.slane %v4090_v56, 4  ;;  %v8489_v49 = vrot.slane %v4099_v20, 5  ;;  %v4109_v12 = vshll.u32 %v8439_v27, 16  ;;  %v4078_v38 = vsel %vm7213_vm2, %v8456_v52, %v8383_v14  ;;  %v5761_v14 = vld [vmem:[%s7181_s10 + $0x60] sm:$0xe]  ;;  %v9026_v39 = vld [vmem:[#allocation3_spill] sm:$0xff] }
 0x104   : > { %6567 = vmatmul.mubr.bf16.gmra.mrb[8].mxu0 %v8256_v19  ;;  %v8487_v19 = vrot.slane %v4093_v8, 5  ;;  %v4114_v23 = vshrl.u32 %v5709_v54, 16  ;;  %v5775_v15 = vrot.slane %v5759_v41, 9  ;;  %v4577_v55 = vrot.slane %v8076_v32, 5  ;;  %v7019_v13 = vld [vmem:[%s7181_s10 + $0xc] sm:$0xff]   ;;  %v7030_v56 = vld [vmem:[%s8972_s1 + $0x238] sm:$0xff]  }
 0x105   : > { %6343 = vmatmul.mubr.bf16.gmra.mrb[24].mxu1 %v9025_v44  ;;  %6570 = vmatprep.mubr.bf16.mxu0 %v5737_v30  ;;  %v4117_v22 = vshll.u32 %v5709_v54, 16  ;;  %v4580_v57 = vrot.slane %v8124_v63, 5  ;;  %v5776_v40 = vrot.slane %v5760_v26, 9  ;;  %v4584_v60 = vrot.slane %v8088_v33, 5  ;;  %v9027_v16 = vld [vmem:[#allocation4_spill] sm:$0xff]  ;;  %v9029_v52 = vld [vmem:[#allocation6_spill] sm:$0xff] }
 0x106   : > { %6346 = vmatprep.mubr.bf16.mxu1 %v5353_v7  ;;  %6599 = vmatpush3.bf16.msra.mxu0 %v7021_v31  ;;  %v4088_v18 = vsel %vm7213_vm2, %v8476_v1, %v8478_v4  ;;  %v8510_v5 = vrot.slane %v4103_v0, 4  ;;  %v8514_v61 = vsel %vm7459_vm5, %v5775_v15, %v4577_v55  ;;  %v4579_v32 = vrot.slane %v4577_v55, 4  ;;  %v9030_v4 = vld [vmem:[#allocation7_spill] sm:$0xff] }
 0x107   : > { %6600 = vmatprep.subr.bf16.mxu0 %v7024_v2  ;;  %v4123_v31 = vshll.u32 %v8500_v51, 16  ;;  %v8520_v63 = vsel %vm7459_vm5, %v5776_v40, %v4584_v60  ;;  %v4586_v33 = vrot.slane %v4584_v60, 4  ;;  %v4587_v3 = vrot.slane %v9026_v39, 5  ;;  %v8551_v26 = vld [vmem:[%s7181_s10 + $0xc8] sm:$0x1]  ;;  %v7020_v40 = vld [vmem:[%s7181_s10 + $0x18] sm:$0xff]  }
 0x108   : > { %v8526_v45 = vsel %vm7459_vm5, %v4579_v32, %v4580_v57  ;;  %v5777_v53 = vrot.slane %v5761_v14, 9  ;;  %v4591_v46 = vrot.slane %v9027_v16, 5  ;;  %v4594_v30 = vrot.slane %v9028_v29, 5  ;;  %v7022_v39 = vld [vmem:[%s7181_s10 + $0x24] sm:$0xff]  }
 0x109   : > { %v5807_v8 = vcombine.low %v8514_v61, %v8526_v45  ;;  %v8537_v20 = vsel %vm7459_vm5, %v4586_v33, %v4587_v3  ;;  %v5778_v7 = vrot.slane %v5762_v28, 9  ;;  %v4601_v0 = vrot.slane %v9030_v4, 5  ;;  %v9032_v28 = vld [vmem:[#allocation11_spill] sm:$0xff]  ;;  %v5468_v61 = vld [vmem:[%s7181_s10 + $0x90] sm:$0xf] }
 0x10a   : > { %6601 = vmatpush3.bf16.msra.mxu0 %v7024_v2  ;;  %v4598_v2 = vrot.slane %v9029_v52, 5  ;;  %v5808_v54 = vcombine.low %v8520_v63, %v8537_v20  ;;  %v8544_v41 = vsel %vm7459_vm5, %v5777_v53, %v4591_v46  ;;  %v4593_v1 = vrot.slane %v4591_v46, 4  ;;  %v9033_v53 = vld [vmem:[#allocation2_spill] sm:$0xff]  ;;  %v7036_v45 = vld [vmem:[%s7181_s10 + $0xa8] sm:$0xff]  }
 0x10b   : > { %6602 = vmatprep.subr.bf16.mxu0 %v7027_v6  ;;  %v8553_v44 = vrot.slane %v4114_v23, 4  ;;  %v8566_v36 = vcombine.low %v4054_v47, %v4064_v34  ;;  %v4096_v62 = vor.u32 %v8487_v19, %v8485_v59  ;;  %v5763_v23 = vld [vmem:[%s7181_s10 + $0x78] sm:$0xe]  ;;  %v8578_v57 = vrot.slane %v4109_v12, 5  ;;  %v5712_v12 = vld [vmem:[%s7181_s10 + $0xcc] sm:$0xf] }
 0x10c   : > { %6571 = vmatmul.mubr.bf16.gmra.mrb[12].mxu0 %v5738_v24  ;;  %v8555_v24 = vrot.slane %v4117_v22, 5  ;;  %v8559_v15 = vsel %vm7459_vm5, %v5778_v7, %v4598_v2  ;;  %v4600_v55 = vrot.slane %v4598_v2, 4  ;;  %v8576_v22 = vcombine.low %v4078_v38, %v4088_v18  ;;  %v5462_v47 = vld [vmem:[%s7181_s10 + $0x78] sm:$0xf]  ;;  %v9031_v18 = vld [vmem:[#allocation8_spill] sm:$0xff] }
 0x10d   : > { %6347 = vmatmul.mubr.bf16.gmra.mrb[28].mxu1 %v5354_v48  ;;  %6574 = vmatprep.mubr.bf16.mxu0 %v5739_v42  ;;  %v4127_v48 = vshrl.u32 %v8500_v51, 16  ;;  %v8573_v42 = vsel %vm7459_vm5, %v4593_v1, %v4594_v30  ;;  %v4106_v34 = vor.u32 %v8510_v5, %v8489_v49  ;;  %v8589_v59 = vrot.slane %v4123_v31, 5  ;;  %v8603_v31 = vld [vmem:[%s7181_s10 + $0xd0] sm:$0xf]  ;;  %v9034_v1 = vld [vmem:[#allocation9_spill] sm:$0xff] }
 0x10e   : > { %6366 = vmatprep.mubr.bf16.mxu1 %v7019_v13  ;;  %6603 = vmatpush3.bf16.msra.mxu0 %v7027_v6  ;;  %v5809_v17 = vcombine.low %v8544_v41, %v8573_v42  ;;  %v8584_v43 = vsel %vm7459_vm5, %v4600_v55, %v4601_v0  ;;  %v4133_v19 = vshll.u32 %v8551_v26, 16  ;;  %v5764_v6 = vld [vmem:[%s7181_s10 + $0x84] sm:$0xe]  ;;  %v4120_v60 = vor.u32 %v8555_v24, %v8553_v44  ;;  %v9035_v24 = vld [vmem:[#allocation12_spill] sm:$0xff]  ;;  %v7100_v63 = vld [vmem:[%s7181_s10 + $0x8c] sm:$0x1] }
 0x10f   : > { %6604 = vmatprep.subr.bf16.mxu0 %v7030_v56  ;;  %v5810_v38 = vcombine.low %v8559_v15, %v8584_v43  ;;  %v5779_v14 = vrot.slane %v5763_v23, 9  ;;  %v4605_v32 = vrot.slane %v9031_v18, 5  ;;  %v4608_v33 = vrot.slane %v9032_v28, 5 }
 0x110   : > { %v4129_v5 = vrot.slane %v4127_v48, 4  ;;  %v2355_v3 = vshrl.u32 %v5462_v47, 16  ;;  %v2358_v13 = vshll.u32 %v5462_v47, 16  ;;  %v2377_v16 = vsel %vm7213_vm2, %v8388_v50, %v9033_v53 }
 0x111   : > { %v4138_v46 = vshrl.u32 %v5712_v12, 16  ;;  %v8611_v29 = vsel %vm7459_vm5, %v5779_v14, %v4605_v32  ;;  %v4607_v30 = vrot.slane %v4605_v32, 4  ;;  %v5780_v7 = vrot.slane %v5764_v6, 9  ;;  %v7080_v6 = vld [vmem:[%s8972_s1 + $0x108] sm:$0xff]  }
 0x112   : > { %6605 = vmatpush3.bf16.msra.mxu0 %v7030_v56  ;;  %v4141_v52 = vshll.u32 %v5712_v12, 16  ;;  %v2357_v2 = vrot.slane %v2355_v3, 4  ;;  %v2360_v56 = vrot.slane %v2358_v13, 5  ;;  %v4612_v4 = vrot.slane %v9034_v1, 5  ;;  %v5765_v12 = vld [vmem:[%s7181_s10 + $0x90] sm:$0xe] }
 0x113   : > { %v4147_v50 = vshll.u32 %v8603_v31, 16  ;;  %v4151_v0 = vshrl.u32 %v8603_v31, 16  ;;  %v8620_v44 = vsel %vm7459_vm5, %v4607_v30, %v4608_v33  ;;  %v4615_v55 = vrot.slane %v9035_v24, 5  ;;  %v7023_v3 = vld [vmem:[%s7181_s10 + $0x30] sm:$0xff]  }
 0x114   : > { %6575 = vmatmul.mubr.bf16.gmra.mrb[16].mxu0 %v8458_v58  ;;  %v9036_v58 = vld [vmem:[#allocation15_spill] sm:$0xff]  ;;  %v4130_v48 = vor.u32 %v4129_v5, %v8589_v59  ;;  %v2361_v23 = vor.u32 %v2360_v56, %v2357_v2  ;;  %v4614_v47 = vrot.slane %v4612_v4, 4  ;;  %v4107_v14 = vrot.slane %v4106_v34, 4  ;;  %v8641_v13 = vld [vmem:[%s7181_s10 + $0xd4] sm:$0x1]  ;;  %v9037_v2 = vld [vmem:[#allocation10_spill] sm:$0xff] }
 0x115   : > { %6367 = vmatmul.mubr.bf16.vlgmr.msra.gmra.mrb[0].mxu1 %v7020_v40  ;;  %6578 = vmatprep.mubr.bf16.mxu0 %v8460_v35  ;;  %v5811_v35 = vcombine.low %v8611_v29, %v8620_v44  ;;  %v4097_v40 = vrot.slane %v4096_v62, 4  ;;  %v4135_v18 = vrot.slane %v4133_v19, 5  ;;  %v8633_v32 = vsel %vm7459_vm5, %v5780_v7, %v4612_v4  ;;  %v7025_v19 = vld [vmem:[%s7181_s10 + $0x3c] sm:$0xff]   ;;  %v7081_v1 = vld [vmem:[%s8972_s1 + $0x110] sm:$0xff]  }
 0x116   : > { %6646 = vmatpush3.bf16.msra.mxu1 %v9036_v58  ;;  %6370 = vmatprep.mubr.bf16.mxu1 %v7022_v39  ;;  %v4140_v28 = vrot.slane %v4138_v46, 4  ;;  %v4143_v33 = vrot.slane %v4141_v52, 5  ;;  %v2362_v39 = vrot.slane %v2361_v23, 4  ;;  %v8637_v5 = vsel %vm7459_vm5, %v4614_v47, %v4615_v55  ;;  %v7082_v47 = vld [vmem:[%s7181_s10 + $0x1c] sm:$0xf] }
 0x117   : > { %6639 = vmatprep.subr.bf16.mxu1 %v7080_v6  ;;  %v8643_v53 = vrot.slane %v4147_v50, 5  ;;  %v4153_v30 = vrot.slane %v4151_v0, 4  ;;  %v5812_v62 = vcombine.low %v8633_v32, %v8637_v5  ;;  %v5781_v34 = vrot.slane %v5765_v12, 9 }
 0x118   : > { %v4121_v7 = vrot.slane %v4120_v60, 4  ;;  %v4131_v46 = vrot.slane %v4130_v48, 4  ;;  %v2367_v52 = vsel %vm7213_vm2, %v2362_v39, %v7789_v11  ;;  %v4619_v56 = vrot.slane %v9037_v2, 5  ;;  %v9038_v11 = vld [vmem:[#allocation14_spill] sm:$0xff]  ;;  %v7026_v39 = vld [vmem:[%s7181_s10 + $0x48] sm:$0xff]  }
 0x119   : > { %v4102_v4 = vsel %vm7213_vm2, %v4097_v40, %v8489_v49  ;;  %v4112_v60 = vsel %vm7213_vm2, %v4107_v14, %v8578_v57  ;;  %v8661_v50 = vcombine.low %v2367_v52, %v2377_v16  ;;  %v4622_v0 = vrot.slane %v9038_v11, 5  ;;  %v5755_v57 = vld [vmem:[%s7181_s10 + $0x18] sm:$0xe]  ;;  %v5766_v16 = vld [vmem:[%s7181_s10 + $0x9c] sm:$0xe] }
 0x11a   : > { %6647 = vmatpush3.bf16.msra.mxu1 %v7080_v6  ;;  %v4144_v24 = vor.u32 %v4143_v33, %v4140_v28  ;;  %v4157_v55 = vshll.u32 %v8641_v13, 16  ;;  %v8668_v58 = vsel %vm7459_vm5, %v5781_v34, %v4619_v56  ;;  %v4621_v48 = vrot.slane %v4619_v56, 4  ;;  %v7083_v40 = vld [vmem:[%s8972_s1 + $0x118] sm:$0xff]   ;;  %v7084_v2 = vld [vmem:[%s7181_s10 + $0x20] sm:$0x1] }
 0x11b   : > { %6640 = vmatprep.subr.bf16.mxu1 %v7081_v1  ;;  %v4154_v49 = vor.u32 %v4153_v30, %v8643_v53  ;;  %v4136_v23 = vsel %vm7213_vm2, %v4131_v46, %v4135_v18  ;;  %v4549_v12 = vrot.slane %v7082_v47, 5  ;;  %v5744_v6 = vcombine.low %v4102_v4, %v4112_v60  ;;  %v9039_v34 = vld [vmem:[#allocation13_spill] sm:$0xff]  ;;  %v5767_v11 = vld [vmem:[%s7181_s10 + $0xa8] sm:$0xe] }
 0x11c   : > { %6579 = vmatmul.mubr.bf16.gmra.mrb[20].mxu0 %v8566_v36  ;;  %v4126_v36 = vsel %vm7213_vm2, %v4121_v7, %v8589_v59  ;;  %v4145_v14 = vrot.slane %v4144_v24, 4  ;;  %v4159_v28 = vrot.slane %v4157_v55, 5  ;;  %v5771_v18 = vrot.slane %v5755_v57, 9  ;;  %v7028_v46 = vld [vmem:[%s7181_s10 + $0x54] sm:$0xff]   ;;  %v5756_v55 = vld [vmem:[%s7181_s10 + $0x24] sm:$0xe] }
 0x11d   : > { %6371 = vmatmul.mubr.bf16.gmra.mrb[4].mxu1 %v7023_v3  ;;  %6582 = vmatprep.mubr.bf16.mxu0 %v8576_v22  ;;  %v8682_v22 = vsel %vm7459_vm5, %v4621_v48, %v4622_v0  ;;  %v5782_v33 = vrot.slane %v5766_v16, 9  ;;  %v5745_v3 = vcombine.low %v4126_v36, %v4136_v23  ;;  %v4155_v30 = vrot.slane %v4154_v49, 4  ;;  %v7086_v48 = vld [vmem:[%s7181_s10 + $0x28] sm:$0xf]  ;;  %v7087_v36 = vld [vmem:[%s7181_s10 + $0x34] sm:$0xf] }
 0x11e   : > { %6374 = vmatprep.mubr.bf16.mxu1 %v7025_v19  ;;  %6648 = vmatpush3.bf16.msra.mxu1 %v7081_v1  ;;  %v5813_v59 = vcombine.low %v8668_v58, %v8682_v22  ;;  %v4626_v19 = vrot.slane %v9039_v34, 5  ;;  %v4629_v7 = vrot.slane %v8371_v25, 5  ;;  %v4551_v52 = vrot.slane %v4549_v12, 4  ;;  %v7085_v1 = vld [vmem:[%s8972_s1 + $0x120] sm:$0xff]  }
 0x11f   : > { %6641 = vmatprep.subr.bf16.mxu1 %v7083_v40  ;;  %v4552_v56 = vrot.slane %v7084_v2, 5  ;;  %v4550_v25 = vsel %vm7459_vm5, %v5771_v18, %v4549_v12  ;;  %v4150_v0 = vsel %vm7213_vm2, %v4145_v14, %v8643_v53  ;;  %v4160_v24 = vsel %vm7213_vm2, %v4155_v30, %v4159_v28  ;;  %v5757_v12 = vld [vmem:[%s7181_s10 + $0x30] sm:$0xe]  ;;  %v7029_v30 = vld [vmem:[%s7181_s10 + $0x60] sm:$0xff]  }
 0x120   : > { %v8699_v4 = vsel %vm7459_vm5, %v5782_v33, %v4626_v19  ;;  %v4628_v60 = vrot.slane %v4626_v19, 4  ;;  %v4556_v49 = vrot.slane %v7086_v48, 5  ;;  %v4563_v23 = vrot.slane %v7087_v36, 5  ;;  %v7089_v33 = vld [vmem:[%s7181_s10 + $0x2c] sm:$0x1] }
 0x121   : > { %v4553_v16 = vsel %vm7459_vm5, %v4551_v52, %v4552_v56  ;;  %v5783_v47 = vrot.slane %v5767_v11, 9  ;;  %v5746_v28 = vcombine.low %v4150_v0, %v4160_v24  ;;  %v5772_v18 = vrot.slane %v5756_v55, 9  ;;  %v7031_v52 = vld [vmem:[%s7181_s10 + $0x6c] sm:$0xff]   ;;  %v5768_v11 = vld [vmem:[%s7181_s10 + $0xb4] sm:$0xe] }
 0x122   : > { %6649 = vmatpush3.bf16.msra.mxu1 %v7083_v40  ;;  %v8713_v57 = vsel %vm7459_vm5, %v4628_v60, %v4629_v7  ;;  %v9040_v40 = vld [vmem:[#allocation16_spill] sm:$0xff]  ;;  %v5803_v34 = vcombine.low %v4550_v25, %v4553_v16  ;;  %v4558_v19 = vrot.slane %v4556_v49, 4  ;;  %v5773_v2 = vrot.slane %v5757_v12, 9  ;;  %v5758_v0 = vld [vmem:[%s7181_s10 + $0x3c] sm:$0xe] }
 0x123   : > { %6642 = vmatprep.subr.bf16.mxu1 %v7085_v1  ;;  %v5814_v53 = vcombine.low %v8699_v4, %v8713_v57  ;;  %v4633_v14 = vrot.slane %v9040_v40, 5  ;;  %v4565_v56 = vrot.slane %v4563_v23, 4  ;;  %v7091_v24 = vld [vmem:[%s7181_s10 + $0x40] sm:$0xf]  ;;  %v4557_v48 = vsel %vm7459_vm5, %v5772_v18, %v4556_v49  ;;  %v7093_v18 = vld [vmem:[%s7181_s10 + $0x44] sm:$0x1] }
 0x124   : > { %6583 = vmatmul.mubr.bf16.gmra.mrb[24].mxu0 %v5744_v6  ;;  %v7088_v6 = vld [vmem:[%s8972_s1 + $0x128] sm:$0xff]   ;;  %v4570_v55 = vrot.slane %v7091_v24, 5  ;;  %v4640_v12 = vrot.slane %v8418_v10, 5  ;;  %v4564_v49 = vsel %vm7459_vm5, %v5773_v2, %v4563_v23  ;;  %v7094_v10 = vld [vmem:[%s8972_s1 + $0x138] sm:$0xff]   ;;  %v5769_v23 = vld [vmem:[%s7181_s10 + $0xc0] sm:$0xe] }
 0x125   : > { %6375 = vmatmul.mubr.bf16.gmra.mrb[8].mxu1 %v7026_v39  ;;  %6586 = vmatprep.mubr.bf16.mxu0 %v5745_v3  ;;  %v4559_v39 = vrot.slane %v7089_v33, 5  ;;  %v4636_v3 = vrot.slane %v8406_v21, 5  ;;  %v8730_v7 = vsel %vm7459_vm5, %v5783_v47, %v4633_v14  ;;  %v7092_v21 = vld [vmem:[%s8972_s1 + $0x130] sm:$0xff]   ;;  %v5784_v47 = vrot.slane %v5768_v11, 9 }
 0x126   : > { %6378 = vmatprep.mubr.bf16.mxu1 %v7028_v46  ;;  %6650 = vmatpush3.bf16.msra.mxu1 %v7085_v1  ;;  %v4635_v46 = vrot.slane %v4633_v14, 4  ;;  %v7090_v1 = vld [vmem:[%s7181_s10 + $0x38] sm:$0x1]  ;;  %v5774_v14 = vrot.slane %v5758_v0, 9  ;;  %v4573_v33 = vrot.slane %v7093_v18, 5  ;;  %v4647_v11 = vrot.slane %v8500_v51, 5 }
 0x127   : > { %6643 = vmatprep.subr.bf16.mxu1 %v7088_v6  ;;  %v4566_v60 = vrot.slane %v7090_v1, 5  ;;  %v4560_v36 = vsel %vm7459_vm5, %v4558_v19, %v4559_v39  ;;  %v4642_v39 = vrot.slane %v4640_v12, 4  ;;  %v5459_v19 = vld [vmem:[%s7181_s10 + $0x6c] sm:$0xf]  ;;  %v7034_v18 = vld [vmem:[%s7181_s10 + $0x90] sm:$0xff]   ;;  %v2398_v20 = vshll.u32 %v7100_v63, 16 }
 0x128   : > { %v8742_v25 = vsel %vm7459_vm5, %v4635_v46, %v4636_v3  ;;  %v5804_v3 = vcombine.low %v4557_v48, %v4560_v36  ;;  %v4571_v1 = vsel %vm7459_vm5, %v5774_v14, %v4570_v55  ;;  %v2331_v0 = vshrl.u32 %v5459_v19, 16  ;;  %v5770_v51 = vld [vmem:[%s7181_s10 + $0xcc] sm:$0xe] }
 0x129   : > { %v5815_v16 = vcombine.low %v8730_v7, %v8742_v25  ;;  %v4567_v40 = vsel %vm7459_vm5, %v4565_v56, %v4566_v60  ;;  %v5785_v56 = vrot.slane %v5769_v23, 9  ;;  %v2334_v24 = vshll.u32 %v5459_v19, 16 }
 0x12a   : > { %6651 = vmatpush3.bf16.msra.mxu1 %v7088_v6  ;;  %v4643_v6 = vrot.slane %v8439_v27, 5  ;;  %v8762_v27 = vsel %vm7459_vm5, %v5784_v47, %v4640_v12  ;;  %v4650_v36 = vrot.slane %v8551_v26, 5  ;;  %v4649_v12 = vrot.slane %v4647_v11, 4 }
 0x12b   : > { %6644 = vmatprep.subr.bf16.mxu1 %v7092_v21  ;;  %v2336_v26 = vrot.slane %v2334_v24, 5  ;;  %v4657_v23 = vrot.slane %v8641_v13, 5 }
 0x12c   : > { %6587 = vmatmul.mubr.bf16.gmra.mrb[28].mxu0 %v5746_v28  ;;  %v4572_v28 = vrot.slane %v4570_v55, 4  ;;  %v8769_v46 = vsel %vm7459_vm5, %v4642_v39, %v4643_v6  ;;  %v8783_v55 = vsel %vm7459_vm5, %v5785_v56, %v4647_v11  ;;  %v4654_v39 = vrot.slane %v8603_v31, 5  ;;  %v7096_v56 = vld [vmem:[%s7181_s10 + $0x74] sm:$0x1] }
 0x12d   : > { %6379 = vmatmul.mubr.bf16.gmra.mrb[12].mxu1 %v7029_v30  ;;  %6606 = vmatprep.mubr.bf16.mxu0 %v5803_v34  ;;  %v7032_v30 = vld [vmem:[%s7181_s10 + $0x78] sm:$0xff]   ;;  %v5805_v34 = vcombine.low %v4564_v49, %v4567_v40  ;;  %v5816_v2 = vcombine.low %v8762_v27, %v8769_v46  ;;  %v8788_v49 = vsel %vm7459_vm5, %v4649_v12, %v4650_v36  ;;  %v2333_v40 = vrot.slane %v2331_v0, 4  ;;  %v7097_v0 = vld [vmem:[%s7181_s10 + $0x88] sm:$0xf] }
 0x12e   : > { %6382 = vmatprep.mubr.bf16.mxu1 %v7031_v52  ;;  %6652 = vmatpush3.bf16.msra.mxu1 %v7092_v21  ;;  %v7033_v52 = vld [vmem:[%s7181_s10 + $0x84] sm:$0xff]   ;;  %v4574_v60 = vsel %vm7459_vm5, %v4572_v28, %v4573_v33  ;;  %v7095_v21 = vld [vmem:[%s7181_s10 + $0x70] sm:$0xf]  ;;  %v5817_v28 = vcombine.low %v8783_v55, %v8788_v49  ;;  %v4656_v19 = vrot.slane %v4654_v39, 4  ;;  %v2388_v24 = vshll.u32 %v7097_v0, 16 }
 0x12f   : > { %6645 = vmatprep.subr.bf16.mxu1 %v7094_v10  ;;  %v2340_v48 = vshll.u32 %v7095_v21, 16  ;;  %v2344_v47 = vshrl.u32 %v7095_v21, 16  ;;  %v5806_v6 = vcombine.low %v4571_v1, %v4574_v60  ;;  %v2350_v1 = vshll.u32 %v7096_v56, 16 }
 0x130   : > { %v8810_v11 = vsel %vm7459_vm5, %v4656_v19, %v4657_v23  ;;  %v2392_v21 = vshrl.u32 %v7097_v0, 16  ;;  %v7099_v19 = vld [vmem:[%s7181_s10 + $0xa0] sm:$0xf] }
 0x131   : > { %v8790_v14 = vrot.slane %v2340_v48, 5  ;;  %v2346_v33 = vrot.slane %v2344_v47, 4  ;;  %v2440_v56 = vshrl.u32 %v7099_v19, 16 }
 0x132   : > { %6653 = vmatpush3.bf16.msra.mxu1 %v7094_v10  ;;  %v5786_v10 = vrot.slane %v5770_v51, 9 }
 0x133   : > { %v2347_v31 = vor.u32 %v2346_v33, %v8790_v14  ;;  %v2406_v33 = vshll.u32 %v5468_v61, 16 }
 0x134   : > { %6607 = vmatmul.mubr.bf16.vlgmr.msra.gmra.mrb[0].mxu0 %v5804_v3  ;;  %v7035_v3 = vld [vmem:[%s7181_s10 + $0x9c] sm:$0xff]  }
 0x135   : > { %6383 = vmatmul.mubr.bf16.gmra.mrb[16].mxu1 %v7032_v30  ;;  %6610 = vmatprep.mubr.bf16.mxu0 %v5805_v34  ;;  %v5465_v30 = vld [vmem:[%s7181_s10 + $0x84] sm:$0xf]  ;;  %v8801_v34 = vsel %vm7459_vm5, %v5786_v10, %v4654_v39  ;;  %v2348_v47 = vrot.slane %v2347_v31, 4  ;;  %v7098_v10 = vld [vmem:[%s7181_s10 + $0x94] sm:$0xf]  ;;  %v2408_v0 = vrot.slane %v2406_v33, 5 }
 0x136   : > { %6386 = vmatprep.mubr.bf16.mxu1 %v7033_v52  ;;  %v2337_v52 = vor.u32 %v2336_v26, %v2333_v40  ;;  %v2379_v13 = vshrl.u32 %v5465_v30, 16  ;;  %v2382_v60 = vshll.u32 %v5465_v30, 16  ;;  %v5818_v48 = vcombine.low %v8801_v34, %v8810_v11 }
 0x137   : > { %v8819_v40 = vrot.slane %v2388_v24, 5  ;;  %v2394_v26 = vrot.slane %v2392_v21, 4  ;;  %v2412_v39 = vshll.u32 %v7098_v10, 16  ;;  %v2416_v23 = vshrl.u32 %v7098_v10, 16  ;;  %v7102_v10 = vld [vmem:[%s7181_s10 + $0xa4] sm:$0x1] }
 0x138   : > { %v2338_v36 = vrot.slane %v2337_v52, 4  ;;  %v2381_v12 = vrot.slane %v2379_v13, 4  ;;  %v2384_v51 = vrot.slane %v2382_v60, 5  ;;  %v2436_v52 = vshll.u32 %v7099_v19, 16  ;;  %v7103_v19 = vld [vmem:[%s7181_s10 + $0xac] sm:$0xf] }
 0x139   : > { %v2395_v13 = vor.u32 %v2394_v26, %v8819_v40  ;;  %v8836_v41 = vrot.slane %v2412_v39, 5  ;;  %v2418_v42 = vrot.slane %v2416_v23, 4  ;;  %v2442_v21 = vrot.slane %v2440_v56, 4  ;;  %v5477_v23 = vld [vmem:[%s7181_s10 + $0xb4] sm:$0xf] }
 0x13a   : > { %v2446_v39 = vshll.u32 %v7102_v10, 16  ;;  %v2464_v15 = vshrl.u32 %v7103_v19, 16  ;;  %v2478_v63 = vshll.u32 %v5477_v23, 16 }
 0x13b   : > { %v2419_v26 = vor.u32 %v2418_v42, %v8836_v41 }
 0x13c   : > { %6611 = vmatmul.mubr.bf16.gmra.mrb[4].mxu0 %v5806_v6  ;;  %v5471_v6 = vld [vmem:[%s7181_s10 + $0x9c] sm:$0xf] }
 0x13d   : > { %6387 = vmatmul.mubr.bf16.gmra.mrb[20].mxu1 %v7034_v18  ;;  %6614 = vmatprep.mubr.bf16.mxu0 %v5807_v8  ;;  %v2352_v8 = vrot.slane %v2350_v1, 5  ;;  %v2403_v18 = vshrl.u32 %v5468_v61, 16  ;;  %v2430_v30 = vshll.u32 %v5471_v6, 16  ;;  %v2343_v1 = vsel %vm7213_vm2, %v2338_v36, %v8790_v14  ;;  %v7038_v61 = vld [vmem:[%s7181_s10 + $0xc0] sm:$0xff]  }
 0x13e   : > { %6390 = vmatprep.mubr.bf16.mxu1 %v7035_v3  ;;  %v2427_v3 = vshrl.u32 %v5471_v6, 16  ;;  %v8838_v14 = vrot.slane %v2436_v52, 5  ;;  %v2460_v52 = vshll.u32 %v7103_v19, 16 }
 0x13f   : > { %v2353_v31 = vsel %vm7213_vm2, %v2348_v47, %v2352_v8  ;;  %v2405_v60 = vrot.slane %v2403_v18, 4  ;;  %v2432_v24 = vrot.slane %v2430_v30, 5  ;;  %v2400_v8 = vrot.slane %v2398_v20, 5  ;;  %v7104_v20 = vld [vmem:[%s7181_s10 + $0xb8] sm:$0xf] }
 0x140   : > { %v2396_v47 = vrot.slane %v2395_v13, 4  ;;  %v2443_v33 = vor.u32 %v2442_v21, %v8838_v14  ;;  %v2484_v29 = vshll.u32 %v7104_v20, 16  ;;  %v2488_v44 = vshrl.u32 %v7104_v20, 16 }
 0x142   : > { %v2444_v13 = vrot.slane %v2443_v33, 4 }
 0x144   : > { %6615 = vmatmul.mubr.bf16.gmra.mrb[8].mxu0 %v5808_v54  ;;  %v2385_v54 = vor.u32 %v2384_v51, %v2381_v12  ;;  %v2409_v12 = vor.u32 %v2408_v0, %v2405_v60  ;;  %v7101_v51 = vld [vmem:[%s7181_s10 + $0x98] sm:$0x1]  ;;  %v2448_v60 = vrot.slane %v2446_v39, 5 }
 0x145   : > { %6391 = vmatmul.mubr.bf16.gmra.mrb[24].mxu1 %v7036_v45  ;;  %6618 = vmatprep.mubr.bf16.mxu0 %v5809_v17  ;;  %v2429_v17 = vrot.slane %v2427_v3, 4  ;;  %v5507_v45 = vcombine.low %v2343_v1, %v2353_v31  ;;  %v2422_v6 = vshll.u32 %v7101_v51, 16  ;;  %v2475_v31 = vshrl.u32 %v5477_v23, 16 }
 0x146   : > { %6394 = vmatprep.mubr.bf16.mxu1 %v7037_v9  ;;  %v2386_v36 = vrot.slane %v2385_v54, 4  ;;  %v5474_v9 = vld [vmem:[%s7181_s10 + $0xa8] sm:$0xf]  ;;  %v2410_v56 = vrot.slane %v2409_v12, 4  ;;  %v2449_v32 = vsel %vm7213_vm2, %v2444_v13, %v2448_v60 }
 0x147   : > { %v2433_v18 = vor.u32 %v2432_v24, %v2429_v17  ;;  %v2451_v3 = vshrl.u32 %v5474_v9, 16  ;;  %v2454_v30 = vshll.u32 %v5474_v9, 16  ;;  %v2424_v1 = vrot.slane %v2422_v6, 5 }
 0x148   : > { %v2391_v43 = vsel %vm7213_vm2, %v2386_v36, %v8819_v40  ;;  %v2462_v17 = vrot.slane %v2460_v52, 5  ;;  %v2466_v24 = vrot.slane %v2464_v15, 4  ;;  %v2477_v21 = vrot.slane %v2475_v31, 4  ;;  %v5480_v36 = vld [vmem:[%s7181_s10 + $0xc0] sm:$0xf] }
 0x149   : > { %v2434_v54 = vrot.slane %v2433_v18, 4  ;;  %v2453_v0 = vrot.slane %v2451_v3, 4  ;;  %v2456_v42 = vrot.slane %v2454_v30, 5  ;;  %v2499_v9 = vshrl.u32 %v5480_v36, 16  ;;  %v7106_v18 = vld [vmem:[%s7181_s10 + $0xc4] sm:$0xf] }
 0x14a   : > { %v2508_v33 = vshll.u32 %v7106_v18, 16 }
 0x14b   : > { %v2439_v51 = vsel %vm7213_vm2, %v2434_v54, %v8838_v14  ;;  %v2457_v5 = vor.u32 %v2456_v42, %v2453_v0  ;;  %v2512_v14 = vshrl.u32 %v7106_v18, 16  ;;  %v2501_v19 = vrot.slane %v2499_v9, 4 }
 0x14c   : > { %6619 = vmatmul.mubr.bf16.gmra.mrb[12].mxu0 %v5810_v38  ;;  %v2401_v38 = vsel %vm7213_vm2, %v2396_v47, %v2400_v8  ;;  %v2490_v8 = vrot.slane %v2488_v44, 4  ;;  %v2415_v47 = vsel %vm7213_vm2, %v2410_v56, %v8836_v41  ;;  %v7105_v41 = vld [vmem:[%s7181_s10 + $0xb0] sm:$0x1]  ;;  %v5511_v58 = vcombine.low %v2439_v51, %v2449_v32  ;;  %v7108_v44 = vld [vmem:[%s7181_s10 + $0xc8] sm:$0x1] }
 0x14d   : > { %6395 = vmatmul.mubr.bf16.gmra.mrb[28].mxu1 %v7038_v61  ;;  %6622 = vmatprep.mubr.bf16.mxu0 %v5811_v35  ;;  %v2420_v35 = vrot.slane %v2419_v26, 4  ;;  %v5509_v40 = vcombine.low %v2391_v43, %v2401_v38  ;;  %v2480_v61 = vrot.slane %v2478_v63, 5  ;;  %v2470_v6 = vshll.u32 %v7105_v41, 16 }
 0x14e   : > { %6430 = vmatprep.mubr.bf16.mxu1 %v5507_v45  ;;  %v2486_v45 = vrot.slane %v2484_v29, 5  ;;  %v2502_v26 = vshll.u32 %v5480_v36, 16  ;;  %v2458_v22 = vrot.slane %v2457_v5, 4  ;;  %v2510_v15 = vrot.slane %v2508_v33, 5 }
 0x14f   : > { %v2425_v12 = vsel %vm7213_vm2, %v2420_v35, %v2424_v1  ;;  %v2481_v10 = vor.u32 %v2480_v61, %v2477_v21  ;;  %v2472_v30 = vrot.slane %v2470_v6, 5  ;;  %v2514_v43 = vrot.slane %v2512_v14, 4 }
 0x150   : > { %v2491_v39 = vor.u32 %v2490_v8, %v2486_v45  ;;  %v5510_v3 = vcombine.low %v2415_v47, %v2425_v12  ;;  %v2504_v52 = vrot.slane %v2502_v26, 5  ;;  %v2463_v31 = vsel %vm7213_vm2, %v2458_v22, %v2462_v17  ;;  %v8912_v47 = vld [vmem:[%s8973_s2] ss:$0 sm:$0xff] }
 0x151   : > { %v2482_v38 = vrot.slane %v2481_v10, 4  ;;  %v2515_v29 = vor.u32 %v2514_v43, %v2510_v15  ;;  %v2518_v35 = vshll.u32 %v7108_v44, 16 }
 0x152   : > { %v2492_v56 = vrot.slane %v2491_v39, 4  ;;  %v2505_v20 = vor.u32 %v2504_v52, %v2501_v19 }
 0x153   : > { %v2487_v4 = vsel %vm7213_vm2, %v2482_v38, %v2486_v45  ;;  %v2520_v54 = vrot.slane %v2518_v35, 5 }
 0x154   : > { %6623 = vmatmul.mubr.bf16.gmra.mrb[16].mxu0 %v5812_v62  ;;  %v2467_v62 = vor.u32 %v2466_v24, %v2462_v17  ;;  %v2506_v25 = vrot.slane %v2505_v20, 4 }
 0x155   : > { %6431 = vmatmul.mubr.bf16.vlgmr.msra.gmra.mrb[16].mxu1 %v8661_v50  ;;  %6626 = vmatprep.mubr.bf16.mxu0 %v5813_v59  ;;  %v7107_v50 = vld [vmem:[%s7181_s10 + $0xbc] sm:$0x1] }
 0x156   : > { %6434 = vmatprep.mubr.bf16.mxu1 %v5509_v40  ;;  %v2494_v23 = vshll.u32 %v7107_v50, 16  ;;  %v2468_v59 = vrot.slane %v2467_v62, 4  ;;  %v2511_v13 = vsel %vm7213_vm2, %v2506_v25, %v2510_v15 }
 0x158   : > { %v2496_v1 = vrot.slane %v2494_v23, 5  ;;  %v2473_v63 = vsel %vm7213_vm2, %v2468_v59, %v2472_v30 }
 0x15a   : > { %v2497_v57 = vsel %vm7213_vm2, %v2492_v56, %v2496_v1 }
 0x15b   : > { %v5513_v7 = vcombine.low %v2487_v4, %v2497_v57 }
 0x15c   : > { %6627 = vmatmul.mubr.bf16.gmra.mrb[20].mxu0 %v5814_v53  ;;  %v5512_v53 = vcombine.low %v2463_v31, %v2473_v63 }
 0x15d   : > { %6435 = vmatmul.mubr.bf16.gmra.mrb[20].mxu1 %v5510_v3  ;;  %6630 = vmatprep.mubr.bf16.mxu0 %v5815_v16  ;;  %v2516_v16 = vrot.slane %v2515_v29, 4 }
 0x15e   : > { %6438 = vmatprep.mubr.bf16.mxu1 %v5511_v58 }
 0x15f   : > { %v2521_v60 = vsel %vm7213_vm2, %v2516_v16, %v2520_v54 }
 0x160   : > { %v5514_v0 = vcombine.low %v2511_v13, %v2521_v60 }
 0x164   : > { %6631 = vmatmul.mubr.bf16.gmra.mrb[24].mxu0 %v5816_v2 }
 0x165   : > { %6439 = vmatmul.mubr.bf16.gmra.mrb[24].mxu1 %v5512_v53  ;;  %6634 = vmatprep.mubr.bf16.mxu0 %v5817_v28 }
 0x166   : > { %6442 = vmatprep.mubr.bf16.mxu1 %v5513_v7 }
 0x16c   : > { %6635 = vmatmul.mubr.bf16.gmra.mrb[28].mxu0 %v5818_v48 }
 0x16d   : > { %6443 = vmatmul.mubr.bf16.gmra.mrb[28].mxu1 %v5514_v0 }
 0x1e8   : > { %v6368_v27 = vpop.f32.mrb[0].mxu1 }
 0x1e9   : > { %v1931_v46 = vpop.f32.mrb[1].mxu1 }
 0x1ea   : > { %v6369_v2 = vpop.f32.mrb[2].mxu1 }
 0x1eb   : > { %v1934_v42 = vpop.f32.mrb[3].mxu1 }
 0x1f0   : > { %v6372_v17 = vpop.f32.mrb[4].mxu1 }
 0x1f1   : > { %v1947_v55 = vpop.f32.mrb[5].mxu1 }
 0x1f2   : > { %v6373_v49 = vpop.f32.mrb[6].mxu1 }
 0x1f3   : > { %v1950_v28 = vpop.f32.mrb[7].mxu1 }
 0x1f8   : > { %v6376_v24 = vpop.f32.mrb[8].mxu1 }
 0x1f9   : > { %v1963_v40 = vpop.f32.mrb[9].mxu1 }
 0x1fa   : > { %v6377_v21 = vpop.f32.mrb[10].mxu1 }
 0x1fb   : > { %v1966_v37 = vpop.f32.mrb[11].mxu1 }
 0x200   : > { %v6380_v61 = vpop.f32.mrb[12].mxu1 }
 0x201   : > { %v1979_v45 = vpop.f32.mrb[13].mxu1 }
 0x202   : > { %v6381_v8 = vpop.f32.mrb[14].mxu1 }
 0x203   : > { %v1982_v36 = vpop.f32.mrb[15].mxu1 }
 0x207   : > { %v6608_v34 = vpop.f32.mrb[0].mxu0 }
 0x208   : > { %v6654_v11 = vadd.f32 %v6608_v34, %v6368_v27  ;;  %v4822_v48 = vpop.f32.mrb[1].mxu0 }
 0x209   : > { %v6655_v12 = vadd.f32 %v4822_v48, %v1931_v46  ;;  %v6609_v51 = vpop.f32.mrb[2].mxu0 }
 0x20a   : > { %v6656_v32 = vadd.f32 %v6609_v51, %v6369_v2  ;;  %v4825_v5 = vpop.f32.mrb[3].mxu0  ;;  %v4990_v41 = vadd.f32 %v6654_v11, %v8912_v47 }
 0x20b   : > { %v6657_v62 = vadd.f32 %v4825_v5, %v1934_v42  ;;  %v4988_v9 = vadd.f32 %v6655_v12, %v8912_v47 }
 0x20c   : > { %v4991_v6 = vadd.f32 %v6656_v32, %v8912_v47 }
 0x20d   : > { %v4989_v26 = vadd.f32 %v6657_v62, %v8912_v47 }
 0x20e   : > { %v5903_v18 = vpack.c.bf16 %v4991_v6, %v4990_v41 }
 0x20f   : > { %v5898_v33 = vpack.c.bf16 %v4989_v26, %v4988_v9  ;;  %v6612_v14 = vpop.f32.mrb[4].mxu0 }
 0x210   : > { %5975 = vst [vmem:[%s8921_s11 + $0x8] sm:$0xff] %v5903_v18   ;;  %v6658_v10 = vadd.f32 %v6612_v14, %v6372_v17  ;;  %v4838_v39 = vpop.f32.mrb[5].mxu0 }
 0x211   : > { %5899 = vst [vmem:[%s8921_s11] sm:$0xff] %v5898_v33   ;;  %v6659_v50 = vadd.f32 %v4838_v39, %v1947_v55  ;;  %v6613_v23 = vpop.f32.mrb[6].mxu0 }
 0x212   : > { %v6660_v3 = vadd.f32 %v6613_v23, %v6373_v49  ;;  %v4841_v58 = vpop.f32.mrb[7].mxu0  ;;  %v4994_v59 = vadd.f32 %v6658_v10, %v8912_v47 }
 0x213   : > { %v6661_v22 = vadd.f32 %v4841_v58, %v1950_v28  ;;  %v4992_v19 = vadd.f32 %v6659_v50, %v8912_v47 }
 0x214   : > { %v4995_v30 = vadd.f32 %v6660_v3, %v8912_v47 }
 0x215   : > { %v4993_v52 = vadd.f32 %v6661_v22, %v8912_v47 }
 0x216   : > { %v5913_v15 = vpack.c.bf16 %v4995_v30, %v4994_v59 }
 0x217   : > { %v5908_v43 = vpack.c.bf16 %v4993_v52, %v4992_v19  ;;  %v6616_v38 = vpop.f32.mrb[8].mxu0 }
 0x218   : > { %5977 = vst [vmem:[%s8921_s11 + $0x18] sm:$0xff] %v5913_v15   ;;  %v6662_v56 = vadd.f32 %v6616_v38, %v6376_v24  ;;  %v4854_v1 = vpop.f32.mrb[9].mxu0 }
 0x219   : > { %5976 = vst [vmem:[%s8921_s11 + $0x10] sm:$0xff] %v5908_v43   ;;  %v6663_v31 = vadd.f32 %v4854_v1, %v1963_v40  ;;  %v6617_v63 = vpop.f32.mrb[10].mxu0 }
 0x21a   : > { %v6664_v20 = vadd.f32 %v6617_v63, %v6377_v21  ;;  %v4857_v29 = vpop.f32.mrb[11].mxu0  ;;  %v4998_v35 = vadd.f32 %v6662_v56, %v8912_v47 }
 0x21b   : > { %v6665_v44 = vadd.f32 %v4857_v29, %v1966_v37  ;;  %v4996_v57 = vadd.f32 %v6663_v31, %v8912_v47 }
 0x21c   : > { %v4999_v4 = vadd.f32 %v6664_v20, %v8912_v47 }
 0x21d   : > { %v4997_v53 = vadd.f32 %v6665_v44, %v8912_v47 }
 0x21e   : > { %v5923_v7 = vpack.c.bf16 %v4999_v4, %v4998_v35 }
 0x21f   : > { %v5918_v25 = vpack.c.bf16 %v4997_v53, %v4996_v57  ;;  %v6620_v16 = vpop.f32.mrb[12].mxu0 }
 0x220   : > { %5979 = vst [vmem:[%s8921_s11 + $0x28] sm:$0xff] %v5923_v7   ;;  %v6666_v54 = vadd.f32 %v6620_v16, %v6380_v61  ;;  %v4870_v13 = vpop.f32.mrb[13].mxu0 }
 0x221   : > { %5978 = vst [vmem:[%s8921_s11 + $0x20] sm:$0xff] %v5918_v25   ;;  %v6667_v60 = vadd.f32 %v4870_v13, %v1979_v45  ;;  %v6621_v0 = vpop.f32.mrb[14].mxu0 }
 0x222   : > { %v6668_v27 = vadd.f32 %v6621_v0, %v6381_v8  ;;  %v4873_v46 = vpop.f32.mrb[15].mxu0  ;;  %v5002_v42 = vadd.f32 %v6666_v54, %v8912_v47 }
 0x223   : > { %v6669_v2 = vadd.f32 %v4873_v46, %v1982_v36  ;;  %v5000_v55 = vadd.f32 %v6667_v60, %v8912_v47 }
 0x224   : > { %v5003_v17 = vadd.f32 %v6668_v27, %v8912_v47 }
 0x225   : > { %v5001_v49 = vadd.f32 %v6669_v2, %v8912_v47 }
 0x226   : > { %v5933_v28 = vpack.c.bf16 %v5003_v17, %v5002_v42 }
 0x227   : > { %v5928_v24 = vpack.c.bf16 %v5001_v49, %v5000_v55  ;;  %v6624_v40 = vpop.f32.mrb[16].mxu0 }
 0x228   : > { %5981 = vst [vmem:[%s8921_s11 + $0x38] sm:$0xff] %v5933_v28   ;;  %v6432_v21 = vpop.f32.mrb[16].mxu1  ;;  %v4886_v37 = vpop.f32.mrb[17].mxu0 }
 0x229   : > { %5980 = vst [vmem:[%s8921_s11 + $0x30] sm:$0xff] %v5928_v24   ;;  %v6670_v61 = vadd.f32 %v6624_v40, %v6432_v21  ;;  %v2749_v45 = vpop.f32.mrb[17].mxu1  ;;  %v6625_v8 = vpop.f32.mrb[18].mxu0 }
 0x22a   : > { %v6671_v36 = vadd.f32 %v4886_v37, %v2749_v45  ;;  %v6433_v34 = vpop.f32.mrb[18].mxu1  ;;  %v4889_v11 = vpop.f32.mrb[19].mxu0 }
 0x22b   : > { %v6672_v48 = vadd.f32 %v6625_v8, %v6433_v34  ;;  %v2752_v12 = vpop.f32.mrb[19].mxu1  ;;  %v5006_v32 = vadd.f32 %v6670_v61, %v8912_v47 }
 0x22c   : > { %v6673_v51 = vadd.f32 %v4889_v11, %v2752_v12  ;;  %v5004_v62 = vadd.f32 %v6671_v36, %v8912_v47 }
 0x22d   : > { %v5007_v5 = vadd.f32 %v6672_v48, %v8912_v47 }
 0x22e   : > { %v5005_v41 = vadd.f32 %v6673_v51, %v8912_v47 }
 0x22f   : > { %v5943_v6 = vpack.c.bf16 %v5007_v5, %v5006_v32  ;;  %v6628_v9 = vpop.f32.mrb[20].mxu0 }
 0x230   : > { %v5938_v26 = vpack.c.bf16 %v5005_v41, %v5004_v62  ;;  %v6436_v18 = vpop.f32.mrb[20].mxu1  ;;  %v4902_v33 = vpop.f32.mrb[21].mxu0 }
 0x231   : > { %5983 = vst [vmem:[%s8921_s11 + $0x48] sm:$0xff] %v5943_v6   ;;  %v6674_v14 = vadd.f32 %v6628_v9, %v6436_v18  ;;  %v2765_v10 = vpop.f32.mrb[21].mxu1  ;;  %v6629_v39 = vpop.f32.mrb[22].mxu0 }
 0x232   : > { %5982 = vst [vmem:[%s8921_s11 + $0x40] sm:$0xff] %v5938_v26   ;;  %v6675_v50 = vadd.f32 %v4902_v33, %v2765_v10  ;;  %v6437_v23 = vpop.f32.mrb[22].mxu1  ;;  %v4905_v3 = vpop.f32.mrb[23].mxu0 }
 0x233   : > { %v6676_v58 = vadd.f32 %v6629_v39, %v6437_v23  ;;  %v2768_v22 = vpop.f32.mrb[23].mxu1  ;;  %v5010_v30 = vadd.f32 %v6674_v14, %v8912_v47 }
 0x234   : > { %v6677_v59 = vadd.f32 %v4905_v3, %v2768_v22  ;;  %v5008_v52 = vadd.f32 %v6675_v50, %v8912_v47 }
 0x235   : > { %v5011_v19 = vadd.f32 %v6676_v58, %v8912_v47 }
 0x236   : > { %v5009_v15 = vadd.f32 %v6677_v59, %v8912_v47 }
 0x237   : > { %v5953_v43 = vpack.c.bf16 %v5011_v19, %v5010_v30  ;;  %v6632_v38 = vpop.f32.mrb[24].mxu0 }
 0x238   : > { %v5948_v56 = vpack.c.bf16 %v5009_v15, %v5008_v52  ;;  %v6440_v1 = vpop.f32.mrb[24].mxu1  ;;  %v4918_v31 = vpop.f32.mrb[25].mxu0 }
 0x239   : > { %5985 = vst [vmem:[%s8921_s11 + $0x58] sm:$0xff] %v5953_v43   ;;  %v6678_v63 = vadd.f32 %v6632_v38, %v6440_v1  ;;  %v2781_v20 = vpop.f32.mrb[25].mxu1  ;;  %v6633_v29 = vpop.f32.mrb[26].mxu0 }
 0x23a   : > { %5984 = vst [vmem:[%s8921_s11 + $0x50] sm:$0xff] %v5948_v56   ;;  %v6679_v44 = vadd.f32 %v4918_v31, %v2781_v20  ;;  %v6441_v35 = vpop.f32.mrb[26].mxu1  ;;  %v4921_v4 = vpop.f32.mrb[27].mxu0 }
 0x23b   : > { %v6680_v57 = vadd.f32 %v6633_v29, %v6441_v35  ;;  %v2784_v53 = vpop.f32.mrb[27].mxu1  ;;  %v5014_v25 = vadd.f32 %v6678_v63, %v8912_v47 }
 0x23c   : > { %v6681_v7 = vadd.f32 %v4921_v4, %v2784_v53  ;;  %v5012_v54 = vadd.f32 %v6679_v44, %v8912_v47 }
 0x23d   : > { %v5015_v16 = vadd.f32 %v6680_v57, %v8912_v47 }
 0x23e   : > { %v5013_v13 = vadd.f32 %v6681_v7, %v8912_v47 }
 0x23f   : > { %v5963_v60 = vpack.c.bf16 %v5015_v16, %v5014_v25  ;;  %v6636_v0 = vpop.f32.mrb[28].mxu0 }
 0x240   : > { %v5958_v27 = vpack.c.bf16 %v5013_v13, %v5012_v54  ;;  %v6444_v46 = vpop.f32.mrb[28].mxu1  ;;  %v4934_v2 = vpop.f32.mrb[29].mxu0 }
 0x241   : > { %5987 = vst [vmem:[%s8921_s11 + $0x68] sm:$0xff] %v5963_v60   ;;  %v6682_v42 = vadd.f32 %v6636_v0, %v6444_v46  ;;  %v2797_v17 = vpop.f32.mrb[29].mxu1  ;;  %v6637_v55 = vpop.f32.mrb[30].mxu0 }
 0x242   : > { %5986 = vst [vmem:[%s8921_s11 + $0x60] sm:$0xff] %v5958_v27   ;;  %v6683_v49 = vadd.f32 %v4934_v2, %v2797_v17  ;;  %v6445_v28 = vpop.f32.mrb[30].mxu1  ;;  %v4937_v24 = vpop.f32.mrb[31].mxu0 }
 0x243   : > { %v6684_v40 = vadd.f32 %v6637_v55, %v6445_v28  ;;  %v2800_v21 = vpop.f32.mrb[31].mxu1  ;;  %v5018_v61 = vadd.f32 %v6682_v42, %v8912_v47 }
 0x244   : > { %v6685_v37 = vadd.f32 %v4937_v24, %v2800_v21  ;;  %v5016_v8 = vadd.f32 %v6683_v49, %v8912_v47 }
 0x245   : > { %v5019_v45 = vadd.f32 %v6684_v40, %v8912_v47 }
 0x246   : > { %v5017_v36 = vadd.f32 %v6685_v37, %v8912_v47 }
 0x247   : > { %v5973_v34 = vpack.c.bf16 %v5019_v45, %v5018_v61 }
 0x248   : > { %v5968_v11 = vpack.c.bf16 %v5017_v36, %v5016_v8 }
 0x249   : > { %5989 = vst [vmem:[%s8921_s11 + $0x78] sm:$0xff] %v5973_v34  }
 0x24a   : > { %5988 = vst [vmem:[%s8921_s11 + $0x70] sm:$0xff] %v5968_v11  }
 0x24b PF: > { %s13_s12 = sadd.s32 1, %s7115_s12  }
 0x24c   : > { %p10_p4 = scmp.ge.s32.totalorder %s13_s12, 4  }
 0x24e   :  { %12 = sbr.rel (!%p10_p4) target bundleno = 1 (0x1), region = 72 }

// kernel: spade_down_block.9
= control target key start
LH: loop header
LB: loop body
LE: loop exit
PB: predicated region body
PF: predicated region fallthrough
CT: control target
= control target key end

     0   :  { %s2237_s21 = smov 0   ;;  %s2529_s0 = inlined_call_operand.vmem [shape: bf16[2,9,9,4], index: 0, kind: input, shape index: {}]   ;;  %s2530_s1 = inlined_call_operand.vmem [shape: bf16[2,9,9,4], index: 1, kind: input, shape index: {}]   ;;  %s2531_s2 = inlined_call_operand.vmem [shape: bf16[2,9,9,4], index: 2, kind: input, shape index: {}]   ;;  %s2532_s3 = inlined_call_operand.vmem [shape: bf16[2,9,9,4], index: 3, kind: input, shape index: {}]   ;;  %s2533_s4 = inlined_call_operand.vmem [shape: bf16[9,4,128], index: 4, kind: input, shape index: {}]   ;;  %s2534_s5 = inlined_call_operand.vmem [shape: f32[1,128], index: 5, kind: input, shape index: {}]   ;;  %s2535_s6 = inlined_call_operand.vmem [shape: f32[2,8,8,128], index: 6, kind: output, shape index: {}]  }
   0x1 LB: > { %s1823_s22 = sadd.s32 4294967295, %s2200_s21   ;;  %p1827_p0 = scmp.ge.s32.totalorder %s2200_s21, 1  ;;  %s2200_s21 = sphi %s2237_s21, %s16_s21  }
   0x2   : > { %p242_p1 = scmp.lt.s32.totalorder %s2200_s21, 3 }
   0x4   : > { %p243_p2 = pnand %p1827_p0, %p242_p1 }
   0x5   : > { %v1834_v0 = vld [vmem:[%s2533_s4 + $0x2] sm:$0x3] (!%p243_p2)  ;;  %vm365_vm0 = vcmask (!%p243_p2), 1041408   ;;  %v2251_v1 = vld [vmem:[%s2533_s4 + $0x8] sm:$0x3] (!%p243_p2)  ;;  %p287_p3 = scmp.lt.s32.totalorder (!%p243_p2), %s1823_s22, 1 }
   0x6   : > { %246 = sbr.rel (%p243_p2) target bundleno = 316 (0x13c), region = 44  ;;  %2151 = vmatprep.subr.msk.bf16.mxu1 (!%p243_p2), %vm365_vm0, %v1834_v0  ;;  %2155 = vmatprep.subr.msk.bf16.mxu0 (!%p243_p2), %vm365_vm0, %v2251_v1  ;;  %v367_v2 = vsel (!%p243_p2), %vm365_vm0, %v1834_v0, 0  ;;  %v2259_v3 = vsel (!%p243_p2), %vm365_vm0, %v2251_v1, 0  ;;  %v321_v4 = vld [vmem:[%s2533_s4] sm:$0x3] (!%p243_p2)  ;;  %vm352_vm1 = vcmask (!%p243_p2), 31744  }
   0x7   : > { %1996 = vmatpush3.bf16.msra.mxu1 (!%p243_p2), %v367_v2  ;;  %2036 = vmatpush3.bf16.msra.mxu0 (!%p243_p2), %v2259_v3  ;;  %v1878_v5 = vld [vmem:[%s2533_s4 + $0xa] sm:$0x3] (!%p243_p2)  ;;  %v467_v6 = vsel (!%p243_p2), %vm365_vm0, %v321_v4, 0  ;;  %v1895_v9 = vld [vmem:[%s2533_s4 + $0xc] sm:$0x3] (!%p243_p2) }
   0x8   : > { %2152 = vmatprep.subr.msk.bf16.mxu1 (!%p243_p2), %vm365_vm0, %v321_v4  ;;  %2157 = vmatprep.subr.msk.bf16.mxu0 (!%p243_p2), %vm365_vm0, %v1878_v5  ;;  %v1158_v7 = vsel (!%p243_p2), %vm365_vm0, %v1878_v5, 0  ;;  %v1851_v10 = vld [vmem:[%s2533_s4 + $0x4] sm:$0x3] (!%p243_p2)  ;;  %vm550_vm2 = vsmask.f32 (!%p243_p2), 3328  ;;  %v2311_v15 = vsel (!%p243_p2), %vm365_vm0, %v1895_v9, 0 }
   0x9   : > { %vm551_vm3 = vsmask.f32 (!%p243_p2), 7440  ;;  %v2314_v16 = vsel (!%p243_p2), %vm365_vm0, %v1851_v10, 0 }
   0xa   : > { %vm2337_vm4 = vmor (!%p243_p2), %vm550_vm2, %vm551_vm3 }
   0xd   : > { %s2539_s22 = smov (!%p287_p3, %s1823_s22), 1 }
   0xe   : > { %s2273_s7 = smul.u32 72, %s2539_s22 }
  0x10   : > { %s2279_s10 = scalar_lea.vmem %s2530_s1, %s2273_s7  ;;  %s2288_s13 = scalar_lea.vmem %s2532_s3, %s2273_s7 }
  0x11   : > { %v2170_v8 = vld [vmem:[%s2279_s10] ss:$8 sps:$4 sm:$0xff]   ;;  %v2172_v12 = vld [vmem:[%s2279_s10 + $0x10] ss:$8 sps:$4 sm:$0xff]   ;;  %s2303_s20 = scalar_lea.vmem %s2531_s2, %s2273_s7  ;;  %s2331_s25 = scalar_lea.vmem %s2529_s0, %s2273_s7 }
  0x12   : > { %v2171_v11 = vld [vmem:[%s2288_s13] ss:$8 sps:$4 sm:$0xff]   ;;  %1997 = vmatprep.mubr.msk.bf16.mxu1 %vm352_vm1, %v2170_v8  ;;  %v2173_v13 = vld [vmem:[%s2288_s13 + $0x10] ss:$8 sps:$4 sm:$0xff]   ;;  %v1004_v19 = vld [vmem:[%s2303_s20 + $0x4] sm:$0x1] }
  0x13   : > { %2037 = vmatprep.mubr.msk.bf16.mxu0 %vm352_vm1, %v2171_v11  ;;  %1998 = vmatmul.mubr.msk.bf16.vlgmr.msra.gmra.mrb[0].mxu1 %vm352_vm1, %v2172_v12  ;;  %v2174_v14 = vld [vmem:[%s2279_s10 + $0x20] ss:$8 sps:$4 sm:$0xff]   ;;  %v2175_v17 = vld [vmem:[%s2279_s10 + $0x30] ss:$8 sps:$4 sm:$0xff]   ;;  %v1006_v21 = vld [vmem:[%s2303_s20 + $0xc] sm:$0x1] }
  0x14   : > { %2006 = vmatpush3.bf16.msra.mxu1 %v467_v6  ;;  %2038 = vmatmul.mubr.msk.bf16.vlgmr.msra.gmra.mrb[0].mxu0 %vm352_vm1, %v2173_v13  ;;  %v1003_v18 = vld [vmem:[%s2303_s20] sm:$0xf]  ;;  %v1005_v20 = vld [vmem:[%s2303_s20 + $0x8] sm:$0xf]  ;;  %v1029_v24 = vshll.u32 %v1004_v19, 16  ;;  %v1043_v27 = vshll.u32 %v1006_v21, 16 }
  0x15   : > { %2046 = vmatpush3.bf16.msra.mxu0 %v1158_v7  ;;  %2001 = vmatprep.mubr.msk.bf16.mxu1 %vm352_vm1, %v2174_v14  ;;  %v1020_v22 = vshrl.u32 %v1003_v18, 16  ;;  %v1023_v23 = vshll.u32 %v1003_v18, 16  ;;  %v1034_v25 = vshrl.u32 %v1005_v20, 16  ;;  %v1037_v26 = vshll.u32 %v1005_v20, 16  ;;  %v1007_v28 = vld [vmem:[%s2303_s20 + $0x10] sm:$0xf] }
  0x16   : > { %2158 = vmatprep.subr.msk.bf16.mxu0 %vm365_vm0, %v1895_v9  ;;  %2153 = vmatprep.subr.msk.bf16.mxu1 %vm365_vm0, %v1851_v10  ;;  %v1008_v29 = vld [vmem:[%s2303_s20 + $0x14] sm:$0x1]  ;;  %v1031_v32 = vrot.slane %v1029_v24, 5  ;;  %v1009_v34 = vld [vmem:[%s2303_s20 + $0x18] sm:$0xf]  ;;  %v1045_v36 = vrot.slane %v1043_v27, 5 }
  0x17   : > { %v1022_v30 = vrot.slane %v1020_v22, 4  ;;  %v1025_v31 = vrot.slane %v1023_v23, 5  ;;  %v1036_v33 = vrot.slane %v1034_v25, 4  ;;  %v1039_v35 = vrot.slane %v1037_v26, 5  ;;  %v1010_v37 = vld [vmem:[%s2303_s20 + $0x1c] sm:$0x1] }
  0x18   : > { %v1048_v38 = vshrl.u32 %v1007_v28, 16  ;;  %v1051_v39 = vshll.u32 %v1007_v28, 16  ;;  %v1057_v41 = vshll.u32 %v1008_v29, 16  ;;  %v1062_v42 = vshrl.u32 %v1009_v34, 16  ;;  %v2176_v53 = vld [vmem:[%s2331_s25] ss:$8 sps:$4 sm:$0xff]  }
  0x19   : > { %v1026_v40 = vor.u32 %v1025_v31, %v1022_v30  ;;  %v1065_v43 = vshll.u32 %v1009_v34, 16  ;;  %v1040_v45 = vor.u32 %v1039_v35, %v1036_v33  ;;  %v1071_v48 = vshll.u32 %v1010_v37, 16  ;;  %v2177_v59 = vld [vmem:[%s2331_s25 + $0x10] ss:$8 sps:$4 sm:$0xff]   ;;  %v1011_v60 = vld [vmem:[%s2303_s20 + $0x20] sm:$0xf] }
  0x1a   : > { %v1050_v46 = vrot.slane %v1048_v38, 4  ;;  %v1053_v47 = vrot.slane %v1051_v39, 5  ;;  %v1059_v50 = vrot.slane %v1057_v41, 5  ;;  %v1064_v51 = vrot.slane %v1062_v42, 4  ;;  %v1012_v61 = vld [vmem:[%s2303_s20 + $0x24] sm:$0x1] }
  0x1b   : > { %2002 = vmatmul.mubr.msk.bf16.gmra.mrb[4].mxu1 %vm352_vm1, %v2175_v17  ;;  %v1027_v49 = vrot.slane %v1026_v40, 4  ;;  %v1067_v52 = vrot.slane %v1065_v43, 5  ;;  %v1041_v54 = vrot.slane %v1040_v45, 4  ;;  %v1073_v56 = vrot.slane %v1071_v48, 5  ;;  %v1013_v0 = vld [vmem:[%s2303_s20 + $0x28] sm:$0xf] }
  0x1c   : > { %v1054_v55 = vor.u32 %v1053_v47, %v1050_v46  ;;  %2007 = vmatprep.mubr.msk.bf16.mxu1 %vm352_vm1, %v2176_v53  ;;  %v1014_v2 = vld [vmem:[%s2303_s20 + $0x2c] sm:$0x1]  ;;  %v1076_v4 = vshrl.u32 %v1011_v60, 16  ;;  %v1079_v7 = vshll.u32 %v1011_v60, 16  ;;  %v1085_v8 = vshll.u32 %v1012_v61, 16 }
  0x1d   : > { %v1032_v57 = vsel %vm2337_vm4, %v1027_v49, %v1031_v32  ;;  %v1068_v58 = vor.u32 %v1067_v52, %v1064_v51  ;;  %v1046_v62 = vsel %vm2337_vm4, %v1041_v54, %v1045_v36  ;;  %v1015_v9 = vld [vmem:[%s2303_s20 + $0x30] sm:$0xf]  ;;  %v2356_v10 = vld [vmem:[%s2533_s4 + $0x6] sm:$0x3]  ;;  %v1090_v13 = vshrl.u32 %v1013_v0, 16 }
  0x1e   : > { %v1055_v63 = vrot.slane %v1054_v55, 4  ;;  %v1879_v5 = vcombine.low %v1032_v57, %v1046_v62  ;;  %v1078_v12 = vrot.slane %v1076_v4, 4  ;;  %v1093_v14 = vshll.u32 %v1013_v0, 16  ;;  %v1016_v17 = vld [vmem:[%s2303_s20 + $0x34] sm:$0x1] }
  0x1f   : > { %v1069_v6 = vrot.slane %v1068_v58, 4  ;;  %v1081_v19 = vrot.slane %v1079_v7, 5  ;;  %v1087_v20 = vrot.slane %v1085_v8, 5  ;;  %v1099_v21 = vshll.u32 %v1014_v2, 16  ;;  %v1017_v22 = vld [vmem:[%s2303_s20 + $0x38] sm:$0xf] }
  0x20   : > { %v1060_v11 = vsel %vm2337_vm4, %v1055_v63, %v1059_v50  ;;  %2047 = vmatprep.mubr.msk.bf16.mxu0 %vm352_vm1, %v1879_v5  ;;  %v2368_v23 = vld [vmem:[%s2533_s4 + $0xe] sm:$0x3]  ;;  %v1092_v25 = vrot.slane %v1090_v13, 4  ;;  %v1095_v26 = vrot.slane %v1093_v14, 5  ;;  %v1018_v27 = vld [vmem:[%s2303_s20 + $0x3c] sm:$0x1] }
  0x21   : > { %v1074_v18 = vsel %vm2337_vm4, %v1069_v6, %v1073_v56  ;;  %v1104_v28 = vshrl.u32 %v1015_v9, 16  ;;  %v1082_v29 = vor.u32 %v1081_v19, %v1078_v12  ;;  %v1101_v30 = vrot.slane %v1099_v21, 5  ;;  %v2180_v53 = vld [vmem:[%s2331_s25 + $0x8] ss:$8 sps:$4 sm:$0xff]   ;;  %v534_v54 = vld [vmem:[%s2331_s25] sm:$0xf] }
  0x22   : > { %v1880_v24 = vcombine.low %v1060_v11, %v1074_v18  ;;  %v1107_v31 = vshll.u32 %v1015_v9, 16  ;;  %v1113_v32 = vshll.u32 %v1016_v17, 16  ;;  %v1096_v33 = vor.u32 %v1095_v26, %v1092_v25  ;;  %v535_v56 = vld [vmem:[%s2331_s25 + $0x4] sm:$0x1]  ;;  %v536_v57 = vld [vmem:[%s2331_s25 + $0x8] sm:$0xf] }
  0x23   : > { %2008 = vmatmul.mubr.msk.bf16.vlgmr.msra.gmra.mrb[0].mxu1 %vm352_vm1, %v2177_v59  ;;  %v1106_v34 = vrot.slane %v1104_v28, 4  ;;  %v1118_v35 = vshrl.u32 %v1017_v22, 16  ;;  %v1121_v36 = vshll.u32 %v1017_v22, 16  ;;  %v1083_v37 = vrot.slane %v1082_v29, 4  ;;  %v537_v58 = vld [vmem:[%s2331_s25 + $0xc] sm:$0x1] }
  0x24   : > { %2016 = vmatpush3.bf16.msra.mxu1 %v2314_v16  ;;  %2048 = vmatmul.mubr.msk.bf16.vlgmr.msra.gmra.mrb[0].mxu0 %vm352_vm1, %v1880_v24  ;;  %v1109_v38 = vrot.slane %v1107_v31, 5  ;;  %v1127_v39 = vshll.u32 %v1018_v27, 16  ;;  %v2178_v16 = vld [vmem:[%s2331_s25 + $0x20] ss:$8 sps:$4 sm:$0xff]   ;;  %v1097_v40 = vrot.slane %v1096_v33, 4  ;;  %v1115_v46 = vrot.slane %v1113_v32, 5 }
  0x25   : > { %2154 = vmatprep.subr.msk.bf16.mxu1 %vm365_vm0, %v2356_v10  ;;  %2056 = vmatpush3.bf16.msra.mxu0 %v2311_v15  ;;  %v1120_v41 = vrot.slane %v1118_v35, 4  ;;  %v1123_v42 = vrot.slane %v1121_v36, 5  ;;  %v1088_v43 = vsel %vm2337_vm4, %v1083_v37, %v1087_v20  ;;  %v2179_v15 = vld [vmem:[%s2331_s25 + $0x30] ss:$8 sps:$4 sm:$0xff]   ;;  %v554_v60 = vshrl.u32 %v534_v54, 16 }
  0x26   : > { %2159 = vmatprep.subr.msk.bf16.mxu0 %vm365_vm0, %v2368_v23  ;;  %v1110_v45 = vor.u32 %v1109_v38, %v1106_v34  ;;  %2011 = vmatprep.mubr.msk.bf16.mxu1 %vm352_vm1, %v2178_v16  ;;  %v1102_v47 = vsel %vm2337_vm4, %v1097_v40, %v1101_v30  ;;  %v1129_v49 = vrot.slane %v1127_v39, 5  ;;  %v557_v61 = vshll.u32 %v534_v54, 16  ;;  %v538_v63 = vld [vmem:[%s2331_s25 + $0x10] sm:$0xf]  ;;  %v539_v6 = vld [vmem:[%s2331_s25 + $0x14] sm:$0x1] }
  0x27   : > { %v1124_v48 = vor.u32 %v1123_v42, %v1120_v41  ;;  %v1881_v50 = vcombine.low %v1088_v43, %v1102_v47  ;;  %v563_v62 = vshll.u32 %v535_v56, 16  ;;  %v568_v2 = vshrl.u32 %v536_v57, 16  ;;  %v540_v11 = vld [vmem:[%s2331_s25 + $0x18] sm:$0xf]  ;;  %v541_v18 = vld [vmem:[%s2331_s25 + $0x1c] sm:$0x1] }
  0x28   : > { %v1111_v51 = vrot.slane %v1110_v45, 4  ;;  %v571_v4 = vshll.u32 %v536_v57, 16  ;;  %v577_v5 = vshll.u32 %v537_v58, 16  ;;  %v556_v7 = vrot.slane %v554_v60, 4  ;;  %v2181_v29 = vld [vmem:[%s2331_s25 + $0x18] ss:$8 sps:$4 sm:$0xff]  }
  0x29   : > { %v1125_v52 = vrot.slane %v1124_v48, 4  ;;  %2051 = vmatprep.mubr.msk.bf16.mxu0 %vm352_vm1, %v1881_v50  ;;  %v559_v8 = vrot.slane %v557_v61, 5  ;;  %v565_v9 = vrot.slane %v563_v62, 5  ;;  %v582_v12 = vshrl.u32 %v538_v63, 16  ;;  %v2182_v37 = vld [vmem:[%s2331_s25 + $0x28] ss:$8 sps:$4 sm:$0xff]  }
  0x2a   : > { %v1116_v55 = vsel %vm2337_vm4, %v1111_v51, %v1115_v46  ;;  %v570_v13 = vrot.slane %v568_v2, 4  ;;  %v573_v14 = vrot.slane %v571_v4, 5  ;;  %v579_v17 = vrot.slane %v577_v5, 5  ;;  %v542_v40 = vld [vmem:[%s2331_s25 + $0x20] sm:$0xf] }
  0x2b   : > { %2012 = vmatmul.mubr.msk.bf16.gmra.mrb[4].mxu1 %vm352_vm1, %v2179_v15  ;;  %v1130_v59 = vsel %vm2337_vm4, %v1125_v52, %v1129_v49  ;;  %v585_v19 = vshll.u32 %v538_v63, 16  ;;  %v560_v20 = vor.u32 %v559_v8, %v556_v7  ;;  %v584_v21 = vrot.slane %v582_v12, 4  ;;  %v543_v45 = vld [vmem:[%s2331_s25 + $0x24] sm:$0x1]  ;;  %v544_v46 = vld [vmem:[%s2331_s25 + $0x28] sm:$0xf] }
  0x2c   : > { %v1882_v0 = vcombine.low %v1116_v55, %v1130_v59  ;;  %v591_v22 = vshll.u32 %v539_v6, 16  ;;  %v596_v24 = vshrl.u32 %v540_v11, 16  ;;  %v574_v25 = vor.u32 %v573_v14, %v570_v13  ;;  %v545_v48 = vld [vmem:[%s2331_s25 + $0x2c] sm:$0x1]  ;;  %v546_v55 = vld [vmem:[%s2331_s25 + $0x30] sm:$0xf] }
  0x2d   : > { %v587_v26 = vrot.slane %v585_v19, 5  ;;  %v599_v27 = vshll.u32 %v540_v11, 16  ;;  %v605_v28 = vshll.u32 %v541_v18, 16  ;;  %v1396_v30 = vsel %vm365_vm0, %v2368_v23, 0  ;;  %v2415_v23 = vld [vmem:[%s2533_s4 + $0x10] sm:$0x3] }
  0x2e   : > { %2052 = vmatmul.mubr.msk.bf16.gmra.mrb[4].mxu0 %vm352_vm1, %v1882_v0  ;;  %v561_v31 = vrot.slane %v560_v20, 4  ;;  %v593_v32 = vrot.slane %v591_v22, 5  ;;  %v598_v33 = vrot.slane %v596_v24, 4  ;;  %v575_v34 = vrot.slane %v574_v25, 4  ;;  %v547_v60 = vld [vmem:[%s2331_s25 + $0x34] sm:$0x1] }
  0x2f   : > { %2057 = vmatprep.mubr.msk.bf16.mxu0 %vm352_vm1, %v2180_v53  ;;  %v588_v35 = vor.u32 %v587_v26, %v584_v21  ;;  %v601_v36 = vrot.slane %v599_v27, 5  ;;  %v607_v39 = vrot.slane %v605_v28, 5  ;;  %v810_v16 = vsel %vm365_vm0, %v2356_v10, 0  ;;  %v2183_v62 = vld [vmem:[%s2331_s25 + $0x38] ss:$8 sps:$4 sm:$0xff]  }
  0x30   : > { %v566_v38 = vsel %vm2337_vm4, %v561_v31, %v565_v9  ;;  %v580_v41 = vsel %vm2337_vm4, %v575_v34, %v579_v17  ;;  %v610_v15 = vshrl.u32 %v542_v40, 16  ;;  %v613_v49 = vshll.u32 %v542_v40, 16  ;;  %v548_v0 = vld [vmem:[%s2331_s25 + $0x38] sm:$0xf]  ;;  %v549_v2 = vld [vmem:[%s2331_s25 + $0x3c] sm:$0x1] }
  0x31   : > { %v589_v42 = vrot.slane %v588_v35, 4  ;;  %v602_v43 = vor.u32 %v601_v36, %v598_v33  ;;  %v1852_v47 = vcombine.low %v566_v38, %v580_v41  ;;  %v619_v10 = vshll.u32 %v543_v45, 16  ;;  %v2184_v14 = vld [vmem:[%s2279_s10 + $0x8] ss:$8 sps:$4 sm:$0xff]   ;;  %v2185_v35 = vld [vmem:[%s2279_s10 + $0x18] ss:$8 sps:$4 sm:$0xff]  }
  0x32   : > { %v624_v50 = vshrl.u32 %v544_v46, 16  ;;  %v612_v53 = vrot.slane %v610_v15, 4  ;;  %v627_v54 = vshll.u32 %v544_v46, 16  ;;  %v615_v56 = vrot.slane %v613_v49, 5  ;;  %v1922_v40 = vld [vmem:[%s2331_s25 + $0xc] sm:$0x1] }
  0x33   : > { %v594_v51 = vsel %vm2337_vm4, %v589_v42, %v593_v32  ;;  %v603_v52 = vrot.slane %v602_v43, 4  ;;  %2017 = vmatprep.mubr.msk.bf16.mxu1 %vm352_vm1, %v1852_v47  ;;  %v621_v57 = vrot.slane %v619_v10, 5  ;;  %v633_v59 = vshll.u32 %v545_v48, 16  ;;  %v1923_v41 = vld [vmem:[%s2331_s25 + $0x10] sm:$0xf] }
  0x34   : > { %v626_v58 = vrot.slane %v624_v50, 4  ;;  %v629_v63 = vrot.slane %v627_v54, 5  ;;  %v638_v4 = vshrl.u32 %v546_v55, 16  ;;  %v616_v6 = vor.u32 %v615_v56, %v612_v53  ;;  %v1924_v42 = vld [vmem:[%s2331_s25 + $0x14] sm:$0x1] }
  0x35   : > { %v608_v61 = vsel %vm2337_vm4, %v603_v52, %v607_v39  ;;  %v635_v7 = vrot.slane %v633_v59, 5  ;;  %v641_v8 = vshll.u32 %v546_v55, 16  ;;  %v647_v12 = vshll.u32 %v547_v60, 16  ;;  %v2188_v39 = vld [vmem:[%s2279_s10 + $0x28] ss:$8 sps:$4 sm:$0xff]  }
  0x36   : > { %2058 = vmatmul.mubr.msk.bf16.vlgmr.msra.gmra.mrb[0].mxu0 %vm352_vm1, %v2181_v29  ;;  %v1853_v5 = vcombine.low %v594_v51, %v608_v61  ;;  %v630_v9 = vor.u32 %v629_v63, %v626_v58  ;;  %v640_v11 = vrot.slane %v638_v4, 4  ;;  %v652_v13 = vshrl.u32 %v548_v0, 16  ;;  %v1925_v48 = vld [vmem:[%s2331_s25 + $0x18] sm:$0xf]  ;;  %v1926_v50 = vld [vmem:[%s2331_s25 + $0x1c] sm:$0x1] }
  0x37   : > { %2066 = vmatpush3.bf16.msra.mxu0 %v1396_v30  ;;  %2061 = vmatprep.mubr.msk.bf16.mxu0 %vm352_vm1, %v2182_v37  ;;  %v617_v17 = vrot.slane %v616_v6, 4  ;;  %v643_v18 = vrot.slane %v641_v8, 5  ;;  %v655_v19 = vshll.u32 %v548_v0, 16  ;;  %v661_v20 = vshll.u32 %v549_v2, 16  ;;  %v2186_v37 = vld [vmem:[%s2303_s20] ss:$8 sps:$4 sm:$0xff]  }
  0x38   : > { %2160 = vmatprep.subr.msk.bf16.mxu0 %vm365_vm0, %v2415_v23  ;;  %2018 = vmatmul.mubr.msk.bf16.vlgmr.msra.gmra.mrb[0].mxu1 %vm352_vm1, %v1853_v5  ;;  %v631_v21 = vrot.slane %v630_v9, 4  ;;  %v654_v22 = vrot.slane %v652_v13, 4  ;;  %v649_v26 = vrot.slane %v647_v12, 5  ;;  %v1626_v34 = vsel %vm365_vm0, %v2415_v23, 0  ;;  %v1927_v51 = vld [vmem:[%s2331_s25 + $0x20] sm:$0xf] }
  0x39   : > { %2026 = vmatpush3.bf16.msra.mxu1 %v810_v16  ;;  %v622_v24 = vsel %vm2337_vm4, %v617_v17, %v621_v57  ;;  %v644_v25 = vor.u32 %v643_v18, %v640_v11  ;;  %v657_v27 = vrot.slane %v655_v19, 5  ;;  %v663_v32 = vrot.slane %v661_v20, 5  ;;  %v1921_v16 = vld [vmem:[%s2331_s25 + $0x8] sm:$0xf]  ;;  %v2187_v52 = vld [vmem:[%s2303_s20 + $0x10] ss:$8 sps:$4 sm:$0xff]  }
  0x3a   : > { %2156 = vmatprep.subr.msk.bf16.mxu1 %vm365_vm0, %v2251_v1  ;;  %v636_v28 = vsel %vm2337_vm4, %v631_v21, %v635_v7  ;;  %v1488_v43 = vshrl.u32 %v1921_v16, 16  ;;  %v1491_v45 = vshll.u32 %v1921_v16, 16  ;;  %v1497_v23 = vshll.u32 %v1922_v40, 16  ;;  %v2189_v53 = vld [vmem:[%s2279_s10 + $0x38] ss:$8 sps:$4 sm:$0xff]   ;;  %s1949_s10 = sshll.u32 %s2539_s22, 6 }
  0x3b   : > { %v1854_v29 = vcombine.low %v622_v24, %v636_v28  ;;  %v645_v30 = vrot.slane %v644_v25, 4  ;;  %v658_v31 = vor.u32 %v657_v27, %v654_v22  ;;  %v1502_v46 = vshrl.u32 %v1923_v41, 16  ;;  %v1928_v58 = vld [vmem:[%s2331_s25 + $0x24] sm:$0x1]  ;;  %v2190_v5 = vld [vmem:[%s2303_s20 + $0x20] ss:$8 sps:$4 sm:$0xff]  }
  0x3c   : > { %v1505_v15 = vshll.u32 %v1923_v41, 16  ;;  %v1511_v47 = vshll.u32 %v1924_v42, 16  ;;  %v1490_v49 = vrot.slane %v1488_v43, 4  ;;  %v1493_v10 = vrot.slane %v1491_v45, 5  ;;  %v1929_v17 = vld [vmem:[%s2331_s25 + $0x28] sm:$0xf] }
  0x3d   : > { %2021 = vmatprep.mubr.msk.bf16.mxu1 %vm352_vm1, %v1854_v29  ;;  %v650_v1 = vsel %vm2337_vm4, %v645_v30, %v649_v26  ;;  %v659_v33 = vrot.slane %v658_v31, 4  ;;  %v1499_v54 = vrot.slane %v1497_v23, 5  ;;  %v1504_v55 = vrot.slane %v1502_v46, 4  ;;  %v1930_v20 = vld [vmem:[%s2331_s25 + $0x2c] sm:$0x1] }
  0x3e   : > { %2062 = vmatmul.mubr.msk.bf16.gmra.mrb[4].mxu0 %vm352_vm1, %v2183_v62  ;;  %v1507_v56 = vrot.slane %v1505_v15, 5  ;;  %v1513_v57 = vrot.slane %v1511_v47, 5  ;;  %v1494_v59 = vor.u32 %v1493_v10, %v1490_v49  ;;  %v1516_v60 = vshrl.u32 %v1925_v48, 16  ;;  %v1931_v21 = vld [vmem:[%s2331_s25 + $0x30] sm:$0xf] }
  0x3f   : > { %2067 = vmatprep.mubr.msk.bf16.mxu0 %vm352_vm1, %v2184_v14  ;;  %v664_v36 = vsel %vm2337_vm4, %v659_v33, %v663_v32  ;;  %v1519_v61 = vshll.u32 %v1925_v48, 16  ;;  %v1525_v62 = vshll.u32 %v1926_v50, 16  ;;  %v1530_v0 = vshrl.u32 %v1927_v51, 16  ;;  %v1932_v22 = vld [vmem:[%s2331_s25 + $0x34] sm:$0x1] }
  0x40   : > { %v1855_v38 = vcombine.low %v650_v1, %v664_v36  ;;  %v1508_v63 = vor.u32 %v1507_v56, %v1504_v55  ;;  %v1533_v2 = vshll.u32 %v1927_v51, 16  ;;  %v1539_v4 = vshll.u32 %v1928_v58, 16  ;;  %v2191_v32 = vld [vmem:[%s2303_s20 + $0x30] ss:$8 sps:$4 sm:$0xff]   ;;  %v1934_v16 = vld [vmem:[%s2331_s25 + $0x3c] sm:$0x1] }
  0x41   : > { %v1495_v6 = vrot.slane %v1494_v59, 4  ;;  %v1518_v7 = vrot.slane %v1516_v60, 4  ;;  %v1521_v8 = vrot.slane %v1519_v61, 5  ;;  %v1527_v9 = vrot.slane %v1525_v62, 5  ;;  %v1933_v36 = vld [vmem:[%s2331_s25 + $0x38] sm:$0xf] }
  0x42   : > { %2022 = vmatmul.mubr.msk.bf16.gmra.mrb[4].mxu1 %vm352_vm1, %v1855_v38  ;;  %v1509_v11 = vrot.slane %v1508_v63, 4  ;;  %v1532_v12 = vrot.slane %v1530_v0, 4  ;;  %v1535_v13 = vrot.slane %v1533_v2, 5  ;;  %v1541_v14 = vrot.slane %v1539_v4, 5  ;;  %v1935_v43 = vld [vmem:[%s2331_s25 + $0x40] sm:$0xf] }
  0x43   : > { %2027 = vmatprep.mubr.msk.bf16.mxu1 %vm352_vm1, %v2186_v37  ;;  %v1500_v18 = vsel %vm2337_vm4, %v1495_v6, %v1499_v54  ;;  %v1522_v19 = vor.u32 %v1521_v8, %v1518_v7  ;;  %v1544_v26 = vshrl.u32 %v1929_v17, 16  ;;  %v1547_v27 = vshll.u32 %v1929_v17, 16  ;;  %v1936_v45 = vld [vmem:[%s2331_s25 + $0x44] sm:$0x1]  ;;  %v2192_v15 = vld [vmem:[%s2288_s13 + $0x20] ss:$8 sps:$4 sm:$0xff]  }
  0x44   : > { %v1514_v24 = vsel %vm2337_vm4, %v1509_v11, %v1513_v57  ;;  %v1536_v25 = vor.u32 %v1535_v13, %v1532_v12  ;;  %v1553_v30 = vshll.u32 %v1930_v20, 16  ;;  %v1558_v31 = vshrl.u32 %v1931_v21, 16  ;;  %v2193_v8 = vld [vmem:[%s2288_s13 + $0x30] ss:$8 sps:$4 sm:$0xff]   ;;  %s2516_s13 = scalar_lea.vmem %s2535_s6, %s1949_s10 }
  0x45   : > { %v1938_v28 = vcombine.low %v1500_v18, %v1514_v24  ;;  %v1523_v29 = vrot.slane %v1522_v19, 4  ;;  %v1546_v33 = vrot.slane %v1544_v26, 4  ;;  %v1572_v23 = vshrl.u32 %v1933_v36, 16  ;;  %v1946_v18 = vld [vmem:[%s2534_s5] ss:$0 sm:$0xff] }
  0x46   : > { %2068 = vmatmul.mubr.msk.bf16.vlgmr.msra.gmra.mrb[0].mxu0 %vm352_vm1, %v2185_v35  ;;  %v1537_v1 = vrot.slane %v1536_v25, 4  ;;  %v1561_v35 = vshll.u32 %v1931_v21, 16  ;;  %v1555_v37 = vrot.slane %v1553_v30, 5  ;;  %v1560_v38 = vrot.slane %v1558_v31, 4 }
  0x47   : > { %2076 = vmatpush3.bf16.msra.mxu0 %v1626_v34  ;;  %2071 = vmatprep.mubr.msk.bf16.mxu0 %vm352_vm1, %v2188_v39  ;;  %v1549_v34 = vrot.slane %v1547_v27, 5  ;;  %v1567_v39 = vshll.u32 %v1932_v22, 16  ;;  %v1575_v48 = vshll.u32 %v1933_v36, 16  ;;  %v1581_v49 = vshll.u32 %v1934_v16, 16 }
  0x48   : > { %v1542_v40 = vsel %vm2337_vm4, %v1537_v1, %v1541_v14  ;;  %v1563_v42 = vrot.slane %v1561_v35, 5  ;;  %v1574_v51 = vrot.slane %v1572_v23, 4  ;;  %v1589_v54 = vshll.u32 %v1935_v43, 16 }
  0x49   : > { %v1550_v41 = vor.u32 %v1549_v34, %v1546_v33  ;;  %v1569_v47 = vrot.slane %v1567_v39, 5  ;;  %v1595_v55 = vshll.u32 %v1936_v45, 16  ;;  %v1583_v60 = vrot.slane %v1581_v49, 5 }
  0x4a   : > { %2028 = vmatmul.mubr.msk.bf16.vlgmr.msra.gmra.mrb[0].mxu1 %vm352_vm1, %v2187_v52  ;;  %v1564_v50 = vor.u32 %v1563_v42, %v1560_v38  ;;  %v1586_v52 = vshrl.u32 %v1935_v43, 16  ;;  %v1591_v61 = vrot.slane %v1589_v54, 5 }
  0x4b   : > { %2086 = vmatpush3.bf16.msra.mxu1 %v2259_v3  ;;  %2031 = vmatprep.mubr.msk.bf16.mxu1 %vm352_vm1, %v2190_v5  ;;  %v1528_v3 = vsel %vm2337_vm4, %v1523_v29, %v1527_v9  ;;  %v1551_v10 = vrot.slane %v1550_v41, 4  ;;  %v1597_v4 = vrot.slane %v1595_v55, 5 }
  0x4c   : > { %v1939_v46 = vcombine.low %v1528_v3, %v1542_v40  ;;  %v1565_v57 = vrot.slane %v1564_v50, 4  ;;  %v1588_v58 = vrot.slane %v1586_v52, 4 }
  0x4d   : > { %v1556_v56 = vsel %vm2337_vm4, %v1551_v10, %v1555_v37 }
  0x4e   : > { %2072 = vmatmul.mubr.msk.bf16.gmra.mrb[4].mxu0 %vm352_vm1, %v2189_v53  ;;  %v1577_v53 = vrot.slane %v1575_v48, 5  ;;  %v1570_v62 = vsel %vm2337_vm4, %v1565_v57, %v1569_v47  ;;  %v1592_v2 = vor.u32 %v1591_v61, %v1588_v58 }
  0x4f   : > { %2077 = vmatprep.mubr.msk.bf16.mxu0 %vm352_vm1, %v1938_v28  ;;  %v1940_v63 = vcombine.low %v1556_v56, %v1570_v62 }
  0x50   : > { %v1578_v59 = vor.u32 %v1577_v53, %v1574_v51  ;;  %v1593_v6 = vrot.slane %v1592_v2, 4 }
  0x52   : > { %2032 = vmatmul.mubr.msk.bf16.gmra.mrb[4].mxu1 %vm352_vm1, %v2191_v32  ;;  %v1579_v0 = vrot.slane %v1578_v59, 4  ;;  %v1598_v7 = vsel %vm2337_vm4, %v1593_v6, %v1597_v4 }
  0x53   : > { %2041 = vmatprep.mubr.msk.bf16.mxu1 %vm352_vm1, %v2192_v15 }
  0x54   : > { %v1584_v5 = vsel %vm2337_vm4, %v1579_v0, %v1583_v60 }
  0x55   : > { %v1941_v9 = vcombine.low %v1584_v5, %v1598_v7 }
  0x56   : > { %2078 = vmatmul.mubr.msk.bf16.vlgmr.msra.gmra.mrb[0].mxu0 %vm352_vm1, %v1939_v46 }
  0x57   : > { %2081 = vmatprep.mubr.msk.bf16.mxu0 %vm352_vm1, %v1940_v63 }
  0x5e   : > { %2082 = vmatmul.mubr.msk.bf16.gmra.mrb[4].mxu0 %vm352_vm1, %v1941_v9  ;;  %2042 = vmatmul.mubr.msk.bf16.vlgmr.msra.gmra.mrb[4].mxu1 %vm352_vm1, %v2193_v8 }
 0x11d   : > { %v2029_v11 = vpop.f32.mrb[0].mxu1 }
 0x11e   : > { %v846_v12 = vpop.f32.mrb[1].mxu1 }
 0x11f   : > { %v2030_v13 = vpop.f32.mrb[2].mxu1 }
 0x120   : > { %v849_v14 = vpop.f32.mrb[3].mxu1 }
 0x129   : > { %v2079_v17 = vpop.f32.mrb[0].mxu0 }
 0x12a   : > { %v2087_v19 = vadd.f32 %v2079_v17, %v2029_v11  ;;  %v1662_v20 = vpop.f32.mrb[1].mxu0 }
 0x12b   : > { %v2088_v44 = vadd.f32 %v1662_v20, %v846_v12  ;;  %v2080_v21 = vpop.f32.mrb[2].mxu0 }
 0x12c   : > { %v1710_v22 = vadd.f32 %v2087_v19, %v1946_v18  ;;  %v2089_v24 = vadd.f32 %v2080_v21, %v2030_v13  ;;  %v1665_v25 = vpop.f32.mrb[3].mxu0 }
 0x12d   : > { %v1708_v26 = vadd.f32 %v2088_v44, %v1946_v18  ;;  %v2090_v27 = vadd.f32 %v1665_v25, %v849_v14 }
 0x12e   : > { %v1718_v28 = vmax.f32 %v1710_v22, 0.0  ;;  %v1711_v29 = vadd.f32 %v2089_v24, %v1946_v18 }
 0x12f   : > { %v1716_v30 = vmax.f32 %v1708_v26, 0.0  ;;  %v1709_v31 = vadd.f32 %v2090_v27, %v1946_v18 }
 0x130   : > { %1726 = vst [vmem:[%s2516_s13 + $0x10] sm:$0xff] %v1718_v28  ;;  %v1719_v32 = vmax.f32 %v1711_v29, 0.0 }
 0x131   : > { %1724 = vst [vmem:[%s2516_s13] sm:$0xff] %v1716_v30  ;;  %v1717_v1 = vmax.f32 %v1709_v31, 0.0  ;;  %v2083_v33 = vpop.f32.mrb[4].mxu0  ;;  %v2043_v35 = vpop.f32.mrb[4].mxu1 }
 0x132   : > { %1727 = vst [vmem:[%s2516_s13 + $0x18] sm:$0xff] %v1719_v32  ;;  %v1678_v34 = vpop.f32.mrb[5].mxu0  ;;  %v2091_v3 = vadd.f32 %v2083_v33, %v2043_v35  ;;  %v980_v37 = vpop.f32.mrb[5].mxu1 }
 0x133   : > { %1725 = vst [vmem:[%s2516_s13 + $0x8] sm:$0xff] %v1717_v1  ;;  %v2084_v36 = vpop.f32.mrb[6].mxu0  ;;  %v2092_v39 = vadd.f32 %v1678_v34, %v980_v37  ;;  %v2044_v16 = vpop.f32.mrb[6].mxu1 }
 0x134   : > { %v1681_v38 = vpop.f32.mrb[7].mxu0  ;;  %v1714_v40 = vadd.f32 %v2091_v3, %v1946_v18  ;;  %v2093_v41 = vadd.f32 %v2084_v36, %v2044_v16  ;;  %v983_v42 = vpop.f32.mrb[7].mxu1 }
 0x135   : > { %v1712_v43 = vadd.f32 %v2092_v39, %v1946_v18  ;;  %v2094_v45 = vadd.f32 %v1681_v38, %v983_v42 }
 0x136   : > { %v1722_v23 = vmax.f32 %v1714_v40, 0.0  ;;  %v1715_v46 = vadd.f32 %v2093_v41, %v1946_v18 }
 0x137   : > { %v1720_v15 = vmax.f32 %v1712_v43, 0.0  ;;  %v1713_v47 = vadd.f32 %v2094_v45, %v1946_v18 }
 0x138   : > { %1730 = vst [vmem:[%s2516_s13 + $0x30] sm:$0xff] %v1722_v23  ;;  %v1723_v48 = vmax.f32 %v1715_v46, 0.0 }
 0x139   : > { %1728 = vst [vmem:[%s2516_s13 + $0x20] sm:$0xff] %v1720_v15  ;;  %v1721_v49 = vmax.f32 %v1713_v47, 0.0 }
 0x13a   : > { %1731 = vst [vmem:[%s2516_s13 + $0x38] sm:$0xff] %v1723_v48 }
 0x13b   : > { %1729 = vst [vmem:[%s2516_s13 + $0x28] sm:$0xff] %v1721_v49 }
 0x13c PF: > { %s16_s21 = sadd.s32 1, %s2200_s21  }
 0x13d   : > { %p13_p4 = scmp.ge.s32.totalorder %s16_s21, 4  }
 0x13f   :  { %15 = sbr.rel (!%p13_p4) target bundleno = 1 (0x1), region = 93 }

</bundles_post_ra>
